<compile_context>
chip_gen: v6e
topology: v6e:2x2x1
jax: 0.10.0
libtpu: 0.0.40
codegen_flags: <defaults>
</compile_context>

<pallas_src>
import jax
import jax.numpy as jnp
from jax.experimental import pallas as pl
from jax.experimental.pallas import tpu as pltpu

# ----- config (stand-ins for cfg / model_cfg / basic_model_cfg / w_mat) -----
POS_EMB_SIZE   = 32     # model_cfg['pos_emb_size']
BILSTM_HIDDEN  = 128    # model_cfg['bilstm_hidden_size']
CLF1_OUT       = 256    # basic_model_cfg['clf1_out']
CLF2_OUT       = 128    # basic_model_cfg['clf2_out']
LABEL_EMB_DIM  = 64     # w_mat.shape[1]
NUM_LABELS     = 50     # w_mat.shape[0]
BOX_FEAT_DIM   = 2048   # hard-coded in nn.LSTM(2048 + ...)
BERT_DIM       = 768    # hard-coded in nn.Linear(768 + ...)
BERT_VOCAB     = 1000

D_IN     = POS_EMB_SIZE + BOX_FEAT_DIM + LABEL_EMB_DIM   # 2144 (logical)
D_IN_PAD = 17 * 128                                       # 2176, lane-aligned
OUT_PAD  = 128                                            # lane-dense clf3 out


def lstm_head_kernel(x_ref,            # (N, Bblk, D_pad) bf16, time-major
                     q_ref,            # (Bblk, 768)      bf16  query_emb
                     wih_ref,          # (D_pad, 4H) bf16  rev-dir W_ih^T, gates [i,f,o,g]
                     whh_ref,          # (H, 4H)     bf16  rev-dir W_hh^T, gates [i,f,o,g]
                     blstm_ref,        # (1, 4H)     f32   b_ih + b_hh
                     w1q_ref,          # (768, C1)   bf16  clf1 W, query slice
                     w1h_ref,          # (H, C1)     bf16  clf1 W, image slice
                     b1_ref,           # (1, C1)     f32
                     w2_ref,           # (C1, C2)    bf16
                     b2_ref,           # (1, C2)     f32
                     w3_ref,           # (C2, 128)   bf16 (only col 0 real)
                     b3_ref,           # (1, 128)    f32  (only col 0 real)
                     out_ref):         # (Bblk, 128) f32
    N, B, Dp = x_ref.shape
    H = whh_ref.shape[0]

    # Hoisted input projection: one big bf16 matmul over all timesteps with
    # the combined LSTM bias folded in.  (N, B, Dp) -> (N*B, Dp) is a
    # layout-trivial merge (B is a multiple of 16 -> whole bf16 tiles).
    x2d = x_ref[...].reshape(N * B, Dp)
    gx = (jnp.dot(x2d, wih_ref[...], preferred_element_type=jnp.float32)
          + blstm_ref[...])                                   # (N*B, 4H) f32

    whh = whh_ref[...]                                        # bf16 (H, 4H)

    # Only the *backward* direction of the BiLSTM evaluated at t=0 is consumed
    # by image_lstm.view(B, -1, 2, H)[:, 0, 1, :].  That equals the final
    # hidden state of an LSTM run over the reversed sequence, so iterate
    # t = N-1 .. 0.  Fully unrolled: N is a small compile-time constant.
    h = jnp.zeros((B, H), jnp.float32)
    c = jnp.zeros((B, H), jnp.float32)
    for i in range(N):
        t = N - 1 - i
        gates = (gx[t * B:(t + 1) * B, :]                     # sublane-aligned
                 + jnp.dot(h.astype(jnp.bfloat16), whh,
                           preferred_element_type=jnp.float32))  # (B, 4H) f32
        # Gate columns repacked to [i, f, o | g]: one contiguous sigmoid slab
        # plus one tanh per step.  Gate math stays f32 (v5e EUP/VPU lack bf16).
        sig = jax.nn.sigmoid(gates[:, :3 * H])
        g_g = jnp.tanh(gates[:, 3 * H:])
        i_g = sig[:, 0 * H:1 * H]
        f_g = sig[:, 1 * H:2 * H]
        o_g = sig[:, 2 * H:3 * H]
        c = f_g * c + i_g * g_g
        h = o_g * jnp.tanh(c)                                 # h == image_emb

    # embs = relu(cat([query_emb, image_emb], 1) @ W1^T + b1), computed as a
    # split matmul (bf16 operands, f32 accumulate) to avoid an in-kernel concat.
    z1 = jnp.maximum(
        jnp.dot(q_ref[...], w1q_ref[...], preferred_element_type=jnp.float32)
        + jnp.dot(h.astype(jnp.bfloat16), w1h_ref[...],
                  preferred_element_type=jnp.float32)
        + b1_ref[...], 0.0)
    z2 = jnp.maximum(
        jnp.dot(z1.astype(jnp.bfloat16), w2_ref[...],
                preferred_element_type=jnp.float32) + b2_ref[...], 0.0)
    # nn.Dropout(0.2) is identity at inference time.
    # Lane-dense final store: w3/b3 zero-padded to 128 output columns.
    out_ref[...] = (jnp.dot(z2.astype(jnp.bfloat16), w3_ref[...],
                            preferred_element_type=jnp.float32) + b3_ref[...])


def lstm_head(x_seq, q_emb, p):
    N, Bp, Dp = x_seq.shape
    H = BILSTM_HIDDEN

    # Batch tile: whole (padded) batch when small, fixed 128-row tiles when
    # large.  forward() guarantees Bp is a multiple of this tile.
    b_blk = min(128, Bp)
    assert Bp % b_blk == 0 and b_blk % 16 == 0
    grid = (Bp // b_blk,)

    weight_args = (p['wih_t'], p['whh_t'], p['b_lstm'],
                   p['w1q_t'], p['w1h_t'], p['b1'],
                   p['w2_t'], p['b2'], p['w3_t'], p['b3'])

    def _resident(a):
        # Full-array block with a constant index map: stays resident in VMEM
        # across batch-grid steps (no re-DMA of the weights).
        return pl.BlockSpec(a.shape, lambda b: (0, 0))

    in_specs = ([pl.BlockSpec((N, b_blk, Dp), lambda b: (0, b, 0)),
                 pl.BlockSpec((b_blk, q_emb.shape[1]), lambda b: (b, 0))]
                + [_resident(a) for a in weight_args])
    out_spec = pl.BlockSpec((b_blk, OUT_PAD), lambda b: (b, 0))

    # Advisory cost estimate so XLA schedules the surrounding glue sensibly.
    flops = int(2 * N * Bp * Dp * 4 * H            # hoisted input projection
                + 2 * N * Bp * H * 4 * H           # recurrent h @ W_hh
                + 2 * Bp * (BERT_DIM * CLF1_OUT + H * CLF1_OUT
                            + CLF1_OUT * CLF2_OUT + CLF2_OUT * OUT_PAD))
    transcendentals = int(N * Bp * 5 * H)          # 3 sigmoid + 2 tanh / step
    bytes_accessed = int(
        x_seq.size * x_seq.dtype.itemsize          # bf16 now
        + q_emb.size * q_emb.dtype.itemsize        # bf16 now
        + sum(a.size * a.dtype.itemsize for a in weight_args)
        + Bp * OUT_PAD * 4)

    return pl.pallas_call(
        lstm_head_kernel,
        out_shape=jax.ShapeDtypeStruct((Bp, OUT_PAD), jnp.float32),
        grid=grid,
        in_specs=in_specs,
        out_specs=out_spec,
        compiler_params=pltpu.CompilerParams(
            # Batch tiles are independent -> shard across v7x's two TCs.
            dimension_semantics=("parallel",),
            # Explicit scoped-VMEM budget: ~18 MiB live with a 128-row bf16
            # tile (double-buffered x + resident weights), which overflows
            # v5e's 16 MiB default; 32 MiB is still well under v7x's 64 MiB.
            vmem_limit_bytes=32 * 1024 * 1024),
        cost_estimate=pl.CostEstimate(
            flops=flops, transcendentals=transcendentals,
            bytes_accessed=bytes_accessed),
    )(x_seq, q_emb, *weight_args)


def forward(params, query_tokens, box_pos, box_feature, box_label):
    B, N = box_label.shape

    # TODO(synk): MyBert is an external, undefined module in the source file;
    # stand in with a deterministic token-embedding + mean-pool -> (B, 768).
    tok_emb = jnp.take(params['bert_emb'], query_tokens, axis=0)   # (B, L, 768)
    query_emb = tok_emb.mean(axis=1).astype(jnp.bfloat16)          # (B, 768)

    # Batch padding / tiling: tiles of <=128 rows; pad B to a multiple of the
    # tile (and of 16 so the bf16 (N,B,D)->(N*B,D) merge in the kernel is
    # layout-trivial).  The grid never collapses to one oversized block.
    b16 = max(16, ((B + 15) // 16) * 16)
    b_blk = min(128, b16)
    Bp = ((b16 + b_blk - 1) // b_blk) * b_blk
    pad_b = Bp - B

    # Build the kernel input time-major directly: swap the (cheap) leading
    # dims of the three sources and do a single concat with the lane padding
    # fused in, so the (N, B, 2176) bf16 tensor hits HBM exactly once already
    # in kernel layout/dtype (no separate post-concat transpose pass).
    pos_emb = box_pos.reshape(-1, 5) @ params['wp_t'] + params['bp']
    pos_t = jnp.swapaxes(pos_emb.reshape(B, N, POS_EMB_SIZE), 0, 1)  # (N,B,P)
    lab_t = jnp.swapaxes(jnp.take(params['w_mat'], box_label, axis=0), 0, 1)
    feat_t = jnp.swapaxes(box_feature, 0, 1)                         # (N,B,2048)

    x_seq = jnp.concatenate(
        [pos_t.astype(jnp.bfloat16),
         feat_t.astype(jnp.bfloat16),
         lab_t.astype(jnp.bfloat16),
         jnp.zeros((N, B, D_IN_PAD - D_IN), jnp.bfloat16)],   # lane-align 2176
        axis=2)

    if pad_b:
        x_seq = jnp.pad(x_seq, ((0, 0), (0, pad_b), (0, 0)))
        query_emb = jnp.pad(query_emb, ((0, pad_b), (0, 0)))

    out_full = lstm_head(x_seq, query_emb, params)       # (Bp, 128) f32
    return out_full[:B, :1]                              # real rows, real col


def init_params(key):
    ks = jax.random.split(key, 14)

    def w(k, shape, scale=0.02, dtype=jnp.float32):
        return (scale * jax.random.normal(k, shape)).astype(dtype)

    # Reverse-direction LSTM weights only (the forward direction is never
    # consumed by the model's output slice [:, 0, 1, :]).
    # A loader from real PyTorch weights must: transpose weight_ih_l0_reverse /
    # weight_hh_l0_reverse, repack the 4H gate columns from PyTorch's
    # [i, f, g, o] order into [i, f, o, g], pre-sum b_ih_l0_reverse +
    # b_hh_l0_reverse into b_lstm, zero-pad the D_IN_PAD - D_IN extra input
    # rows, and cast the MXU operands to bf16 exactly as below.
    wih = w(ks[4], (D_IN, 4 * BILSTM_HIDDEN))
    wih = jnp.pad(wih, ((0, D_IN_PAD - D_IN), (0, 0))).astype(jnp.bfloat16)

    # clf3 weight/bias zero-padded to 128 output lanes (only column 0 is
    # real); weight kept bf16 so the final matmul is a single MXU pass.
    w3 = jnp.pad(w(ks[12], (CLF2_OUT, 1)), ((0, 0), (0, OUT_PAD - 1)))
    b3 = jnp.pad(w(ks[13], (1, 1)), ((0, 0), (0, OUT_PAD - 1)))

    return dict(
        bert_emb=w(ks[0], (BERT_VOCAB, BERT_DIM)),
        w_mat=w(ks[1], (NUM_LABELS, LABEL_EMB_DIM)),
        wp_t=w(ks[2], (5, POS_EMB_SIZE)),
        bp=w(ks[3], (POS_EMB_SIZE,)),
        wih_t=wih,                                                   # bf16
        whh_t=w(ks[5], (BILSTM_HIDDEN, 4 * BILSTM_HIDDEN),
                dtype=jnp.bfloat16),
        b_lstm=w(ks[6], (1, 4 * BILSTM_HIDDEN)),     # f32, b_ih + b_hh combined
        w1q_t=w(ks[7], (BERT_DIM, CLF1_OUT), dtype=jnp.bfloat16),
        w1h_t=w(ks[8], (BILSTM_HIDDEN, CLF1_OUT), dtype=jnp.bfloat16),
        b1=w(ks[9], (1, CLF1_OUT)),
        w2_t=w(ks[10], (CLF1_OUT, CLF2_OUT), dtype=jnp.bfloat16),
        b2=w(ks[11], (1, CLF2_OUT)),
        w3_t=w3.astype(jnp.bfloat16),                                # (C2, 128)
        b3=b3,                                                       # (1, 128)
    )


if __name__ == "__main__":
    key = jax.random.PRNGKey(0)
    kp, kq, kpos, kfeat, klab = jax.random.split(key, 5)
    params = init_params(kp)

    B, N_BOXES, L_QUERY = 2, 8, 8
    query_tokens = jax.random.randint(kq, (B, L_QUERY), 0, BERT_VOCAB)
    box_pos = jax.random.normal(kpos, (B, N_BOXES, 5), dtype=jnp.float32)
    box_feature = jax.random.normal(kfeat, (B, N_BOXES, BOX_FEAT_DIM),
                                    dtype=jnp.float32)
    box_label = jax.random.randint(klab, (B, N_BOXES), 0, NUM_LABELS)

    fwd = jax.jit(forward)   # fuses the time-major concat producer with pads
    out = fwd(params, query_tokens, box_pos, box_feature, box_label)
    out = jax.block_until_ready(out)
    assert out.shape == (B, 1) and out.dtype == jnp.float32
    print("KERNEL_OK")
</pallas_src>

<mosaic_0001>
module attributes {stable_mosaic.version = 11 : i64} {
  func.func @lstm_head_kernel(%arg0: i32, %arg1: memref<8x16x2176xbf16, #tpu.memory_space<vmem>>, %arg2: memref<16x768xbf16, #tpu.memory_space<vmem>>, %arg3: memref<2176x512xbf16, #tpu.memory_space<vmem>>, %arg4: memref<128x512xbf16, #tpu.memory_space<vmem>>, %arg5: memref<1x512xf32, #tpu.memory_space<vmem>>, %arg6: memref<768x256xbf16, #tpu.memory_space<vmem>>, %arg7: memref<128x256xbf16, #tpu.memory_space<vmem>>, %arg8: memref<1x256xf32, #tpu.memory_space<vmem>>, %arg9: memref<256x128xbf16, #tpu.memory_space<vmem>>, %arg10: memref<1x128xf32, #tpu.memory_space<vmem>>, %arg11: memref<128x128xbf16, #tpu.memory_space<vmem>>, %arg12: memref<1x128xf32, #tpu.memory_space<vmem>>, %arg13: memref<16x128xf32, #tpu.memory_space<vmem>>) attributes {dimension_semantics = [#tpu.dimension_semantics<parallel>], iteration_bounds = array<i64: 1>, scalar_prefetch = 0 : i64, scratch_operands = 0 : i64, tpu.core_type = #tpu.core_type<tc>, window_params = [{transform_indices = @transform_0, window_bounds = array<i64: 8, 16, 2176>}, {transform_indices = @transform_1, window_bounds = array<i64: 16, 768>}, {pipeline_mode = #tpu.pipeline_mode<synchronous>, transform_indices = @transform_2, window_bounds = array<i64: 2176, 512>}, {pipeline_mode = #tpu.pipeline_mode<synchronous>, transform_indices = @transform_3, window_bounds = array<i64: 128, 512>}, {pipeline_mode = #tpu.pipeline_mode<synchronous>, transform_indices = @transform_4, window_bounds = array<i64: 1, 512>}, {pipeline_mode = #tpu.pipeline_mode<synchronous>, transform_indices = @transform_5, window_bounds = array<i64: 768, 256>}, {pipeline_mode = #tpu.pipeline_mode<synchronous>, transform_indices = @transform_6, window_bounds = array<i64: 128, 256>}, {pipeline_mode = #tpu.pipeline_mode<synchronous>, transform_indices = @transform_7, window_bounds = array<i64: 1, 256>}, {pipeline_mode = #tpu.pipeline_mode<synchronous>, transform_indices = @transform_8, window_bounds = array<i64: 256, 128>}, {pipeline_mode = #tpu.pipeline_mode<synchronous>, transform_indices = @transform_9, window_bounds = array<i64: 1, 128>}, {pipeline_mode = #tpu.pipeline_mode<synchronous>, transform_indices = @transform_10, window_bounds = array<i64: 128, 128>}, {pipeline_mode = #tpu.pipeline_mode<synchronous>, transform_indices = @transform_11, window_bounds = array<i64: 1, 128>}, {transform_indices = @transform_12, window_bounds = array<i64: 16, 128>}]} {
    %c0 = arith.constant 0 : index
    %c0_0 = arith.constant 0 : index
    %c0_1 = arith.constant 0 : index
    %0 = vector.load %arg1[%c0, %c0_0, %c0_1] : memref<8x16x2176xbf16, #tpu.memory_space<vmem>>, vector<8x16x2176xbf16>
    %1 = vector.shape_cast %0 : vector<8x16x2176xbf16> to vector<128x2176xbf16>
    %c0_2 = arith.constant 0 : index
    %c0_3 = arith.constant 0 : index
    %2 = vector.load %arg3[%c0_2, %c0_3] : memref<2176x512xbf16, #tpu.memory_space<vmem>>, vector<2176x512xbf16>
    %cst = arith.constant dense<0.000000e+00> : vector<128x512xf32>
    %3 = tpu.matmul %1, %2, %cst {dimension_numbers = #tpu.dot_dimension_numbers<[1], [0], [0], [1], [0, 0, 1, 1], [], []>} : vector<128x2176xbf16>, vector<2176x512xbf16>, vector<128x512xf32> -> vector<128x512xf32>
    %c0_4 = arith.constant 0 : index
    %c0_5 = arith.constant 0 : index
    %4 = vector.load %arg5[%c0_4, %c0_5] : memref<1x512xf32, #tpu.memory_space<vmem>>, vector<1x512xf32>
    %5 = vector.broadcast %4 : vector<1x512xf32> to vector<128x512xf32>
    %6 = arith.addf %3, %5 : vector<128x512xf32>
    %c0_6 = arith.constant 0 : index
    %c0_7 = arith.constant 0 : index
    %7 = vector.load %arg4[%c0_6, %c0_7] : memref<128x512xbf16, #tpu.memory_space<vmem>>, vector<128x512xbf16>
    %cst_8 = arith.constant 0.000000e+00 : f32
    %8 = vector.broadcast %cst_8 : f32 to vector<16x128xf32>
    %cst_9 = arith.constant 0.000000e+00 : f32
    %9 = vector.broadcast %cst_9 : f32 to vector<16x128xf32>
    %10 = vector.extract_strided_slice %6 {offsets = [112, 0], sizes = [16, 512], strides = [1, 1]} : vector<128x512xf32> to vector<16x512xf32>
    %11 = arith.truncf %8 : vector<16x128xf32> to vector<16x128xbf16>
    %cst_10 = arith.constant dense<0.000000e+00> : vector<16x512xf32>
    %12 = tpu.matmul %11, %7, %cst_10 {dimension_numbers = #tpu.dot_dimension_numbers<[1], [0], [0], [1], [0, 0, 1, 1], [], []>} : vector<16x128xbf16>, vector<128x512xbf16>, vector<16x512xf32> -> vector<16x512xf32>
    %13 = arith.addf %10, %12 : vector<16x512xf32>
    %14 = vector.extract_strided_slice %13 {offsets = [0, 0], sizes = [16, 384], strides = [1, 1]} : vector<16x512xf32> to vector<16x384xf32>
    %15 = arith.negf %14 : vector<16x384xf32>
    %16 = math.exp %15 : vector<16x384xf32>
    %cst_11 = arith.constant 1.000000e+00 : f32
    %17 = vector.broadcast %cst_11 : f32 to vector<16x384xf32>
    %18 = arith.addf %17, %16 : vector<16x384xf32>
    %19 = arith.divf %17, %18 : vector<16x384xf32>
    %20 = vector.extract_strided_slice %13 {offsets = [0, 384], sizes = [16, 128], strides = [1, 1]} : vector<16x512xf32> to vector<16x128xf32>
    %21 = math.tanh %20 : vector<16x128xf32>
    %22 = vector.extract_strided_slice %19 {offsets = [0, 0], sizes = [16, 128], strides = [1, 1]} : vector<16x384xf32> to vector<16x128xf32>
    %23 = vector.extract_strided_slice %19 {offsets = [0, 128], sizes = [16, 128], strides = [1, 1]} : vector<16x384xf32> to vector<16x128xf32>
    %24 = vector.extract_strided_slice %19 {offsets = [0, 256], sizes = [16, 128], strides = [1, 1]} : vector<16x384xf32> to vector<16x128xf32>
    %25 = arith.mulf %23, %9 : vector<16x128xf32>
    %26 = arith.mulf %22, %21 : vector<16x128xf32>
    %27 = arith.addf %25, %26 : vector<16x128xf32>
    %28 = math.tanh %27 : vector<16x128xf32>
    %29 = arith.mulf %24, %28 : vector<16x128xf32>
    %30 = vector.extract_strided_slice %6 {offsets = [96, 0], sizes = [16, 512], strides = [1, 1]} : vector<128x512xf32> to vector<16x512xf32>
    %31 = arith.truncf %29 : vector<16x128xf32> to vector<16x128xbf16>
    %cst_12 = arith.constant dense<0.000000e+00> : vector<16x512xf32>
    %32 = tpu.matmul %31, %7, %cst_12 {dimension_numbers = #tpu.dot_dimension_numbers<[1], [0], [0], [1], [0, 0, 1, 1], [], []>} : vector<16x128xbf16>, vector<128x512xbf16>, vector<16x512xf32> -> vector<16x512xf32>
    %33 = arith.addf %30, %32 : vector<16x512xf32>
    %34 = vector.extract_strided_slice %33 {offsets = [0, 0], sizes = [16, 384], strides = [1, 1]} : vector<16x512xf32> to vector<16x384xf32>
    %35 = arith.negf %34 : vector<16x384xf32>
    %36 = math.exp %35 : vector<16x384xf32>
    %cst_13 = arith.constant 1.000000e+00 : f32
    %37 = vector.broadcast %cst_13 : f32 to vector<16x384xf32>
    %38 = arith.addf %37, %36 : vector<16x384xf32>
    %39 = arith.divf %37, %38 : vector<16x384xf32>
    %40 = vector.extract_strided_slice %33 {offsets = [0, 384], sizes = [16, 128], strides = [1, 1]} : vector<16x512xf32> to vector<16x128xf32>
    %41 = math.tanh %40 : vector<16x128xf32>
    %42 = vector.extract_strided_slice %39 {offsets = [0, 0], sizes = [16, 128], strides = [1, 1]} : vector<16x384xf32> to vector<16x128xf32>
    %43 = vector.extract_strided_slice %39 {offsets = [0, 128], sizes = [16, 128], strides = [1, 1]} : vector<16x384xf32> to vector<16x128xf32>
    %44 = vector.extract_strided_slice %39 {offsets = [0, 256], sizes = [16, 128], strides = [1, 1]} : vector<16x384xf32> to vector<16x128xf32>
    %45 = arith.mulf %43, %27 : vector<16x128xf32>
    %46 = arith.mulf %42, %41 : vector<16x128xf32>
    %47 = arith.addf %45, %46 : vector<16x128xf32>
    %48 = math.tanh %47 : vector<16x128xf32>
    %49 = arith.mulf %44, %48 : vector<16x128xf32>
    %50 = vector.extract_strided_slice %6 {offsets = [80, 0], sizes = [16, 512], strides = [1, 1]} : vector<128x512xf32> to vector<16x512xf32>
    %51 = arith.truncf %49 : vector<16x128xf32> to vector<16x128xbf16>
    %cst_14 = arith.constant dense<0.000000e+00> : vector<16x512xf32>
    %52 = tpu.matmul %51, %7, %cst_14 {dimension_numbers = #tpu.dot_dimension_numbers<[1], [0], [0], [1], [0, 0, 1, 1], [], []>} : vector<16x128xbf16>, vector<128x512xbf16>, vector<16x512xf32> -> vector<16x512xf32>
    %53 = arith.addf %50, %52 : vector<16x512xf32>
    %54 = vector.extract_strided_slice %53 {offsets = [0, 0], sizes = [16, 384], strides = [1, 1]} : vector<16x512xf32> to vector<16x384xf32>
    %55 = arith.negf %54 : vector<16x384xf32>
    %56 = math.exp %55 : vector<16x384xf32>
    %cst_15 = arith.constant 1.000000e+00 : f32
    %57 = vector.broadcast %cst_15 : f32 to vector<16x384xf32>
    %58 = arith.addf %57, %56 : vector<16x384xf32>
    %59 = arith.divf %57, %58 : vector<16x384xf32>
    %60 = vector.extract_strided_slice %53 {offsets = [0, 384], sizes = [16, 128], strides = [1, 1]} : vector<16x512xf32> to vector<16x128xf32>
    %61 = math.tanh %60 : vector<16x128xf32>
    %62 = vector.extract_strided_slice %59 {offsets = [0, 0], sizes = [16, 128], strides = [1, 1]} : vector<16x384xf32> to vector<16x128xf32>
    %63 = vector.extract_strided_slice %59 {offsets = [0, 128], sizes = [16, 128], strides = [1, 1]} : vector<16x384xf32> to vector<16x128xf32>
    %64 = vector.extract_strided_slice %59 {offsets = [0, 256], sizes = [16, 128], strides = [1, 1]} : vector<16x384xf32> to vector<16x128xf32>
    %65 = arith.mulf %63, %47 : vector<16x128xf32>
    %66 = arith.mulf %62, %61 : vector<16x128xf32>
    %67 = arith.addf %65, %66 : vector<16x128xf32>
    %68 = math.tanh %67 : vector<16x128xf32>
    %69 = arith.mulf %64, %68 : vector<16x128xf32>
    %70 = vector.extract_strided_slice %6 {offsets = [64, 0], sizes = [16, 512], strides = [1, 1]} : vector<128x512xf32> to vector<16x512xf32>
    %71 = arith.truncf %69 : vector<16x128xf32> to vector<16x128xbf16>
    %cst_16 = arith.constant dense<0.000000e+00> : vector<16x512xf32>
    %72 = tpu.matmul %71, %7, %cst_16 {dimension_numbers = #tpu.dot_dimension_numbers<[1], [0], [0], [1], [0, 0, 1, 1], [], []>} : vector<16x128xbf16>, vector<128x512xbf16>, vector<16x512xf32> -> vector<16x512xf32>
    %73 = arith.addf %70, %72 : vector<16x512xf32>
    %74 = vector.extract_strided_slice %73 {offsets = [0, 0], sizes = [16, 384], strides = [1, 1]} : vector<16x512xf32> to vector<16x384xf32>
    %75 = arith.negf %74 : vector<16x384xf32>
    %76 = math.exp %75 : vector<16x384xf32>
    %cst_17 = arith.constant 1.000000e+00 : f32
    %77 = vector.broadcast %cst_17 : f32 to vector<16x384xf32>
    %78 = arith.addf %77, %76 : vector<16x384xf32>
    %79 = arith.divf %77, %78 : vector<16x384xf32>
    %80 = vector.extract_strided_slice %73 {offsets = [0, 384], sizes = [16, 128], strides = [1, 1]} : vector<16x512xf32> to vector<16x128xf32>
    %81 = math.tanh %80 : vector<16x128xf32>
    %82 = vector.extract_strided_slice %79 {offsets = [0, 0], sizes = [16, 128], strides = [1, 1]} : vector<16x384xf32> to vector<16x128xf32>
    %83 = vector.extract_strided_slice %79 {offsets = [0, 128], sizes = [16, 128], strides = [1, 1]} : vector<16x384xf32> to vector<16x128xf32>
    %84 = vector.extract_strided_slice %79 {offsets = [0, 256], sizes = [16, 128], strides = [1, 1]} : vector<16x384xf32> to vector<16x128xf32>
    %85 = arith.mulf %83, %67 : vector<16x128xf32>
    %86 = arith.mulf %82, %81 : vector<16x128xf32>
    %87 = arith.addf %85, %86 : vector<16x128xf32>
    %88 = math.tanh %87 : vector<16x128xf32>
    %89 = arith.mulf %84, %88 : vector<16x128xf32>
    %90 = vector.extract_strided_slice %6 {offsets = [48, 0], sizes = [16, 512], strides = [1, 1]} : vector<128x512xf32> to vector<16x512xf32>
    %91 = arith.truncf %89 : vector<16x128xf32> to vector<16x128xbf16>
    %cst_18 = arith.constant dense<0.000000e+00> : vector<16x512xf32>
    %92 = tpu.matmul %91, %7, %cst_18 {dimension_numbers = #tpu.dot_dimension_numbers<[1], [0], [0], [1], [0, 0, 1, 1], [], []>} : vector<16x128xbf16>, vector<128x512xbf16>, vector<16x512xf32> -> vector<16x512xf32>
    %93 = arith.addf %90, %92 : vector<16x512xf32>
    %94 = vector.extract_strided_slice %93 {offsets = [0, 0], sizes = [16, 384], strides = [1, 1]} : vector<16x512xf32> to vector<16x384xf32>
    %95 = arith.negf %94 : vector<16x384xf32>
    %96 = math.exp %95 : vector<16x384xf32>
    %cst_19 = arith.constant 1.000000e+00 : f32
    %97 = vector.broadcast %cst_19 : f32 to vector<16x384xf32>
    %98 = arith.addf %97, %96 : vector<16x384xf32>
    %99 = arith.divf %97, %98 : vector<16x384xf32>
    %100 = vector.extract_strided_slice %93 {offsets = [0, 384], sizes = [16, 128], strides = [1, 1]} : vector<16x512xf32> to vector<16x128xf32>
    %101 = math.tanh %100 : vector<16x128xf32>
    %102 = vector.extract_strided_slice %99 {offsets = [0, 0], sizes = [16, 128], strides = [1, 1]} : vector<16x384xf32> to vector<16x128xf32>
    %103 = vector.extract_strided_slice %99 {offsets = [0, 128], sizes = [16, 128], strides = [1, 1]} : vector<16x384xf32> to vector<16x128xf32>
    %104 = vector.extract_strided_slice %99 {offsets = [0, 256], sizes = [16, 128], strides = [1, 1]} : vector<16x384xf32> to vector<16x128xf32>
    %105 = arith.mulf %103, %87 : vector<16x128xf32>
    %106 = arith.mulf %102, %101 : vector<16x128xf32>
    %107 = arith.addf %105, %106 : vector<16x128xf32>
    %108 = math.tanh %107 : vector<16x128xf32>
    %109 = arith.mulf %104, %108 : vector<16x128xf32>
    %110 = vector.extract_strided_slice %6 {offsets = [32, 0], sizes = [16, 512], strides = [1, 1]} : vector<128x512xf32> to vector<16x512xf32>
    %111 = arith.truncf %109 : vector<16x128xf32> to vector<16x128xbf16>
    %cst_20 = arith.constant dense<0.000000e+00> : vector<16x512xf32>
    %112 = tpu.matmul %111, %7, %cst_20 {dimension_numbers = #tpu.dot_dimension_numbers<[1], [0], [0], [1], [0, 0, 1, 1], [], []>} : vector<16x128xbf16>, vector<128x512xbf16>, vector<16x512xf32> -> vector<16x512xf32>
    %113 = arith.addf %110, %112 : vector<16x512xf32>
    %114 = vector.extract_strided_slice %113 {offsets = [0, 0], sizes = [16, 384], strides = [1, 1]} : vector<16x512xf32> to vector<16x384xf32>
    %115 = arith.negf %114 : vector<16x384xf32>
    %116 = math.exp %115 : vector<16x384xf32>
    %cst_21 = arith.constant 1.000000e+00 : f32
    %117 = vector.broadcast %cst_21 : f32 to vector<16x384xf32>
    %118 = arith.addf %117, %116 : vector<16x384xf32>
    %119 = arith.divf %117, %118 : vector<16x384xf32>
    %120 = vector.extract_strided_slice %113 {offsets = [0, 384], sizes = [16, 128], strides = [1, 1]} : vector<16x512xf32> to vector<16x128xf32>
    %121 = math.tanh %120 : vector<16x128xf32>
    %122 = vector.extract_strided_slice %119 {offsets = [0, 0], sizes = [16, 128], strides = [1, 1]} : vector<16x384xf32> to vector<16x128xf32>
    %123 = vector.extract_strided_slice %119 {offsets = [0, 128], sizes = [16, 128], strides = [1, 1]} : vector<16x384xf32> to vector<16x128xf32>
    %124 = vector.extract_strided_slice %119 {offsets = [0, 256], sizes = [16, 128], strides = [1, 1]} : vector<16x384xf32> to vector<16x128xf32>
    %125 = arith.mulf %123, %107 : vector<16x128xf32>
    %126 = arith.mulf %122, %121 : vector<16x128xf32>
    %127 = arith.addf %125, %126 : vector<16x128xf32>
    %128 = math.tanh %127 : vector<16x128xf32>
    %129 = arith.mulf %124, %128 : vector<16x128xf32>
    %130 = vector.extract_strided_slice %6 {offsets = [16, 0], sizes = [16, 512], strides = [1, 1]} : vector<128x512xf32> to vector<16x512xf32>
    %131 = arith.truncf %129 : vector<16x128xf32> to vector<16x128xbf16>
    %cst_22 = arith.constant dense<0.000000e+00> : vector<16x512xf32>
    %132 = tpu.matmul %131, %7, %cst_22 {dimension_numbers = #tpu.dot_dimension_numbers<[1], [0], [0], [1], [0, 0, 1, 1], [], []>} : vector<16x128xbf16>, vector<128x512xbf16>, vector<16x512xf32> -> vector<16x512xf32>
    %133 = arith.addf %130, %132 : vector<16x512xf32>
    %134 = vector.extract_strided_slice %133 {offsets = [0, 0], sizes = [16, 384], strides = [1, 1]} : vector<16x512xf32> to vector<16x384xf32>
    %135 = arith.negf %134 : vector<16x384xf32>
    %136 = math.exp %135 : vector<16x384xf32>
    %cst_23 = arith.constant 1.000000e+00 : f32
    %137 = vector.broadcast %cst_23 : f32 to vector<16x384xf32>
    %138 = arith.addf %137, %136 : vector<16x384xf32>
    %139 = arith.divf %137, %138 : vector<16x384xf32>
    %140 = vector.extract_strided_slice %133 {offsets = [0, 384], sizes = [16, 128], strides = [1, 1]} : vector<16x512xf32> to vector<16x128xf32>
    %141 = math.tanh %140 : vector<16x128xf32>
    %142 = vector.extract_strided_slice %139 {offsets = [0, 0], sizes = [16, 128], strides = [1, 1]} : vector<16x384xf32> to vector<16x128xf32>
    %143 = vector.extract_strided_slice %139 {offsets = [0, 128], sizes = [16, 128], strides = [1, 1]} : vector<16x384xf32> to vector<16x128xf32>
    %144 = vector.extract_strided_slice %139 {offsets = [0, 256], sizes = [16, 128], strides = [1, 1]} : vector<16x384xf32> to vector<16x128xf32>
    %145 = arith.mulf %143, %127 : vector<16x128xf32>
    %146 = arith.mulf %142, %141 : vector<16x128xf32>
    %147 = arith.addf %145, %146 : vector<16x128xf32>
    %148 = math.tanh %147 : vector<16x128xf32>
    %149 = arith.mulf %144, %148 : vector<16x128xf32>
    %150 = vector.extract_strided_slice %6 {offsets = [0, 0], sizes = [16, 512], strides = [1, 1]} : vector<128x512xf32> to vector<16x512xf32>
    %151 = arith.truncf %149 : vector<16x128xf32> to vector<16x128xbf16>
    %cst_24 = arith.constant dense<0.000000e+00> : vector<16x512xf32>
    %152 = tpu.matmul %151, %7, %cst_24 {dimension_numbers = #tpu.dot_dimension_numbers<[1], [0], [0], [1], [0, 0, 1, 1], [], []>} : vector<16x128xbf16>, vector<128x512xbf16>, vector<16x512xf32> -> vector<16x512xf32>
    %153 = arith.addf %150, %152 : vector<16x512xf32>
    %154 = vector.extract_strided_slice %153 {offsets = [0, 0], sizes = [16, 384], strides = [1, 1]} : vector<16x512xf32> to vector<16x384xf32>
    %155 = arith.negf %154 : vector<16x384xf32>
    %156 = math.exp %155 : vector<16x384xf32>
    %cst_25 = arith.constant 1.000000e+00 : f32
    %157 = vector.broadcast %cst_25 : f32 to vector<16x384xf32>
    %158 = arith.addf %157, %156 : vector<16x384xf32>
    %159 = arith.divf %157, %158 : vector<16x384xf32>
    %160 = vector.extract_strided_slice %153 {offsets = [0, 384], sizes = [16, 128], strides = [1, 1]} : vector<16x512xf32> to vector<16x128xf32>
    %161 = math.tanh %160 : vector<16x128xf32>
    %162 = vector.extract_strided_slice %159 {offsets = [0, 0], sizes = [16, 128], strides = [1, 1]} : vector<16x384xf32> to vector<16x128xf32>
    %163 = vector.extract_strided_slice %159 {offsets = [0, 128], sizes = [16, 128], strides = [1, 1]} : vector<16x384xf32> to vector<16x128xf32>
    %164 = vector.extract_strided_slice %159 {offsets = [0, 256], sizes = [16, 128], strides = [1, 1]} : vector<16x384xf32> to vector<16x128xf32>
    %165 = arith.mulf %163, %147 : vector<16x128xf32>
    %166 = arith.mulf %162, %161 : vector<16x128xf32>
    %167 = arith.addf %165, %166 : vector<16x128xf32>
    %168 = math.tanh %167 : vector<16x128xf32>
    %169 = arith.mulf %164, %168 : vector<16x128xf32>
    %c0_26 = arith.constant 0 : index
    %c0_27 = arith.constant 0 : index
    %170 = vector.load %arg2[%c0_26, %c0_27] : memref<16x768xbf16, #tpu.memory_space<vmem>>, vector<16x768xbf16>
    %c0_28 = arith.constant 0 : index
    %c0_29 = arith.constant 0 : index
    %171 = vector.load %arg6[%c0_28, %c0_29] : memref<768x256xbf16, #tpu.memory_space<vmem>>, vector<768x256xbf16>
    %cst_30 = arith.constant dense<0.000000e+00> : vector<16x256xf32>
    %172 = tpu.matmul %170, %171, %cst_30 {dimension_numbers = #tpu.dot_dimension_numbers<[1], [0], [0], [1], [0, 0, 1, 1], [], []>} : vector<16x768xbf16>, vector<768x256xbf16>, vector<16x256xf32> -> vector<16x256xf32>
    %173 = arith.truncf %169 : vector<16x128xf32> to vector<16x128xbf16>
    %c0_31 = arith.constant 0 : index
    %c0_32 = arith.constant 0 : index
    %174 = vector.load %arg7[%c0_31, %c0_32] : memref<128x256xbf16, #tpu.memory_space<vmem>>, vector<128x256xbf16>
    %cst_33 = arith.constant dense<0.000000e+00> : vector<16x256xf32>
    %175 = tpu.matmul %173, %174, %cst_33 {dimension_numbers = #tpu.dot_dimension_numbers<[1], [0], [0], [1], [0, 0, 1, 1], [], []>} : vector<16x128xbf16>, vector<128x256xbf16>, vector<16x256xf32> -> vector<16x256xf32>
    %176 = arith.addf %172, %175 : vector<16x256xf32>
    %c0_34 = arith.constant 0 : index
    %c0_35 = arith.constant 0 : index
    %177 = vector.load %arg8[%c0_34, %c0_35] : memref<1x256xf32, #tpu.memory_space<vmem>>, vector<1x256xf32>
    %178 = vector.broadcast %177 : vector<1x256xf32> to vector<16x256xf32>
    %179 = arith.addf %176, %178 : vector<16x256xf32>
    %cst_36 = arith.constant 0.000000e+00 : f32
    %180 = vector.broadcast %cst_36 : f32 to vector<16x256xf32>
    %181 = arith.maximumf %179, %180 : vector<16x256xf32>
    %182 = arith.truncf %181 : vector<16x256xf32> to vector<16x256xbf16>
    %c0_37 = arith.constant 0 : index
    %c0_38 = arith.constant 0 : index
    %183 = vector.load %arg9[%c0_37, %c0_38] : memref<256x128xbf16, #tpu.memory_space<vmem>>, vector<256x128xbf16>
    %cst_39 = arith.constant dense<0.000000e+00> : vector<16x128xf32>
    %184 = tpu.matmul %182, %183, %cst_39 {dimension_numbers = #tpu.dot_dimension_numbers<[1], [0], [0], [1], [0, 0, 1, 1], [], []>} : vector<16x256xbf16>, vector<256x128xbf16>, vector<16x128xf32> -> vector<16x128xf32>
    %c0_40 = arith.constant 0 : index
    %c0_41 = arith.constant 0 : index
    %185 = vector.load %arg10[%c0_40, %c0_41] : memref<1x128xf32, #tpu.memory_space<vmem>>, vector<1x128xf32>
    %186 = vector.broadcast %185 : vector<1x128xf32> to vector<16x128xf32>
    %187 = arith.addf %184, %186 : vector<16x128xf32>
    %cst_42 = arith.constant 0.000000e+00 : f32
    %188 = vector.broadcast %cst_42 : f32 to vector<16x128xf32>
    %189 = arith.maximumf %187, %188 : vector<16x128xf32>
    %190 = arith.truncf %189 : vector<16x128xf32> to vector<16x128xbf16>
    %c0_43 = arith.constant 0 : index
    %c0_44 = arith.constant 0 : index
    %191 = vector.load %arg11[%c0_43, %c0_44] : memref<128x128xbf16, #tpu.memory_space<vmem>>, vector<128x128xbf16>
    %cst_45 = arith.constant dense<0.000000e+00> : vector<16x128xf32>
    %192 = tpu.matmul %190, %191, %cst_45 {dimension_numbers = #tpu.dot_dimension_numbers<[1], [0], [0], [1], [0, 0, 1, 1], [], []>} : vector<16x128xbf16>, vector<128x128xbf16>, vector<16x128xf32> -> vector<16x128xf32>
    %c0_46 = arith.constant 0 : index
    %c0_47 = arith.constant 0 : index
    %193 = vector.load %arg12[%c0_46, %c0_47] : memref<1x128xf32, #tpu.memory_space<vmem>>, vector<1x128xf32>
    %194 = vector.broadcast %193 : vector<1x128xf32> to vector<16x128xf32>
    %195 = arith.addf %192, %194 : vector<16x128xf32>
    %c0_48 = arith.constant 0 : index
    %c0_49 = arith.constant 0 : index
    %196 = vector.load %arg13[%c0_48, %c0_49] : memref<16x128xf32, #tpu.memory_space<vmem>>, vector<16x128xf32>
    tpu.vector_store %arg13[%c0_48, %c0_49], %195 {strides = array<i32>} : memref<16x128xf32, #tpu.memory_space<vmem>>, vector<16x128xf32>,
    return
  }
  func.func @transform_0(%arg0: i32) -> (i32, i32, i32) {
    %c0_i32 = arith.constant 0 : i32
    %c0_i32_0 = arith.constant 0 : i32
    %c0_i32_1 = arith.constant 0 : i32
    return %c0_i32, %arg0, %c0_i32_0 : i32, i32, i32
  }
  func.func @transform_1(%arg0: i32) -> (i32, i32) {
    %c0_i32 = arith.constant 0 : i32
    %c0_i32_0 = arith.constant 0 : i32
    return %arg0, %c0_i32 : i32, i32
  }
  func.func @transform_2(%arg0: i32) -> (i32, i32) {
    %c0_i32 = arith.constant 0 : i32
    %c0_i32_0 = arith.constant 0 : i32
    %c0_i32_1 = arith.constant 0 : i32
    return %c0_i32, %c0_i32_0 : i32, i32
  }
  func.func @transform_3(%arg0: i32) -> (i32, i32) {
    %c0_i32 = arith.constant 0 : i32
    %c0_i32_0 = arith.constant 0 : i32
    %c0_i32_1 = arith.constant 0 : i32
    return %c0_i32, %c0_i32_0 : i32, i32
  }
  func.func @transform_4(%arg0: i32) -> (i32, i32) {
    %c0_i32 = arith.constant 0 : i32
    %c0_i32_0 = arith.constant 0 : i32
    %c0_i32_1 = arith.constant 0 : i32
    return %c0_i32, %c0_i32_0 : i32, i32
  }
  func.func @transform_5(%arg0: i32) -> (i32, i32) {
    %c0_i32 = arith.constant 0 : i32
    %c0_i32_0 = arith.constant 0 : i32
    %c0_i32_1 = arith.constant 0 : i32
    return %c0_i32, %c0_i32_0 : i32, i32
  }
  func.func @transform_6(%arg0: i32) -> (i32, i32) {
    %c0_i32 = arith.constant 0 : i32
    %c0_i32_0 = arith.constant 0 : i32
    %c0_i32_1 = arith.constant 0 : i32
    return %c0_i32, %c0_i32_0 : i32, i32
  }
  func.func @transform_7(%arg0: i32) -> (i32, i32) {
    %c0_i32 = arith.constant 0 : i32
    %c0_i32_0 = arith.constant 0 : i32
    %c0_i32_1 = arith.constant 0 : i32
    return %c0_i32, %c0_i32_0 : i32, i32
  }
  func.func @transform_8(%arg0: i32) -> (i32, i32) {
    %c0_i32 = arith.constant 0 : i32
    %c0_i32_0 = arith.constant 0 : i32
    %c0_i32_1 = arith.constant 0 : i32
    return %c0_i32, %c0_i32_0 : i32, i32
  }
  func.func @transform_9(%arg0: i32) -> (i32, i32) {
    %c0_i32 = arith.constant 0 : i32
    %c0_i32_0 = arith.constant 0 : i32
    %c0_i32_1 = arith.constant 0 : i32
    return %c0_i32, %c0_i32_0 : i32, i32
  }
  func.func @transform_10(%arg0: i32) -> (i32, i32) {
    %c0_i32 = arith.constant 0 : i32
    %c0_i32_0 = arith.constant 0 : i32
    %c0_i32_1 = arith.constant 0 : i32
    return %c0_i32, %c0_i32_0 : i32, i32
  }
  func.func @transform_11(%arg0: i32) -> (i32, i32) {
    %c0_i32 = arith.constant 0 : i32
    %c0_i32_0 = arith.constant 0 : i32
    %c0_i32_1 = arith.constant 0 : i32
    return %c0_i32, %c0_i32_0 : i32, i32
  }
  func.func @transform_12(%arg0: i32) -> (i32, i32) {
    %c0_i32 = arith.constant 0 : i32
    %c0_i32_0 = arith.constant 0 : i32
    return %arg0, %c0_i32 : i32, i32
  }
}

</mosaic_0001>

<bundles_post_ra>
// kernel: forward.1
= control target key start
LH: loop header
LB: loop body
LE: loop exit
PB: predicated region body
PF: predicated region fallthrough
CT: control target
= control target key end

     0   :  { %17 = vsyncpa [#allocation3], 0  ;;  %s14250_s0 = inlined_call_operand.vmem [shape: bf16[8,16,2176], index: 0, kind: input, shape index: {}]   ;;  %s14251_s1 = inlined_call_operand.vmem [shape: bf16[16,768], index: 1, kind: input, shape index: {}]   ;;  %s14252_s2 = inlined_call_operand.hbm [shape: bf16[2176,512], index: 2, kind: input, shape index: {}]   ;;  %s14253_s3 = inlined_call_operand.hbm [shape: bf16[128,512], index: 3, kind: input, shape index: {}]   ;;  %s14254_s4 = inlined_call_operand.hbm [shape: f32[1,512], index: 4, kind: input, shape index: {}]   ;;  %s14255_s5 = inlined_call_operand.hbm [shape: bf16[768,256], index: 5, kind: input, shape index: {}]   ;;  %s14256_s6 = inlined_call_operand.hbm [shape: bf16[128,256], index: 6, kind: input, shape index: {}]   ;;  %s14257_s7 = inlined_call_operand.hbm [shape: f32[1,256], index: 7, kind: input, shape index: {}]   ;;  %s14258_s8 = inlined_call_operand.hbm [shape: bf16[256,128], index: 8, kind: input, shape index: {}]   ;;  %s14259_s9 = inlined_call_operand.hbm [shape: f32[1,128], index: 9, kind: input, shape index: {}]   ;;  %s14260_s10 = inlined_call_operand.hbm [shape: bf16[128,128], index: 10, kind: input, shape index: {}]   ;;  %s14261_s11 = inlined_call_operand.hbm [shape: f32[1,128], index: 11, kind: input, shape index: {}]   ;;  %s14262_s12 = inlined_call_operand.vmem [shape: f32[16,128], index: 12, kind: output, shape index: {}]  }
   0x1   :  { %18 = vsyncpa [#allocation5], 0 }
   0x2   :  { %19 = vsyncpa [#allocation8], 0 }
   0x3   :  { %20 = vsyncpa [#allocation11], 0 }
   0x4   :  { %21 = vsyncpa [#allocation14], 0 }
   0x5   :  { %22 = vsyncpa [#allocation17], 0  ;;  %s11769_s21 = smov [#allocation4]   ;;  %s11770_s23 = smov [#allocation7]  }
   0x6   :  { %s44_s22 = sshll.u32 %s11769_s21, 4  ;;  %s66_s24 = sshll.u32 %s11770_s23, 4  ;;  %s45_s22 = int_to_ptr.vmem [resolvable:$true] %s44_s22  ;;  %s67_s24 = int_to_ptr.vmem [resolvable:$true] %s66_s24 }
   0x7   :  { %s11565_s25 = scalar_lea.vmem %s45_s22, 4096  ;;  %p11570_p1 = scmp.lt.s32.totalorder %s45_s22, %s45_s22 }
   0x8   :  { %p11566_p0 = scmp.ne.s32.totalorder %s45_s22, %s11565_s25  ;;  %p11571_p2 = scmp.lt.s32.totalorder %s11565_s25, %s11565_s25 }
   0xa   :  { %p11572_p3 = por %p11571_p2, %p11570_p1 }
   0xc   :  { %p11573_p4 = pnand %p11572_p3, %p11566_p0 }
   0xe   :  { %11576 = shalt.err (!%p11573_p4)
}
   0xf   :  { %s11771_s26 = smov 256   ;;  %s11772_s27 = smov 16  }
  0x10   :  { %50 = dma.hbm_to_vmem [thread:$0]  %s14253_s3, 4096, %s45_s22, [#allocation5], %s11771_s26, %s11771_s26, %s11772_s27  }
  0x11   :  { %s11585_s30 = scalar_lea.vmem %s67_s24, 12288  ;;  %p11590_p6 = scmp.lt.s32.totalorder %s67_s24, %s67_s24 }
  0x12   :  { %p11586_p5 = scmp.ne.s32.totalorder %s67_s24, %s11585_s30  ;;  %p11591_p7 = scmp.lt.s32.totalorder %s11585_s30, %s11585_s30 }
  0x14   :  { %p11592_p8 = por %p11591_p7, %p11590_p6 }
  0x16   :  { %p11593_p9 = pnand %p11592_p8, %p11586_p5 }
  0x18   :  { %11596 = shalt.err (!%p11593_p9)
}
  0x19   :  { %s11773_s13 = smov 128   ;;  %s11774_s14 = smov 8  }
  0x1a   :  { %72 = dma.hbm_to_vmem [thread:$0]  %s14255_s5, 12288, %s67_s24, [#allocation8], %s11773_s13, %s11773_s13, %s11774_s14  }
  0x1b   :  { %s11775_s17 = smov [#allocation10]   ;;  %s11776_s19 = smov [#allocation13]  }
  0x1c   :  { %s91_s18 = sshll.u32 %s11775_s17, 4  ;;  %s113_s3 = sshll.u32 %s11776_s19, 4  ;;  %s92_s18 = int_to_ptr.vmem [resolvable:$true] %s91_s18  ;;  %s114_s3 = int_to_ptr.vmem [resolvable:$true] %s113_s3 }
  0x1d   :  { %s11605_s20 = scalar_lea.vmem %s92_s18, 32  ;;  %p11610_p11 = scmp.lt.s32.totalorder %s92_s18, %s92_s18 }
  0x1e   :  { %p11606_p10 = scmp.ne.s32.totalorder %s92_s18, %s11605_s20  ;;  %p11611_p12 = scmp.lt.s32.totalorder %s11605_s20, %s11605_s20 }
  0x20   :  { %p11612_p13 = por %p11611_p12, %p11610_p11 }
  0x22   :  { %p11613_p0 = pnand %p11612_p13, %p11606_p10 }
  0x24   :  { %11616 = shalt.err (!%p11613_p0)
}
  0x25   :  { %94 = dma.hbm_to_vmem [thread:$0]  %s14257_s7, 32, %s92_s18, [#allocation11]  }
  0x26   :  { %s11625_s23 = scalar_lea.vmem %s114_s3, 16  ;;  %s11629_s5 = scalar_lea.vmem %s114_s3, 32 }
  0x27   :  { %p11626_p1 = scmp.ne.s32.totalorder %s114_s3, %s11625_s23  ;;  %p11630_p2 = scmp.lt.s32.totalorder %s114_s3, %s114_s3 }
  0x28   :  { %p11631_p3 = scmp.lt.s32.totalorder %s11629_s5, %s11625_s23 }
  0x2a   :  { %p11632_p4 = por %p11631_p3, %p11630_p2 }
  0x2c   :  { %p11633_p5 = pnand %p11632_p4, %p11626_p1 }
  0x2e   :  { %11636 = shalt.err (!%p11633_p5)
}
  0x2f   :  { %116 = dma.hbm_to_vmem [thread:$0]  %s14259_s9, 16, %s114_s3, [#allocation14]  }
  0x30   :  { %s11777_s28 = smov [#allocation2]   ;;  %s11778_s30 = smov [#allocation6]  }
  0x31   :  { %s32_s29 = sshll.u32 %s11777_s28, 4  ;;  %s57_s15 = sshll.u32 %s11778_s30, 4  ;;  %s33_s29 = int_to_ptr.vmem [resolvable:$true] %s32_s29  ;;  %s58_s15 = int_to_ptr.vmem [resolvable:$true] %s57_s15 }
  0x32   :  { %s11645_s16 = scalar_lea.vmem %s33_s29, 69632  ;;  %p11650_p7 = scmp.lt.s32.totalorder %s33_s29, %s33_s29 }
  0x33   :  { %p11646_p6 = scmp.ne.s32.totalorder %s33_s29, %s11645_s16  ;;  %p11651_p8 = scmp.lt.s32.totalorder %s11645_s16, %s11645_s16 }
  0x35   :  { %p11652_p9 = por %p11651_p8, %p11650_p7 }
  0x37   :  { %p11653_p10 = pnand %p11652_p9, %p11646_p6 }
  0x39   :  { %11656 = shalt.err (!%p11653_p10)
}
  0x3a   :  { %38 = dma.hbm_to_vmem [thread:$0]  %s14252_s2, 69632, %s33_s29, [#allocation3], %s11771_s26, %s11771_s26, %s11772_s27  }
  0x3b   :  { %s11665_s9 = scalar_lea.vmem %s58_s15, 64  ;;  %p11670_p12 = scmp.lt.s32.totalorder %s58_s15, %s58_s15 }
  0x3c   :  { %p11666_p11 = scmp.ne.s32.totalorder %s58_s15, %s11665_s9  ;;  %p11671_p13 = scmp.lt.s32.totalorder %s11665_s9, %s11665_s9 }
  0x3e   :  { %p11672_p0 = por %p11671_p13, %p11670_p12 }
  0x40   :  { %p11673_p1 = pnand %p11672_p0, %p11666_p11 }
  0x42   :  { %11676 = shalt.err (!%p11673_p1)
}
  0x43   :  { %60 = dma.hbm_to_vmem [thread:$0]  %s14254_s4, 64, %s58_s15, [#allocation5]  }
  0x44   :  { %s11779_s3 = smov [#allocation9]   ;;  %s11780_s21 = smov [#allocation12]  }
  0x45   :  { %s78_s20 = sshll.u32 %s11779_s3, 4  ;;  %s100_s22 = sshll.u32 %s11780_s21, 4  ;;  %s79_s20 = int_to_ptr.vmem [resolvable:$true] %s78_s20  ;;  %s101_s22 = int_to_ptr.vmem [resolvable:$true] %s100_s22 }
  0x46   :  { %s11685_s23 = scalar_lea.vmem %s79_s20, 2048  ;;  %p11690_p3 = scmp.lt.s32.totalorder %s79_s20, %s79_s20 }
  0x47   :  { %p11686_p2 = scmp.ne.s32.totalorder %s79_s20, %s11685_s23  ;;  %p11691_p4 = scmp.lt.s32.totalorder %s11685_s23, %s11685_s23 }
  0x49   :  { %p11692_p5 = por %p11691_p4, %p11690_p3 }
  0x4b   :  { %p11693_p6 = pnand %p11692_p5, %p11686_p2 }
  0x4d   :  { %11696 = shalt.err (!%p11693_p6)
}
  0x4e   :  { %84 = dma.hbm_to_vmem [thread:$0]  %s14256_s6, 2048, %s79_s20, [#allocation8], %s11773_s13, %s11773_s13, %s11774_s14  }
  0x4f   :  { %s11705_s4 = scalar_lea.vmem %s101_s22, 2048  ;;  %p11710_p8 = scmp.lt.s32.totalorder %s101_s22, %s101_s22 }
  0x50   :  { %p11706_p7 = scmp.ne.s32.totalorder %s101_s22, %s11705_s4  ;;  %p11711_p9 = scmp.lt.s32.totalorder %s11705_s4, %s11705_s4 }
  0x52   :  { %p11712_p10 = por %p11711_p9, %p11710_p8 }
  0x54   :  { %p11713_p11 = pnand %p11712_p10, %p11706_p7 }
  0x56   :  { %11716 = shalt.err (!%p11713_p11)
}
  0x57   :  { %s11781_s27 = smov 64   ;;  %s11782_s5 = smov 4  }
  0x58   :  { %106 = dma.hbm_to_vmem [thread:$0]  %s14258_s8, 2048, %s101_s22, [#allocation11], %s11781_s27, %s11781_s27, %s11782_s5  }
  0x59   :  { %s11783_s28 = smov [#allocation15]   ;;  %s11784_s30 = smov [#allocation16]  }
  0x5a   :  { %s122_s29 = sshll.u32 %s11783_s28, 4  ;;  %s135_s15 = sshll.u32 %s11784_s30, 4  ;;  %s123_s29 = int_to_ptr.vmem [resolvable:$true] %s122_s29  ;;  %s136_s15 = int_to_ptr.vmem [resolvable:$true] %s135_s15 }
  0x5b   :  { %s11725_s6 = scalar_lea.vmem %s123_s29, 1024  ;;  %p11730_p13 = scmp.lt.s32.totalorder %s123_s29, %s123_s29 }
  0x5c   :  { %p11726_p12 = scmp.ne.s32.totalorder %s123_s29, %s11725_s6  ;;  %p11731_p0 = scmp.lt.s32.totalorder %s11725_s6, %s11725_s6 }
  0x5e   :  { %p11732_p1 = por %p11731_p0, %p11730_p13 }
  0x60   :  { %p11733_p2 = pnand %p11732_p1, %p11726_p12 }
  0x62   :  { %11736 = shalt.err (!%p11733_p2)
}
  0x63   :  { %128 = dma.hbm_to_vmem [thread:$0]  %s14260_s10, 1024, %s123_s29, [#allocation14], %s11781_s27, %s11781_s27, %s11782_s5  }
  0x64   :  { %s11745_s16 = scalar_lea.vmem %s136_s15, 16  ;;  %s11749_s8 = scalar_lea.vmem %s136_s15, 32 }
  0x65   :  { %p11746_p3 = scmp.ne.s32.totalorder %s136_s15, %s11745_s16  ;;  %p11750_p4 = scmp.lt.s32.totalorder %s136_s15, %s136_s15 }
  0x66   :  { %p11751_p5 = scmp.lt.s32.totalorder %s11749_s8, %s11745_s16 }
  0x68   :  { %p11752_p6 = por %p11751_p5, %p11750_p4 }
  0x6a   :  { %p11753_p7 = pnand %p11752_p6, %p11746_p3 }
  0x6c   :  { %11756 = shalt.err (!%p11753_p7)
}
  0x6d   :  { %138 = dma.hbm_to_vmem [thread:$0]  %s14261_s11, 16, %s136_s15, [#allocation17]  }
  0x6e   :  { %11757 = dma.done.wait [#allocation3], 69632  }
  0x6f   :  { %11758 = vsyncadd [#allocation3], 4294897664 }
  0x70   :  { %11759 = dma.done.wait [#allocation5], 4160  }
  0x71   :  { %11760 = vsyncadd [#allocation5], 4294963136 }
  0x72   :  { %11761 = dma.done.wait [#allocation8], 14336  }
  0x73   :  { %11762 = vsyncadd [#allocation8], 4294952960 }
  0x74   :  { %11763 = dma.done.wait [#allocation11], 2080  }
  0x75   :  { %11764 = vsyncadd [#allocation11], 4294965216 }
  0x76   :  { %11765 = dma.done.wait [#allocation14], 1040  }
  0x77   :  { %11766 = vsyncadd [#allocation14], 4294966256 }
  0x78   :  { %11767 = dma.done.wait [#allocation17], 16  }
  0x79   :  { %11768 = vsyncadd [#allocation17], 4294967280  ;;  %v9837_v0 = vld [vmem:[#allocation2 + $0xe4] ss:$16 sps:$4 sm:$0xff]   ;;  %v9841_v2 = vld [vmem:[#allocation2 + $0xe0] ss:$16 sps:$4 sm:$0xff]  }
  0x7a   :  { %v9839_v1 = vld [vmem:[#allocation2 + $0x2e4] ss:$16 sps:$4 sm:$0xff]   ;;  %4288 = vmatprep.subr.bf16.mxu0 %v9837_v0  ;;  %v9842_v3 = vld [vmem:[#allocation2 + $0x2e0] ss:$16 sps:$4 sm:$0xff]   ;;  %vm11787_vm0 = vmmov 0  }
  0x7b   :  { %4401 = vmatprep.subr.bf16.mxu1 %v9839_v1  ;;  %v9843_v4 = vld [vmem:[#allocation2 + $0xc4] ss:$16 sps:$4 sm:$0xff]   ;;  %4289 = vmatpush1.bf16.msra.mxu0 %v9841_v2  ;;  %v9847_v6 = vld [vmem:[#allocation2 + $0xc0] ss:$16 sps:$4 sm:$0xff]  }
  0x7c   :  { %4402 = vmatpush1.bf16.msra.mxu1 %v9842_v3  ;;  %v9845_v5 = vld [vmem:[#allocation2 + $0x2c4] ss:$16 sps:$4 sm:$0xff]   ;;  %4290 = vmatprep.subr.bf16.mxu0 %v9843_v4  ;;  %v9848_v7 = vld [vmem:[#allocation2 + $0x2c0] ss:$16 sps:$4 sm:$0xff]  }
  0x7d   :  { %4403 = vmatprep.subr.bf16.mxu1 %v9845_v5  ;;  %v9849_v8 = vld [vmem:[#allocation2 + $0xa4] ss:$16 sps:$4 sm:$0xff]   ;;  %v9853_v10 = vld [vmem:[#allocation2 + $0xa0] ss:$16 sps:$4 sm:$0xff]   ;;  %v9936_v5 = vld [vmem:[%s14250_s0 + $0x8] ss:$68 sps:$4 sm:$0xff]  }
  0x7e   :  { %v9851_v9 = vld [vmem:[#allocation2 + $0x2a4] ss:$16 sps:$4 sm:$0xff]   ;;  %v9854_v11 = vld [vmem:[#allocation2 + $0x2a0] ss:$16 sps:$4 sm:$0xff]  }
  0x7f   :  { %4291 = vmatpush1.bf16.msra.mxu0 %v9847_v6  ;;  %v9855_v12 = vld [vmem:[#allocation2 + $0x84] ss:$16 sps:$4 sm:$0xff]   ;;  %v9859_v14 = vld [vmem:[#allocation2 + $0x80] ss:$16 sps:$4 sm:$0xff]  }
  0x80   :  { %4404 = vmatpush1.bf16.msra.mxu1 %v9848_v7  ;;  %4292 = vmatprep.subr.bf16.mxu0 %v9849_v8  ;;  %v9857_v13 = vld [vmem:[#allocation2 + $0x284] ss:$16 sps:$4 sm:$0xff]   ;;  %v9860_v15 = vld [vmem:[#allocation2 + $0x280] ss:$16 sps:$4 sm:$0xff]  }
  0x81   :  { %4405 = vmatprep.subr.bf16.mxu1 %v9851_v9  ;;  %v9861_v16 = vld [vmem:[#allocation2 + $0x64] ss:$16 sps:$4 sm:$0xff]   ;;  %v9865_v18 = vld [vmem:[#allocation2 + $0x60] ss:$16 sps:$4 sm:$0xff]  }
  0x82   :  { %v9863_v17 = vld [vmem:[#allocation2 + $0x264] ss:$16 sps:$4 sm:$0xff]   ;;  %v9866_v19 = vld [vmem:[#allocation2 + $0x260] ss:$16 sps:$4 sm:$0xff]  }
  0x83   :  { %4293 = vmatpush1.bf16.msra.mxu0 %v9853_v10  ;;  %v9867_v20 = vld [vmem:[#allocation2 + $0x44] ss:$16 sps:$4 sm:$0xff]   ;;  %v9871_v22 = vld [vmem:[#allocation2 + $0x40] ss:$16 sps:$4 sm:$0xff]  }
  0x84   :  { %4406 = vmatpush1.bf16.msra.mxu1 %v9854_v11  ;;  %4294 = vmatprep.subr.bf16.mxu0 %v9855_v12  ;;  %v9869_v21 = vld [vmem:[#allocation2 + $0x244] ss:$16 sps:$4 sm:$0xff]   ;;  %v9872_v23 = vld [vmem:[#allocation2 + $0x240] ss:$16 sps:$4 sm:$0xff]  }
  0x85   :  { %4407 = vmatprep.subr.bf16.mxu1 %v9857_v13  ;;  %v9873_v24 = vld [vmem:[#allocation2 + $0x24] ss:$16 sps:$4 sm:$0xff]   ;;  %v9877_v26 = vld [vmem:[#allocation2 + $0x20] ss:$16 sps:$4 sm:$0xff]  }
  0x86   :  { %v9875_v25 = vld [vmem:[#allocation2 + $0x224] ss:$16 sps:$4 sm:$0xff]   ;;  %v9878_v27 = vld [vmem:[#allocation2 + $0x220] ss:$16 sps:$4 sm:$0xff]  }
  0x87   :  { %4295 = vmatpush1.bf16.msra.mxu0 %v9859_v14  ;;  %v9879_v28 = vld [vmem:[#allocation2 + $0x4] ss:$16 sps:$4 sm:$0xff]   ;;  %v9883_v30 = vld [vmem:[#allocation2] ss:$16 sps:$4 sm:$0xff]  }
  0x88   :  { %4408 = vmatpush1.bf16.msra.mxu1 %v9860_v15  ;;  %4296 = vmatprep.subr.bf16.mxu0 %v9861_v16  ;;  %v9881_v29 = vld [vmem:[#allocation2 + $0x204] ss:$16 sps:$4 sm:$0xff]   ;;  %v9884_v31 = vld [vmem:[#allocation2 + $0x200] ss:$16 sps:$4 sm:$0xff]   ;;  %v9955_v16 = vld [vmem:[%s14250_s0 + $0x88] ss:$68 sps:$4 sm:$0xff]  }
  0x89   :  { %4409 = vmatprep.subr.bf16.mxu1 %v9863_v17  ;;  %v9885_v32 = vld [vmem:[#allocation2 + $0x1e4] ss:$16 sps:$4 sm:$0xff]   ;;  %v9889_v34 = vld [vmem:[#allocation2 + $0x1e0] ss:$16 sps:$4 sm:$0xff]  }
  0x8a   :  { %v9887_v33 = vld [vmem:[#allocation2 + $0x3e4] ss:$16 sps:$4 sm:$0xff]   ;;  %v9890_v35 = vld [vmem:[#allocation2 + $0x3e0] ss:$16 sps:$4 sm:$0xff]  }
  0x8b   :  { %4297 = vmatpush1.bf16.msra.mxu0 %v9865_v18  ;;  %v9891_v36 = vld [vmem:[#allocation2 + $0x1c4] ss:$16 sps:$4 sm:$0xff]   ;;  %v9895_v38 = vld [vmem:[#allocation2 + $0x1c0] ss:$16 sps:$4 sm:$0xff]  }
  0x8c   :  { %4410 = vmatpush1.bf16.msra.mxu1 %v9866_v19  ;;  %4298 = vmatprep.subr.bf16.mxu0 %v9867_v20  ;;  %v9893_v37 = vld [vmem:[#allocation2 + $0x3c4] ss:$16 sps:$4 sm:$0xff]   ;;  %v9896_v39 = vld [vmem:[#allocation2 + $0x3c0] ss:$16 sps:$4 sm:$0xff]  }
  0x8d   :  { %4411 = vmatprep.subr.bf16.mxu1 %v9869_v21  ;;  %v9897_v40 = vld [vmem:[#allocation2 + $0x1a4] ss:$16 sps:$4 sm:$0xff]   ;;  %v9901_v42 = vld [vmem:[#allocation2 + $0x1a0] ss:$16 sps:$4 sm:$0xff]  }
  0x8e   :  { %v9899_v41 = vld [vmem:[#allocation2 + $0x3a4] ss:$16 sps:$4 sm:$0xff]   ;;  %v9902_v43 = vld [vmem:[#allocation2 + $0x3a0] ss:$16 sps:$4 sm:$0xff]  }
  0x8f   :  { %4299 = vmatpush1.bf16.msra.mxu0 %v9871_v22  ;;  %v9903_v44 = vld [vmem:[#allocation2 + $0x184] ss:$16 sps:$4 sm:$0xff]   ;;  %v9907_v46 = vld [vmem:[#allocation2 + $0x180] ss:$16 sps:$4 sm:$0xff]  }
  0x90   :  { %4412 = vmatpush1.bf16.msra.mxu1 %v9872_v23  ;;  %4300 = vmatprep.subr.bf16.mxu0 %v9873_v24  ;;  %v9905_v45 = vld [vmem:[#allocation2 + $0x384] ss:$16 sps:$4 sm:$0xff]   ;;  %v9908_v47 = vld [vmem:[#allocation2 + $0x380] ss:$16 sps:$4 sm:$0xff]  }
  0x91   :  { %4413 = vmatprep.subr.bf16.mxu1 %v9875_v25  ;;  %v9909_v48 = vld [vmem:[#allocation2 + $0x164] ss:$16 sps:$4 sm:$0xff]   ;;  %v9938_v51 = vld [vmem:[%s14250_s0 + $0xc] ss:$68 sps:$4 sm:$0xff]   ;;  %v9971_v23 = vld [vmem:[%s14250_s0 + $0x11c] ss:$68 sps:$4 sm:$0xff]  }
  0x92   :  { %v9935_v49 = vld [vmem:[%s14250_s0 + $0x4] ss:$68 sps:$4 sm:$0xff]   ;;  %v9913_v52 = vld [vmem:[#allocation2 + $0x160] ss:$16 sps:$4 sm:$0xff]   ;;  %4433 = vmatprep.mubr.bf16.mxu1 %v9938_v51  ;;  %v9953_v11 = vld [vmem:[%s14250_s0 + $0x94] ss:$68 sps:$4 sm:$0xff]  }
  0x93   :  { %4301 = vmatpush1.bf16.msra.mxu0 %v9877_v26  ;;  %v9911_v50 = vld [vmem:[#allocation2 + $0x364] ss:$16 sps:$4 sm:$0xff]   ;;  %4320 = vmatprep.mubr.bf16.mxu0 %v9935_v49  ;;  %v9914_v53 = vld [vmem:[#allocation2 + $0x360] ss:$16 sps:$4 sm:$0xff]  }
  0x94   :  { %4414 = vmatpush1.bf16.msra.mxu1 %v9878_v27  ;;  %4302 = vmatprep.subr.bf16.mxu0 %v9879_v28  ;;  %v9915_v54 = vld [vmem:[#allocation2 + $0x144] ss:$16 sps:$4 sm:$0xff]   ;;  %v9919_v56 = vld [vmem:[#allocation2 + $0x140] ss:$16 sps:$4 sm:$0xff]  }
  0x95   :  { %4415 = vmatprep.subr.bf16.mxu1 %v9881_v29  ;;  %v9917_v55 = vld [vmem:[#allocation2 + $0x344] ss:$16 sps:$4 sm:$0xff]   ;;  %v9920_v57 = vld [vmem:[#allocation2 + $0x340] ss:$16 sps:$4 sm:$0xff]   ;;  %v9974_v29 = vld [vmem:[%s14250_s0 + $0x118] ss:$68 sps:$4 sm:$0xff]  }
  0x96   :  { %v9921_v58 = vld [vmem:[#allocation2 + $0x124] ss:$16 sps:$4 sm:$0xff]   ;;  %v9925_v60 = vld [vmem:[#allocation2 + $0x120] ss:$16 sps:$4 sm:$0xff]  }
  0x97   :  { %4303 = vmatpush1.bf16.msra.mxu0 %v9883_v30  ;;  %v9923_v59 = vld [vmem:[#allocation2 + $0x324] ss:$16 sps:$4 sm:$0xff]   ;;  %v9926_v61 = vld [vmem:[#allocation2 + $0x320] ss:$16 sps:$4 sm:$0xff]  }
  0x98   :  { %4416 = vmatpush1.bf16.msra.mxu1 %v9884_v31  ;;  %4304 = vmatprep.subr.bf16.mxu0 %v9885_v32  ;;  %v9927_v62 = vld [vmem:[#allocation2 + $0x104] ss:$16 sps:$4 sm:$0xff]   ;;  %v9931_v0 = vld [vmem:[#allocation2 + $0x100] ss:$16 sps:$4 sm:$0xff]  }
  0x99   :  { %4417 = vmatprep.subr.bf16.mxu1 %v9887_v33  ;;  %v9929_v63 = vld [vmem:[#allocation2 + $0x304] ss:$16 sps:$4 sm:$0xff]   ;;  %v9932_v1 = vld [vmem:[#allocation2 + $0x300] ss:$16 sps:$4 sm:$0xff]  }
  0x9a   :  { %v9941_v2 = vld [vmem:[#allocation2 + $0x4e4] ss:$16 sps:$4 sm:$0xff]   ;;  %v9939_v6 = vld [vmem:[#allocation2 + $0x4e0] ss:$16 sps:$4 sm:$0xff]  }
  0x9b   :  { %4305 = vmatpush2.bf16.msra.mxu0 %v9889_v34  ;;  %v9944_v3 = vld [vmem:[#allocation2 + $0x6e4] ss:$16 sps:$4 sm:$0xff]   ;;  %v9942_v7 = vld [vmem:[#allocation2 + $0x6e0] ss:$16 sps:$4 sm:$0xff]  }
  0x9c   :  { %4418 = vmatpush2.bf16.msra.mxu1 %v9890_v35  ;;  %4306 = vmatprep.subr.bf16.mxu0 %v9891_v36  ;;  %v9933_v4 = vld [vmem:[%s14250_s0] ss:$68 sps:$4 sm:$0xff]   ;;  %v9951_v10 = vld [vmem:[%s14250_s0 + $0x8c] ss:$68 sps:$4 sm:$0xff]   ;;  %v9969_v22 = vld [vmem:[%s14250_s0 + $0x114] ss:$68 sps:$4 sm:$0xff]  }
  0x9d   :  { %4419 = vmatprep.subr.bf16.mxu1 %v9893_v37  ;;  %v9947_v8 = vld [vmem:[#allocation2 + $0x4c4] ss:$16 sps:$4 sm:$0xff]   ;;  %v9945_v12 = vld [vmem:[#allocation2 + $0x4c0] ss:$16 sps:$4 sm:$0xff]  }
  0x9e   :  { %v9950_v9 = vld [vmem:[#allocation2 + $0x6c4] ss:$16 sps:$4 sm:$0xff]   ;;  %v9948_v13 = vld [vmem:[#allocation2 + $0x6c0] ss:$16 sps:$4 sm:$0xff]  }
  0x9f   :  { %4307 = vmatpush2.bf16.msra.mxu0 %v9895_v38  ;;  %v9959_v14 = vld [vmem:[#allocation2 + $0x4a4] ss:$16 sps:$4 sm:$0xff]   ;;  %v9957_v18 = vld [vmem:[#allocation2 + $0x4a0] ss:$16 sps:$4 sm:$0xff]  }
  0xa0   :  { %4420 = vmatpush2.bf16.msra.mxu1 %v9896_v39  ;;  %4308 = vmatprep.subr.bf16.mxu0 %v9897_v40  ;;  %v9962_v15 = vld [vmem:[#allocation2 + $0x6a4] ss:$16 sps:$4 sm:$0xff]   ;;  %v9960_v19 = vld [vmem:[#allocation2 + $0x6a0] ss:$16 sps:$4 sm:$0xff]   ;;  %v9991_v40 = vld [vmem:[%s14250_s0 + $0x198] ss:$68 sps:$4 sm:$0xff]  }
  0xa1   :  { %4421 = vmatprep.subr.bf16.mxu1 %v9899_v41  ;;  %v9956_v17 = vld [vmem:[%s14250_s0 + $0x90] ss:$68 sps:$4 sm:$0xff]   ;;  %v9987_v34 = vld [vmem:[%s14250_s0 + $0x19c] ss:$68 sps:$4 sm:$0xff]   ;;  %v9989_v35 = vld [vmem:[%s14250_s0 + $0x1a4] ss:$68 sps:$4 sm:$0xff]  }
  0xa2   :  { %v9965_v20 = vld [vmem:[#allocation2 + $0x484] ss:$16 sps:$4 sm:$0xff]   ;;  %v9963_v24 = vld [vmem:[#allocation2 + $0x480] ss:$16 sps:$4 sm:$0xff]  }
  0xa3   :  { %4309 = vmatpush2.bf16.msra.mxu0 %v9901_v42  ;;  %v9968_v21 = vld [vmem:[#allocation2 + $0x684] ss:$16 sps:$4 sm:$0xff]   ;;  %v9966_v25 = vld [vmem:[#allocation2 + $0x680] ss:$16 sps:$4 sm:$0xff]  }
  0xa4   :  { %4422 = vmatpush2.bf16.msra.mxu1 %v9902_v43  ;;  %4310 = vmatprep.subr.bf16.mxu0 %v9903_v44  ;;  %v9977_v26 = vld [vmem:[#allocation2 + $0x464] ss:$16 sps:$4 sm:$0xff]   ;;  %v9975_v30 = vld [vmem:[#allocation2 + $0x460] ss:$16 sps:$4 sm:$0xff]  }
  0xa5   :  { %4423 = vmatprep.subr.bf16.mxu1 %v9905_v45  ;;  %v9980_v27 = vld [vmem:[#allocation2 + $0x664] ss:$16 sps:$4 sm:$0xff]   ;;  %v9978_v31 = vld [vmem:[#allocation2 + $0x660] ss:$16 sps:$4 sm:$0xff]  }
  0xa6   :  { %v9973_v28 = vld [vmem:[%s14250_s0 + $0x110] ss:$68 sps:$4 sm:$0xff]   ;;  %v9992_v41 = vld [vmem:[%s14250_s0 + $0x1a0] ss:$68 sps:$4 sm:$0xff]  }
  0xa7   :  { %4311 = vmatpush2.bf16.msra.mxu0 %v9907_v46  ;;  %v9983_v32 = vld [vmem:[#allocation2 + $0x444] ss:$16 sps:$4 sm:$0xff]   ;;  %v9981_v36 = vld [vmem:[#allocation2 + $0x440] ss:$16 sps:$4 sm:$0xff]  }
  0xa8   :  { %4424 = vmatpush2.bf16.msra.mxu1 %v9908_v47  ;;  %4312 = vmatprep.subr.bf16.mxu0 %v9909_v48  ;;  %v9986_v33 = vld [vmem:[#allocation2 + $0x644] ss:$16 sps:$4 sm:$0xff]   ;;  %v9984_v37 = vld [vmem:[#allocation2 + $0x640] ss:$16 sps:$4 sm:$0xff]  }
  0xa9   :  { %4425 = vmatprep.subr.bf16.mxu1 %v9911_v50  ;;  %v9995_v38 = vld [vmem:[#allocation2 + $0x424] ss:$16 sps:$4 sm:$0xff]   ;;  %v9993_v42 = vld [vmem:[#allocation2 + $0x420] ss:$16 sps:$4 sm:$0xff]  }
  0xaa   :  { %v9998_v39 = vld [vmem:[#allocation2 + $0x624] ss:$16 sps:$4 sm:$0xff]   ;;  %v9996_v43 = vld [vmem:[#allocation2 + $0x620] ss:$16 sps:$4 sm:$0xff]  }
  0xab   :  { %4313 = vmatpush2.bf16.msra.mxu0 %v9913_v52  ;;  %v10001_v44 = vld [vmem:[#allocation2 + $0x404] ss:$16 sps:$4 sm:$0xff]   ;;  %v10007_v47 = vld [vmem:[%s14250_s0 + $0x22c] ss:$68 sps:$4 sm:$0xff]  }
  0xac   :  { %4426 = vmatpush2.bf16.msra.mxu1 %v9914_v53  ;;  %4314 = vmatprep.subr.bf16.mxu0 %v9915_v54  ;;  %v10004_v45 = vld [vmem:[#allocation2 + $0x604] ss:$16 sps:$4 sm:$0xff]   ;;  %v9999_v48 = vld [vmem:[#allocation2 + $0x400] ss:$16 sps:$4 sm:$0xff]   ;;  %v10010_v53 = vld [vmem:[%s14250_s0 + $0x228] ss:$68 sps:$4 sm:$0xff]  }
  0xad   :  { %4427 = vmatprep.subr.bf16.mxu1 %v9917_v55  ;;  %v10005_v46 = vld [vmem:[%s14250_s0 + $0x224] ss:$68 sps:$4 sm:$0xff]   ;;  %v10002_v49 = vld [vmem:[#allocation2 + $0x600] ss:$16 sps:$4 sm:$0xff]  }
  0xae   :  { %v10013_v50 = vld [vmem:[#allocation2 + $0x5e4] ss:$16 sps:$4 sm:$0xff]   ;;  %v10011_v54 = vld [vmem:[#allocation2 + $0x5e0] ss:$16 sps:$4 sm:$0xff]  }
  0xaf   :  { %4315 = vmatpush2.bf16.msra.mxu0 %v9919_v56  ;;  %v10016_v51 = vld [vmem:[#allocation2 + $0x7e4] ss:$16 sps:$4 sm:$0xff]   ;;  %v10014_v55 = vld [vmem:[#allocation2 + $0x7e0] ss:$16 sps:$4 sm:$0xff]  }
  0xb0   :  { %4428 = vmatpush2.bf16.msra.mxu1 %v9920_v57  ;;  %4316 = vmatprep.subr.bf16.mxu0 %v9921_v58  ;;  %v10009_v52 = vld [vmem:[%s14250_s0 + $0x220] ss:$68 sps:$4 sm:$0xff]   ;;  %v10023_v58 = vld [vmem:[%s14250_s0 + $0x2ac] ss:$68 sps:$4 sm:$0xff]  }
  0xb1   :  { %4429 = vmatprep.subr.bf16.mxu1 %v9923_v59  ;;  %v10019_v56 = vld [vmem:[#allocation2 + $0x5c4] ss:$16 sps:$4 sm:$0xff]  }
  0xb2   :  { %v10022_v57 = vld [vmem:[#allocation2 + $0x7c4] ss:$16 sps:$4 sm:$0xff]  }
  0xb3   :  { %4317 = vmatpush2.bf16.msra.mxu0 %v9925_v60  ;;  %v10025_v59 = vld [vmem:[%s14250_s0 + $0x2b4] ss:$68 sps:$4 sm:$0xff]   ;;  %v10017_v60 = vld [vmem:[#allocation2 + $0x5c0] ss:$16 sps:$4 sm:$0xff]  }
  0xb4   :  { %4430 = vmatpush2.bf16.msra.mxu1 %v9926_v61  ;;  %4318 = vmatprep.subr.bf16.mxu0 %v9927_v62  ;;  %v10020_v61 = vld [vmem:[#allocation2 + $0x7c0] ss:$16 sps:$4 sm:$0xff]   ;;  %v10031_v62 = vld [vmem:[#allocation2 + $0x5a4] ss:$16 sps:$4 sm:$0xff]  }
  0xb5   :  { %4431 = vmatprep.subr.bf16.mxu1 %v9929_v63  ;;  %v10034_v63 = vld [vmem:[#allocation2 + $0x7a4] ss:$16 sps:$4 sm:$0xff]  }
  0xb7   :  { %4319 = vmatpush2.bf16.msra.mxu0 %v9931_v0  ;;  %v10027_v0 = vld [vmem:[%s14250_s0 + $0x2a8] ss:$68 sps:$4 sm:$0xff]  }
  0xb8   :  { %4432 = vmatpush2.bf16.msra.mxu1 %v9932_v1  ;;  %4514 = vmatprep.subr.bf16.mxu0 %v9941_v2  ;;  %v10028_v1 = vld [vmem:[%s14250_s0 + $0x2b0] ss:$68 sps:$4 sm:$0xff]  }
  0xb9   :  { %4627 = vmatprep.subr.bf16.mxu1 %v9944_v3  ;;  %v10029_v2 = vld [vmem:[#allocation2 + $0x5a0] ss:$16 sps:$4 sm:$0xff]  }
  0xba   :  { %4321 = vmatmul.mubr.bf16.vlgmr.msra.gmra.mxu0 %v9933_v4  ;;  %v10032_v3 = vld [vmem:[#allocation2 + $0x7a0] ss:$16 sps:$4 sm:$0xff]   ;;  %v10037_v4 = vld [vmem:[#allocation2 + $0x584] ss:$16 sps:$4 sm:$0xff]  }
  0xbb   :  { %4434 = vmatmul.mubr.bf16.vlgmr.msra.gmra.mxu1 %v9936_v5  ;;  %4515 = vmatpush1.bf16.msra.mxu0 %v9939_v6  ;;  %v10040_v5 = vld [vmem:[#allocation2 + $0x784] ss:$16 sps:$4 sm:$0xff]  }
  0xbc   :  { %4628 = vmatpush1.bf16.msra.mxu1 %v9942_v7  ;;  %4516 = vmatprep.subr.bf16.mxu0 %v9947_v8  ;;  %v10041_v6 = vld [vmem:[%s14250_s0 + $0x334] ss:$68 sps:$4 sm:$0xff]   ;;  %v10043_v7 = vld [vmem:[%s14250_s0 + $0x33c] ss:$68 sps:$4 sm:$0xff]  }
  0xbd   :  { %4629 = vmatprep.subr.bf16.mxu1 %v9950_v9  ;;  %4330 = vmatprep.mubr.bf16.mxu0 %v9951_v10  ;;  %v10035_v8 = vld [vmem:[#allocation2 + $0x580] ss:$16 sps:$4 sm:$0xff]   ;;  %v10049_v10 = vld [vmem:[#allocation2 + $0x564] ss:$16 sps:$4 sm:$0xff]  }
  0xbe   :  { %4443 = vmatprep.mubr.bf16.mxu1 %v9953_v11  ;;  %v10038_v9 = vld [vmem:[#allocation2 + $0x780] ss:$16 sps:$4 sm:$0xff]   ;;  %v10052_v11 = vld [vmem:[#allocation2 + $0x764] ss:$16 sps:$4 sm:$0xff]  }
  0xbf   :  { %4517 = vmatpush1.bf16.msra.mxu0 %v9945_v12  ;;  %v10045_v12 = vld [vmem:[%s14250_s0 + $0x330] ss:$68 sps:$4 sm:$0xff]  }
  0xc0   :  { %4630 = vmatpush1.bf16.msra.mxu1 %v9948_v13  ;;  %4518 = vmatprep.subr.bf16.mxu0 %v9959_v14  ;;  %v10046_v13 = vld [vmem:[%s14250_s0 + $0x338] ss:$68 sps:$4 sm:$0xff]   ;;  %v10047_v14 = vld [vmem:[#allocation2 + $0x560] ss:$16 sps:$4 sm:$0xff]  }
  0xc1   :  { %4631 = vmatprep.subr.bf16.mxu1 %v9962_v15  ;;  %v10050_v15 = vld [vmem:[#allocation2 + $0x760] ss:$16 sps:$4 sm:$0xff]  }
  0xc2   :  { %4331 = vmatmul.mubr.bf16.gmra.mxu0 %v9955_v16  ;;  %v10055_v16 = vld [vmem:[#allocation2 + $0x544] ss:$16 sps:$4 sm:$0xff]  }
  0xc3   :  { %4444 = vmatmul.mubr.bf16.gmra.mxu1 %v9956_v17  ;;  %4519 = vmatpush1.bf16.msra.mxu0 %v9957_v18  ;;  %v10058_v17 = vld [vmem:[#allocation2 + $0x744] ss:$16 sps:$4 sm:$0xff]   ;;  %v10059_v18 = vld [vmem:[%s14250_s0 + $0x3bc] ss:$68 sps:$4 sm:$0xff]  }
  0xc4   :  { %4632 = vmatpush1.bf16.msra.mxu1 %v9960_v19  ;;  %4520 = vmatprep.subr.bf16.mxu0 %v9965_v20  ;;  %v10061_v19 = vld [vmem:[%s14250_s0 + $0x3c4] ss:$68 sps:$4 sm:$0xff]   ;;  %v10053_v20 = vld [vmem:[#allocation2 + $0x540] ss:$16 sps:$4 sm:$0xff]  }
  0xc5   :  { %4633 = vmatprep.subr.bf16.mxu1 %v9968_v21  ;;  %4340 = vmatprep.mubr.bf16.mxu0 %v9969_v22  ;;  %v10056_v21 = vld [vmem:[#allocation2 + $0x740] ss:$16 sps:$4 sm:$0xff]   ;;  %v10067_v22 = vld [vmem:[#allocation2 + $0x524] ss:$16 sps:$4 sm:$0xff]  }
  0xc6   :  { %4453 = vmatprep.mubr.bf16.mxu1 %v9971_v23  ;;  %v10070_v23 = vld [vmem:[#allocation2 + $0x724] ss:$16 sps:$4 sm:$0xff]  }
  0xc7   :  { %4521 = vmatpush1.bf16.msra.mxu0 %v9963_v24  ;;  %v10063_v24 = vld [vmem:[%s14250_s0 + $0x3b8] ss:$68 sps:$4 sm:$0xff]  }
  0xc8   :  { %4634 = vmatpush1.bf16.msra.mxu1 %v9966_v25  ;;  %4522 = vmatprep.subr.bf16.mxu0 %v9977_v26  ;;  %v10064_v25 = vld [vmem:[%s14250_s0 + $0x3c0] ss:$68 sps:$4 sm:$0xff]  }
  0xc9   :  { %4635 = vmatprep.subr.bf16.mxu1 %v9980_v27  ;;  %v10065_v26 = vld [vmem:[#allocation2 + $0x520] ss:$16 sps:$4 sm:$0xff]  }
  0xca   :  { %4341 = vmatmul.mubr.bf16.gmra.mxu0 %v9973_v28  ;;  %v10068_v27 = vld [vmem:[#allocation2 + $0x720] ss:$16 sps:$4 sm:$0xff]   ;;  %v10073_v28 = vld [vmem:[#allocation2 + $0x504] ss:$16 sps:$4 sm:$0xff]  }
  0xcb   :  { %4454 = vmatmul.mubr.bf16.gmra.mxu1 %v9974_v29  ;;  %4523 = vmatpush1.bf16.msra.mxu0 %v9975_v30  ;;  %v10076_v29 = vld [vmem:[#allocation2 + $0x704] ss:$16 sps:$4 sm:$0xff]  }
  0xcc   :  { %4636 = vmatpush1.bf16.msra.mxu1 %v9978_v31  ;;  %4524 = vmatprep.subr.bf16.mxu0 %v9983_v32  ;;  %v10079_v30 = vld [vmem:[%s14250_s0 + $0x14] ss:$68 sps:$4 sm:$0xff]   ;;  %v10082_v31 = vld [vmem:[%s14250_s0 + $0x1c] ss:$68 sps:$4 sm:$0xff]  }
  0xcd   :  { %4637 = vmatprep.subr.bf16.mxu1 %v9986_v33  ;;  %4350 = vmatprep.mubr.bf16.mxu0 %v9987_v34  ;;  %v10071_v32 = vld [vmem:[#allocation2 + $0x500] ss:$16 sps:$4 sm:$0xff]   ;;  %v10085_v34 = vld [vmem:[#allocation2 + $0x8e4] ss:$16 sps:$4 sm:$0xff]  }
  0xce   :  { %4463 = vmatprep.mubr.bf16.mxu1 %v9989_v35  ;;  %v10074_v33 = vld [vmem:[#allocation2 + $0x700] ss:$16 sps:$4 sm:$0xff]   ;;  %v10088_v35 = vld [vmem:[#allocation2 + $0xae4] ss:$16 sps:$4 sm:$0xff]  }
  0xcf   :  { %4525 = vmatpush1.bf16.msra.mxu0 %v9981_v36  ;;  %v10077_v36 = vld [vmem:[%s14250_s0 + $0x10] ss:$68 sps:$4 sm:$0xff]  }
  0xd0   :  { %4638 = vmatpush1.bf16.msra.mxu1 %v9984_v37  ;;  %4526 = vmatprep.subr.bf16.mxu0 %v9995_v38  ;;  %v10080_v37 = vld [vmem:[%s14250_s0 + $0x18] ss:$68 sps:$4 sm:$0xff]   ;;  %v10083_v38 = vld [vmem:[#allocation2 + $0x8e0] ss:$16 sps:$4 sm:$0xff]  }
  0xd1   :  { %4639 = vmatprep.subr.bf16.mxu1 %v9998_v39  ;;  %v10086_v39 = vld [vmem:[#allocation2 + $0xae0] ss:$16 sps:$4 sm:$0xff]  }
  0xd2   :  { %4351 = vmatmul.mubr.bf16.gmra.mxu0 %v9991_v40  ;;  %v10091_v40 = vld [vmem:[#allocation2 + $0x8c4] ss:$16 sps:$4 sm:$0xff]  }
  0xd3   :  { %4464 = vmatmul.mubr.bf16.gmra.mxu1 %v9992_v41  ;;  %4527 = vmatpush1.bf16.msra.mxu0 %v9993_v42  ;;  %v10094_v41 = vld [vmem:[#allocation2 + $0xac4] ss:$16 sps:$4 sm:$0xff]   ;;  %v10095_v42 = vld [vmem:[%s14250_s0 + $0x9c] ss:$68 sps:$4 sm:$0xff]  }
  0xd4   :  { %4640 = vmatpush1.bf16.msra.mxu1 %v9996_v43  ;;  %4528 = vmatprep.subr.bf16.mxu0 %v10001_v44  ;;  %v10097_v43 = vld [vmem:[%s14250_s0 + $0xa4] ss:$68 sps:$4 sm:$0xff]   ;;  %v10089_v44 = vld [vmem:[#allocation2 + $0x8c0] ss:$16 sps:$4 sm:$0xff]  }
  0xd5   :  { %4641 = vmatprep.subr.bf16.mxu1 %v10004_v45  ;;  %4360 = vmatprep.mubr.bf16.mxu0 %v10005_v46  ;;  %v10092_v45 = vld [vmem:[#allocation2 + $0xac0] ss:$16 sps:$4 sm:$0xff]   ;;  %v10103_v46 = vld [vmem:[#allocation2 + $0x8a4] ss:$16 sps:$4 sm:$0xff]  }
  0xd6   :  { %4473 = vmatprep.mubr.bf16.mxu1 %v10007_v47  ;;  %v10106_v47 = vld [vmem:[#allocation2 + $0xaa4] ss:$16 sps:$4 sm:$0xff]  }
  0xd7   :  { %4529 = vmatpush1.bf16.msra.mxu0 %v9999_v48  ;;  %v10099_v48 = vld [vmem:[%s14250_s0 + $0x98] ss:$68 sps:$4 sm:$0xff]  }
  0xd8   :  { %4642 = vmatpush1.bf16.msra.mxu1 %v10002_v49  ;;  %4530 = vmatprep.subr.bf16.mxu0 %v10013_v50  ;;  %v10100_v49 = vld [vmem:[%s14250_s0 + $0xa0] ss:$68 sps:$4 sm:$0xff]  }
  0xd9   :  { %4643 = vmatprep.subr.bf16.mxu1 %v10016_v51  ;;  %v10101_v50 = vld [vmem:[#allocation2 + $0x8a0] ss:$16 sps:$4 sm:$0xff]  }
  0xda   :  { %4361 = vmatmul.mubr.bf16.gmra.mxu0 %v10009_v52  ;;  %v10104_v51 = vld [vmem:[#allocation2 + $0xaa0] ss:$16 sps:$4 sm:$0xff]   ;;  %v10109_v52 = vld [vmem:[#allocation2 + $0x884] ss:$16 sps:$4 sm:$0xff]  }
  0xdb   :  { %4474 = vmatmul.mubr.bf16.gmra.mxu1 %v10010_v53  ;;  %4531 = vmatpush2.bf16.msra.mxu0 %v10011_v54  ;;  %v10112_v53 = vld [vmem:[#allocation2 + $0xa84] ss:$16 sps:$4 sm:$0xff]  }
  0xdc   :  { %4644 = vmatpush2.bf16.msra.mxu1 %v10014_v55  ;;  %4532 = vmatprep.subr.bf16.mxu0 %v10019_v56  ;;  %v10113_v54 = vld [vmem:[%s14250_s0 + $0x124] ss:$68 sps:$4 sm:$0xff]   ;;  %v10115_v55 = vld [vmem:[%s14250_s0 + $0x12c] ss:$68 sps:$4 sm:$0xff]  }
  0xdd   :  { %4645 = vmatprep.subr.bf16.mxu1 %v10022_v57  ;;  %4370 = vmatprep.mubr.bf16.mxu0 %v10023_v58  ;;  %v10107_v56 = vld [vmem:[#allocation2 + $0x880] ss:$16 sps:$4 sm:$0xff]   ;;  %v10121_v58 = vld [vmem:[#allocation2 + $0x864] ss:$16 sps:$4 sm:$0xff]  }
  0xde   :  { %4483 = vmatprep.mubr.bf16.mxu1 %v10025_v59  ;;  %v10110_v57 = vld [vmem:[#allocation2 + $0xa80] ss:$16 sps:$4 sm:$0xff]   ;;  %v10124_v59 = vld [vmem:[#allocation2 + $0xa64] ss:$16 sps:$4 sm:$0xff]  }
  0xdf   :  { %4533 = vmatpush2.bf16.msra.mxu0 %v10017_v60  ;;  %v10117_v60 = vld [vmem:[%s14250_s0 + $0x120] ss:$68 sps:$4 sm:$0xff]  }
  0xe0   :  { %4646 = vmatpush2.bf16.msra.mxu1 %v10020_v61  ;;  %4534 = vmatprep.subr.bf16.mxu0 %v10031_v62  ;;  %v10118_v61 = vld [vmem:[%s14250_s0 + $0x128] ss:$68 sps:$4 sm:$0xff]   ;;  %v10119_v62 = vld [vmem:[#allocation2 + $0x860] ss:$16 sps:$4 sm:$0xff]  }
  0xe1   :  { %4647 = vmatprep.subr.bf16.mxu1 %v10034_v63  ;;  %v10122_v63 = vld [vmem:[#allocation2 + $0xa60] ss:$16 sps:$4 sm:$0xff]  }
  0xe2   :  { %4371 = vmatmul.mubr.bf16.gmra.mxu0 %v10027_v0  ;;  %v10127_v0 = vld [vmem:[#allocation2 + $0x844] ss:$16 sps:$4 sm:$0xff]  }
  0xe3   :  { %4484 = vmatmul.mubr.bf16.gmra.mxu1 %v10028_v1  ;;  %4535 = vmatpush2.bf16.msra.mxu0 %v10029_v2  ;;  %v10130_v1 = vld [vmem:[#allocation2 + $0xa44] ss:$16 sps:$4 sm:$0xff]   ;;  %v10131_v2 = vld [vmem:[%s14250_s0 + $0x1ac] ss:$68 sps:$4 sm:$0xff]  }
  0xe4   :  { %4648 = vmatpush2.bf16.msra.mxu1 %v10032_v3  ;;  %4536 = vmatprep.subr.bf16.mxu0 %v10037_v4  ;;  %v10133_v3 = vld [vmem:[%s14250_s0 + $0x1b4] ss:$68 sps:$4 sm:$0xff]   ;;  %v10125_v4 = vld [vmem:[#allocation2 + $0x840] ss:$16 sps:$4 sm:$0xff]  }
  0xe5   :  { %4649 = vmatprep.subr.bf16.mxu1 %v10040_v5  ;;  %4380 = vmatprep.mubr.bf16.mxu0 %v10041_v6  ;;  %v10128_v5 = vld [vmem:[#allocation2 + $0xa40] ss:$16 sps:$4 sm:$0xff]   ;;  %v10139_v6 = vld [vmem:[#allocation2 + $0x824] ss:$16 sps:$4 sm:$0xff]  }
  0xe6   :  { %4493 = vmatprep.mubr.bf16.mxu1 %v10043_v7  ;;  %v10142_v7 = vld [vmem:[#allocation2 + $0xa24] ss:$16 sps:$4 sm:$0xff]  }
  0xe7   :  { %4537 = vmatpush2.bf16.msra.mxu0 %v10035_v8  ;;  %v10135_v8 = vld [vmem:[%s14250_s0 + $0x1a8] ss:$68 sps:$4 sm:$0xff]  }
  0xe8   :  { %4650 = vmatpush2.bf16.msra.mxu1 %v10038_v9  ;;  %4538 = vmatprep.subr.bf16.mxu0 %v10049_v10  ;;  %v10136_v9 = vld [vmem:[%s14250_s0 + $0x1b0] ss:$68 sps:$4 sm:$0xff]  }
  0xe9   :  { %4651 = vmatprep.subr.bf16.mxu1 %v10052_v11  ;;  %v10137_v10 = vld [vmem:[#allocation2 + $0x820] ss:$16 sps:$4 sm:$0xff]  }
  0xea   :  { %4381 = vmatmul.mubr.bf16.gmra.mxu0 %v10045_v12  ;;  %v10140_v11 = vld [vmem:[#allocation2 + $0xa20] ss:$16 sps:$4 sm:$0xff]   ;;  %v10145_v12 = vld [vmem:[#allocation2 + $0x804] ss:$16 sps:$4 sm:$0xff]  }
  0xeb   :  { %4494 = vmatmul.mubr.bf16.gmra.mxu1 %v10046_v13  ;;  %4539 = vmatpush2.bf16.msra.mxu0 %v10047_v14  ;;  %v10148_v13 = vld [vmem:[#allocation2 + $0xa04] ss:$16 sps:$4 sm:$0xff]  }
  0xec   :  { %4652 = vmatpush2.bf16.msra.mxu1 %v10050_v15  ;;  %4540 = vmatprep.subr.bf16.mxu0 %v10055_v16  ;;  %v10149_v14 = vld [vmem:[%s14250_s0 + $0x234] ss:$68 sps:$4 sm:$0xff]   ;;  %v10151_v15 = vld [vmem:[%s14250_s0 + $0x23c] ss:$68 sps:$4 sm:$0xff]  }
  0xed   :  { %4653 = vmatprep.subr.bf16.mxu1 %v10058_v17  ;;  %4390 = vmatprep.mubr.bf16.mxu0 %v10059_v18  ;;  %v10143_v16 = vld [vmem:[#allocation2 + $0x800] ss:$16 sps:$4 sm:$0xff]   ;;  %v10157_v18 = vld [vmem:[#allocation2 + $0x9e4] ss:$16 sps:$4 sm:$0xff]  }
  0xee   :  { %4503 = vmatprep.mubr.bf16.mxu1 %v10061_v19  ;;  %v10146_v17 = vld [vmem:[#allocation2 + $0xa00] ss:$16 sps:$4 sm:$0xff]   ;;  %v10160_v19 = vld [vmem:[#allocation2 + $0xbe4] ss:$16 sps:$4 sm:$0xff]  }
  0xef   :  { %4541 = vmatpush2.bf16.msra.mxu0 %v10053_v20  ;;  %v10153_v20 = vld [vmem:[%s14250_s0 + $0x230] ss:$68 sps:$4 sm:$0xff]  }
  0xf0   :  { %4654 = vmatpush2.bf16.msra.mxu1 %v10056_v21  ;;  %4542 = vmatprep.subr.bf16.mxu0 %v10067_v22  ;;  %v10154_v21 = vld [vmem:[%s14250_s0 + $0x238] ss:$68 sps:$4 sm:$0xff]   ;;  %v10155_v22 = vld [vmem:[#allocation2 + $0x9e0] ss:$16 sps:$4 sm:$0xff]  }
  0xf1   :  { %4655 = vmatprep.subr.bf16.mxu1 %v10070_v23  ;;  %v10158_v23 = vld [vmem:[#allocation2 + $0xbe0] ss:$16 sps:$4 sm:$0xff]  }
  0xf2   :  { %4391 = vmatmul.mubr.bf16.gmra.mxu0 %v10063_v24  ;;  %v10163_v24 = vld [vmem:[#allocation2 + $0x9c4] ss:$16 sps:$4 sm:$0xff]  }
  0xf3   :  { %4504 = vmatmul.mubr.bf16.gmra.mxu1 %v10064_v25  ;;  %4543 = vmatpush2.bf16.msra.mxu0 %v10065_v26  ;;  %v10166_v25 = vld [vmem:[#allocation2 + $0xbc4] ss:$16 sps:$4 sm:$0xff]   ;;  %v10167_v26 = vld [vmem:[%s14250_s0 + $0x2bc] ss:$68 sps:$4 sm:$0xff]  }
  0xf4   :  { %4656 = vmatpush2.bf16.msra.mxu1 %v10068_v27  ;;  %4544 = vmatprep.subr.bf16.mxu0 %v10073_v28  ;;  %v10169_v27 = vld [vmem:[%s14250_s0 + $0x2c4] ss:$68 sps:$4 sm:$0xff]   ;;  %v10161_v28 = vld [vmem:[#allocation2 + $0x9c0] ss:$16 sps:$4 sm:$0xff]  }
  0xf5   :  { %4657 = vmatprep.subr.bf16.mxu1 %v10076_v29  ;;  %4546 = vmatprep.mubr.bf16.mxu0 %v10079_v30  ;;  %v10164_v29 = vld [vmem:[#allocation2 + $0xbc0] ss:$16 sps:$4 sm:$0xff]   ;;  %v10175_v30 = vld [vmem:[#allocation2 + $0x9a4] ss:$16 sps:$4 sm:$0xff]  }
  0xf6   :  { %4659 = vmatprep.mubr.bf16.mxu1 %v10082_v31  ;;  %v10178_v31 = vld [vmem:[#allocation2 + $0xba4] ss:$16 sps:$4 sm:$0xff]  }
  0xf7   :  { %4545 = vmatpush2.bf16.msra.mxu0 %v10071_v32  ;;  %v10171_v32 = vld [vmem:[%s14250_s0 + $0x2b8] ss:$68 sps:$4 sm:$0xff]  }
  0xf8   :  { %4658 = vmatpush2.bf16.msra.mxu1 %v10074_v33  ;;  %4740 = vmatprep.subr.bf16.mxu0 %v10085_v34  ;;  %v10172_v33 = vld [vmem:[%s14250_s0 + $0x2c0] ss:$68 sps:$4 sm:$0xff]  }
  0xf9   :  { %4853 = vmatprep.subr.bf16.mxu1 %v10088_v35  ;;  %v10173_v34 = vld [vmem:[#allocation2 + $0x9a0] ss:$16 sps:$4 sm:$0xff]  }
  0xfa   :  { %4547 = vmatmul.mubr.bf16.vlgmr.msra.gmra.mxu0 %v10077_v36  ;;  %v10176_v35 = vld [vmem:[#allocation2 + $0xba0] ss:$16 sps:$4 sm:$0xff]   ;;  %v10181_v36 = vld [vmem:[#allocation2 + $0x984] ss:$16 sps:$4 sm:$0xff]  }
  0xfb   :  { %4660 = vmatmul.mubr.bf16.vlgmr.msra.gmra.mxu1 %v10080_v37  ;;  %4741 = vmatpush1.bf16.msra.mxu0 %v10083_v38  ;;  %v10184_v37 = vld [vmem:[#allocation2 + $0xb84] ss:$16 sps:$4 sm:$0xff]  }
  0xfc   :  { %4854 = vmatpush1.bf16.msra.mxu1 %v10086_v39  ;;  %4742 = vmatprep.subr.bf16.mxu0 %v10091_v40  ;;  %v10185_v38 = vld [vmem:[%s14250_s0 + $0x344] ss:$68 sps:$4 sm:$0xff]   ;;  %v10187_v39 = vld [vmem:[%s14250_s0 + $0x34c] ss:$68 sps:$4 sm:$0xff]  }
  0xfd   :  { %4855 = vmatprep.subr.bf16.mxu1 %v10094_v41  ;;  %4556 = vmatprep.mubr.bf16.mxu0 %v10095_v42  ;;  %v10179_v40 = vld [vmem:[#allocation2 + $0x980] ss:$16 sps:$4 sm:$0xff]   ;;  %v10193_v42 = vld [vmem:[#allocation2 + $0x964] ss:$16 sps:$4 sm:$0xff]  }
  0xfe   :  { %4669 = vmatprep.mubr.bf16.mxu1 %v10097_v43  ;;  %v10182_v41 = vld [vmem:[#allocation2 + $0xb80] ss:$16 sps:$4 sm:$0xff]   ;;  %v10196_v43 = vld [vmem:[#allocation2 + $0xb64] ss:$16 sps:$4 sm:$0xff]  }
  0xff   :  { %4743 = vmatpush1.bf16.msra.mxu0 %v10089_v44  ;;  %v10189_v44 = vld [vmem:[%s14250_s0 + $0x340] ss:$68 sps:$4 sm:$0xff]  }
 0x100   :  { %4856 = vmatpush1.bf16.msra.mxu1 %v10092_v45  ;;  %4744 = vmatprep.subr.bf16.mxu0 %v10103_v46  ;;  %v10190_v45 = vld [vmem:[%s14250_s0 + $0x348] ss:$68 sps:$4 sm:$0xff]   ;;  %v10191_v46 = vld [vmem:[#allocation2 + $0x960] ss:$16 sps:$4 sm:$0xff]  }
 0x101   :  { %4857 = vmatprep.subr.bf16.mxu1 %v10106_v47  ;;  %v10194_v47 = vld [vmem:[#allocation2 + $0xb60] ss:$16 sps:$4 sm:$0xff]  }
 0x102   :  { %4557 = vmatmul.mubr.bf16.gmra.mxu0 %v10099_v48  ;;  %v10199_v48 = vld [vmem:[#allocation2 + $0x944] ss:$16 sps:$4 sm:$0xff]  }
 0x103   :  { %4670 = vmatmul.mubr.bf16.gmra.mxu1 %v10100_v49  ;;  %4745 = vmatpush1.bf16.msra.mxu0 %v10101_v50  ;;  %v10202_v49 = vld [vmem:[#allocation2 + $0xb44] ss:$16 sps:$4 sm:$0xff]   ;;  %v10203_v50 = vld [vmem:[%s14250_s0 + $0x3cc] ss:$68 sps:$4 sm:$0xff]  }
 0x104   :  { %4858 = vmatpush1.bf16.msra.mxu1 %v10104_v51  ;;  %4746 = vmatprep.subr.bf16.mxu0 %v10109_v52  ;;  %v10205_v51 = vld [vmem:[%s14250_s0 + $0x3d4] ss:$68 sps:$4 sm:$0xff]   ;;  %v10197_v52 = vld [vmem:[#allocation2 + $0x940] ss:$16 sps:$4 sm:$0xff]  }
 0x105   :  { %4859 = vmatprep.subr.bf16.mxu1 %v10112_v53  ;;  %4566 = vmatprep.mubr.bf16.mxu0 %v10113_v54  ;;  %v10200_v53 = vld [vmem:[#allocation2 + $0xb40] ss:$16 sps:$4 sm:$0xff]   ;;  %v10211_v54 = vld [vmem:[#allocation2 + $0x924] ss:$16 sps:$4 sm:$0xff]  }
 0x106   :  { %4679 = vmatprep.mubr.bf16.mxu1 %v10115_v55  ;;  %v10214_v55 = vld [vmem:[#allocation2 + $0xb24] ss:$16 sps:$4 sm:$0xff]  }
 0x107   :  { %4747 = vmatpush1.bf16.msra.mxu0 %v10107_v56  ;;  %v10207_v56 = vld [vmem:[%s14250_s0 + $0x3c8] ss:$68 sps:$4 sm:$0xff]  }
 0x108   :  { %4860 = vmatpush1.bf16.msra.mxu1 %v10110_v57  ;;  %4748 = vmatprep.subr.bf16.mxu0 %v10121_v58  ;;  %v10208_v57 = vld [vmem:[%s14250_s0 + $0x3d0] ss:$68 sps:$4 sm:$0xff]  }
 0x109   :  { %4861 = vmatprep.subr.bf16.mxu1 %v10124_v59  ;;  %v10209_v58 = vld [vmem:[#allocation2 + $0x920] ss:$16 sps:$4 sm:$0xff]  }
 0x10a   :  { %4567 = vmatmul.mubr.bf16.gmra.mxu0 %v10117_v60  ;;  %v10212_v59 = vld [vmem:[#allocation2 + $0xb20] ss:$16 sps:$4 sm:$0xff]   ;;  %v10217_v60 = vld [vmem:[#allocation2 + $0x904] ss:$16 sps:$4 sm:$0xff]  }
 0x10b   :  { %4680 = vmatmul.mubr.bf16.gmra.mxu1 %v10118_v61  ;;  %4749 = vmatpush1.bf16.msra.mxu0 %v10119_v62  ;;  %v10220_v61 = vld [vmem:[#allocation2 + $0xb04] ss:$16 sps:$4 sm:$0xff]  }
 0x10c   :  { %4862 = vmatpush1.bf16.msra.mxu1 %v10122_v63  ;;  %4750 = vmatprep.subr.bf16.mxu0 %v10127_v0  ;;  %v10223_v62 = vld [vmem:[%s14250_s0 + $0x24] ss:$68 sps:$4 sm:$0xff]   ;;  %v10226_v63 = vld [vmem:[%s14250_s0 + $0x2c] ss:$68 sps:$4 sm:$0xff]  }
 0x10d   :  { %4863 = vmatprep.subr.bf16.mxu1 %v10130_v1  ;;  %4576 = vmatprep.mubr.bf16.mxu0 %v10131_v2  ;;  %v10215_v0 = vld [vmem:[#allocation2 + $0x900] ss:$16 sps:$4 sm:$0xff]   ;;  %v10229_v2 = vld [vmem:[#allocation2 + $0xce4] ss:$16 sps:$4 sm:$0xff]  }
 0x10e   :  { %4689 = vmatprep.mubr.bf16.mxu1 %v10133_v3  ;;  %v10218_v1 = vld [vmem:[#allocation2 + $0xb00] ss:$16 sps:$4 sm:$0xff]   ;;  %v10232_v3 = vld [vmem:[#allocation2 + $0xee4] ss:$16 sps:$4 sm:$0xff]  }
 0x10f   :  { %4751 = vmatpush1.bf16.msra.mxu0 %v10125_v4  ;;  %v10221_v4 = vld [vmem:[%s14250_s0 + $0x20] ss:$68 sps:$4 sm:$0xff]  }
 0x110   :  { %4864 = vmatpush1.bf16.msra.mxu1 %v10128_v5  ;;  %4752 = vmatprep.subr.bf16.mxu0 %v10139_v6  ;;  %v10224_v5 = vld [vmem:[%s14250_s0 + $0x28] ss:$68 sps:$4 sm:$0xff]   ;;  %v10227_v6 = vld [vmem:[#allocation2 + $0xce0] ss:$16 sps:$4 sm:$0xff]  }
 0x111   :  { %4865 = vmatprep.subr.bf16.mxu1 %v10142_v7  ;;  %v10230_v7 = vld [vmem:[#allocation2 + $0xee0] ss:$16 sps:$4 sm:$0xff]  }
 0x112   :  { %4577 = vmatmul.mubr.bf16.gmra.mxu0 %v10135_v8  ;;  %v10235_v8 = vld [vmem:[#allocation2 + $0xcc4] ss:$16 sps:$4 sm:$0xff]  }
 0x113   :  { %4690 = vmatmul.mubr.bf16.gmra.mxu1 %v10136_v9  ;;  %4753 = vmatpush1.bf16.msra.mxu0 %v10137_v10  ;;  %v10238_v9 = vld [vmem:[#allocation2 + $0xec4] ss:$16 sps:$4 sm:$0xff]   ;;  %v10239_v10 = vld [vmem:[%s14250_s0 + $0xac] ss:$68 sps:$4 sm:$0xff]  }
 0x114   :  { %4866 = vmatpush1.bf16.msra.mxu1 %v10140_v11  ;;  %4754 = vmatprep.subr.bf16.mxu0 %v10145_v12  ;;  %v10241_v11 = vld [vmem:[%s14250_s0 + $0xb4] ss:$68 sps:$4 sm:$0xff]   ;;  %v10233_v12 = vld [vmem:[#allocation2 + $0xcc0] ss:$16 sps:$4 sm:$0xff]  }
 0x115   :  { %4867 = vmatprep.subr.bf16.mxu1 %v10148_v13  ;;  %4586 = vmatprep.mubr.bf16.mxu0 %v10149_v14  ;;  %v10236_v13 = vld [vmem:[#allocation2 + $0xec0] ss:$16 sps:$4 sm:$0xff]   ;;  %v10247_v14 = vld [vmem:[#allocation2 + $0xca4] ss:$16 sps:$4 sm:$0xff]  }
 0x116   :  { %4699 = vmatprep.mubr.bf16.mxu1 %v10151_v15  ;;  %v10250_v15 = vld [vmem:[#allocation2 + $0xea4] ss:$16 sps:$4 sm:$0xff]  }
 0x117   :  { %4755 = vmatpush1.bf16.msra.mxu0 %v10143_v16  ;;  %v10243_v16 = vld [vmem:[%s14250_s0 + $0xa8] ss:$68 sps:$4 sm:$0xff]  }
 0x118   :  { %4868 = vmatpush1.bf16.msra.mxu1 %v10146_v17  ;;  %4756 = vmatprep.subr.bf16.mxu0 %v10157_v18  ;;  %v10244_v17 = vld [vmem:[%s14250_s0 + $0xb0] ss:$68 sps:$4 sm:$0xff]  }
 0x119   :  { %4869 = vmatprep.subr.bf16.mxu1 %v10160_v19  ;;  %v10245_v18 = vld [vmem:[#allocation2 + $0xca0] ss:$16 sps:$4 sm:$0xff]  }
 0x11a   :  { %4587 = vmatmul.mubr.bf16.gmra.mxu0 %v10153_v20  ;;  %v10248_v19 = vld [vmem:[#allocation2 + $0xea0] ss:$16 sps:$4 sm:$0xff]   ;;  %v10253_v20 = vld [vmem:[#allocation2 + $0xc84] ss:$16 sps:$4 sm:$0xff]  }
 0x11b   :  { %4700 = vmatmul.mubr.bf16.gmra.mxu1 %v10154_v21  ;;  %4757 = vmatpush2.bf16.msra.mxu0 %v10155_v22  ;;  %v10256_v21 = vld [vmem:[#allocation2 + $0xe84] ss:$16 sps:$4 sm:$0xff]  }
 0x11c   :  { %4870 = vmatpush2.bf16.msra.mxu1 %v10158_v23  ;;  %4758 = vmatprep.subr.bf16.mxu0 %v10163_v24  ;;  %v10257_v22 = vld [vmem:[%s14250_s0 + $0x134] ss:$68 sps:$4 sm:$0xff]   ;;  %v10259_v23 = vld [vmem:[%s14250_s0 + $0x13c] ss:$68 sps:$4 sm:$0xff]  }
 0x11d   :  { %4871 = vmatprep.subr.bf16.mxu1 %v10166_v25  ;;  %4596 = vmatprep.mubr.bf16.mxu0 %v10167_v26  ;;  %v10251_v24 = vld [vmem:[#allocation2 + $0xc80] ss:$16 sps:$4 sm:$0xff]   ;;  %v10265_v26 = vld [vmem:[#allocation2 + $0xc64] ss:$16 sps:$4 sm:$0xff]  }
 0x11e   :  { %4709 = vmatprep.mubr.bf16.mxu1 %v10169_v27  ;;  %v10254_v25 = vld [vmem:[#allocation2 + $0xe80] ss:$16 sps:$4 sm:$0xff]   ;;  %v10268_v27 = vld [vmem:[#allocation2 + $0xe64] ss:$16 sps:$4 sm:$0xff]  }
 0x11f   :  { %4759 = vmatpush2.bf16.msra.mxu0 %v10161_v28  ;;  %v10261_v28 = vld [vmem:[%s14250_s0 + $0x130] ss:$68 sps:$4 sm:$0xff]  }
 0x120   :  { %4872 = vmatpush2.bf16.msra.mxu1 %v10164_v29  ;;  %4760 = vmatprep.subr.bf16.mxu0 %v10175_v30  ;;  %v10262_v29 = vld [vmem:[%s14250_s0 + $0x138] ss:$68 sps:$4 sm:$0xff]   ;;  %v10263_v30 = vld [vmem:[#allocation2 + $0xc60] ss:$16 sps:$4 sm:$0xff]  }
 0x121   :  { %4873 = vmatprep.subr.bf16.mxu1 %v10178_v31  ;;  %v10266_v31 = vld [vmem:[#allocation2 + $0xe60] ss:$16 sps:$4 sm:$0xff]  }
 0x122   :  { %4597 = vmatmul.mubr.bf16.gmra.mxu0 %v10171_v32  ;;  %v10271_v32 = vld [vmem:[#allocation2 + $0xc44] ss:$16 sps:$4 sm:$0xff]  }
 0x123   :  { %4710 = vmatmul.mubr.bf16.gmra.mxu1 %v10172_v33  ;;  %4761 = vmatpush2.bf16.msra.mxu0 %v10173_v34  ;;  %v10274_v33 = vld [vmem:[#allocation2 + $0xe44] ss:$16 sps:$4 sm:$0xff]   ;;  %v10275_v34 = vld [vmem:[%s14250_s0 + $0x1bc] ss:$68 sps:$4 sm:$0xff]  }
 0x124   :  { %4874 = vmatpush2.bf16.msra.mxu1 %v10176_v35  ;;  %4762 = vmatprep.subr.bf16.mxu0 %v10181_v36  ;;  %v10277_v35 = vld [vmem:[%s14250_s0 + $0x1c4] ss:$68 sps:$4 sm:$0xff]   ;;  %v10269_v36 = vld [vmem:[#allocation2 + $0xc40] ss:$16 sps:$4 sm:$0xff]  }
 0x125   :  { %4875 = vmatprep.subr.bf16.mxu1 %v10184_v37  ;;  %4606 = vmatprep.mubr.bf16.mxu0 %v10185_v38  ;;  %v10272_v37 = vld [vmem:[#allocation2 + $0xe40] ss:$16 sps:$4 sm:$0xff]   ;;  %v10283_v38 = vld [vmem:[#allocation2 + $0xc24] ss:$16 sps:$4 sm:$0xff]  }
 0x126   :  { %4719 = vmatprep.mubr.bf16.mxu1 %v10187_v39  ;;  %v10286_v39 = vld [vmem:[#allocation2 + $0xe24] ss:$16 sps:$4 sm:$0xff]  }
 0x127   :  { %4763 = vmatpush2.bf16.msra.mxu0 %v10179_v40  ;;  %v10279_v40 = vld [vmem:[%s14250_s0 + $0x1b8] ss:$68 sps:$4 sm:$0xff]  }
 0x128   :  { %4876 = vmatpush2.bf16.msra.mxu1 %v10182_v41  ;;  %4764 = vmatprep.subr.bf16.mxu0 %v10193_v42  ;;  %v10280_v41 = vld [vmem:[%s14250_s0 + $0x1c0] ss:$68 sps:$4 sm:$0xff]  }
 0x129   :  { %4877 = vmatprep.subr.bf16.mxu1 %v10196_v43  ;;  %v10281_v42 = vld [vmem:[#allocation2 + $0xc20] ss:$16 sps:$4 sm:$0xff]  }
 0x12a   :  { %4607 = vmatmul.mubr.bf16.gmra.mxu0 %v10189_v44  ;;  %v10284_v43 = vld [vmem:[#allocation2 + $0xe20] ss:$16 sps:$4 sm:$0xff]   ;;  %v10289_v44 = vld [vmem:[#allocation2 + $0xc04] ss:$16 sps:$4 sm:$0xff]  }
 0x12b   :  { %4720 = vmatmul.mubr.bf16.gmra.mxu1 %v10190_v45  ;;  %4765 = vmatpush2.bf16.msra.mxu0 %v10191_v46  ;;  %v10292_v45 = vld [vmem:[#allocation2 + $0xe04] ss:$16 sps:$4 sm:$0xff]  }
 0x12c   :  { %4878 = vmatpush2.bf16.msra.mxu1 %v10194_v47  ;;  %4766 = vmatprep.subr.bf16.mxu0 %v10199_v48  ;;  %v10293_v46 = vld [vmem:[%s14250_s0 + $0x244] ss:$68 sps:$4 sm:$0xff]   ;;  %v10295_v47 = vld [vmem:[%s14250_s0 + $0x24c] ss:$68 sps:$4 sm:$0xff]  }
 0x12d   :  { %4879 = vmatprep.subr.bf16.mxu1 %v10202_v49  ;;  %4616 = vmatprep.mubr.bf16.mxu0 %v10203_v50  ;;  %v10287_v48 = vld [vmem:[#allocation2 + $0xc00] ss:$16 sps:$4 sm:$0xff]   ;;  %v10301_v50 = vld [vmem:[#allocation2 + $0xde4] ss:$16 sps:$4 sm:$0xff]  }
 0x12e   :  { %4729 = vmatprep.mubr.bf16.mxu1 %v10205_v51  ;;  %v10290_v49 = vld [vmem:[#allocation2 + $0xe00] ss:$16 sps:$4 sm:$0xff]   ;;  %v10304_v51 = vld [vmem:[#allocation2 + $0xfe4] ss:$16 sps:$4 sm:$0xff]  }
 0x12f   :  { %4767 = vmatpush2.bf16.msra.mxu0 %v10197_v52  ;;  %v10297_v52 = vld [vmem:[%s14250_s0 + $0x240] ss:$68 sps:$4 sm:$0xff]  }
 0x130   :  { %4880 = vmatpush2.bf16.msra.mxu1 %v10200_v53  ;;  %4768 = vmatprep.subr.bf16.mxu0 %v10211_v54  ;;  %v10298_v53 = vld [vmem:[%s14250_s0 + $0x248] ss:$68 sps:$4 sm:$0xff]   ;;  %v10299_v54 = vld [vmem:[#allocation2 + $0xde0] ss:$16 sps:$4 sm:$0xff]  }
 0x131   :  { %4881 = vmatprep.subr.bf16.mxu1 %v10214_v55  ;;  %v10302_v55 = vld [vmem:[#allocation2 + $0xfe0] ss:$16 sps:$4 sm:$0xff]  }
 0x132   :  { %4617 = vmatmul.mubr.bf16.gmra.mxu0 %v10207_v56  ;;  %v10307_v56 = vld [vmem:[#allocation2 + $0xdc4] ss:$16 sps:$4 sm:$0xff]  }
 0x133   :  { %4730 = vmatmul.mubr.bf16.gmra.mxu1 %v10208_v57  ;;  %4769 = vmatpush2.bf16.msra.mxu0 %v10209_v58  ;;  %v10310_v57 = vld [vmem:[#allocation2 + $0xfc4] ss:$16 sps:$4 sm:$0xff]   ;;  %v10311_v58 = vld [vmem:[%s14250_s0 + $0x2cc] ss:$68 sps:$4 sm:$0xff]  }
 0x134   :  { %4882 = vmatpush2.bf16.msra.mxu1 %v10212_v59  ;;  %4770 = vmatprep.subr.bf16.mxu0 %v10217_v60  ;;  %v10313_v59 = vld [vmem:[%s14250_s0 + $0x2d4] ss:$68 sps:$4 sm:$0xff]   ;;  %v10305_v60 = vld [vmem:[#allocation2 + $0xdc0] ss:$16 sps:$4 sm:$0xff]  }
 0x135   :  { %4883 = vmatprep.subr.bf16.mxu1 %v10220_v61  ;;  %4772 = vmatprep.mubr.bf16.mxu0 %v10223_v62  ;;  %v10308_v61 = vld [vmem:[#allocation2 + $0xfc0] ss:$16 sps:$4 sm:$0xff]   ;;  %v10319_v62 = vld [vmem:[#allocation2 + $0xda4] ss:$16 sps:$4 sm:$0xff]  }
 0x136   :  { %4885 = vmatprep.mubr.bf16.mxu1 %v10226_v63  ;;  %v10322_v63 = vld [vmem:[#allocation2 + $0xfa4] ss:$16 sps:$4 sm:$0xff]  }
 0x137   :  { %4771 = vmatpush2.bf16.msra.mxu0 %v10215_v0  ;;  %v10315_v0 = vld [vmem:[%s14250_s0 + $0x2c8] ss:$68 sps:$4 sm:$0xff]  }
 0x138   :  { %4884 = vmatpush2.bf16.msra.mxu1 %v10218_v1  ;;  %4966 = vmatprep.subr.bf16.mxu0 %v10229_v2  ;;  %v10316_v1 = vld [vmem:[%s14250_s0 + $0x2d0] ss:$68 sps:$4 sm:$0xff]  }
 0x139   :  { %5079 = vmatprep.subr.bf16.mxu1 %v10232_v3  ;;  %v10317_v2 = vld [vmem:[#allocation2 + $0xda0] ss:$16 sps:$4 sm:$0xff]  }
 0x13a   :  { %4773 = vmatmul.mubr.bf16.vlgmr.msra.gmra.mxu0 %v10221_v4  ;;  %v10320_v3 = vld [vmem:[#allocation2 + $0xfa0] ss:$16 sps:$4 sm:$0xff]   ;;  %v10325_v4 = vld [vmem:[#allocation2 + $0xd84] ss:$16 sps:$4 sm:$0xff]  }
 0x13b   :  { %4886 = vmatmul.mubr.bf16.vlgmr.msra.gmra.mxu1 %v10224_v5  ;;  %4967 = vmatpush1.bf16.msra.mxu0 %v10227_v6  ;;  %v10328_v5 = vld [vmem:[#allocation2 + $0xf84] ss:$16 sps:$4 sm:$0xff]  }
 0x13c   :  { %5080 = vmatpush1.bf16.msra.mxu1 %v10230_v7  ;;  %4968 = vmatprep.subr.bf16.mxu0 %v10235_v8  ;;  %v10329_v6 = vld [vmem:[%s14250_s0 + $0x354] ss:$68 sps:$4 sm:$0xff]   ;;  %v10331_v7 = vld [vmem:[%s14250_s0 + $0x35c] ss:$68 sps:$4 sm:$0xff]  }
 0x13d   :  { %5081 = vmatprep.subr.bf16.mxu1 %v10238_v9  ;;  %4782 = vmatprep.mubr.bf16.mxu0 %v10239_v10  ;;  %v10323_v8 = vld [vmem:[#allocation2 + $0xd80] ss:$16 sps:$4 sm:$0xff]  }
 0x13e   :  { %4895 = vmatprep.mubr.bf16.mxu1 %v10241_v11  ;;  %v10326_v9 = vld [vmem:[#allocation2 + $0xf80] ss:$16 sps:$4 sm:$0xff]   ;;  %v10337_v11 = vld [vmem:[#allocation2 + $0xd64] ss:$16 sps:$4 sm:$0xff]  }
 0x13f   :  { %4969 = vmatpush1.bf16.msra.mxu0 %v10233_v12  ;;  %v10333_v10 = vld [vmem:[%s14250_s0 + $0x350] ss:$68 sps:$4 sm:$0xff]  }
 0x140   :  { %5082 = vmatpush1.bf16.msra.mxu1 %v10236_v13  ;;  %4970 = vmatprep.subr.bf16.mxu0 %v10247_v14  ;;  %v10340_v12 = vld [vmem:[#allocation2 + $0xf64] ss:$16 sps:$4 sm:$0xff]   ;;  %v10334_v13 = vld [vmem:[%s14250_s0 + $0x358] ss:$68 sps:$4 sm:$0xff]   ;;  %v10335_v14 = vld [vmem:[#allocation2 + $0xd60] ss:$16 sps:$4 sm:$0xff]  }
 0x141   :  { %5083 = vmatprep.subr.bf16.mxu1 %v10250_v15  ;;  %v10338_v15 = vld [vmem:[#allocation2 + $0xf60] ss:$16 sps:$4 sm:$0xff]  }
 0x142   :  { %4783 = vmatmul.mubr.bf16.gmra.mxu0 %v10243_v16  ;;  %v10343_v16 = vld [vmem:[#allocation2 + $0xd44] ss:$16 sps:$4 sm:$0xff]  }
 0x143   :  { %4896 = vmatmul.mubr.bf16.gmra.mxu1 %v10244_v17  ;;  %4971 = vmatpush1.bf16.msra.mxu0 %v10245_v18  ;;  %v10346_v17 = vld [vmem:[#allocation2 + $0xf44] ss:$16 sps:$4 sm:$0xff]   ;;  %v10347_v18 = vld [vmem:[%s14250_s0 + $0x3dc] ss:$68 sps:$4 sm:$0xff]  }
 0x144   :  { %5084 = vmatpush1.bf16.msra.mxu1 %v10248_v19  ;;  %4972 = vmatprep.subr.bf16.mxu0 %v10253_v20  ;;  %v10349_v19 = vld [vmem:[%s14250_s0 + $0x3e4] ss:$68 sps:$4 sm:$0xff]   ;;  %v10341_v20 = vld [vmem:[#allocation2 + $0xd40] ss:$16 sps:$4 sm:$0xff]  }
 0x145   :  { %5085 = vmatprep.subr.bf16.mxu1 %v10256_v21  ;;  %4792 = vmatprep.mubr.bf16.mxu0 %v10257_v22  ;;  %v10344_v21 = vld [vmem:[#allocation2 + $0xf40] ss:$16 sps:$4 sm:$0xff]   ;;  %v860_v22 = vlaneseq }
 0x146   :  { %4905 = vmatprep.mubr.bf16.mxu1 %v10259_v23  ;;  %v10351_v23 = vld [vmem:[%s14250_s0 + $0x3d8] ss:$68 sps:$4 sm:$0xff]  }
 0x147   :  { %4973 = vmatpush1.bf16.msra.mxu0 %v10251_v24  ;;  %v10355_v24 = vld [vmem:[#allocation2 + $0xd24] ss:$16 sps:$4 sm:$0xff]  }
 0x148   :  { %5086 = vmatpush1.bf16.msra.mxu1 %v10254_v25  ;;  %4974 = vmatprep.subr.bf16.mxu0 %v10265_v26  ;;  %v10358_v25 = vld [vmem:[#allocation2 + $0xf24] ss:$16 sps:$4 sm:$0xff]  }
 0x149   :  { %5087 = vmatprep.subr.bf16.mxu1 %v10268_v27  ;;  %v10352_v26 = vld [vmem:[%s14250_s0 + $0x3e0] ss:$68 sps:$4 sm:$0xff]  }
 0x14a   :  { %4793 = vmatmul.mubr.bf16.gmra.mxu0 %v10261_v28  ;;  %v10353_v27 = vld [vmem:[#allocation2 + $0xd20] ss:$16 sps:$4 sm:$0xff]  }
 0x14b   :  { %4906 = vmatmul.mubr.bf16.gmra.mxu1 %v10262_v29  ;;  %4975 = vmatpush1.bf16.msra.mxu0 %v10263_v30  ;;  %v10356_v28 = vld [vmem:[#allocation2 + $0xf20] ss:$16 sps:$4 sm:$0xff]   ;;  %v10361_v29 = vld [vmem:[#allocation2 + $0xd04] ss:$16 sps:$4 sm:$0xff]   ;;  %v12183_v30 = vshrl.u32 %v860_v22, 7 }
 0x14c   :  { %5088 = vmatpush1.bf16.msra.mxu1 %v10266_v31  ;;  %4976 = vmatprep.subr.bf16.mxu0 %v10271_v32  ;;  %v10364_v31 = vld [vmem:[#allocation2 + $0xf04] ss:$16 sps:$4 sm:$0xff]   ;;  %v10359_v32 = vld [vmem:[#allocation2 + $0xd00] ss:$16 sps:$4 sm:$0xff]   ;;  %v10406_v22 = vld [vmem:[#allocation2 + $0x6c] ss:$16 sps:$4 sm:$0xff]  }
 0x14d   :  { %5089 = vmatprep.subr.bf16.mxu1 %v10274_v33  ;;  %4802 = vmatprep.mubr.bf16.mxu0 %v10275_v34  ;;  %14280 = vst [vmem:[#allocation24_spill] sm:$0xff] %v12183_v30  ;;  %v10367_v33 = vld [vmem:[%s14250_s0 + $0x34] ss:$68 sps:$4 sm:$0xff]   ;;  %v10370_v34 = vld [vmem:[%s14250_s0 + $0x3c] ss:$68 sps:$4 sm:$0xff]  }
 0x14e   :  { %4915 = vmatprep.mubr.bf16.mxu1 %v10277_v35  ;;  %v10362_v35 = vld [vmem:[#allocation2 + $0xf00] ss:$16 sps:$4 sm:$0xff]  }
 0x14f   :  { %4977 = vmatpush1.bf16.msra.mxu0 %v10269_v36  ;;  %v858_v36 = vld [vmem:[#allocation6] sm:$0xf] }
 0x150   :  { %5090 = vmatpush1.bf16.msra.mxu1 %v10272_v37  ;;  %4978 = vmatprep.subr.bf16.mxu0 %v10283_v38  ;;  %v14263_v37 = vsub.s32 0, %v12183_v30  ;;  %v10373_v38 = vld [vmem:[#allocation2 + $0x10e4] ss:$16 sps:$4 sm:$0xff]  }
 0x151   :  { %5091 = vmatprep.subr.bf16.mxu1 %v10286_v39  ;;  %v10376_v39 = vld [vmem:[#allocation2 + $0xec] ss:$16 sps:$4 sm:$0xff]  }
 0x152   :  { %4803 = vmatmul.mubr.bf16.gmra.mxu0 %v10279_v40  ;;  %v10365_v40 = vld [vmem:[%s14250_s0 + $0x30] ss:$68 sps:$4 sm:$0xff]  }
 0x153   :  { %4916 = vmatmul.mubr.bf16.gmra.mxu1 %v10280_v41  ;;  %4979 = vmatpush1.bf16.msra.mxu0 %v10281_v42  ;;  %v10368_v41 = vld [vmem:[%s14250_s0 + $0x38] ss:$68 sps:$4 sm:$0xff]   ;;  %v14264_v42 = vsub.s32 1, %v12183_v30 }
 0x154   :  { %5092 = vmatpush1.bf16.msra.mxu1 %v10284_v43  ;;  %4980 = vmatprep.subr.bf16.mxu0 %v10289_v44  ;;  %v10371_v43 = vld [vmem:[#allocation2 + $0x10e0] ss:$16 sps:$4 sm:$0xff]   ;;  %v12201_v44 = vrot.slane %v858_v36, %v14263_v37 }
 0x155   :  { %5093 = vmatprep.subr.bf16.mxu1 %v10292_v45  ;;  %4812 = vmatprep.mubr.bf16.mxu0 %v10293_v46  ;;  %v10374_v45 = vld [vmem:[#allocation2 + $0xe8] ss:$16 sps:$4 sm:$0xff]   ;;  %v10379_v46 = vld [vmem:[#allocation2 + $0xcc] ss:$16 sps:$4 sm:$0xff]  }
 0x156   :  { %4925 = vmatprep.mubr.bf16.mxu1 %v10295_v47  ;;  %v10380_v47 = vld [vmem:[%s14250_s0 + $0xbc] ss:$68 sps:$4 sm:$0xff]  }
 0x157   :  { %4981 = vmatpush1.bf16.msra.mxu0 %v10287_v48  ;;  %v12208_v48 = vrot.slane %v858_v36, %v14264_v42  ;;  %v10409_v36 = vld [vmem:[#allocation2 + $0x4c] ss:$16 sps:$4 sm:$0xff]   ;;  %v10811_v42 = vld [vmem:[#allocation2 + $0xfe8] ss:$16 sps:$4 sm:$0xff]  }
 0x158   :  { %5094 = vmatpush1.bf16.msra.mxu1 %v10290_v49  ;;  %4982 = vmatprep.subr.bf16.mxu0 %v10301_v50  ;;  %v10382_v49 = vld [vmem:[%s14250_s0 + $0xc4] ss:$68 sps:$4 sm:$0xff]  }
 0x159   :  { %5095 = vmatprep.subr.bf16.mxu1 %v10304_v51  ;;  %v10388_v50 = vld [vmem:[#allocation2 + $0x10c4] ss:$16 sps:$4 sm:$0xff]  }
 0x15a   :  { %4813 = vmatmul.mubr.bf16.gmra.mxu0 %v10297_v52 }
 0x15b   :  { %4926 = vmatmul.mubr.bf16.gmra.mxu1 %v10298_v53  ;;  %4983 = vmatpush2.bf16.msra.mxu0 %v10299_v54  ;;  %v10377_v53 = vld [vmem:[#allocation2 + $0xc8] ss:$16 sps:$4 sm:$0xff]  }
 0x15c   :  { %5096 = vmatpush2.bf16.msra.mxu1 %v10302_v55  ;;  %4984 = vmatprep.subr.bf16.mxu0 %v10307_v56  ;;  %v10386_v55 = vld [vmem:[#allocation2 + $0x10c0] ss:$16 sps:$4 sm:$0xff]  }
 0x15d   :  { %5097 = vmatprep.subr.bf16.mxu1 %v10310_v57  ;;  %4822 = vmatprep.mubr.bf16.mxu0 %v10311_v58  ;;  %v10391_v58 = vld [vmem:[#allocation2 + $0xac] ss:$16 sps:$4 sm:$0xff]  }
 0x15e   :  { %4935 = vmatprep.mubr.bf16.mxu1 %v10313_v59  ;;  %v10403_v59 = vld [vmem:[#allocation2 + $0x10a4] ss:$16 sps:$4 sm:$0xff]  }
 0x15f   :  { %4985 = vmatpush2.bf16.msra.mxu0 %v10305_v60 }
 0x160   :  { %5098 = vmatpush2.bf16.msra.mxu1 %v10308_v61  ;;  %4986 = vmatprep.subr.bf16.mxu0 %v10319_v62  ;;  %v10384_v62 = vld [vmem:[%s14250_s0 + $0xb8] ss:$68 sps:$4 sm:$0xff]  }
 0x161   :  { %5099 = vmatprep.subr.bf16.mxu1 %v10322_v63  ;;  %v10385_v63 = vld [vmem:[%s14250_s0 + $0xc0] ss:$68 sps:$4 sm:$0xff]  }
 0x162   :  { %4823 = vmatmul.mubr.bf16.gmra.mxu0 %v10315_v0 }
 0x163   :  { %4936 = vmatmul.mubr.bf16.gmra.mxu1 %v10316_v1  ;;  %4987 = vmatpush2.bf16.msra.mxu0 %v10317_v2  ;;  %v10389_v2 = vld [vmem:[#allocation2 + $0xa8] ss:$16 sps:$4 sm:$0xff]  }
 0x164   :  { %5100 = vmatpush2.bf16.msra.mxu1 %v10320_v3  ;;  %4988 = vmatprep.subr.bf16.mxu0 %v10325_v4 }
 0x165   :  { %5101 = vmatprep.subr.bf16.mxu1 %v10328_v5  ;;  %4832 = vmatprep.mubr.bf16.mxu0 %v10329_v6  ;;  %v10395_v5 = vld [vmem:[%s14250_s0 + $0x144] ss:$68 sps:$4 sm:$0xff]  }
 0x166   :  { %4945 = vmatprep.mubr.bf16.mxu1 %v10331_v7 }
 0x167   :  { %4989 = vmatpush2.bf16.msra.mxu0 %v10323_v8  ;;  %v10394_v8 = vld [vmem:[#allocation2 + $0x8c] ss:$16 sps:$4 sm:$0xff]  }
 0x168   :  { %5102 = vmatpush2.bf16.msra.mxu1 %v10326_v9  ;;  %4990 = vmatprep.subr.bf16.mxu0 %v10337_v11  ;;  %v10397_v9 = vld [vmem:[%s14250_s0 + $0x14c] ss:$68 sps:$4 sm:$0xff]  }
 0x169   :  { %5103 = vmatprep.subr.bf16.mxu1 %v10340_v12  ;;  %v10401_v12 = vld [vmem:[#allocation2 + $0x10a0] ss:$16 sps:$4 sm:$0xff]  }
 0x16a   :  { %4833 = vmatmul.mubr.bf16.gmra.mxu0 %v10333_v10 }
 0x16b   :  { %4946 = vmatmul.mubr.bf16.gmra.mxu1 %v10334_v13  ;;  %4991 = vmatpush2.bf16.msra.mxu0 %v10335_v14 }
 0x16c   :  { %5104 = vmatpush2.bf16.msra.mxu1 %v10338_v15  ;;  %4992 = vmatprep.subr.bf16.mxu0 %v10343_v16  ;;  %v10418_v15 = vld [vmem:[#allocation2 + $0x1084] ss:$16 sps:$4 sm:$0xff]  }
 0x16d   :  { %5105 = vmatprep.subr.bf16.mxu1 %v10346_v17  ;;  %4842 = vmatprep.mubr.bf16.mxu0 %v10347_v18  ;;  %v10392_v18 = vld [vmem:[#allocation2 + $0x88] ss:$16 sps:$4 sm:$0xff]  }
 0x16e   :  { %4955 = vmatprep.mubr.bf16.mxu1 %v10349_v19 }
 0x16f   :  { %4993 = vmatpush2.bf16.msra.mxu0 %v10341_v20 }
 0x170   :  { %5106 = vmatpush2.bf16.msra.mxu1 %v10344_v21  ;;  %4994 = vmatprep.subr.bf16.mxu0 %v10355_v24  ;;  %v10399_v21 = vld [vmem:[%s14250_s0 + $0x140] ss:$68 sps:$4 sm:$0xff]  }
 0x171   :  { %5107 = vmatprep.subr.bf16.mxu1 %v10358_v25  ;;  %v10400_v25 = vld [vmem:[%s14250_s0 + $0x148] ss:$68 sps:$4 sm:$0xff]  }
 0x172   :  { %4843 = vmatmul.mubr.bf16.gmra.mxu0 %v10351_v23 }
 0x173   :  { %4956 = vmatmul.mubr.bf16.gmra.mxu1 %v10352_v26  ;;  %4995 = vmatpush2.bf16.msra.mxu0 %v10353_v27  ;;  %v10416_v26 = vld [vmem:[#allocation2 + $0x1080] ss:$16 sps:$4 sm:$0xff]  }
 0x174   :  { %5108 = vmatpush2.bf16.msra.mxu1 %v10356_v28  ;;  %4996 = vmatprep.subr.bf16.mxu0 %v10361_v29  ;;  %v10404_v29 = vld [vmem:[#allocation2 + $0x68] ss:$16 sps:$4 sm:$0xff]  }
 0x175   :  { %5109 = vmatprep.subr.bf16.mxu1 %v10364_v31  ;;  %4998 = vmatprep.mubr.bf16.mxu0 %v10367_v33  ;;  %v10410_v33 = vld [vmem:[%s14250_s0 + $0x1cc] ss:$68 sps:$4 sm:$0xff]  }
 0x176   :  { %5111 = vmatprep.mubr.bf16.mxu1 %v10370_v34 }
 0x177   :  { %4997 = vmatpush2.bf16.msra.mxu0 %v10359_v32 }
 0x178   :  { %5110 = vmatpush2.bf16.msra.mxu1 %v10362_v35  ;;  %5192 = vmatprep.subr.bf16.mxu0 %v10373_v38  ;;  %v10412_v38 = vld [vmem:[%s14250_s0 + $0x1d4] ss:$68 sps:$4 sm:$0xff]  }
 0x179   :  { %5305 = vmatprep.subr.bf16.mxu1 %v10376_v39 }
 0x17a   :  { %v4322_v51 = vpop.f32.mrf.mxu0  ;;  %4999 = vmatmul.mubr.bf16.vlgmr.msra.gmra.mxu0 %v10365_v40 }
 0x17b   :  { %v4435_v52 = vpop.f32.mrf.mxu1  ;;  %5112 = vmatmul.mubr.bf16.vlgmr.msra.gmra.mxu1 %v10368_v41  ;;  %v4323_v54 = vadd.f32 %v4322_v51, %v12201_v44  ;;  %5193 = vmatpush1.bf16.msra.mxu0 %v10371_v43  ;;  %v10407_v41 = vld [vmem:[#allocation2 + $0x48] ss:$16 sps:$4 sm:$0xff]   ;;  %v10433_v43 = vld [vmem:[#allocation2 + $0x1064] ss:$16 sps:$4 sm:$0xff]  }
 0x17c   :  { %5306 = vmatpush1.bf16.msra.mxu1 %v10374_v45  ;;  %v4324_v56 = vpop.f32.mrf.mxu0  ;;  %5008 = vmatprep.mubr.bf16.mxu0 %v10380_v47  ;;  %v10431_v47 = vld [vmem:[#allocation2 + $0x1060] ss:$16 sps:$4 sm:$0xff]   ;;  %v10448_v51 = vld [vmem:[#allocation2 + $0x1044] ss:$16 sps:$4 sm:$0xff]  }
 0x17d   :  { %v4437_v57 = vpop.f32.mrf.mxu1  ;;  %5307 = vmatprep.subr.bf16.mxu1 %v10379_v46  ;;  %v12214_v60 = vadd.f32 %v4435_v52, %v4323_v54  ;;  %v4325_v61 = vadd.f32 %v4324_v56, %v12208_v48  ;;  %5121 = vmatprep.mubr.bf16.mxu1 %v10382_v49  ;;  %v10421_v54 = vld [vmem:[#allocation2 + $0x2c] ss:$16 sps:$4 sm:$0xff]  }
 0x17e   :  { %5194 = vmatprep.subr.bf16.mxu0 %v10388_v50  ;;  %v4326_v0 = vpop.f32.mrf.mxu0 }
 0x17f   :  { %v4439_v1 = vpop.f32.mrf.mxu1  ;;  %v12223_v3 = vadd.f32 %v4437_v57, %v4325_v61  ;;  %v4327_v4 = vadd.f32 %v4326_v0, %v12201_v44  ;;  %5195 = vmatpush1.bf16.msra.mxu0 %v10386_v55  ;;  %v10414_v57 = vld [vmem:[%s14250_s0 + $0x1c8] ss:$68 sps:$4 sm:$0xff]  }
 0x180   :  { %5308 = vmatpush1.bf16.msra.mxu1 %v10377_v53  ;;  %v4328_v6 = vpop.f32.mrf.mxu0  ;;  %5196 = vmatprep.subr.bf16.mxu0 %v10403_v59 }
 0x181   :  { %v4441_v7 = vpop.f32.mrf.mxu1  ;;  %5309 = vmatprep.subr.bf16.mxu1 %v10391_v58  ;;  %v12232_v10 = vadd.f32 %v4439_v1, %v4327_v4  ;;  %v4329_v11 = vadd.f32 %v4328_v6, %v12208_v48  ;;  %v10415_v58 = vld [vmem:[%s14250_s0 + $0x1d0] ss:$68 sps:$4 sm:$0xff]   ;;  %v10430_v6 = vld [vmem:[%s14250_s0 + $0x25c] ss:$68 sps:$4 sm:$0xff]  }
 0x182   :  { %v4332_v13 = vpop.f32.mrf.mxu0  ;;  %5009 = vmatmul.mubr.bf16.gmra.mxu0 %v10384_v62  ;;  %v10419_v62 = vld [vmem:[#allocation2 + $0x28] ss:$16 sps:$4 sm:$0xff]  }
 0x183   :  { %v4445_v14 = vpop.f32.mrf.mxu1  ;;  %5122 = vmatmul.mubr.bf16.gmra.mxu1 %v10385_v63  ;;  %v12235_v16 = vadd.f32 %v4441_v7, %v4329_v11  ;;  %v4333_v17 = vadd.f32 %v4332_v13, %v12201_v44  ;;  %5018 = vmatprep.mubr.bf16.mxu0 %v10395_v5  ;;  %v10427_v1 = vld [vmem:[%s14250_s0 + $0x254] ss:$68 sps:$4 sm:$0xff]   ;;  %v10424_v5 = vld [vmem:[#allocation2 + $0xc] ss:$16 sps:$4 sm:$0xff]  }
 0x184   :  { %5310 = vmatpush1.bf16.msra.mxu1 %v10389_v2  ;;  %v4334_v19 = vpop.f32.mrf.mxu0  ;;  %5131 = vmatprep.mubr.bf16.mxu1 %v10397_v9  ;;  %v10446_v9 = vld [vmem:[#allocation2 + $0x1040] ss:$16 sps:$4 sm:$0xff]   ;;  %v10463_v13 = vld [vmem:[#allocation2 + $0x1024] ss:$16 sps:$4 sm:$0xff]  }
 0x185   :  { %v4447_v20 = vpop.f32.mrf.mxu1  ;;  %5311 = vmatprep.subr.bf16.mxu1 %v10394_v8  ;;  %v12241_v23 = vadd.f32 %v4445_v14, %v4333_v17  ;;  %v4335_v24 = vadd.f32 %v4334_v19, %v12208_v48  ;;  %5197 = vmatpush1.bf16.msra.mxu0 %v10401_v12  ;;  %v10422_v17 = vld [vmem:[#allocation2 + $0x8] ss:$16 sps:$4 sm:$0xff]  }
 0x186   :  { %v4336_v27 = vpop.f32.mrf.mxu0  ;;  %5198 = vmatprep.subr.bf16.mxu0 %v10418_v15 }
 0x187   :  { %v4449_v28 = vpop.f32.mrf.mxu1  ;;  %v12247_v31 = vadd.f32 %v4447_v20, %v4335_v24  ;;  %v4337_v32 = vadd.f32 %v4336_v27, %v12201_v44  ;;  %v10425_v20 = vld [vmem:[%s14250_s0 + $0x250] ss:$68 sps:$4 sm:$0xff]  }
 0x188   :  { %5312 = vmatpush1.bf16.msra.mxu1 %v10392_v18  ;;  %v4338_v34 = vpop.f32.mrf.mxu0  ;;  %v10461_v27 = vld [vmem:[#allocation2 + $0x1020] ss:$16 sps:$4 sm:$0xff]  }
 0x189   :  { %v4451_v35 = vpop.f32.mrf.mxu1  ;;  %5313 = vmatprep.subr.bf16.mxu1 %v10406_v22  ;;  %v12256_v39 = vadd.f32 %v4449_v28, %v4337_v32  ;;  %v4339_v40 = vadd.f32 %v4338_v34, %v12208_v48  ;;  %5199 = vmatpush1.bf16.msra.mxu0 %v10416_v26  ;;  %v10436_v22 = vld [vmem:[#allocation2 + $0x1ec] ss:$16 sps:$4 sm:$0xff]   ;;  %v10434_v26 = vld [vmem:[#allocation2 + $0x1e8] ss:$16 sps:$4 sm:$0xff]  }
 0x18a   :  { %v4342_v45 = vpop.f32.mrf.mxu0  ;;  %5019 = vmatmul.mubr.bf16.gmra.mxu0 %v10399_v21  ;;  %5200 = vmatprep.subr.bf16.mxu0 %v10433_v43  ;;  %v10428_v21 = vld [vmem:[%s14250_s0 + $0x258] ss:$68 sps:$4 sm:$0xff]  }
 0x18b   :  { %v4455_v46 = vpop.f32.mrf.mxu1  ;;  %5132 = vmatmul.mubr.bf16.gmra.mxu1 %v10400_v25  ;;  %v12259_v49 = vadd.f32 %v4451_v35, %v4339_v40  ;;  %v4343_v50 = vadd.f32 %v4342_v45, %v12201_v44  ;;  %5028 = vmatprep.mubr.bf16.mxu0 %v10410_v33  ;;  %v10439_v32 = vld [vmem:[#allocation2 + $0x1cc] ss:$16 sps:$4 sm:$0xff]   ;;  %v10445_v40 = vld [vmem:[%s14250_s0 + $0x2e4] ss:$68 sps:$4 sm:$0xff]  }
 0x18c   :  { %5314 = vmatpush1.bf16.msra.mxu1 %v10404_v29  ;;  %v4344_v52 = vpop.f32.mrf.mxu0  ;;  %5141 = vmatprep.mubr.bf16.mxu1 %v10412_v38  ;;  %v10442_v35 = vld [vmem:[%s14250_s0 + $0x2dc] ss:$68 sps:$4 sm:$0xff]   ;;  %v10478_v45 = vld [vmem:[#allocation2 + $0x1004] ss:$16 sps:$4 sm:$0xff]  }
 0x18d   :  { %v4457_v53 = vpop.f32.mrf.mxu1  ;;  %5315 = vmatprep.subr.bf16.mxu1 %v10409_v36  ;;  %v12262_v55 = vadd.f32 %v4455_v46, %v4343_v50  ;;  %v4345_v56 = vadd.f32 %v4344_v52, %v12208_v48  ;;  %5201 = vmatpush1.bf16.msra.mxu0 %v10431_v47  ;;  %v10437_v50 = vld [vmem:[#allocation2 + $0x1c8] ss:$16 sps:$4 sm:$0xff]  }
 0x18e   :  { %v4346_v59 = vpop.f32.mrf.mxu0  ;;  %5202 = vmatprep.subr.bf16.mxu0 %v10448_v51  ;;  %v10476_v51 = vld [vmem:[#allocation2 + $0x1000] ss:$16 sps:$4 sm:$0xff]  }
 0x18f   :  { %v4459_v61 = vpop.f32.mrf.mxu1  ;;  %v12271_v63 = vadd.f32 %v4457_v53, %v4345_v56  ;;  %v4347_v0 = vadd.f32 %v4346_v59, %v12201_v44 }
 0x190   :  { %5316 = vmatpush1.bf16.msra.mxu1 %v10407_v41  ;;  %v4348_v2 = vpop.f32.mrf.mxu0 }
 0x191   :  { %v4461_v4 = vpop.f32.mrf.mxu1  ;;  %5317 = vmatprep.subr.bf16.mxu1 %v10421_v54  ;;  %v12280_v7 = vadd.f32 %v4459_v61, %v4347_v0  ;;  %v4349_v8 = vadd.f32 %v4348_v2, %v12208_v48  ;;  %5203 = vmatpush1.bf16.msra.mxu0 %v10446_v9  ;;  %v10488_v54 = vld [vmem:[#allocation2 + $0x2ec] ss:$16 sps:$4 sm:$0xff]   ;;  %v10443_v0 = vld [vmem:[%s14250_s0 + $0x2e0] ss:$68 sps:$4 sm:$0xff]  }
 0x192   :  { %v4352_v11 = vpop.f32.mrf.mxu0  ;;  %5029 = vmatmul.mubr.bf16.gmra.mxu0 %v10414_v57  ;;  %5204 = vmatprep.subr.bf16.mxu0 %v10463_v13  ;;  %v10457_v9 = vld [vmem:[%s14250_s0 + $0x364] ss:$68 sps:$4 sm:$0xff]   ;;  %v10460_v13 = vld [vmem:[%s14250_s0 + $0x36c] ss:$68 sps:$4 sm:$0xff]  }
 0x193   :  { %v4465_v12 = vpop.f32.mrf.mxu1  ;;  %5142 = vmatmul.mubr.bf16.gmra.mxu1 %v10415_v58  ;;  %v12283_v14 = vadd.f32 %v4461_v4, %v4349_v8  ;;  %v4353_v15 = vadd.f32 %v4352_v11, %v12201_v44  ;;  %5038 = vmatprep.mubr.bf16.mxu0 %v10427_v1  ;;  %v10451_v58 = vld [vmem:[#allocation2 + $0x1ac] ss:$16 sps:$4 sm:$0xff]   ;;  %v10449_v4 = vld [vmem:[#allocation2 + $0x1a8] ss:$16 sps:$4 sm:$0xff]  }
 0x194   :  { %5318 = vmatpush1.bf16.msra.mxu1 %v10419_v62  ;;  %v4354_v18 = vpop.f32.mrf.mxu0  ;;  %5151 = vmatprep.mubr.bf16.mxu1 %v10430_v6  ;;  %v10440_v62 = vld [vmem:[%s14250_s0 + $0x2d8] ss:$68 sps:$4 sm:$0xff]  }
 0x195   :  { %v4467_v19 = vpop.f32.mrf.mxu1  ;;  %5319 = vmatprep.subr.bf16.mxu1 %v10424_v5  ;;  %v12292_v24 = vadd.f32 %v4465_v12, %v4353_v15  ;;  %v4355_v25 = vadd.f32 %v4354_v18, %v12208_v48  ;;  %5205 = vmatpush1.bf16.msra.mxu0 %v10461_v27  ;;  %v10454_v8 = vld [vmem:[#allocation2 + $0x18c] ss:$16 sps:$4 sm:$0xff]  }
 0x196   :  { %v4356_v28 = vpop.f32.mrf.mxu0  ;;  %5206 = vmatprep.subr.bf16.mxu0 %v10478_v45  ;;  %v10466_v27 = vld [vmem:[#allocation2 + $0x16c] ss:$16 sps:$4 sm:$0xff]  }
 0x197   :  { %v4469_v29 = vpop.f32.mrf.mxu1  ;;  %v12295_v33 = vadd.f32 %v4467_v19, %v4355_v25  ;;  %v4357_v34 = vadd.f32 %v4356_v28, %v12201_v44  ;;  %v10472_v45 = vld [vmem:[%s14250_s0 + $0x3ec] ss:$68 sps:$4 sm:$0xff]  }
 0x198   :  { %5320 = vmatpush1.bf16.msra.mxu1 %v10422_v17  ;;  %v4358_v36 = vpop.f32.mrf.mxu0 }
 0x199   :  { %v4471_v38 = vpop.f32.mrf.mxu1  ;;  %5321 = vmatprep.subr.bf16.mxu1 %v10436_v22  ;;  %v12304_v41 = vadd.f32 %v4469_v29, %v4357_v34  ;;  %v4359_v43 = vadd.f32 %v4358_v36, %v12208_v48  ;;  %5207 = vmatpush1.bf16.msra.mxu0 %v10476_v51  ;;  %v10452_v22 = vld [vmem:[#allocation2 + $0x188] ss:$16 sps:$4 sm:$0xff]  }
 0x19a   :  { %v4362_v46 = vpop.f32.mrf.mxu0  ;;  %5039 = vmatmul.mubr.bf16.gmra.mxu0 %v10425_v20  ;;  %5418 = vmatprep.subr.bf16.mxu0 %v10488_v54  ;;  %v10458_v36 = vld [vmem:[%s14250_s0 + $0x368] ss:$68 sps:$4 sm:$0xff]   ;;  %v10475_v51 = vld [vmem:[%s14250_s0 + $0x3f4] ss:$68 sps:$4 sm:$0xff]  }
 0x19b   :  { %v4475_v47 = vpop.f32.mrf.mxu1  ;;  %5152 = vmatmul.mubr.bf16.gmra.mxu1 %v10428_v21  ;;  %v12307_v52 = vadd.f32 %v4471_v38, %v4359_v43  ;;  %v4363_v53 = vadd.f32 %v4362_v46, %v12201_v44  ;;  %5048 = vmatprep.mubr.bf16.mxu0 %v10442_v35  ;;  %v10464_v43 = vld [vmem:[#allocation2 + $0x168] ss:$16 sps:$4 sm:$0xff]  }
 0x19c   :  { %5322 = vmatpush2.bf16.msra.mxu1 %v10434_v26  ;;  %v4364_v56 = vpop.f32.mrf.mxu0  ;;  %5161 = vmatprep.mubr.bf16.mxu1 %v10445_v40 }
 0x19d   :  { %v4477_v57 = vpop.f32.mrf.mxu1  ;;  %5323 = vmatprep.subr.bf16.mxu1 %v10439_v32  ;;  %v12310_v59 = vadd.f32 %v4475_v47, %v4363_v53  ;;  %v4365_v61 = vadd.f32 %v4364_v56, %v12208_v48  ;;  %v10455_v32 = vld [vmem:[%s14250_s0 + $0x360] ss:$68 sps:$4 sm:$0xff]  }
 0x19e   :  { %v4366_v1 = vpop.f32.mrf.mxu0 }
 0x19f   :  { %v4479_v2 = vpop.f32.mrf.mxu1  ;;  %v12319_v5 = vadd.f32 %v4477_v57, %v4365_v61  ;;  %v4367_v6 = vadd.f32 %v4366_v1, %v12201_v44 }
 0x1a0   :  { %5324 = vmatpush2.bf16.msra.mxu1 %v10437_v50  ;;  %v4368_v11 = vpop.f32.mrf.mxu0  ;;  %v10469_v50 = vld [vmem:[#allocation2 + $0x14c] ss:$16 sps:$4 sm:$0xff]  }
 0x1a1   :  { %v4481_v12 = vpop.f32.mrf.mxu1  ;;  %5325 = vmatprep.subr.bf16.mxu1 %v10451_v58  ;;  %v12328_v15 = vadd.f32 %v4479_v2, %v4367_v6  ;;  %v4369_v17 = vadd.f32 %v4368_v11, %v12208_v48  ;;  %v10481_v2 = vld [vmem:[#allocation2 + $0x12c] ss:$16 sps:$4 sm:$0xff]  }
 0x1a2   :  { %v4372_v18 = vpop.f32.mrf.mxu0  ;;  %5049 = vmatmul.mubr.bf16.gmra.mxu0 %v10440_v62  ;;  %v10467_v62 = vld [vmem:[#allocation2 + $0x148] ss:$16 sps:$4 sm:$0xff]  }
 0x1a3   :  { %v4485_v19 = vpop.f32.mrf.mxu1  ;;  %5162 = vmatmul.mubr.bf16.gmra.mxu1 %v10443_v0  ;;  %v12331_v20 = vadd.f32 %v4481_v12, %v4369_v17  ;;  %v4373_v21 = vadd.f32 %v4372_v18, %v12201_v44  ;;  %5058 = vmatprep.mubr.bf16.mxu0 %v10457_v9  ;;  %v10473_v12 = vld [vmem:[%s14250_s0 + $0x3f0] ss:$68 sps:$4 sm:$0xff]   ;;  %v10479_v18 = vld [vmem:[#allocation2 + $0x128] ss:$16 sps:$4 sm:$0xff]  }
 0x1a4   :  { %5326 = vmatpush2.bf16.msra.mxu1 %v10449_v4  ;;  %v4374_v25 = vpop.f32.mrf.mxu0  ;;  %5171 = vmatprep.mubr.bf16.mxu1 %v10460_v13 }
 0x1a5   :  { %v4487_v26 = vpop.f32.mrf.mxu1  ;;  %5327 = vmatprep.subr.bf16.mxu1 %v10454_v8  ;;  %v12334_v28 = vadd.f32 %v4485_v19, %v4373_v21  ;;  %v4375_v29 = vadd.f32 %v4374_v25, %v12208_v48  ;;  %v10470_v8 = vld [vmem:[%s14250_s0 + $0x3e8] ss:$68 sps:$4 sm:$0xff]  }
 0x1a6   :  { %v4376_v34 = vpop.f32.mrf.mxu0 }
 0x1a7   :  { %v4489_v35 = vpop.f32.mrf.mxu1  ;;  %v12343_v38 = vadd.f32 %v4487_v26, %v4375_v29  ;;  %v4377_v40 = vadd.f32 %v4376_v34, %v12201_v44 }
 0x1a8   :  { %5328 = vmatpush2.bf16.msra.mxu1 %v10452_v22  ;;  %v4378_v46 = vpop.f32.mrf.mxu0  ;;  %v10484_v22 = vld [vmem:[#allocation2 + $0x10c] ss:$16 sps:$4 sm:$0xff]  }
 0x1a9   :  { %v4491_v47 = vpop.f32.mrf.mxu1  ;;  %5329 = vmatprep.subr.bf16.mxu1 %v10466_v27  ;;  %v12352_v53 = vadd.f32 %v4489_v35, %v4377_v40  ;;  %v4379_v54 = vadd.f32 %v4378_v46, %v12208_v48  ;;  %v10482_v35 = vld [vmem:[#allocation2 + $0x108] ss:$16 sps:$4 sm:$0xff]   ;;  %v10491_v46 = vld [vmem:[#allocation2 + $0x4ec] ss:$16 sps:$4 sm:$0xff]  }
 0x1aa   :  { %v4382_v56 = vpop.f32.mrf.mxu0  ;;  %5059 = vmatmul.mubr.bf16.gmra.mxu0 %v10455_v32 }
 0x1ab   :  { %v4495_v57 = vpop.f32.mrf.mxu1  ;;  %5172 = vmatmul.mubr.bf16.gmra.mxu1 %v10458_v36  ;;  %v12355_v58 = vadd.f32 %v4491_v47, %v4379_v54  ;;  %v4383_v61 = vadd.f32 %v4382_v56, %v12201_v44  ;;  %5068 = vmatprep.mubr.bf16.mxu0 %v10472_v45  ;;  %v14265_v36 = vmov 0   ;;  %v11358_v45 = vld [vmem:[%s14250_s0 + $0x4] ss:$68 sps:$4 sm:$0xff]  }
 0x1ac   :  { %5330 = vmatpush2.bf16.msra.mxu1 %v10464_v43  ;;  %v4384_v0 = vpop.f32.mrf.mxu0  ;;  %5181 = vmatprep.mubr.bf16.mxu1 %v10475_v51  ;;  %v10485_v51 = vld [vmem:[%s14250_s0 + $0x40] ss:$68 sps:$4 sm:$0xff]  }
 0x1ad   :  { %v4497_v1 = vpop.f32.mrf.mxu1  ;;  %5331 = vmatprep.subr.bf16.mxu1 %v10469_v50  ;;  %v12358_v4 = vadd.f32 %v4495_v57, %v4383_v61  ;;  %v4385_v6 = vadd.f32 %v4384_v0, %v12208_v48  ;;  %v10486_v57 = vld [vmem:[#allocation2 + $0x2e8] ss:$16 sps:$4 sm:$0xff]  }
 0x1ae   :  { %v4386_v9 = vpop.f32.mrf.mxu0  ;;  %v10489_v61 = vld [vmem:[#allocation2 + $0x4e8] ss:$16 sps:$4 sm:$0xff]  }
 0x1af   :  { %v4499_v11 = vpop.f32.mrf.mxu1  ;;  %v12367_v13 = vadd.f32 %v4497_v1, %v4385_v6  ;;  %v4387_v17 = vadd.f32 %v4386_v9, %v12201_v44  ;;  %v10494_v1 = vld [vmem:[#allocation2 + $0x2cc] ss:$16 sps:$4 sm:$0xff]  }
 0x1b0   :  { %5332 = vmatpush2.bf16.msra.mxu1 %v10467_v62  ;;  %v4388_v19 = vpop.f32.mrf.mxu0 }
 0x1b1   :  { %v4501_v21 = vpop.f32.mrf.mxu1  ;;  %5333 = vmatprep.subr.bf16.mxu1 %v10481_v2  ;;  %v12370_v25 = vadd.f32 %v4499_v11, %v4387_v17  ;;  %v4389_v26 = vadd.f32 %v4388_v19, %v12208_v48  ;;  %v10492_v19 = vld [vmem:[#allocation2 + $0x2c8] ss:$16 sps:$4 sm:$0xff]  }
 0x1b2   :  { %v4392_v27 = vpop.f32.mrf.mxu0  ;;  %5069 = vmatmul.mubr.bf16.gmra.mxu0 %v10470_v8  ;;  %v10497_v8 = vld [vmem:[#allocation2 + $0x4cc] ss:$16 sps:$4 sm:$0xff]  }
 0x1b3   :  { %v4505_v29 = vpop.f32.mrf.mxu1  ;;  %5182 = vmatmul.mubr.bf16.gmra.mxu1 %v10473_v12  ;;  %v12373_v32 = vadd.f32 %v4501_v21, %v4389_v26  ;;  %v4393_v34 = vadd.f32 %v4392_v27, %v12201_v44  ;;  %5224 = vmatprep.mubr.bf16.mxu0 %v14265_v36  ;;  %v10501_v26 = vld [vmem:[#allocation2 + $0x2ac] ss:$16 sps:$4 sm:$0xff]  }
 0x1b4   :  { %5334 = vmatpush2.bf16.msra.mxu1 %v10479_v18  ;;  %v4394_v40 = vpop.f32.mrf.mxu0  ;;  %5337 = vmatprep.mubr.bf16.mxu1 %v11358_v45  ;;  %v11359_v18 = vld [vmem:[%s14250_s0] ss:$68 sps:$4 sm:$0xff]   ;;  %v10498_v45 = vld [vmem:[%s14250_s0 + $0xc8] ss:$68 sps:$4 sm:$0xff]  }
 0x1b5   :  { %v4507_v43 = vpop.f32.mrf.mxu1  ;;  %5335 = vmatprep.subr.bf16.mxu1 %v10484_v22  ;;  %v12380_v47 = vadd.f32 %v4505_v29, %v4393_v34  ;;  %v4395_v50 = vadd.f32 %v4394_v40, %v12208_v48  ;;  %v10495_v22 = vld [vmem:[#allocation2 + $0x4c8] ss:$16 sps:$4 sm:$0xff]   ;;  %v11360_v40 = vld [vmem:[%s14250_s0 + $0x8c] ss:$68 sps:$4 sm:$0xff]  }
 0x1b6   :  { %v4396_v54 = vpop.f32.mrf.mxu0 }
 0x1b7   :  { %v4509_v56 = vpop.f32.mrf.mxu1  ;;  %v12386_v62 = vadd.f32 %v4507_v43, %v4395_v50  ;;  %v4397_v0 = vadd.f32 %v4396_v54, %v12201_v44 }
 0x1b8   :  { %5336 = vmatpush2.bf16.msra.mxu1 %v10482_v35  ;;  %v4398_v2 = vpop.f32.mrf.mxu0 }
 0x1b9   :  { %v4511_v6 = vpop.f32.mrf.mxu1  ;;  %5531 = vmatprep.subr.bf16.mxu1 %v10491_v46  ;;  %v12389_v9 = vadd.f32 %v4509_v56, %v4397_v0  ;;  %v4399_v11 = vadd.f32 %v4398_v2, %v12208_v48  ;;  %v10504_v48 = vld [vmem:[#allocation2 + $0x4ac] ss:$16 sps:$4 sm:$0xff]  }
 0x1ba   :  { %v4548_v12 = vpop.f32.mrf.mxu0  ;;  %5225 = vmatmul.mubr.bf16.vlgmr.msra.gmra.mxu0 %v10485_v51  ;;  %v10502_v51 = vld [vmem:[#allocation2 + $0x4a8] ss:$16 sps:$4 sm:$0xff]  }
 0x1bb   :  { %v4661_v17 = vpop.f32.mrf.mxu1  ;;  %5338 = vmatmul.mubr.bf16.vlgmr.msra.gmra.mxu1 %v11359_v18  ;;  %v12395_v44 = vadd.f32 %v4511_v6, %v4399_v11  ;;  %v4549_v21 = vadd.f32 %v4548_v12, %v12214_v60  ;;  %5419 = vmatpush1.bf16.msra.mxu0 %v10486_v57  ;;  %v10507_v57 = vld [vmem:[#allocation2 + $0x28c] ss:$16 sps:$4 sm:$0xff]  }
 0x1bc   :  { %5532 = vmatpush1.bf16.msra.mxu1 %v10489_v61  ;;  %v4550_v27 = vpop.f32.mrf.mxu0  ;;  %5420 = vmatprep.subr.bf16.mxu0 %v10494_v1  ;;  %v10510_v61 = vld [vmem:[#allocation2 + $0x48c] ss:$16 sps:$4 sm:$0xff]  }
 0x1bd   :  { %v4663_v29 = vpop.f32.mrf.mxu1  ;;  %5533 = vmatprep.subr.bf16.mxu1 %v10497_v8  ;;  %v12398_v34 = vadd.f32 %v4661_v17, %v4549_v21  ;;  %v4551_v35 = vadd.f32 %v4550_v27, %v12223_v3  ;;  %5234 = vmatprep.mubr.bf16.mxu0 %v14265_v36  ;;  %v10499_v3 = vld [vmem:[#allocation2 + $0x2a8] ss:$16 sps:$4 sm:$0xff]   ;;  %v10514_v18 = vld [vmem:[#allocation2 + $0x26c] ss:$16 sps:$4 sm:$0xff]  }
 0x1be   :  { %5347 = vmatprep.mubr.bf16.mxu1 %v11360_v40  ;;  %v4552_v60 = vpop.f32.mrf.mxu0  ;;  %v10505_v8 = vld [vmem:[#allocation2 + $0x288] ss:$16 sps:$4 sm:$0xff]  }
 0x1bf   :  { %v4665_v43 = vpop.f32.mrf.mxu1  ;;  %v12408_v46 = vadd.f32 %v4663_v29, %v4551_v35  ;;  %v4553_v50 = vadd.f32 %v4552_v60, %v12232_v10  ;;  %5421 = vmatpush1.bf16.msra.mxu0 %v10492_v19  ;;  %v11361_v10 = vld [vmem:[%s14250_s0 + $0x88] ss:$68 sps:$4 sm:$0xff]   ;;  %v11362_v27 = vld [vmem:[%s14250_s0 + $0x114] ss:$68 sps:$4 sm:$0xff]  }
 0x1c0   :  { %5534 = vmatpush1.bf16.msra.mxu1 %v10495_v22  ;;  %v4554_v54 = vpop.f32.mrf.mxu0  ;;  %5422 = vmatprep.subr.bf16.mxu0 %v10501_v26  ;;  %v10508_v17 = vld [vmem:[#allocation2 + $0x488] ss:$16 sps:$4 sm:$0xff]  }
 0x1c1   :  { %v4667_v56 = vpop.f32.mrf.mxu1  ;;  %5535 = vmatprep.subr.bf16.mxu1 %v10504_v48  ;;  %v12411_v0 = vadd.f32 %v4665_v43, %v4553_v50  ;;  %v4555_v1 = vadd.f32 %v4554_v54, %v12235_v16  ;;  %v10517_v16 = vld [vmem:[#allocation2 + $0x46c] ss:$16 sps:$4 sm:$0xff]   ;;  %v10512_v35 = vld [vmem:[#allocation2 + $0x268] ss:$16 sps:$4 sm:$0xff]  }
 0x1c2   :  { %v4558_v2 = vpop.f32.mrf.mxu0  ;;  %5235 = vmatmul.mubr.bf16.gmra.mxu0 %v10498_v45  ;;  %v10520_v50 = vld [vmem:[#allocation2 + $0x24c] ss:$16 sps:$4 sm:$0xff]  }
 0x1c3   :  { %v4671_v6 = vpop.f32.mrf.mxu1  ;;  %5348 = vmatmul.mubr.bf16.gmra.mxu1 %v11361_v10  ;;  %v12417_v11 = vadd.f32 %v4667_v56, %v4555_v1  ;;  %v4559_v12 = vadd.f32 %v4558_v2, %v12241_v23  ;;  %5423 = vmatpush1.bf16.msra.mxu0 %v10499_v3  ;;  %v10511_v23 = vld [vmem:[%s14250_s0 + $0x150] ss:$68 sps:$4 sm:$0xff]   ;;  %v10523_v3 = vld [vmem:[#allocation2 + $0x44c] ss:$16 sps:$4 sm:$0xff]  }
 0x1c4   :  { %5536 = vmatpush1.bf16.msra.mxu1 %v10502_v51  ;;  %v4560_v19 = vpop.f32.mrf.mxu0  ;;  %5424 = vmatprep.subr.bf16.mxu0 %v10507_v57 }
 0x1c5   :  { %v4673_v21 = vpop.f32.mrf.mxu1  ;;  %5537 = vmatprep.subr.bf16.mxu1 %v10510_v61  ;;  %v12420_v22 = vadd.f32 %v4671_v6, %v4559_v12  ;;  %v4561_v26 = vadd.f32 %v4560_v19, %v12247_v31  ;;  %5244 = vmatprep.mubr.bf16.mxu0 %v14265_v36  ;;  %v10515_v31 = vld [vmem:[#allocation2 + $0x468] ss:$16 sps:$4 sm:$0xff]   ;;  %v10530_v12 = vld [vmem:[#allocation2 + $0x42c] ss:$16 sps:$4 sm:$0xff]  }
 0x1c6   :  { %5357 = vmatprep.mubr.bf16.mxu1 %v11362_v27  ;;  %v4562_v29 = vpop.f32.mrf.mxu0  ;;  %v10518_v61 = vld [vmem:[#allocation2 + $0x248] ss:$16 sps:$4 sm:$0xff]   ;;  %v11364_v19 = vld [vmem:[%s14250_s0 + $0x19c] ss:$68 sps:$4 sm:$0xff]  }
 0x1c7   :  { %v4675_v48 = vpop.f32.mrf.mxu1  ;;  %v12430_v40 = vadd.f32 %v4673_v21, %v4561_v26  ;;  %v4563_v60 = vadd.f32 %v4562_v29, %v12256_v39  ;;  %5425 = vmatpush1.bf16.msra.mxu0 %v10505_v8  ;;  %v11363_v39 = vld [vmem:[%s14250_s0 + $0x110] ss:$68 sps:$4 sm:$0xff]   ;;  %v10521_v6 = vld [vmem:[#allocation2 + $0x448] ss:$16 sps:$4 sm:$0xff]  }
 0x1c8   :  { %5538 = vmatpush1.bf16.msra.mxu1 %v10508_v17  ;;  %v4564_v43 = vpop.f32.mrf.mxu0  ;;  %5426 = vmatprep.subr.bf16.mxu0 %v10514_v18  ;;  %v10525_v26 = vld [vmem:[#allocation2 + $0x228] ss:$16 sps:$4 sm:$0xff]  }
 0x1c9   :  { %v4677_v45 = vpop.f32.mrf.mxu1  ;;  %5539 = vmatprep.subr.bf16.mxu1 %v10517_v16  ;;  %v12433_v51 = vadd.f32 %v4675_v48, %v4563_v60  ;;  %v4565_v54 = vadd.f32 %v4564_v43, %v12259_v49  ;;  %v10527_v49 = vld [vmem:[#allocation2 + $0x22c] ss:$16 sps:$4 sm:$0xff]  }
 0x1ca   :  { %v4568_v56 = vpop.f32.mrf.mxu0  ;;  %5245 = vmatmul.mubr.bf16.gmra.mxu0 %v10511_v23  ;;  %v10536_v60 = vld [vmem:[#allocation2 + $0x40c] ss:$16 sps:$4 sm:$0xff]  }
 0x1cb   :  { %v4681_v57 = vpop.f32.mrf.mxu1  ;;  %5358 = vmatmul.mubr.bf16.gmra.mxu1 %v11363_v39  ;;  %v12439_v1 = vadd.f32 %v4677_v45, %v4565_v54  ;;  %v4569_v2 = vadd.f32 %v4568_v56, %v12262_v55  ;;  %5427 = vmatpush1.bf16.msra.mxu0 %v10512_v35  ;;  %v10524_v55 = vld [vmem:[%s14250_s0 + $0x1d8] ss:$68 sps:$4 sm:$0xff]  }
 0x1cc   :  { %5540 = vmatpush1.bf16.msra.mxu1 %v10515_v31  ;;  %v4570_v10 = vpop.f32.mrf.mxu0  ;;  %5428 = vmatprep.subr.bf16.mxu0 %v10520_v50  ;;  %v10533_v35 = vld [vmem:[#allocation2 + $0x20c] ss:$16 sps:$4 sm:$0xff]  }
 0x1cd   :  { %v4683_v8 = vpop.f32.mrf.mxu1  ;;  %5541 = vmatprep.subr.bf16.mxu1 %v10523_v3  ;;  %v12442_v17 = vadd.f32 %v4681_v57, %v4569_v2  ;;  %v4571_v18 = vadd.f32 %v4570_v10, %v12271_v63  ;;  %5254 = vmatprep.mubr.bf16.mxu0 %v14265_v36  ;;  %v10528_v63 = vld [vmem:[#allocation2 + $0x428] ss:$16 sps:$4 sm:$0xff]   ;;  %v10543_v2 = vld [vmem:[#allocation2 + $0x5ec] ss:$16 sps:$4 sm:$0xff]  }
 0x1ce   :  { %5367 = vmatprep.mubr.bf16.mxu1 %v11364_v19  ;;  %v4572_v21 = vpop.f32.mrf.mxu0  ;;  %v10531_v3 = vld [vmem:[#allocation2 + $0x208] ss:$16 sps:$4 sm:$0xff]  }
 0x1cf   :  { %v4685_v16 = vpop.f32.mrf.mxu1  ;;  %v12452_v27 = vadd.f32 %v4683_v8, %v4571_v18  ;;  %v4573_v23 = vadd.f32 %v4572_v21, %v12280_v7  ;;  %5429 = vmatpush1.bf16.msra.mxu0 %v10518_v61  ;;  %v11365_v7 = vld [vmem:[%s14250_s0 + $0x198] ss:$68 sps:$4 sm:$0xff]   ;;  %v11366_v8 = vld [vmem:[%s14250_s0 + $0x224] ss:$68 sps:$4 sm:$0xff]  }
 0x1d0   :  { %5542 = vmatpush1.bf16.msra.mxu1 %v10521_v6  ;;  %v4574_v29 = vpop.f32.mrf.mxu0  ;;  %5430 = vmatprep.subr.bf16.mxu0 %v10527_v49  ;;  %v10534_v57 = vld [vmem:[#allocation2 + $0x408] ss:$16 sps:$4 sm:$0xff]  }
 0x1d1   :  { %v4687_v48 = vpop.f32.mrf.mxu1  ;;  %5543 = vmatprep.subr.bf16.mxu1 %v10530_v12  ;;  %v12455_v31 = vadd.f32 %v4685_v16, %v4573_v23  ;;  %v4575_v43 = vadd.f32 %v4574_v29, %v12283_v14  ;;  %v10540_v14 = vld [vmem:[#allocation2 + $0x3ec] ss:$16 sps:$4 sm:$0xff]   ;;  %v10538_v18 = vld [vmem:[#allocation2 + $0x3e8] ss:$16 sps:$4 sm:$0xff]  }
 0x1d2   :  { %v4578_v45 = vpop.f32.mrf.mxu0  ;;  %5255 = vmatmul.mubr.bf16.gmra.mxu0 %v10524_v55  ;;  %v10549_v23 = vld [vmem:[#allocation2 + $0x5cc] ss:$16 sps:$4 sm:$0xff]  }
 0x1d3   :  { %v4691_v50 = vpop.f32.mrf.mxu1  ;;  %5368 = vmatmul.mubr.bf16.gmra.mxu1 %v11365_v7  ;;  %v12461_v54 = vadd.f32 %v4687_v48, %v4575_v43  ;;  %v4579_v56 = vadd.f32 %v4578_v45, %v12292_v24  ;;  %5431 = vmatpush1.bf16.msra.mxu0 %v10525_v26  ;;  %v10537_v24 = vld [vmem:[%s14250_s0 + $0x260] ss:$68 sps:$4 sm:$0xff]   ;;  %v10546_v26 = vld [vmem:[#allocation2 + $0x3cc] ss:$16 sps:$4 sm:$0xff]  }
 0x1d4   :  { %5544 = vmatpush1.bf16.msra.mxu1 %v10528_v63  ;;  %v4580_v39 = vpop.f32.mrf.mxu0  ;;  %5432 = vmatprep.subr.bf16.mxu0 %v10533_v35 }
 0x1d5   :  { %v4693_v61 = vpop.f32.mrf.mxu1  ;;  %5545 = vmatprep.subr.bf16.mxu1 %v10536_v60  ;;  %v12464_v6 = vadd.f32 %v4691_v50, %v4579_v56  ;;  %v4581_v10 = vadd.f32 %v4580_v39, %v12295_v33  ;;  %5264 = vmatprep.mubr.bf16.mxu0 %v14265_v36  ;;  %v10541_v33 = vld [vmem:[#allocation2 + $0x5e8] ss:$16 sps:$4 sm:$0xff]   ;;  %v10556_v56 = vld [vmem:[#allocation2 + $0x5ac] ss:$16 sps:$4 sm:$0xff]  }
 0x1d6   :  { %5377 = vmatprep.mubr.bf16.mxu1 %v11366_v8  ;;  %v4582_v49 = vpop.f32.mrf.mxu0  ;;  %v10544_v60 = vld [vmem:[#allocation2 + $0x3c8] ss:$16 sps:$4 sm:$0xff]  }
 0x1d7   :  { %v4695_v12 = vpop.f32.mrf.mxu1  ;;  %v12474_v19 = vadd.f32 %v4693_v61, %v4581_v10  ;;  %v4583_v55 = vadd.f32 %v4582_v49, %v12304_v41  ;;  %5433 = vmatpush1.bf16.msra.mxu0 %v10531_v3  ;;  %v11367_v41 = vld [vmem:[%s14250_s0 + $0x220] ss:$68 sps:$4 sm:$0xff]   ;;  %v10547_v50 = vld [vmem:[#allocation2 + $0x5c8] ss:$16 sps:$4 sm:$0xff]   ;;  %v11368_v61 = vld [vmem:[%s14250_s0 + $0x2ac] ss:$68 sps:$4 sm:$0xff]  }
 0x1d8   :  { %5546 = vmatpush1.bf16.msra.mxu1 %v10534_v57  ;;  %v4584_v21 = vpop.f32.mrf.mxu0  ;;  %5434 = vmatprep.subr.bf16.mxu0 %v10540_v14  ;;  %v10551_v10 = vld [vmem:[#allocation2 + $0x3a8] ss:$16 sps:$4 sm:$0xff]  }
 0x1d9   :  { %v4697_v16 = vpop.f32.mrf.mxu1  ;;  %5547 = vmatprep.subr.bf16.mxu1 %v10543_v2  ;;  %v12477_v63 = vadd.f32 %v4695_v12, %v4583_v55  ;;  %v4585_v29 = vadd.f32 %v4584_v21, %v12307_v52  ;;  %v10553_v52 = vld [vmem:[#allocation2 + $0x3ac] ss:$16 sps:$4 sm:$0xff]  }
 0x1da   :  { %v4588_v48 = vpop.f32.mrf.mxu0  ;;  %5265 = vmatmul.mubr.bf16.gmra.mxu0 %v10537_v24  ;;  %v10562_v55 = vld [vmem:[#allocation2 + $0x58c] ss:$16 sps:$4 sm:$0xff]  }
 0x1db   :  { %v4701_v35 = vpop.f32.mrf.mxu1  ;;  %5378 = vmatmul.mubr.bf16.gmra.mxu1 %v11367_v41  ;;  %v12483_v43 = vadd.f32 %v4697_v16, %v4585_v29  ;;  %v4589_v45 = vadd.f32 %v4588_v48, %v12310_v59  ;;  %5435 = vmatpush2.bf16.msra.mxu0 %v10538_v18  ;;  %v10550_v59 = vld [vmem:[%s14250_s0 + $0x2e8] ss:$68 sps:$4 sm:$0xff]  }
 0x1dc   :  { %5548 = vmatpush2.bf16.msra.mxu1 %v10541_v33  ;;  %v4590_v7 = vpop.f32.mrf.mxu0  ;;  %5436 = vmatprep.subr.bf16.mxu0 %v10546_v26  ;;  %v10559_v18 = vld [vmem:[#allocation2 + $0x38c] ss:$16 sps:$4 sm:$0xff]  }
 0x1dd   :  { %v4703_v3 = vpop.f32.mrf.mxu1  ;;  %5549 = vmatprep.subr.bf16.mxu1 %v10549_v23  ;;  %v12486_v57 = vadd.f32 %v4701_v35, %v4589_v45  ;;  %v4591_v39 = vadd.f32 %v4590_v7, %v12319_v5  ;;  %5274 = vmatprep.mubr.bf16.mxu0 %v14265_v36  ;;  %v10554_v5 = vld [vmem:[#allocation2 + $0x5a8] ss:$16 sps:$4 sm:$0xff]   ;;  %v10569_v45 = vld [vmem:[#allocation2 + $0x56c] ss:$16 sps:$4 sm:$0xff]  }
 0x1de   :  { %5387 = vmatprep.mubr.bf16.mxu1 %v11368_v61  ;;  %v4592_v14 = vpop.f32.mrf.mxu0  ;;  %v10557_v23 = vld [vmem:[#allocation2 + $0x388] ss:$16 sps:$4 sm:$0xff]  }
 0x1df   :  { %v4705_v2 = vpop.f32.mrf.mxu1  ;;  %v12496_v8 = vadd.f32 %v4703_v3, %v4591_v39  ;;  %v4593_v24 = vadd.f32 %v4592_v14, %v12328_v15  ;;  %5437 = vmatpush2.bf16.msra.mxu0 %v10544_v60  ;;  %v11369_v15 = vld [vmem:[%s14250_s0 + $0x2a8] ss:$68 sps:$4 sm:$0xff]   ;;  %v11370_v3 = vld [vmem:[%s14250_s0 + $0x334] ss:$68 sps:$4 sm:$0xff]  }
 0x1e0   :  { %5550 = vmatpush2.bf16.msra.mxu1 %v10547_v50  ;;  %v4594_v49 = vpop.f32.mrf.mxu0  ;;  %5438 = vmatprep.subr.bf16.mxu0 %v10553_v52  ;;  %v10560_v35 = vld [vmem:[#allocation2 + $0x588] ss:$16 sps:$4 sm:$0xff]  }
 0x1e1   :  { %v4707_v12 = vpop.f32.mrf.mxu1  ;;  %5551 = vmatprep.subr.bf16.mxu1 %v10556_v56  ;;  %v12499_v33 = vadd.f32 %v4705_v2, %v4593_v24  ;;  %v4595_v21 = vadd.f32 %v4594_v49, %v12331_v20  ;;  %v10566_v20 = vld [vmem:[#allocation2 + $0x36c] ss:$16 sps:$4 sm:$0xff]   ;;  %v10564_v39 = vld [vmem:[#allocation2 + $0x368] ss:$16 sps:$4 sm:$0xff]  }
 0x1e2   :  { %v4598_v16 = vpop.f32.mrf.mxu0  ;;  %5275 = vmatmul.mubr.bf16.gmra.mxu0 %v10550_v59  ;;  %v10575_v24 = vld [vmem:[#allocation2 + $0x54c] ss:$16 sps:$4 sm:$0xff]  }
 0x1e3   :  { %v4711_v26 = vpop.f32.mrf.mxu1  ;;  %5388 = vmatmul.mubr.bf16.gmra.mxu1 %v11369_v15  ;;  %v12505_v29 = vadd.f32 %v4707_v12, %v4595_v21  ;;  %v4599_v48 = vadd.f32 %v4598_v16, %v12334_v28  ;;  %5439 = vmatpush2.bf16.msra.mxu0 %v10551_v10  ;;  %v10563_v28 = vld [vmem:[%s14250_s0 + $0x370] ss:$68 sps:$4 sm:$0xff]   ;;  %v10572_v10 = vld [vmem:[#allocation2 + $0x34c] ss:$16 sps:$4 sm:$0xff]  }
 0x1e4   :  { %5552 = vmatpush2.bf16.msra.mxu1 %v10554_v5  ;;  %v4600_v41 = vpop.f32.mrf.mxu0  ;;  %5440 = vmatprep.subr.bf16.mxu0 %v10559_v18 }
 0x1e5   :  { %v4713_v60 = vpop.f32.mrf.mxu1  ;;  %5553 = vmatprep.subr.bf16.mxu1 %v10562_v55  ;;  %v12508_v50 = vadd.f32 %v4711_v26, %v4599_v48  ;;  %v4601_v7 = vadd.f32 %v4600_v41, %v12343_v38  ;;  %5284 = vmatprep.mubr.bf16.mxu0 %v14265_v36  ;;  %v10567_v38 = vld [vmem:[#allocation2 + $0x568] ss:$16 sps:$4 sm:$0xff]   ;;  %v10582_v48 = vld [vmem:[#allocation2 + $0x52c] ss:$16 sps:$4 sm:$0xff]  }
 0x1e6   :  { %5397 = vmatprep.mubr.bf16.mxu1 %v11370_v3  ;;  %v4602_v52 = vpop.f32.mrf.mxu0  ;;  %v10570_v55 = vld [vmem:[#allocation2 + $0x348] ss:$16 sps:$4 sm:$0xff]  }
 0x1e7   :  { %v4715_v56 = vpop.f32.mrf.mxu1  ;;  %v12518_v61 = vadd.f32 %v4713_v60, %v4601_v7  ;;  %v4603_v59 = vadd.f32 %v4602_v52, %v12352_v53  ;;  %5441 = vmatpush2.bf16.msra.mxu0 %v10557_v23  ;;  %v11371_v53 = vld [vmem:[%s14250_s0 + $0x330] ss:$68 sps:$4 sm:$0xff]   ;;  %v10573_v26 = vld [vmem:[#allocation2 + $0x548] ss:$16 sps:$4 sm:$0xff]   ;;  %v11372_v60 = vld [vmem:[%s14250_s0 + $0x3bc] ss:$68 sps:$4 sm:$0xff]  }
 0x1e8   :  { %5554 = vmatpush2.bf16.msra.mxu1 %v10560_v35  ;;  %v4604_v14 = vpop.f32.mrf.mxu0  ;;  %5442 = vmatprep.subr.bf16.mxu0 %v10566_v20  ;;  %v10577_v7 = vld [vmem:[#allocation2 + $0x328] ss:$16 sps:$4 sm:$0xff]  }
 0x1e9   :  { %v4717_v2 = vpop.f32.mrf.mxu1  ;;  %5555 = vmatprep.subr.bf16.mxu1 %v10569_v45  ;;  %v12521_v5 = vadd.f32 %v4715_v56, %v4603_v59  ;;  %v4605_v49 = vadd.f32 %v4604_v14, %v12355_v58  ;;  %v10579_v58 = vld [vmem:[#allocation2 + $0x32c] ss:$16 sps:$4 sm:$0xff]  }
 0x1ea   :  { %v4608_v12 = vpop.f32.mrf.mxu0  ;;  %5285 = vmatmul.mubr.bf16.gmra.mxu0 %v10563_v28  ;;  %v10588_v59 = vld [vmem:[#allocation2 + $0x50c] ss:$16 sps:$4 sm:$0xff]  }
 0x1eb   :  { %v4721_v18 = vpop.f32.mrf.mxu1  ;;  %5398 = vmatmul.mubr.bf16.gmra.mxu1 %v11371_v53  ;;  %v12527_v21 = vadd.f32 %v4717_v2, %v4605_v49  ;;  %v4609_v16 = vadd.f32 %v4608_v12, %v12358_v4  ;;  %5443 = vmatpush2.bf16.msra.mxu0 %v10564_v39  ;;  %v10576_v4 = vld [vmem:[%s14250_s0 + $0x3f8] ss:$68 sps:$4 sm:$0xff]  }
 0x1ec   :  { %5556 = vmatpush2.bf16.msra.mxu1 %v10567_v38  ;;  %v4610_v15 = vpop.f32.mrf.mxu0  ;;  %5444 = vmatprep.subr.bf16.mxu0 %v10572_v10  ;;  %v10585_v39 = vld [vmem:[#allocation2 + $0x30c] ss:$16 sps:$4 sm:$0xff]  }
 0x1ed   :  { %v4723_v23 = vpop.f32.mrf.mxu1  ;;  %5557 = vmatprep.subr.bf16.mxu1 %v10575_v24  ;;  %v12530_v35 = vadd.f32 %v4721_v18, %v4609_v16  ;;  %v4611_v41 = vadd.f32 %v4610_v15, %v12367_v13  ;;  %5294 = vmatprep.mubr.bf16.mxu0 %v14265_v36  ;;  %v10580_v13 = vld [vmem:[#allocation2 + $0x528] ss:$16 sps:$4 sm:$0xff]   ;;  %v10594_v16 = vld [vmem:[#allocation2 + $0x8ec] ss:$16 sps:$4 sm:$0xff]  }
 0x1ee   :  { %5407 = vmatprep.mubr.bf16.mxu1 %v11372_v60  ;;  %v4612_v20 = vpop.f32.mrf.mxu0  ;;  %v10583_v24 = vld [vmem:[#allocation2 + $0x308] ss:$16 sps:$4 sm:$0xff]  }
 0x1ef   :  { %v4725_v45 = vpop.f32.mrf.mxu1  ;;  %v12540_v3 = vadd.f32 %v4723_v23, %v4611_v41  ;;  %v4613_v28 = vadd.f32 %v4612_v20, %v12370_v25  ;;  %5445 = vmatpush2.bf16.msra.mxu0 %v10570_v55  ;;  %v11373_v25 = vld [vmem:[%s14250_s0 + $0x3b8] ss:$68 sps:$4 sm:$0xff]   ;;  %v11374_v23 = vld [vmem:[%s14250_s0 + $0xc] ss:$68 sps:$4 sm:$0xff]  }
 0x1f0   :  { %5558 = vmatpush2.bf16.msra.mxu1 %v10573_v26  ;;  %v4614_v52 = vpop.f32.mrf.mxu0  ;;  %5446 = vmatprep.subr.bf16.mxu0 %v10579_v58  ;;  %v10586_v18 = vld [vmem:[#allocation2 + $0x508] ss:$16 sps:$4 sm:$0xff]  }
 0x1f1   :  { %v4727_v56 = vpop.f32.mrf.mxu1  ;;  %5559 = vmatprep.subr.bf16.mxu1 %v10582_v48  ;;  %v12543_v38 = vadd.f32 %v4725_v45, %v4613_v28  ;;  %v4615_v14 = vadd.f32 %v4614_v52, %v12373_v32  ;;  %v10591_v32 = vld [vmem:[#allocation2 + $0x6ec] ss:$16 sps:$4 sm:$0xff]   ;;  %v10589_v41 = vld [vmem:[#allocation2 + $0x6e8] ss:$16 sps:$4 sm:$0xff]  }
 0x1f2   :  { %v4618_v2 = vpop.f32.mrf.mxu0  ;;  %5295 = vmatmul.mubr.bf16.gmra.mxu0 %v10576_v4  ;;  %v10600_v28 = vld [vmem:[#allocation2 + $0x8cc] ss:$16 sps:$4 sm:$0xff]  }
 0x1f3   :  { %v4731_v10 = vpop.f32.mrf.mxu1  ;;  %5408 = vmatmul.mubr.bf16.gmra.mxu1 %v11373_v25  ;;  %v12549_v49 = vadd.f32 %v4727_v56, %v4615_v14  ;;  %v4619_v12 = vadd.f32 %v4618_v2, %v12380_v47  ;;  %5447 = vmatpush2.bf16.msra.mxu0 %v10577_v7  ;;  %v11375_v47 = vld [vmem:[%s14250_s0 + $0x14] ss:$68 sps:$4 sm:$0xff]   ;;  %v10597_v7 = vld [vmem:[#allocation2 + $0x6cc] ss:$16 sps:$4 sm:$0xff]  }
 0x1f4   :  { %5560 = vmatpush2.bf16.msra.mxu1 %v10580_v13  ;;  %v4620_v53 = vpop.f32.mrf.mxu0  ;;  %5448 = vmatprep.subr.bf16.mxu0 %v10585_v39  ;;  %v10595_v14 = vld [vmem:[#allocation2 + $0x6c8] ss:$16 sps:$4 sm:$0xff]  }
 0x1f5   :  { %v4733_v55 = vpop.f32.mrf.mxu1  ;;  %5561 = vmatprep.subr.bf16.mxu1 %v10588_v59  ;;  %v12552_v26 = vadd.f32 %v4731_v10, %v4619_v12  ;;  %v4621_v15 = vadd.f32 %v4620_v53, %v12386_v62  ;;  %5450 = vmatprep.mubr.bf16.mxu0 %v11374_v23  ;;  %v10592_v62 = vld [vmem:[#allocation2 + $0x8e8] ss:$16 sps:$4 sm:$0xff]   ;;  %v10603_v12 = vld [vmem:[#allocation2 + $0x6ac] ss:$16 sps:$4 sm:$0xff]  }
 0x1f6   :  { %5563 = vmatprep.mubr.bf16.mxu1 %v11375_v47  ;;  %v4622_v58 = vpop.f32.mrf.mxu0  ;;  %v11376_v59 = vld [vmem:[%s14250_s0 + $0x8] ss:$68 sps:$4 sm:$0xff]  }
 0x1f7   :  { %v4735_v48 = vpop.f32.mrf.mxu1  ;;  %v12561_v60 = vadd.f32 %v4733_v55, %v4621_v15  ;;  %v4623_v4 = vadd.f32 %v4622_v58, %v12389_v9  ;;  %5449 = vmatpush2.bf16.msra.mxu0 %v10583_v24  ;;  %v11377_v9 = vld [vmem:[%s14250_s0 + $0x10] ss:$68 sps:$4 sm:$0xff]   ;;  %v10601_v23 = vld [vmem:[#allocation2 + $0x6a8] ss:$16 sps:$4 sm:$0xff]  }
 0x1f8   :  { %5562 = vmatpush2.bf16.msra.mxu1 %v10586_v18  ;;  %v4624_v20 = vpop.f32.mrf.mxu0  ;;  %5644 = vmatprep.subr.bf16.mxu0 %v10591_v32  ;;  %v10606_v18 = vld [vmem:[#allocation2 + $0x8ac] ss:$16 sps:$4 sm:$0xff]   ;;  %v11378_v32 = vld [vmem:[%s14250_s0 + $0x94] ss:$68 sps:$4 sm:$0xff]  }
 0x1f9   :  { %v4737_v45 = vpop.f32.mrf.mxu1  ;;  %5757 = vmatprep.subr.bf16.mxu1 %v10594_v16  ;;  %v12564_v13 = vadd.f32 %v4735_v48, %v4623_v4  ;;  %v4625_v52 = vadd.f32 %v4624_v20, %v12395_v44  ;;  %v10598_v44 = vld [vmem:[#allocation2 + $0x8c8] ss:$16 sps:$4 sm:$0xff]   ;;  %v10609_v4 = vld [vmem:[#allocation2 + $0x68c] ss:$16 sps:$4 sm:$0xff]  }
 0x1fa   :  { %v4774_v56 = vpop.f32.mrf.mxu0  ;;  %5451 = vmatmul.mubr.bf16.vlgmr.msra.gmra.mxu0 %v11376_v59 }
 0x1fb   :  { %v4887_v39 = vpop.f32.mrf.mxu1  ;;  %5564 = vmatmul.mubr.bf16.vlgmr.msra.gmra.mxu1 %v11377_v9  ;;  %v12573_v2 = vadd.f32 %v4737_v45, %v4625_v52  ;;  %v4775_v10 = vadd.f32 %v4774_v56, %v12398_v34  ;;  %5645 = vmatpush1.bf16.msra.mxu0 %v10589_v41  ;;  %v11379_v34 = vld [vmem:[%s14250_s0 + $0x9c] ss:$68 sps:$4 sm:$0xff]   ;;  %v11380_v52 = vld [vmem:[%s14250_s0 + $0x90] ss:$68 sps:$4 sm:$0xff]   ;;  %v10607_v56 = vld [vmem:[#allocation2 + $0x688] ss:$16 sps:$4 sm:$0xff]  }
 0x1fc   :  { %5758 = vmatpush1.bf16.msra.mxu1 %v10592_v62  ;;  %v4776_v25 = vpop.f32.mrf.mxu0  ;;  %5646 = vmatprep.subr.bf16.mxu0 %v10597_v7  ;;  %v10612_v62 = vld [vmem:[#allocation2 + $0x88c] ss:$16 sps:$4 sm:$0xff]  }
 0x1fd   :  { %v4889_v24 = vpop.f32.mrf.mxu1  ;;  %5759 = vmatprep.subr.bf16.mxu1 %v10600_v28  ;;  %v12576_v53 = vadd.f32 %v4887_v39, %v4775_v10  ;;  %v4777_v55 = vadd.f32 %v4776_v25, %v12408_v46  ;;  %5460 = vmatprep.mubr.bf16.mxu0 %v11378_v32  ;;  %v10604_v46 = vld [vmem:[#allocation2 + $0x8a8] ss:$16 sps:$4 sm:$0xff]   ;;  %v10615_v10 = vld [vmem:[#allocation2 + $0x66c] ss:$16 sps:$4 sm:$0xff]  }
 0x1fe   :  { %5573 = vmatprep.mubr.bf16.mxu1 %v11379_v34  ;;  %v4778_v16 = vpop.f32.mrf.mxu0  ;;  %v10613_v32 = vld [vmem:[#allocation2 + $0x668] ss:$16 sps:$4 sm:$0xff]  }
 0x1ff   :  { %v4891_v15 = vpop.f32.mrf.mxu1  ;;  %v12585_v47 = vadd.f32 %v4889_v24, %v4777_v55  ;;  %v4779_v58 = vadd.f32 %v4778_v16, %v12411_v0  ;;  %5647 = vmatpush1.bf16.msra.mxu0 %v10595_v14  ;;  %v11381_v0 = vld [vmem:[%s14250_s0 + $0x98] ss:$68 sps:$4 sm:$0xff]  }
 0x200   :  { %5760 = vmatpush1.bf16.msra.mxu1 %v10598_v44  ;;  %v4780_v48 = vpop.f32.mrf.mxu0  ;;  %5648 = vmatprep.subr.bf16.mxu0 %v10603_v12  ;;  %v10618_v44 = vld [vmem:[#allocation2 + $0x86c] ss:$16 sps:$4 sm:$0xff]  }
 0x201   :  { %v4893_v41 = vpop.f32.mrf.mxu1  ;;  %5761 = vmatprep.subr.bf16.mxu1 %v10606_v18  ;;  %v12588_v20 = vadd.f32 %v4891_v15, %v4779_v58  ;;  %v4781_v45 = vadd.f32 %v4780_v48, %v12417_v11  ;;  %v10610_v11 = vld [vmem:[#allocation2 + $0x888] ss:$16 sps:$4 sm:$0xff]   ;;  %v11382_v12 = vld [vmem:[%s14250_s0 + $0x11c] ss:$68 sps:$4 sm:$0xff]  }
 0x202   :  { %v4784_v7 = vpop.f32.mrf.mxu0  ;;  %5461 = vmatmul.mubr.bf16.gmra.mxu0 %v11380_v52  ;;  %v10621_v58 = vld [vmem:[#allocation2 + $0x64c] ss:$16 sps:$4 sm:$0xff]  }
 0x203   :  { %v4897_v28 = vpop.f32.mrf.mxu1  ;;  %5574 = vmatmul.mubr.bf16.gmra.mxu1 %v11381_v0  ;;  %v12597_v39 = vadd.f32 %v4893_v41, %v4781_v45  ;;  %v4785_v59 = vadd.f32 %v4784_v7, %v12420_v22  ;;  %5649 = vmatpush1.bf16.msra.mxu0 %v10601_v23  ;;  %v11383_v22 = vld [vmem:[%s14250_s0 + $0x124] ss:$68 sps:$4 sm:$0xff]   ;;  %v11384_v45 = vld [vmem:[%s14250_s0 + $0x118] ss:$68 sps:$4 sm:$0xff]  }
 0x204   :  { %5762 = vmatpush1.bf16.msra.mxu1 %v10604_v46  ;;  %v4786_v9 = vpop.f32.mrf.mxu0  ;;  %5650 = vmatprep.subr.bf16.mxu0 %v10609_v4  ;;  %v10624_v46 = vld [vmem:[#allocation2 + $0x84c] ss:$16 sps:$4 sm:$0xff]   ;;  %v10619_v7 = vld [vmem:[#allocation2 + $0x648] ss:$16 sps:$4 sm:$0xff]  }
 0x205   :  { %v4899_v14 = vpop.f32.mrf.mxu1  ;;  %5763 = vmatprep.subr.bf16.mxu1 %v10612_v62  ;;  %v12600_v25 = vadd.f32 %v4897_v28, %v4785_v59  ;;  %v4787_v24 = vadd.f32 %v4786_v9, %v12430_v40  ;;  %5470 = vmatprep.mubr.bf16.mxu0 %v11382_v12  ;;  %v10616_v40 = vld [vmem:[#allocation2 + $0x868] ss:$16 sps:$4 sm:$0xff]   ;;  %v10627_v59 = vld [vmem:[#allocation2 + $0x62c] ss:$16 sps:$4 sm:$0xff]  }
 0x206   :  { %5583 = vmatprep.mubr.bf16.mxu1 %v11383_v22  ;;  %v4788_v18 = vpop.f32.mrf.mxu0  ;;  %v10625_v12 = vld [vmem:[#allocation2 + $0x628] ss:$16 sps:$4 sm:$0xff]  }
 0x207   :  { %v4901_v55 = vpop.f32.mrf.mxu1  ;;  %v12609_v34 = vadd.f32 %v4899_v14, %v4787_v24  ;;  %v4789_v16 = vadd.f32 %v4788_v18, %v12433_v51  ;;  %5651 = vmatpush1.bf16.msra.mxu0 %v10607_v56  ;;  %v11385_v51 = vld [vmem:[%s14250_s0 + $0x120] ss:$68 sps:$4 sm:$0xff]  }
 0x208   :  { %5764 = vmatpush1.bf16.msra.mxu1 %v10610_v11  ;;  %v4790_v15 = vpop.f32.mrf.mxu0  ;;  %5652 = vmatprep.subr.bf16.mxu0 %v10615_v10  ;;  %v10630_v11 = vld [vmem:[#allocation2 + $0x82c] ss:$16 sps:$4 sm:$0xff]   ;;  %v11386_v10 = vld [vmem:[%s14250_s0 + $0x1a4] ss:$68 sps:$4 sm:$0xff]  }
 0x209   :  { %v4903_v23 = vpop.f32.mrf.mxu1  ;;  %5765 = vmatprep.subr.bf16.mxu1 %v10618_v44  ;;  %v12612_v48 = vadd.f32 %v4901_v55, %v4789_v16  ;;  %v4791_v41 = vadd.f32 %v4790_v15, %v12439_v1  ;;  %v10622_v1 = vld [vmem:[#allocation2 + $0x848] ss:$16 sps:$4 sm:$0xff]   ;;  %v10633_v16 = vld [vmem:[#allocation2 + $0x60c] ss:$16 sps:$4 sm:$0xff]  }
 0x20a   :  { %v4794_v4 = vpop.f32.mrf.mxu0  ;;  %5471 = vmatmul.mubr.bf16.gmra.mxu0 %v11384_v45 }
 0x20b   :  { %v4907_v62 = vpop.f32.mrf.mxu1  ;;  %5584 = vmatmul.mubr.bf16.gmra.mxu1 %v11385_v51  ;;  %v12621_v28 = vadd.f32 %v4903_v23, %v4791_v41  ;;  %v4795_v52 = vadd.f32 %v4794_v4, %v12442_v17  ;;  %5653 = vmatpush1.bf16.msra.mxu0 %v10613_v32  ;;  %v11387_v17 = vld [vmem:[%s14250_s0 + $0x1ac] ss:$68 sps:$4 sm:$0xff]   ;;  %v11388_v41 = vld [vmem:[%s14250_s0 + $0x1a0] ss:$68 sps:$4 sm:$0xff]   ;;  %v10631_v4 = vld [vmem:[#allocation2 + $0x608] ss:$16 sps:$4 sm:$0xff]  }
 0x20c   :  { %5766 = vmatpush1.bf16.msra.mxu1 %v10616_v40  ;;  %v4796_v0 = vpop.f32.mrf.mxu0  ;;  %5654 = vmatprep.subr.bf16.mxu0 %v10621_v58  ;;  %v10636_v40 = vld [vmem:[#allocation2 + $0x80c] ss:$16 sps:$4 sm:$0xff]  }
 0x20d   :  { %v4909_v56 = vpop.f32.mrf.mxu1  ;;  %5767 = vmatprep.subr.bf16.mxu1 %v10624_v46  ;;  %v12624_v9 = vadd.f32 %v4907_v62, %v4795_v52  ;;  %v4797_v14 = vadd.f32 %v4796_v0, %v12452_v27  ;;  %5480 = vmatprep.mubr.bf16.mxu0 %v11386_v10  ;;  %v10628_v27 = vld [vmem:[#allocation2 + $0x828] ss:$16 sps:$4 sm:$0xff]   ;;  %v10639_v52 = vld [vmem:[#allocation2 + $0x7ec] ss:$16 sps:$4 sm:$0xff]  }
 0x20e   :  { %5593 = vmatprep.mubr.bf16.mxu1 %v11387_v17  ;;  %v4798_v44 = vpop.f32.mrf.mxu0  ;;  %v10637_v10 = vld [vmem:[#allocation2 + $0x7e8] ss:$16 sps:$4 sm:$0xff]  }
 0x20f   :  { %v4911_v24 = vpop.f32.mrf.mxu1  ;;  %v12633_v22 = vadd.f32 %v4909_v56, %v4797_v14  ;;  %v4799_v18 = vadd.f32 %v4798_v44, %v12455_v31  ;;  %5655 = vmatpush1.bf16.msra.mxu0 %v10619_v7  ;;  %v11389_v31 = vld [vmem:[%s14250_s0 + $0x1a8] ss:$68 sps:$4 sm:$0xff]  }
 0x210   :  { %5768 = vmatpush1.bf16.msra.mxu1 %v10622_v1  ;;  %v4800_v55 = vpop.f32.mrf.mxu0  ;;  %5656 = vmatprep.subr.bf16.mxu0 %v10627_v59  ;;  %v10642_v1 = vld [vmem:[#allocation2 + $0x9ec] ss:$16 sps:$4 sm:$0xff]  }
 0x211   :  { %v4913_v32 = vpop.f32.mrf.mxu1  ;;  %5769 = vmatprep.subr.bf16.mxu1 %v10630_v11  ;;  %v12636_v15 = vadd.f32 %v4911_v24, %v4799_v18  ;;  %v4801_v23 = vadd.f32 %v4800_v55, %v12461_v54  ;;  %v10634_v54 = vld [vmem:[#allocation2 + $0x808] ss:$16 sps:$4 sm:$0xff]   ;;  %v11390_v59 = vld [vmem:[%s14250_s0 + $0x22c] ss:$68 sps:$4 sm:$0xff]  }
 0x212   :  { %v4804_v58 = vpop.f32.mrf.mxu0  ;;  %5481 = vmatmul.mubr.bf16.gmra.mxu0 %v11388_v41  ;;  %v10645_v18 = vld [vmem:[#allocation2 + $0x7cc] ss:$16 sps:$4 sm:$0xff]  }
 0x213   :  { %v4917_v46 = vpop.f32.mrf.mxu1  ;;  %5594 = vmatmul.mubr.bf16.gmra.mxu1 %v11389_v31  ;;  %v12645_v62 = vadd.f32 %v4913_v32, %v4801_v23  ;;  %v4805_v45 = vadd.f32 %v4804_v58, %v12464_v6  ;;  %5657 = vmatpush1.bf16.msra.mxu0 %v10625_v12  ;;  %v11391_v6 = vld [vmem:[%s14250_s0 + $0x234] ss:$68 sps:$4 sm:$0xff]   ;;  %v11392_v23 = vld [vmem:[%s14250_s0 + $0x228] ss:$68 sps:$4 sm:$0xff]  }
 0x214   :  { %5770 = vmatpush1.bf16.msra.mxu1 %v10628_v27  ;;  %v4806_v51 = vpop.f32.mrf.mxu0  ;;  %5658 = vmatprep.subr.bf16.mxu0 %v10633_v16  ;;  %v10648_v27 = vld [vmem:[#allocation2 + $0x9cc] ss:$16 sps:$4 sm:$0xff]   ;;  %v10643_v58 = vld [vmem:[#allocation2 + $0x7c8] ss:$16 sps:$4 sm:$0xff]  }
 0x215   :  { %v4919_v7 = vpop.f32.mrf.mxu1  ;;  %5771 = vmatprep.subr.bf16.mxu1 %v10636_v40  ;;  %v12648_v0 = vadd.f32 %v4917_v46, %v4805_v45  ;;  %v4807_v56 = vadd.f32 %v4806_v51, %v12474_v19  ;;  %5490 = vmatprep.mubr.bf16.mxu0 %v11390_v59  ;;  %v10640_v19 = vld [vmem:[#allocation2 + $0x9e8] ss:$16 sps:$4 sm:$0xff]   ;;  %v10651_v45 = vld [vmem:[#allocation2 + $0x7ac] ss:$16 sps:$4 sm:$0xff]  }
 0x216   :  { %5603 = vmatprep.mubr.bf16.mxu1 %v11391_v6  ;;  %v4808_v11 = vpop.f32.mrf.mxu0  ;;  %v10649_v59 = vld [vmem:[#allocation2 + $0x7a8] ss:$16 sps:$4 sm:$0xff]  }
 0x217   :  { %v4921_v14 = vpop.f32.mrf.mxu1  ;;  %v12657_v17 = vadd.f32 %v4919_v7, %v4807_v56  ;;  %v4809_v44 = vadd.f32 %v4808_v11, %v12477_v63  ;;  %5659 = vmatpush1.bf16.msra.mxu0 %v10631_v4  ;;  %v11393_v63 = vld [vmem:[%s14250_s0 + $0x230] ss:$68 sps:$4 sm:$0xff]  }
 0x218   :  { %5772 = vmatpush1.bf16.msra.mxu1 %v10634_v54  ;;  %v4810_v24 = vpop.f32.mrf.mxu0  ;;  %5660 = vmatprep.subr.bf16.mxu0 %v10639_v52  ;;  %v10654_v54 = vld [vmem:[#allocation2 + $0x9ac] ss:$16 sps:$4 sm:$0xff]   ;;  %v11394_v52 = vld [vmem:[%s14250_s0 + $0x2b4] ss:$68 sps:$4 sm:$0xff]  }
 0x219   :  { %v4923_v12 = vpop.f32.mrf.mxu1  ;;  %5773 = vmatprep.subr.bf16.mxu1 %v10642_v1  ;;  %v12660_v55 = vadd.f32 %v4921_v14, %v4809_v44  ;;  %v4811_v32 = vadd.f32 %v4810_v24, %v12483_v43  ;;  %v10646_v43 = vld [vmem:[#allocation2 + $0x9c8] ss:$16 sps:$4 sm:$0xff]   ;;  %v10657_v44 = vld [vmem:[#allocation2 + $0x78c] ss:$16 sps:$4 sm:$0xff]  }
 0x21a   :  { %v4814_v16 = vpop.f32.mrf.mxu0  ;;  %5491 = vmatmul.mubr.bf16.gmra.mxu0 %v11392_v23 }
 0x21b   :  { %v4927_v40 = vpop.f32.mrf.mxu1  ;;  %5604 = vmatmul.mubr.bf16.gmra.mxu1 %v11393_v63  ;;  %v12669_v46 = vadd.f32 %v4923_v12, %v4811_v32  ;;  %v4815_v41 = vadd.f32 %v4814_v16, %v12486_v57  ;;  %5661 = vmatpush2.bf16.msra.mxu0 %v10637_v10  ;;  %v11395_v57 = vld [vmem:[%s14250_s0 + $0x2bc] ss:$68 sps:$4 sm:$0xff]   ;;  %v11396_v32 = vld [vmem:[%s14250_s0 + $0x2b0] ss:$68 sps:$4 sm:$0xff]   ;;  %v10655_v16 = vld [vmem:[#allocation2 + $0x788] ss:$16 sps:$4 sm:$0xff]  }
 0x21c   :  { %5774 = vmatpush2.bf16.msra.mxu1 %v10640_v19  ;;  %v4816_v31 = vpop.f32.mrf.mxu0  ;;  %5662 = vmatprep.subr.bf16.mxu0 %v10645_v18  ;;  %v10660_v19 = vld [vmem:[#allocation2 + $0x98c] ss:$16 sps:$4 sm:$0xff]  }
 0x21d   :  { %v4929_v4 = vpop.f32.mrf.mxu1  ;;  %5775 = vmatprep.subr.bf16.mxu1 %v10648_v27  ;;  %v12672_v51 = vadd.f32 %v4927_v40, %v4815_v41  ;;  %v4817_v7 = vadd.f32 %v4816_v31, %v12496_v8  ;;  %5500 = vmatprep.mubr.bf16.mxu0 %v11394_v52  ;;  %v10652_v8 = vld [vmem:[#allocation2 + $0x9a8] ss:$16 sps:$4 sm:$0xff]   ;;  %v10663_v41 = vld [vmem:[#allocation2 + $0x76c] ss:$16 sps:$4 sm:$0xff]  }
 0x21e   :  { %5613 = vmatprep.mubr.bf16.mxu1 %v11395_v57  ;;  %v4818_v1 = vpop.f32.mrf.mxu0  ;;  %v10661_v52 = vld [vmem:[#allocation2 + $0x768] ss:$16 sps:$4 sm:$0xff]  }
 0x21f   :  { %v4931_v56 = vpop.f32.mrf.mxu1  ;;  %v12681_v6 = vadd.f32 %v4929_v4, %v4817_v7  ;;  %v4819_v11 = vadd.f32 %v4818_v1, %v12499_v33  ;;  %5663 = vmatpush2.bf16.msra.mxu0 %v10643_v58  ;;  %v11397_v33 = vld [vmem:[%s14250_s0 + $0x2b8] ss:$68 sps:$4 sm:$0xff]  }
 0x220   :  { %5776 = vmatpush2.bf16.msra.mxu1 %v10646_v43  ;;  %v4820_v14 = vpop.f32.mrf.mxu0  ;;  %5664 = vmatprep.subr.bf16.mxu0 %v10651_v45  ;;  %v10666_v43 = vld [vmem:[#allocation2 + $0x96c] ss:$16 sps:$4 sm:$0xff]  }
 0x221   :  { %v4933_v10 = vpop.f32.mrf.mxu1  ;;  %5777 = vmatprep.subr.bf16.mxu1 %v10654_v54  ;;  %v12684_v24 = vadd.f32 %v4931_v56, %v4819_v11  ;;  %v4821_v12 = vadd.f32 %v4820_v14, %v12505_v29  ;;  %v10658_v29 = vld [vmem:[#allocation2 + $0x988] ss:$16 sps:$4 sm:$0xff]   ;;  %v11398_v45 = vld [vmem:[%s14250_s0 + $0x33c] ss:$68 sps:$4 sm:$0xff]  }
 0x222   :  { %v4824_v18 = vpop.f32.mrf.mxu0  ;;  %5501 = vmatmul.mubr.bf16.gmra.mxu0 %v11396_v32  ;;  %v10669_v11 = vld [vmem:[#allocation2 + $0x74c] ss:$16 sps:$4 sm:$0xff]  }
 0x223   :  { %v4937_v27 = vpop.f32.mrf.mxu1  ;;  %5614 = vmatmul.mubr.bf16.gmra.mxu1 %v11397_v33  ;;  %v12693_v40 = vadd.f32 %v4933_v10, %v4821_v12  ;;  %v4825_v23 = vadd.f32 %v4824_v18, %v12508_v50  ;;  %5665 = vmatpush2.bf16.msra.mxu0 %v10649_v59  ;;  %v11399_v50 = vld [vmem:[%s14250_s0 + $0x344] ss:$68 sps:$4 sm:$0xff]   ;;  %v11400_v12 = vld [vmem:[%s14250_s0 + $0x338] ss:$68 sps:$4 sm:$0xff]  }
 0x224   :  { %5778 = vmatpush2.bf16.msra.mxu1 %v10652_v8  ;;  %v4826_v63 = vpop.f32.mrf.mxu0  ;;  %5666 = vmatprep.subr.bf16.mxu0 %v10657_v44  ;;  %v10672_v8 = vld [vmem:[#allocation2 + $0x94c] ss:$16 sps:$4 sm:$0xff]   ;;  %v10667_v18 = vld [vmem:[#allocation2 + $0x748] ss:$16 sps:$4 sm:$0xff]  }
 0x225   :  { %v4939_v58 = vpop.f32.mrf.mxu1  ;;  %5779 = vmatprep.subr.bf16.mxu1 %v10660_v19  ;;  %v12696_v31 = vadd.f32 %v4937_v27, %v4825_v23  ;;  %v4827_v4 = vadd.f32 %v4826_v63, %v12518_v61  ;;  %5510 = vmatprep.mubr.bf16.mxu0 %v11398_v45  ;;  %v10664_v61 = vld [vmem:[#allocation2 + $0x968] ss:$16 sps:$4 sm:$0xff]   ;;  %v10675_v23 = vld [vmem:[#allocation2 + $0x72c] ss:$16 sps:$4 sm:$0xff]  }
 0x226   :  { %5623 = vmatprep.mubr.bf16.mxu1 %v11399_v50  ;;  %v4828_v54 = vpop.f32.mrf.mxu0  ;;  %v10673_v45 = vld [vmem:[#allocation2 + $0x728] ss:$16 sps:$4 sm:$0xff]  }
 0x227   :  { %v4941_v7 = vpop.f32.mrf.mxu1  ;;  %v12705_v57 = vadd.f32 %v4939_v58, %v4827_v4  ;;  %v4829_v1 = vadd.f32 %v4828_v54, %v12521_v5  ;;  %5667 = vmatpush2.bf16.msra.mxu0 %v10655_v16  ;;  %v11401_v5 = vld [vmem:[%s14250_s0 + $0x340] ss:$68 sps:$4 sm:$0xff]  }
 0x228   :  { %5780 = vmatpush2.bf16.msra.mxu1 %v10658_v29  ;;  %v4830_v56 = vpop.f32.mrf.mxu0  ;;  %5668 = vmatprep.subr.bf16.mxu0 %v10663_v41  ;;  %v10678_v29 = vld [vmem:[#allocation2 + $0x92c] ss:$16 sps:$4 sm:$0xff]   ;;  %v11402_v41 = vld [vmem:[%s14250_s0 + $0x3c4] ss:$68 sps:$4 sm:$0xff]  }
 0x229   :  { %v4943_v59 = vpop.f32.mrf.mxu1  ;;  %5781 = vmatprep.subr.bf16.mxu1 %v10666_v43  ;;  %v12708_v14 = vadd.f32 %v4941_v7, %v4829_v1  ;;  %v4831_v10 = vadd.f32 %v4830_v56, %v12527_v21  ;;  %v10670_v21 = vld [vmem:[#allocation2 + $0x948] ss:$16 sps:$4 sm:$0xff]   ;;  %v10681_v1 = vld [vmem:[#allocation2 + $0x70c] ss:$16 sps:$4 sm:$0xff]  }
 0x22a   :  { %v4834_v44 = vpop.f32.mrf.mxu0  ;;  %5511 = vmatmul.mubr.bf16.gmra.mxu0 %v11400_v12 }
 0x22b   :  { %v4947_v19 = vpop.f32.mrf.mxu1  ;;  %5624 = vmatmul.mubr.bf16.gmra.mxu1 %v11401_v5  ;;  %v12717_v27 = vadd.f32 %v4943_v59, %v4831_v10  ;;  %v4835_v32 = vadd.f32 %v4834_v44, %v12530_v35  ;;  %5669 = vmatpush2.bf16.msra.mxu0 %v10661_v52  ;;  %v11403_v35 = vld [vmem:[%s14250_s0 + $0x3cc] ss:$68 sps:$4 sm:$0xff]   ;;  %v11404_v10 = vld [vmem:[%s14250_s0 + $0x3c0] ss:$68 sps:$4 sm:$0xff]   ;;  %v10679_v44 = vld [vmem:[#allocation2 + $0x708] ss:$16 sps:$4 sm:$0xff]  }
 0x22c   :  { %5782 = vmatpush2.bf16.msra.mxu1 %v10664_v61  ;;  %v4836_v33 = vpop.f32.mrf.mxu0  ;;  %5670 = vmatprep.subr.bf16.mxu0 %v10669_v11  ;;  %v10684_v61 = vld [vmem:[#allocation2 + $0x90c] ss:$16 sps:$4 sm:$0xff]  }
 0x22d   :  { %v4949_v16 = vpop.f32.mrf.mxu1  ;;  %5783 = vmatprep.subr.bf16.mxu1 %v10672_v8  ;;  %v12720_v63 = vadd.f32 %v4947_v19, %v4835_v32  ;;  %v4837_v58 = vadd.f32 %v4836_v33, %v12540_v3  ;;  %5520 = vmatprep.mubr.bf16.mxu0 %v11402_v41  ;;  %v10676_v3 = vld [vmem:[#allocation2 + $0x928] ss:$16 sps:$4 sm:$0xff]   ;;  %v10687_v32 = vld [vmem:[#allocation2 + $0xaec] ss:$16 sps:$4 sm:$0xff]  }
 0x22e   :  { %5633 = vmatprep.mubr.bf16.mxu1 %v11403_v35  ;;  %v4838_v43 = vpop.f32.mrf.mxu0  ;;  %v10685_v41 = vld [vmem:[#allocation2 + $0xae8] ss:$16 sps:$4 sm:$0xff]  }
 0x22f   :  { %v4951_v4 = vpop.f32.mrf.mxu1  ;;  %v12729_v50 = vadd.f32 %v4949_v16, %v4837_v58  ;;  %v4839_v54 = vadd.f32 %v4838_v43, %v12543_v38  ;;  %5671 = vmatpush2.bf16.msra.mxu0 %v10667_v18  ;;  %v11405_v38 = vld [vmem:[%s14250_s0 + $0x3c8] ss:$68 sps:$4 sm:$0xff]  }
 0x230   :  { %5784 = vmatpush2.bf16.msra.mxu1 %v10670_v21  ;;  %v4840_v7 = vpop.f32.mrf.mxu0  ;;  %5672 = vmatprep.subr.bf16.mxu0 %v10675_v23  ;;  %v10690_v21 = vld [vmem:[#allocation2 + $0xcec] ss:$16 sps:$4 sm:$0xff]  }
 0x231   :  { %v4953_v52 = vpop.f32.mrf.mxu1  ;;  %5785 = vmatprep.subr.bf16.mxu1 %v10678_v29  ;;  %v12732_v56 = vadd.f32 %v4951_v4, %v4839_v54  ;;  %v4841_v59 = vadd.f32 %v4840_v7, %v12549_v49  ;;  %v10682_v49 = vld [vmem:[#allocation2 + $0x908] ss:$16 sps:$4 sm:$0xff]   ;;  %v11406_v23 = vld [vmem:[%s14250_s0 + $0x1c] ss:$68 sps:$4 sm:$0xff]  }
 0x232   :  { %v4844_v11 = vpop.f32.mrf.mxu0  ;;  %5521 = vmatmul.mubr.bf16.gmra.mxu0 %v11404_v10  ;;  %v10693_v54 = vld [vmem:[#allocation2 + $0xacc] ss:$16 sps:$4 sm:$0xff]  }
 0x233   :  { %v4957_v8 = vpop.f32.mrf.mxu1  ;;  %5634 = vmatmul.mubr.bf16.gmra.mxu1 %v11405_v38  ;;  %v12741_v19 = vadd.f32 %v4953_v52, %v4841_v59  ;;  %v4845_v12 = vadd.f32 %v4844_v11, %v12552_v26  ;;  %5673 = vmatpush2.bf16.msra.mxu0 %v10673_v45  ;;  %v11407_v26 = vld [vmem:[%s14250_s0 + $0x24] ss:$68 sps:$4 sm:$0xff]   ;;  %v11408_v59 = vld [vmem:[%s14250_s0 + $0x18] ss:$68 sps:$4 sm:$0xff]  }
 0x234   :  { %5786 = vmatpush2.bf16.msra.mxu1 %v10676_v3  ;;  %v4846_v5 = vpop.f32.mrf.mxu0  ;;  %5674 = vmatprep.subr.bf16.mxu0 %v10681_v1  ;;  %v10696_v3 = vld [vmem:[#allocation2 + $0xccc] ss:$16 sps:$4 sm:$0xff]   ;;  %v10691_v11 = vld [vmem:[#allocation2 + $0xac8] ss:$16 sps:$4 sm:$0xff]  }
 0x235   :  { %v4959_v18 = vpop.f32.mrf.mxu1  ;;  %5787 = vmatprep.subr.bf16.mxu1 %v10684_v61  ;;  %v12744_v33 = vadd.f32 %v4957_v8, %v4845_v12  ;;  %v4847_v16 = vadd.f32 %v4846_v5, %v12561_v60  ;;  %5676 = vmatprep.mubr.bf16.mxu0 %v11406_v23  ;;  %v10688_v60 = vld [vmem:[#allocation2 + $0xce8] ss:$16 sps:$4 sm:$0xff]   ;;  %v10699_v12 = vld [vmem:[#allocation2 + $0xaac] ss:$16 sps:$4 sm:$0xff]  }
 0x236   :  { %5789 = vmatprep.mubr.bf16.mxu1 %v11407_v26  ;;  %v4848_v29 = vpop.f32.mrf.mxu0  ;;  %v10697_v23 = vld [vmem:[#allocation2 + $0xaa8] ss:$16 sps:$4 sm:$0xff]  }
 0x237   :  { %v4961_v58 = vpop.f32.mrf.mxu1  ;;  %v12753_v35 = vadd.f32 %v4959_v18, %v4847_v16  ;;  %v4849_v43 = vadd.f32 %v4848_v29, %v12564_v13  ;;  %5675 = vmatpush2.bf16.msra.mxu0 %v10679_v44  ;;  %v11409_v13 = vld [vmem:[%s14250_s0 + $0x20] ss:$68 sps:$4 sm:$0xff]  }
 0x238   :  { %5788 = vmatpush2.bf16.msra.mxu1 %v10682_v49  ;;  %v4850_v4 = vpop.f32.mrf.mxu0  ;;  %5870 = vmatprep.subr.bf16.mxu0 %v10687_v32  ;;  %v10702_v49 = vld [vmem:[#allocation2 + $0xcac] ss:$16 sps:$4 sm:$0xff]   ;;  %v11410_v32 = vld [vmem:[%s14250_s0 + $0xa4] ss:$68 sps:$4 sm:$0xff]  }
 0x239   :  { %v4963_v45 = vpop.f32.mrf.mxu1  ;;  %5983 = vmatprep.subr.bf16.mxu1 %v10690_v21  ;;  %v12756_v7 = vadd.f32 %v4961_v58, %v4849_v43  ;;  %v4851_v52 = vadd.f32 %v4850_v4, %v12573_v2  ;;  %v10694_v2 = vld [vmem:[#allocation2 + $0xcc8] ss:$16 sps:$4 sm:$0xff]   ;;  %v10705_v43 = vld [vmem:[#allocation2 + $0xa8c] ss:$16 sps:$4 sm:$0xff]  }
 0x23a   :  { %v5000_v1 = vpop.f32.mrf.mxu0  ;;  %5677 = vmatmul.mubr.bf16.vlgmr.msra.gmra.mxu0 %v11408_v59  ;;  %v10711_v59 = vld [vmem:[#allocation2 + $0xa6c] ss:$16 sps:$4 sm:$0xff]  }
 0x23b   :  { %v5113_v61 = vpop.f32.mrf.mxu1  ;;  %5790 = vmatmul.mubr.bf16.vlgmr.msra.gmra.mxu1 %v11409_v13  ;;  %v12765_v8 = vadd.f32 %v4963_v45, %v4851_v52  ;;  %v5001_v10 = vadd.f32 %v5000_v1, %v12576_v53  ;;  %5871 = vmatpush1.bf16.msra.mxu0 %v10685_v41  ;;  %v11411_v53 = vld [vmem:[%s14250_s0 + $0xac] ss:$68 sps:$4 sm:$0xff]  }
 0x23c   :  { %5984 = vmatpush1.bf16.msra.mxu1 %v10688_v60  ;;  %v5002_v38 = vpop.f32.mrf.mxu0  ;;  %5872 = vmatprep.subr.bf16.mxu0 %v10693_v54  ;;  %v10708_v60 = vld [vmem:[#allocation2 + $0xc8c] ss:$16 sps:$4 sm:$0xff]   ;;  %v10703_v54 = vld [vmem:[#allocation2 + $0xa88] ss:$16 sps:$4 sm:$0xff]  }
 0x23d   :  { %v5115_v44 = vpop.f32.mrf.mxu1  ;;  %5985 = vmatprep.subr.bf16.mxu1 %v10696_v3  ;;  %v12768_v5 = vadd.f32 %v5113_v61, %v5001_v10  ;;  %v5003_v18 = vadd.f32 %v5002_v38, %v12585_v47  ;;  %5686 = vmatprep.mubr.bf16.mxu0 %v11410_v32  ;;  %v10700_v47 = vld [vmem:[#allocation2 + $0xca8] ss:$16 sps:$4 sm:$0xff]   ;;  %v10714_v13 = vld [vmem:[#allocation2 + $0xc6c] ss:$16 sps:$4 sm:$0xff]  }
 0x23e   :  { %5799 = vmatprep.mubr.bf16.mxu1 %v11411_v53  ;;  %v5004_v21 = vpop.f32.mrf.mxu0  ;;  %v10706_v3 = vld [vmem:[#allocation2 + $0xc88] ss:$16 sps:$4 sm:$0xff]  }
 0x23f   :  { %v5117_v16 = vpop.f32.mrf.mxu1  ;;  %v12777_v26 = vadd.f32 %v5115_v44, %v5003_v18  ;;  %v5005_v29 = vadd.f32 %v5004_v21, %v12588_v20  ;;  %5873 = vmatpush1.bf16.msra.mxu0 %v10691_v11  ;;  %v11412_v20 = vld [vmem:[%s14250_s0 + $0xa0] ss:$68 sps:$4 sm:$0xff]   ;;  %v11413_v61 = vld [vmem:[%s14250_s0 + $0xa8] ss:$68 sps:$4 sm:$0xff]  }
 0x240   :  { %5986 = vmatpush1.bf16.msra.mxu1 %v10694_v2  ;;  %v5006_v58 = vpop.f32.mrf.mxu0  ;;  %5874 = vmatprep.subr.bf16.mxu0 %v10699_v12  ;;  %v11414_v12 = vld [vmem:[%s14250_s0 + $0x12c] ss:$68 sps:$4 sm:$0xff]   ;;  %v10712_v18 = vld [vmem:[#allocation2 + $0xc68] ss:$16 sps:$4 sm:$0xff]  }
 0x241   :  { %v5119_v41 = vpop.f32.mrf.mxu1  ;;  %5987 = vmatprep.subr.bf16.mxu1 %v10702_v49  ;;  %v12780_v4 = vadd.f32 %v5117_v16, %v5005_v29  ;;  %v5007_v45 = vadd.f32 %v5006_v58, %v12597_v39  ;;  %v11415_v49 = vld [vmem:[%s14250_s0 + $0x134] ss:$68 sps:$4 sm:$0xff]   ;;  %v10717_v21 = vld [vmem:[#allocation2 + $0xa4c] ss:$16 sps:$4 sm:$0xff]  }
 0x242   :  { %v5010_v52 = vpop.f32.mrf.mxu0  ;;  %5687 = vmatmul.mubr.bf16.gmra.mxu0 %v11412_v20  ;;  %v10720_v16 = vld [vmem:[#allocation2 + $0xc4c] ss:$16 sps:$4 sm:$0xff]  }
 0x243   :  { %v5123_v1 = vpop.f32.mrf.mxu1  ;;  %5800 = vmatmul.mubr.bf16.gmra.mxu1 %v11413_v61  ;;  %v12789_v11 = vadd.f32 %v5119_v41, %v5007_v45  ;;  %v5011_v39 = vadd.f32 %v5010_v52, %v12600_v25  ;;  %5875 = vmatpush1.bf16.msra.mxu0 %v10697_v23  ;;  %v10709_v25 = vld [vmem:[#allocation2 + $0xa68] ss:$16 sps:$4 sm:$0xff]  }
 0x244   :  { %5988 = vmatpush1.bf16.msra.mxu1 %v10700_v47  ;;  %v5012_v10 = vpop.f32.mrf.mxu0  ;;  %5876 = vmatprep.subr.bf16.mxu0 %v10705_v43  ;;  %v10715_v43 = vld [vmem:[#allocation2 + $0xa48] ss:$16 sps:$4 sm:$0xff]  }
 0x245   :  { %v5125_v2 = vpop.f32.mrf.mxu1  ;;  %5989 = vmatprep.subr.bf16.mxu1 %v10708_v60  ;;  %v12792_v38 = vadd.f32 %v5123_v1, %v5011_v39  ;;  %v5013_v44 = vadd.f32 %v5012_v10, %v12609_v34  ;;  %5696 = vmatprep.mubr.bf16.mxu0 %v11414_v12  ;;  %v10718_v60 = vld [vmem:[#allocation2 + $0xc48] ss:$16 sps:$4 sm:$0xff]  }
 0x246   :  { %5809 = vmatprep.mubr.bf16.mxu1 %v11415_v49  ;;  %v5014_v32 = vpop.f32.mrf.mxu0  ;;  %v11416_v1 = vld [vmem:[%s14250_s0 + $0x128] ss:$68 sps:$4 sm:$0xff]   ;;  %v11418_v10 = vld [vmem:[%s14250_s0 + $0x1b4] ss:$68 sps:$4 sm:$0xff]  }
 0x247   :  { %v5127_v53 = vpop.f32.mrf.mxu1  ;;  %v12801_v23 = vadd.f32 %v5125_v2, %v5013_v44  ;;  %v5015_v34 = vadd.f32 %v5014_v32, %v12612_v48  ;;  %5877 = vmatpush1.bf16.msra.mxu0 %v10703_v54  ;;  %v11417_v48 = vld [vmem:[%s14250_s0 + $0x130] ss:$68 sps:$4 sm:$0xff]   ;;  %v10723_v54 = vld [vmem:[#allocation2 + $0xa2c] ss:$16 sps:$4 sm:$0xff]   ;;  %v10724_v44 = vld [vmem:[#allocation2 + $0xc28] ss:$16 sps:$4 sm:$0xff]  }
 0x248   :  { %5990 = vmatpush1.bf16.msra.mxu1 %v10706_v3  ;;  %v5016_v29 = vpop.f32.mrf.mxu0  ;;  %5878 = vmatprep.subr.bf16.mxu0 %v10711_v59  ;;  %v10726_v3 = vld [vmem:[#allocation2 + $0xc2c] ss:$16 sps:$4 sm:$0xff]  }
 0x249   :  { %v5129_v47 = vpop.f32.mrf.mxu1  ;;  %5991 = vmatprep.subr.bf16.mxu1 %v10714_v13  ;;  %v12804_v58 = vadd.f32 %v5127_v53, %v5015_v34  ;;  %v5017_v41 = vadd.f32 %v5016_v29, %v12621_v28  ;;  %v11419_v2 = vld [vmem:[%s14250_s0 + $0x1bc] ss:$68 sps:$4 sm:$0xff]   ;;  %v10727_v29 = vld [vmem:[#allocation2 + $0xa08] ss:$16 sps:$4 sm:$0xff]  }
 0x24a   :  { %v5020_v45 = vpop.f32.mrf.mxu0  ;;  %5697 = vmatmul.mubr.bf16.gmra.mxu0 %v11416_v1  ;;  %v10732_v32 = vld [vmem:[#allocation2 + $0xc0c] ss:$16 sps:$4 sm:$0xff]  }
 0x24b   :  { %v5133_v52 = vpop.f32.mrf.mxu1  ;;  %5810 = vmatmul.mubr.bf16.gmra.mxu1 %v11417_v48  ;;  %v12813_v20 = vadd.f32 %v5129_v47, %v5017_v41  ;;  %v5021_v28 = vadd.f32 %v5020_v45, %v12624_v9  ;;  %5879 = vmatpush1.bf16.msra.mxu0 %v10709_v25  ;;  %v10721_v9 = vld [vmem:[#allocation2 + $0xa28] ss:$16 sps:$4 sm:$0xff]  }
 0x24c   :  { %5992 = vmatpush1.bf16.msra.mxu1 %v10712_v18  ;;  %v5022_v61 = vpop.f32.mrf.mxu0  ;;  %5880 = vmatprep.subr.bf16.mxu0 %v10717_v21  ;;  %v10730_v47 = vld [vmem:[#allocation2 + $0xc08] ss:$16 sps:$4 sm:$0xff]  }
 0x24d   :  { %v5135_v59 = vpop.f32.mrf.mxu1  ;;  %5993 = vmatprep.subr.bf16.mxu1 %v10720_v16  ;;  %v12816_v13 = vadd.f32 %v5133_v52, %v5021_v28  ;;  %v5023_v39 = vadd.f32 %v5022_v61, %v12633_v22  ;;  %5706 = vmatprep.mubr.bf16.mxu0 %v11418_v10  ;;  %v10729_v22 = vld [vmem:[#allocation2 + $0xa0c] ss:$16 sps:$4 sm:$0xff]  }
 0x24e   :  { %5819 = vmatprep.mubr.bf16.mxu1 %v11419_v2  ;;  %v5024_v12 = vpop.f32.mrf.mxu0  ;;  %v10738_v52 = vld [vmem:[#allocation2 + $0xdec] ss:$16 sps:$4 sm:$0xff]  }
 0x24f   :  { %v5137_v49 = vpop.f32.mrf.mxu1  ;;  %v12825_v25 = vadd.f32 %v5135_v59, %v5023_v39  ;;  %v5025_v18 = vadd.f32 %v5024_v12, %v12636_v15  ;;  %5881 = vmatpush1.bf16.msra.mxu0 %v10715_v43  ;;  %v11420_v15 = vld [vmem:[%s14250_s0 + $0x1b0] ss:$68 sps:$4 sm:$0xff]   ;;  %v11421_v43 = vld [vmem:[%s14250_s0 + $0x1b8] ss:$68 sps:$4 sm:$0xff]   ;;  %v11423_v59 = vld [vmem:[%s14250_s0 + $0x244] ss:$68 sps:$4 sm:$0xff]  }
 0x250   :  { %5994 = vmatpush1.bf16.msra.mxu1 %v10718_v60  ;;  %v5026_v53 = vpop.f32.mrf.mxu0  ;;  %5882 = vmatprep.subr.bf16.mxu0 %v10723_v54  ;;  %v10735_v60 = vld [vmem:[#allocation2 + $0xbec] ss:$16 sps:$4 sm:$0xff]   ;;  %v10736_v39 = vld [vmem:[#allocation2 + $0xde8] ss:$16 sps:$4 sm:$0xff]  }
 0x251   :  { %v5139_v21 = vpop.f32.mrf.mxu1  ;;  %5995 = vmatprep.subr.bf16.mxu1 %v10726_v3  ;;  %v12828_v16 = vadd.f32 %v5137_v49, %v5025_v18  ;;  %v5027_v34 = vadd.f32 %v5026_v53, %v12645_v62  ;;  %v11422_v61 = vld [vmem:[%s14250_s0 + $0x23c] ss:$68 sps:$4 sm:$0xff]   ;;  %v10739_v53 = vld [vmem:[#allocation2 + $0xbc8] ss:$16 sps:$4 sm:$0xff]  }
 0x252   :  { %v5030_v41 = vpop.f32.mrf.mxu0  ;;  %5707 = vmatmul.mubr.bf16.gmra.mxu0 %v11420_v15  ;;  %v10744_v12 = vld [vmem:[#allocation2 + $0xdcc] ss:$16 sps:$4 sm:$0xff]  }
 0x253   :  { %v5143_v45 = vpop.f32.mrf.mxu1  ;;  %5820 = vmatmul.mubr.bf16.gmra.mxu1 %v11421_v43  ;;  %v12837_v1 = vadd.f32 %v5139_v21, %v5027_v34  ;;  %v5031_v62 = vadd.f32 %v5030_v41, %v12648_v0  ;;  %5883 = vmatpush1.bf16.msra.mxu0 %v10721_v9  ;;  %v10733_v0 = vld [vmem:[#allocation2 + $0xbe8] ss:$16 sps:$4 sm:$0xff]  }
 0x254   :  { %5996 = vmatpush1.bf16.msra.mxu1 %v10724_v44  ;;  %v5032_v48 = vpop.f32.mrf.mxu0  ;;  %5884 = vmatprep.subr.bf16.mxu0 %v10729_v22  ;;  %v10742_v21 = vld [vmem:[#allocation2 + $0xdc8] ss:$16 sps:$4 sm:$0xff]  }
 0x255   :  { %v5145_v54 = vpop.f32.mrf.mxu1  ;;  %5997 = vmatprep.subr.bf16.mxu1 %v10732_v32  ;;  %v12840_v3 = vadd.f32 %v5143_v45, %v5031_v62  ;;  %v5033_v28 = vadd.f32 %v5032_v48, %v12657_v17  ;;  %5716 = vmatprep.mubr.bf16.mxu0 %v11422_v61  ;;  %v10741_v17 = vld [vmem:[#allocation2 + $0xbcc] ss:$16 sps:$4 sm:$0xff]   ;;  %v11426_v48 = vld [vmem:[%s14250_s0 + $0x2c4] ss:$68 sps:$4 sm:$0xff]  }
 0x256   :  { %5829 = vmatprep.mubr.bf16.mxu1 %v11423_v59  ;;  %v5034_v10 = vpop.f32.mrf.mxu0  ;;  %v10750_v45 = vld [vmem:[#allocation2 + $0xdac] ss:$16 sps:$4 sm:$0xff]  }
 0x257   :  { %v5147_v2 = vpop.f32.mrf.mxu1  ;;  %v12849_v9 = vadd.f32 %v5145_v54, %v5033_v28  ;;  %v5035_v44 = vadd.f32 %v5034_v10, %v12660_v55  ;;  %5885 = vmatpush1.bf16.msra.mxu0 %v10727_v29  ;;  %v11424_v55 = vld [vmem:[%s14250_s0 + $0x238] ss:$68 sps:$4 sm:$0xff]   ;;  %v11425_v29 = vld [vmem:[%s14250_s0 + $0x240] ss:$68 sps:$4 sm:$0xff]   ;;  %v11427_v54 = vld [vmem:[%s14250_s0 + $0x2cc] ss:$68 sps:$4 sm:$0xff]  }
 0x258   :  { %5998 = vmatpush1.bf16.msra.mxu1 %v10730_v47  ;;  %v5036_v49 = vpop.f32.mrf.mxu0  ;;  %5886 = vmatprep.subr.bf16.mxu0 %v10735_v60  ;;  %v10747_v47 = vld [vmem:[#allocation2 + $0xbac] ss:$16 sps:$4 sm:$0xff]   ;;  %v10748_v28 = vld [vmem:[#allocation2 + $0xda8] ss:$16 sps:$4 sm:$0xff]  }
 0x259   :  { %v5149_v18 = vpop.f32.mrf.mxu1  ;;  %5999 = vmatprep.subr.bf16.mxu1 %v10738_v52  ;;  %v12852_v22 = vadd.f32 %v5147_v2, %v5035_v44  ;;  %v5037_v32 = vadd.f32 %v5036_v49, %v12669_v46  ;;  %v10756_v10 = vld [vmem:[#allocation2 + $0xd8c] ss:$16 sps:$4 sm:$0xff]   ;;  %v10751_v49 = vld [vmem:[#allocation2 + $0xb88] ss:$16 sps:$4 sm:$0xff]  }
 0x25a   :  { %v5040_v34 = vpop.f32.mrf.mxu0  ;;  %5717 = vmatmul.mubr.bf16.gmra.mxu0 %v11424_v55 }
 0x25b   :  { %v5153_v41 = vpop.f32.mrf.mxu1  ;;  %5830 = vmatmul.mubr.bf16.gmra.mxu1 %v11425_v29  ;;  %v12861_v15 = vadd.f32 %v5149_v18, %v5037_v32  ;;  %v5041_v46 = vadd.f32 %v5040_v34, %v12672_v51  ;;  %5887 = vmatpush2.bf16.msra.mxu0 %v10733_v0  ;;  %v10745_v51 = vld [vmem:[#allocation2 + $0xba8] ss:$16 sps:$4 sm:$0xff]  }
 0x25c   :  { %6000 = vmatpush2.bf16.msra.mxu1 %v10736_v39  ;;  %v5042_v43 = vpop.f32.mrf.mxu0  ;;  %5888 = vmatprep.subr.bf16.mxu0 %v10741_v17  ;;  %v10754_v18 = vld [vmem:[#allocation2 + $0xd88] ss:$16 sps:$4 sm:$0xff]  }
 0x25d   :  { %v5155_v60 = vpop.f32.mrf.mxu1  ;;  %6001 = vmatprep.subr.bf16.mxu1 %v10744_v12  ;;  %v12864_v52 = vadd.f32 %v5153_v41, %v5041_v46  ;;  %v5043_v62 = vadd.f32 %v5042_v43, %v12681_v6  ;;  %5726 = vmatprep.mubr.bf16.mxu0 %v11426_v48  ;;  %v10753_v6 = vld [vmem:[#allocation2 + $0xb8c] ss:$16 sps:$4 sm:$0xff]  }
 0x25e   :  { %5839 = vmatprep.mubr.bf16.mxu1 %v11427_v54  ;;  %v5044_v61 = vpop.f32.mrf.mxu0  ;;  %v11430_v43 = vld [vmem:[%s14250_s0 + $0x34c] ss:$68 sps:$4 sm:$0xff]  }
 0x25f   :  { %v5157_v59 = vpop.f32.mrf.mxu1  ;;  %v12873_v0 = vadd.f32 %v5155_v60, %v5043_v62  ;;  %v5045_v39 = vadd.f32 %v5044_v61, %v12684_v24  ;;  %5889 = vmatpush2.bf16.msra.mxu0 %v10739_v53  ;;  %v11428_v24 = vld [vmem:[%s14250_s0 + $0x2c0] ss:$68 sps:$4 sm:$0xff]   ;;  %v11429_v53 = vld [vmem:[%s14250_s0 + $0x2c8] ss:$68 sps:$4 sm:$0xff]  }
 0x260   :  { %6002 = vmatpush2.bf16.msra.mxu1 %v10742_v21  ;;  %v5046_v2 = vpop.f32.mrf.mxu0  ;;  %5890 = vmatprep.subr.bf16.mxu0 %v10747_v47  ;;  %v10759_v21 = vld [vmem:[#allocation2 + $0xb6c] ss:$16 sps:$4 sm:$0xff]   ;;  %v10757_v60 = vld [vmem:[#allocation2 + $0xb68] ss:$16 sps:$4 sm:$0xff]  }
 0x261   :  { %v5159_v44 = vpop.f32.mrf.mxu1  ;;  %6003 = vmatprep.subr.bf16.mxu1 %v10750_v45  ;;  %v12876_v17 = vadd.f32 %v5157_v59, %v5045_v39  ;;  %v5047_v12 = vadd.f32 %v5046_v2, %v12693_v40  ;;  %v10762_v47 = vld [vmem:[#allocation2 + $0xd6c] ss:$16 sps:$4 sm:$0xff]   ;;  %v10760_v62 = vld [vmem:[#allocation2 + $0xd68] ss:$16 sps:$4 sm:$0xff]  }
 0x262   :  { %v5050_v32 = vpop.f32.mrf.mxu0  ;;  %5727 = vmatmul.mubr.bf16.gmra.mxu0 %v11428_v24  ;;  %v10768_v39 = vld [vmem:[#allocation2 + $0xd4c] ss:$16 sps:$4 sm:$0xff]   ;;  %v10763_v2 = vld [vmem:[#allocation2 + $0xb48] ss:$16 sps:$4 sm:$0xff]  }
 0x263   :  { %v5163_v34 = vpop.f32.mrf.mxu1  ;;  %5840 = vmatmul.mubr.bf16.gmra.mxu1 %v11429_v53  ;;  %v12885_v41 = vadd.f32 %v5159_v44, %v5047_v12  ;;  %v5051_v55 = vadd.f32 %v5050_v32, %v12696_v31  ;;  %5891 = vmatpush2.bf16.msra.mxu0 %v10745_v51  ;;  %v11431_v31 = vld [vmem:[%s14250_s0 + $0x354] ss:$68 sps:$4 sm:$0xff]   ;;  %v10765_v51 = vld [vmem:[#allocation2 + $0xb4c] ss:$16 sps:$4 sm:$0xff]  }
 0x264   :  { %6004 = vmatpush2.bf16.msra.mxu1 %v10748_v28  ;;  %v5052_v40 = vpop.f32.mrf.mxu0  ;;  %5892 = vmatprep.subr.bf16.mxu0 %v10753_v6  ;;  %v10766_v44 = vld [vmem:[#allocation2 + $0xd48] ss:$16 sps:$4 sm:$0xff]  }
 0x265   :  { %v5165_v29 = vpop.f32.mrf.mxu1  ;;  %6005 = vmatprep.subr.bf16.mxu1 %v10756_v10  ;;  %v12888_v45 = vadd.f32 %v5163_v34, %v5051_v55  ;;  %v5053_v46 = vadd.f32 %v5052_v40, %v12705_v57  ;;  %5736 = vmatprep.mubr.bf16.mxu0 %v11430_v43  ;;  %v11432_v34 = vld [vmem:[%s14250_s0 + $0x348] ss:$68 sps:$4 sm:$0xff]  }
 0x266   :  { %5849 = vmatprep.mubr.bf16.mxu1 %v11431_v31  ;;  %v5054_v48 = vpop.f32.mrf.mxu0 }
 0x267   :  { %v5167_v54 = vpop.f32.mrf.mxu1  ;;  %v12897_v28 = vadd.f32 %v5165_v29, %v5053_v46  ;;  %v5055_v61 = vadd.f32 %v5054_v48, %v12708_v14  ;;  %5893 = vmatpush2.bf16.msra.mxu0 %v10751_v49  ;;  %v11433_v14 = vld [vmem:[%s14250_s0 + $0x350] ss:$68 sps:$4 sm:$0xff]   ;;  %v10771_v49 = vld [vmem:[#allocation2 + $0xb2c] ss:$16 sps:$4 sm:$0xff]   ;;  %v10772_v46 = vld [vmem:[#allocation2 + $0xd28] ss:$16 sps:$4 sm:$0xff]  }
 0x268   :  { %6006 = vmatpush2.bf16.msra.mxu1 %v10754_v18  ;;  %v5056_v57 = vpop.f32.mrf.mxu0  ;;  %5894 = vmatprep.subr.bf16.mxu0 %v10759_v21  ;;  %v10774_v21 = vld [vmem:[#allocation2 + $0xd2c] ss:$16 sps:$4 sm:$0xff]   ;;  %v11434_v29 = vld [vmem:[%s14250_s0 + $0x3d4] ss:$68 sps:$4 sm:$0xff]  }
 0x269   :  { %v5169_v59 = vpop.f32.mrf.mxu1  ;;  %6007 = vmatprep.subr.bf16.mxu1 %v10762_v47  ;;  %v12900_v6 = vadd.f32 %v5167_v54, %v5055_v61  ;;  %v5057_v10 = vadd.f32 %v5056_v57, %v12717_v27  ;;  %v10769_v47 = vld [vmem:[#allocation2 + $0xb28] ss:$16 sps:$4 sm:$0xff]  }
 0x26a   :  { %v5060_v12 = vpop.f32.mrf.mxu0  ;;  %5737 = vmatmul.mubr.bf16.gmra.mxu0 %v11432_v34 }
 0x26b   :  { %v5173_v32 = vpop.f32.mrf.mxu1  ;;  %5850 = vmatmul.mubr.bf16.gmra.mxu1 %v11433_v14  ;;  %v12909_v18 = vadd.f32 %v5169_v59, %v5057_v10  ;;  %v5061_v24 = vadd.f32 %v5060_v12, %v12720_v63  ;;  %5895 = vmatpush2.bf16.msra.mxu0 %v10757_v60  ;;  %v11435_v63 = vld [vmem:[%s14250_s0 + $0x3dc] ss:$68 sps:$4 sm:$0xff]   ;;  %v10775_v59 = vld [vmem:[#allocation2 + $0xb08] ss:$16 sps:$4 sm:$0xff]  }
 0x26c   :  { %6008 = vmatpush2.bf16.msra.mxu1 %v10760_v62  ;;  %v5062_v27 = vpop.f32.mrf.mxu0  ;;  %5896 = vmatprep.subr.bf16.mxu0 %v10765_v51  ;;  %v10777_v60 = vld [vmem:[#allocation2 + $0xb0c] ss:$16 sps:$4 sm:$0xff]  }
 0x26d   :  { %v5175_v53 = vpop.f32.mrf.mxu1  ;;  %6009 = vmatprep.subr.bf16.mxu1 %v10768_v39  ;;  %v12912_v55 = vadd.f32 %v5173_v32, %v5061_v24  ;;  %v5063_v40 = vadd.f32 %v5062_v27, %v12729_v50  ;;  %5746 = vmatprep.mubr.bf16.mxu0 %v11434_v29  ;;  %v10780_v51 = vld [vmem:[#allocation2 + $0xd0c] ss:$16 sps:$4 sm:$0xff]   ;;  %v10778_v39 = vld [vmem:[#allocation2 + $0xd08] ss:$16 sps:$4 sm:$0xff]   ;;  %v11436_v32 = vld [vmem:[%s14250_s0 + $0x3d0] ss:$68 sps:$4 sm:$0xff]  }
 0x26e   :  { %5859 = vmatprep.mubr.bf16.mxu1 %v11435_v63  ;;  %v5064_v43 = vpop.f32.mrf.mxu0  ;;  %v10798_v24 = vld [vmem:[#allocation2 + $0x10ec] ss:$16 sps:$4 sm:$0xff]   ;;  %v874_v29 = vsub.s32 3, %v12183_v30 }
 0x26f   :  { %v5177_v31 = vpop.f32.mrf.mxu1  ;;  %v12921_v62 = vadd.f32 %v5175_v53, %v5063_v40  ;;  %v5065_v48 = vadd.f32 %v5064_v43, %v12732_v56  ;;  %5897 = vmatpush2.bf16.msra.mxu0 %v10763_v2  ;;  %v11437_v56 = vld [vmem:[%s14250_s0 + $0x3d8] ss:$68 sps:$4 sm:$0xff]  }
 0x270   :  { %6010 = vmatpush2.bf16.msra.mxu1 %v10766_v44  ;;  %v5066_v50 = vpop.f32.mrf.mxu0  ;;  %5898 = vmatprep.subr.bf16.mxu0 %v10771_v49  ;;  %v10783_v49 = vld [vmem:[#allocation2 + $0xeec] ss:$16 sps:$4 sm:$0xff]   ;;  %v10781_v40 = vld [vmem:[#allocation2 + $0xee8] ss:$16 sps:$4 sm:$0xff]  }
 0x271   :  { %v5179_v54 = vpop.f32.mrf.mxu1  ;;  %6011 = vmatprep.subr.bf16.mxu1 %v10774_v21  ;;  %v12924_v61 = vadd.f32 %v5177_v31, %v5065_v48  ;;  %v5067_v57 = vadd.f32 %v5066_v50, %v12741_v19  ;;  %v870_v19 = vsub.s32 2, %v12183_v30  ;;  %v11438_v21 = vld [vmem:[%s14250_s0 + $0x2c] ss:$68 sps:$4 sm:$0xff]   ;;  %v11440_v31 = vld [vmem:[#allocation6] sm:$0xf] }
 0x272   :  { %v5070_v10 = vpop.f32.mrf.mxu0  ;;  %5747 = vmatmul.mubr.bf16.gmra.mxu0 %v11436_v32  ;;  %v10796_v48 = vld [vmem:[#allocation2 + $0x10e8] ss:$16 sps:$4 sm:$0xff]  }
 0x273   :  { %v5183_v12 = vpop.f32.mrf.mxu1  ;;  %5860 = vmatmul.mubr.bf16.gmra.mxu1 %v11437_v56  ;;  %v12933_v2 = vadd.f32 %v5179_v54, %v5067_v57  ;;  %v5071_v44 = vadd.f32 %v5070_v10, %v12744_v33  ;;  %5899 = vmatpush2.bf16.msra.mxu0 %v10769_v47  ;;  %v11439_v33 = vld [vmem:[%s14250_s0 + $0x34] ss:$68 sps:$4 sm:$0xff]  }
 0x274   :  { %6012 = vmatpush2.bf16.msra.mxu1 %v10772_v46  ;;  %v5072_v34 = vpop.f32.mrf.mxu0  ;;  %5900 = vmatprep.subr.bf16.mxu0 %v10777_v60  ;;  %v10786_v46 = vld [vmem:[#allocation2 + $0xecc] ss:$16 sps:$4 sm:$0xff]   ;;  %v12950_v60 = vrot.slane %v11440_v31, %v870_v19  ;;  %v10784_v32 = vld [vmem:[#allocation2 + $0xec8] ss:$16 sps:$4 sm:$0xff]  }
 0x275   :  { %v5185_v14 = vpop.f32.mrf.mxu1  ;;  %6013 = vmatprep.subr.bf16.mxu1 %v10780_v51  ;;  %v12937_v27 = vadd.f32 %v5183_v12, %v5071_v44  ;;  %v5073_v53 = vadd.f32 %v5072_v34, %v12753_v35  ;;  %5902 = vmatprep.mubr.bf16.mxu0 %v11438_v21  ;;  %v10807_v51 = vld [vmem:[#allocation2 + $0x10cc] ss:$16 sps:$4 sm:$0xff]   ;;  %v12955_v12 = vrot.slane %v11440_v31, %v874_v29 }
 0x276   :  { %6015 = vmatprep.mubr.bf16.mxu1 %v11439_v33  ;;  %v5074_v63 = vpop.f32.mrf.mxu0  ;;  %v10789_v44 = vld [vmem:[#allocation2 + $0xeac] ss:$16 sps:$4 sm:$0xff]  }
 0x277   :  { %v5187_v47 = vpop.f32.mrf.mxu1  ;;  %v12947_v43 = vadd.f32 %v5185_v14, %v5073_v53  ;;  %v5075_v35 = vadd.f32 %v5074_v63, %v12756_v7  ;;  %5901 = vmatpush2.bf16.msra.mxu0 %v10775_v59  ;;  %14281 = vst [vmem:[#allocation25_spill] sm:$0xff] %v12955_v12  ;;  %v11441_v59 = vld [vmem:[%s14250_s0 + $0x28] ss:$68 sps:$4 sm:$0xff]   ;;  %v11443_v14 = vld [vmem:[%s14250_s0 + $0xb4] ss:$68 sps:$4 sm:$0xff]  }
 0x278   :  { %6014 = vmatpush2.bf16.msra.mxu1 %v10778_v39  ;;  %v5076_v50 = vpop.f32.mrf.mxu0  ;;  %6096 = vmatprep.subr.bf16.mxu0 %v10783_v49  ;;  %v11442_v39 = vld [vmem:[%s14250_s0 + $0x30] ss:$68 sps:$4 sm:$0xff]   ;;  %v10805_v49 = vld [vmem:[#allocation2 + $0x10c8] ss:$16 sps:$4 sm:$0xff]   ;;  %v11444_v21 = vld [vmem:[%s14250_s0 + $0xbc] ss:$68 sps:$4 sm:$0xff]  }
 0x279   :  { %v5189_v54 = vpop.f32.mrf.mxu1  ;;  %6209 = vmatprep.subr.bf16.mxu1 %v10798_v24  ;;  %v12952_v57 = vadd.f32 %v5187_v47, %v5075_v35  ;;  %v5077_v10 = vadd.f32 %v5076_v50, %v12765_v8  ;;  %v10792_v47 = vld [vmem:[#allocation2 + $0xe8c] ss:$16 sps:$4 sm:$0xff]  }
 0x27a   :  { %v5226_v56 = vpop.f32.mrf.mxu0  ;;  %5903 = vmatmul.mubr.bf16.vlgmr.msra.gmra.mxu0 %v11441_v59  ;;  %v10816_v31 = vld [vmem:[#allocation2 + $0x10ac] ss:$16 sps:$4 sm:$0xff]  }
 0x27b   :  { %v5339_v7 = vpop.f32.mrf.mxu1  ;;  %6016 = vmatmul.mubr.bf16.vlgmr.msra.gmra.mxu1 %v11442_v39  ;;  %v12963_v19 = vadd.f32 %v5189_v54, %v5077_v10  ;;  %v12966_v8 = vadd.f32 %v5226_v56, %v12768_v5  ;;  %6097 = vmatpush1.bf16.msra.mxu0 %v10781_v40  ;;  %v10787_v40 = vld [vmem:[#allocation2 + $0xea8] ss:$16 sps:$4 sm:$0xff]  }
 0x27c   :  { %v12969_v34 = vadd.f32 %v5339_v7, %v12950_v60  ;;  %5912 = vmatprep.mubr.bf16.mxu0 %v11443_v14  ;;  %v5228_v24 = vpop.f32.mrf.mxu0  ;;  %6098 = vmatprep.subr.bf16.mxu0 %v10786_v46  ;;  %v10814_v54 = vld [vmem:[#allocation2 + $0x10a8] ss:$16 sps:$4 sm:$0xff]   ;;  %v11447_v14 = vld [vmem:[%s14250_s0 + $0x13c] ss:$68 sps:$4 sm:$0xff]  }
 0x27d   :  { %14282 = vst [vmem:[#allocation26_spill] sm:$0xff] %v12966_v8  ;;  %v5341_v53 = vpop.f32.mrf.mxu1  ;;  %6025 = vmatprep.mubr.bf16.mxu1 %v11444_v21  ;;  %v12978_v5 = vadd.f32 %v5228_v24, %v12777_v26  ;;  %6210 = vmatpush1.bf16.msra.mxu1 %v10796_v48  ;;  %v10790_v56 = vld [vmem:[#allocation2 + $0xe88] ss:$16 sps:$4 sm:$0xff]  }
 0x27e   :  { %v12981_v33 = vadd.f32 %v5341_v53, %v12955_v12  ;;  %v5230_v29 = vpop.f32.mrf.mxu0  ;;  %6211 = vmatprep.subr.bf16.mxu1 %v10807_v51  ;;  %v10825_v51 = vld [vmem:[#allocation2 + $0x108c] ss:$16 sps:$4 sm:$0xff]   ;;  %v11448_v53 = vld [vmem:[%s14250_s0 + $0x144] ss:$68 sps:$4 sm:$0xff]  }
 0x27f   :  { %14283 = vst [vmem:[#allocation27_spill] sm:$0xff] %v12978_v5  ;;  %v5343_v63 = vpop.f32.mrf.mxu1  ;;  %v12984_v35 = vadd.f32 %v5230_v29, %v12780_v4  ;;  %6099 = vmatpush1.bf16.msra.mxu0 %v10784_v32  ;;  %v11445_v32 = vld [vmem:[%s14250_s0 + $0xb0] ss:$68 sps:$4 sm:$0xff]   ;;  %v11446_v59 = vld [vmem:[%s14250_s0 + $0xb8] ss:$68 sps:$4 sm:$0xff]  }
 0x280   :  { %v12987_v46 = vadd.f32 %v5343_v63, %v12950_v60  ;;  %v5232_v50 = vpop.f32.mrf.mxu0  ;;  %6100 = vmatprep.subr.bf16.mxu0 %v10789_v44  ;;  %v10829_v8 = vld [vmem:[#allocation2 + $0xf68] ss:$16 sps:$4 sm:$0xff]  }
 0x281   :  { %14284 = vst [vmem:[#allocation28_spill] sm:$0xff] %v12984_v35  ;;  %v5345_v26 = vpop.f32.mrf.mxu1  ;;  %v12990_v10 = vadd.f32 %v5232_v50, %v12789_v11  ;;  %6212 = vmatpush1.bf16.msra.mxu1 %v10805_v49  ;;  %v10795_v11 = vld [vmem:[#allocation2 + $0xe6c] ss:$16 sps:$4 sm:$0xff]  }
 0x282   :  { %v12993_v48 = vadd.f32 %v5345_v26, %v12955_v12  ;;  %v5236_v4 = vpop.f32.mrf.mxu0  ;;  %5913 = vmatmul.mubr.bf16.gmra.mxu0 %v11445_v32  ;;  %6213 = vmatprep.subr.bf16.mxu1 %v10816_v31  ;;  %v10801_v50 = vld [vmem:[#allocation2 + $0xe4c] ss:$16 sps:$4 sm:$0xff]  }
 0x283   :  { %14285 = vst [vmem:[#allocation29_spill] sm:$0xff] %v12990_v10  ;;  %v5349_v7 = vpop.f32.mrf.mxu1  ;;  %6026 = vmatmul.mubr.bf16.gmra.mxu1 %v11446_v59  ;;  %v13002_v39 = vadd.f32 %v5236_v4, %v12792_v38  ;;  %6101 = vmatpush1.bf16.msra.mxu0 %v10787_v40  ;;  %v10793_v40 = vld [vmem:[#allocation2 + $0xe68] ss:$16 sps:$4 sm:$0xff]   ;;  %v10834_v32 = vld [vmem:[#allocation2 + $0x106c] ss:$16 sps:$4 sm:$0xff]  }
 0x284   :  { %v13005_v44 = vadd.f32 %v5349_v7, %v12950_v60  ;;  %5922 = vmatprep.mubr.bf16.mxu0 %v11447_v14  ;;  %v5238_v49 = vpop.f32.mrf.mxu0  ;;  %6102 = vmatprep.subr.bf16.mxu0 %v10792_v47  ;;  %v10823_v4 = vld [vmem:[#allocation2 + $0x1088] ss:$16 sps:$4 sm:$0xff]  }
 0x285   :  { %14286 = vst [vmem:[#allocation30_spill] sm:$0xff] %v13002_v39  ;;  %v5351_v24 = vpop.f32.mrf.mxu1  ;;  %6035 = vmatprep.mubr.bf16.mxu1 %v11448_v53  ;;  %v13014_v38 = vadd.f32 %v5238_v49, %v12801_v23  ;;  %6214 = vmatpush1.bf16.msra.mxu1 %v10814_v54  ;;  %v10799_v54 = vld [vmem:[#allocation2 + $0xe48] ss:$16 sps:$4 sm:$0xff]  }
 0x286   :  { %v13017_v21 = vadd.f32 %v5351_v24, %v12955_v12  ;;  %v5240_v29 = vpop.f32.mrf.mxu0  ;;  %6215 = vmatprep.subr.bf16.mxu1 %v10825_v51  ;;  %v11449_v49 = vld [vmem:[%s14250_s0 + $0x138] ss:$68 sps:$4 sm:$0xff]  }
 0x287   :  { %14287 = vst [vmem:[#allocation31_spill] sm:$0xff] %v13014_v38  ;;  %v5353_v63 = vpop.f32.mrf.mxu1  ;;  %v13020_v26 = vadd.f32 %v5240_v29, %v12804_v58  ;;  %6103 = vmatpush1.bf16.msra.mxu0 %v10790_v56  ;;  %v11450_v56 = vld [vmem:[%s14250_s0 + $0x140] ss:$68 sps:$4 sm:$0xff]   ;;  %v11452_v29 = vld [vmem:[%s14250_s0 + $0x1cc] ss:$68 sps:$4 sm:$0xff]  }
 0x288   :  { %v13023_v47 = vadd.f32 %v5353_v63, %v12950_v60  ;;  %v5242_v23 = vpop.f32.mrf.mxu0  ;;  %6104 = vmatprep.subr.bf16.mxu0 %v10795_v11  ;;  %v11451_v11 = vld [vmem:[%s14250_s0 + $0x1c4] ss:$68 sps:$4 sm:$0xff]   ;;  %v10804_v63 = vld [vmem:[#allocation2 + $0xe2c] ss:$16 sps:$4 sm:$0xff]  }
 0x289   :  { %14288 = vst [vmem:[#allocation32_spill] sm:$0xff] %v13020_v26  ;;  %v5355_v7 = vpop.f32.mrf.mxu1  ;;  %v13026_v59 = vadd.f32 %v5242_v23, %v12813_v20  ;;  %6216 = vmatpush1.bf16.msra.mxu1 %v10823_v4 }
 0x28a   :  { %v13029_v31 = vadd.f32 %v5355_v7, %v12955_v12  ;;  %v5246_v14 = vpop.f32.mrf.mxu0  ;;  %5923 = vmatmul.mubr.bf16.gmra.mxu0 %v11449_v49  ;;  %6217 = vmatprep.subr.bf16.mxu1 %v10834_v32  ;;  %v10802_v49 = vld [vmem:[#allocation2 + $0xe28] ss:$16 sps:$4 sm:$0xff]   ;;  %v10840_v32 = vld [vmem:[#allocation2 + $0x104c] ss:$16 sps:$4 sm:$0xff]  }
 0x28b   :  { %14289 = vst [vmem:[#allocation33_spill] sm:$0xff] %v13026_v59  ;;  %v5359_v58 = vpop.f32.mrf.mxu1  ;;  %6036 = vmatmul.mubr.bf16.gmra.mxu1 %v11450_v56  ;;  %v13038_v51 = vadd.f32 %v5246_v14, %v12816_v13  ;;  %6105 = vmatpush1.bf16.msra.mxu0 %v10793_v40  ;;  %v10832_v40 = vld [vmem:[#allocation2 + $0x1068] ss:$16 sps:$4 sm:$0xff]  }
 0x28c   :  { %v13041_v20 = vadd.f32 %v5359_v58, %v12950_v60  ;;  %5932 = vmatprep.mubr.bf16.mxu0 %v11451_v11  ;;  %v5248_v24 = vpop.f32.mrf.mxu0  ;;  %6106 = vmatprep.subr.bf16.mxu0 %v10801_v50 }
 0x28d   :  { %14290 = vst [vmem:[#allocation34_spill] sm:$0xff] %v13038_v51  ;;  %v5361_v53 = vpop.f32.mrf.mxu1  ;;  %6045 = vmatprep.mubr.bf16.mxu1 %v11452_v29  ;;  %v13050_v13 = vadd.f32 %v5248_v24, %v12825_v25  ;;  %v10810_v25 = vld [vmem:[#allocation2 + $0xe0c] ss:$16 sps:$4 sm:$0xff]   ;;  %6218 = vmatpush1.bf16.msra.mxu1 %v10832_v40  ;;  %v11453_v29 = vld [vmem:[%s14250_s0 + $0x1c0] ss:$68 sps:$4 sm:$0xff]  }
 0x28e   :  { %v13053_v23 = vadd.f32 %v5361_v53, %v12955_v12  ;;  %v5250_v7 = vpop.f32.mrf.mxu0  ;;  %v10808_v40 = vld [vmem:[#allocation2 + $0xe08] ss:$16 sps:$4 sm:$0xff]   ;;  %6219 = vmatprep.subr.bf16.mxu1 %v10840_v32  ;;  %v13241_v51 = vld [vmem:[#allocation4 + $0xe0] ss:$16 sps:$4 sm:$0xff]  }
 0x28f   :  { %14291 = vst [vmem:[#allocation35_spill] sm:$0xff] %v13050_v13  ;;  %v5363_v14 = vpop.f32.mrf.mxu1  ;;  %v13056_v58 = vadd.f32 %v5250_v7, %v12828_v16  ;;  %6107 = vmatpush1.bf16.msra.mxu0 %v10799_v54  ;;  %v11454_v54 = vld [vmem:[%s14250_s0 + $0x1c8] ss:$68 sps:$4 sm:$0xff]  }
 0x290   :  { %v13059_v50 = vadd.f32 %v5363_v14, %v12950_v60  ;;  %v5252_v56 = vpop.f32.mrf.mxu0  ;;  %6108 = vmatprep.subr.bf16.mxu0 %v10804_v63  ;;  %v10838_v63 = vld [vmem:[#allocation2 + $0x1048] ss:$16 sps:$4 sm:$0xff]   ;;  %v11455_v14 = vld [vmem:[%s14250_s0 + $0x24c] ss:$68 sps:$4 sm:$0xff]  }
 0x291   :  { %14292 = vst [vmem:[#allocation36_spill] sm:$0xff] %v13056_v58  ;;  %v5365_v11 = vpop.f32.mrf.mxu1  ;;  %v13062_v24 = vadd.f32 %v5252_v56, %v12837_v1  ;;  %v10846_v56 = vld [vmem:[#allocation2 + $0x102c] ss:$16 sps:$4 sm:$0xff]   ;;  %6220 = vmatpush1.bf16.msra.mxu1 %v10838_v63  ;;  %v10844_v63 = vld [vmem:[#allocation2 + $0x1028] ss:$16 sps:$4 sm:$0xff]  }
 0x292   :  { %v13065_v4 = vadd.f32 %v5365_v11, %v12955_v12  ;;  %v5256_v53 = vpop.f32.mrf.mxu0  ;;  %5933 = vmatmul.mubr.bf16.gmra.mxu0 %v11453_v29  ;;  %6221 = vmatprep.subr.bf16.mxu1 %v10846_v56  ;;  %v10852_v56 = vld [vmem:[#allocation2 + $0x100c] ss:$16 sps:$4 sm:$0xff]  }
 0x293   :  { %14293 = vst [vmem:[#allocation37_spill] sm:$0xff] %v13062_v24  ;;  %v5369_v16 = vpop.f32.mrf.mxu1  ;;  %6046 = vmatmul.mubr.bf16.gmra.mxu1 %v11454_v54  ;;  %v13074_v1 = vadd.f32 %v5256_v53, %v12840_v3  ;;  %6109 = vmatpush1.bf16.msra.mxu0 %v10802_v49  ;;  %v11456_v54 = vld [vmem:[%s14250_s0 + $0x254] ss:$68 sps:$4 sm:$0xff]   ;;  %v10813_v3 = vld [vmem:[#allocation2 + $0xfec] ss:$16 sps:$4 sm:$0xff]  }
 0x294   :  { %v13077_v7 = vadd.f32 %v5369_v16, %v12950_v60  ;;  %5942 = vmatprep.mubr.bf16.mxu0 %v11455_v14  ;;  %v5258_v11 = vpop.f32.mrf.mxu0  ;;  %6110 = vmatprep.subr.bf16.mxu0 %v10810_v25 }
 0x295   :  { %14294 = vst [vmem:[#allocation38_spill] sm:$0xff] %v13074_v1  ;;  %v5371_v29 = vpop.f32.mrf.mxu1  ;;  %6055 = vmatprep.mubr.bf16.mxu1 %v11456_v54  ;;  %v13086_v53 = vadd.f32 %v5258_v11, %v12849_v9  ;;  %v10819_v9 = vld [vmem:[#allocation2 + $0xfcc] ss:$16 sps:$4 sm:$0xff]   ;;  %6222 = vmatpush1.bf16.msra.mxu1 %v10844_v63 }
 0x296   :  { %v13089_v49 = vadd.f32 %v5371_v29, %v12955_v12  ;;  %v5260_v16 = vpop.f32.mrf.mxu0  ;;  %6223 = vmatprep.subr.bf16.mxu1 %v10852_v56  ;;  %v13139_v56 = vld [vmem:[#allocation4 + $0xec] ss:$16 sps:$4 sm:$0xff]  }
 0x297   :  { %14295 = vst [vmem:[#allocation39_spill] sm:$0xff] %v13086_v53  ;;  %v5373_v37 = vpop.f32.mrf.mxu1  ;;  %v13092_v14 = vadd.f32 %v5260_v16, %v12852_v22  ;;  %6111 = vmatpush1.bf16.msra.mxu0 %v10808_v40  ;;  %v11458_v40 = vld [vmem:[%s14250_s0 + $0x250] ss:$68 sps:$4 sm:$0xff]  }
 0x298   :  { %v13095_v25 = vadd.f32 %v5373_v37, %v12950_v60  ;;  %v5262_v54 = vpop.f32.mrf.mxu0  ;;  %6112 = vmatprep.subr.bf16.mxu0 %v10813_v3  ;;  %v11457_v37 = vld [vmem:[%s14250_s0 + $0x248] ss:$68 sps:$4 sm:$0xff]   ;;  %v11459_v16 = vld [vmem:[%s14250_s0 + $0x2d4] ss:$68 sps:$4 sm:$0xff]  }
 0x299   :  { %14296 = vst [vmem:[#allocation40_spill] sm:$0xff] %v13092_v14  ;;  %v5375_v36 = vpop.f32.mrf.mxu1  ;;  %v13098_v11 = vadd.f32 %v5262_v54, %v12861_v15  ;;  %v10817_v3 = vld [vmem:[#allocation2 + $0xfc8] ss:$16 sps:$4 sm:$0xff]  }
 0x29a   :  { %v13101_v32 = vadd.f32 %v5375_v36, %v12955_v12  ;;  %v5266_v29 = vpop.f32.mrf.mxu0  ;;  %5943 = vmatmul.mubr.bf16.gmra.mxu0 %v11457_v37 }
 0x29b   :  { %14297 = vst [vmem:[#allocation41_spill] sm:$0xff] %v13098_v11  ;;  %v5379_v22 = vpop.f32.mrf.mxu1  ;;  %6056 = vmatmul.mubr.bf16.gmra.mxu1 %v11458_v40  ;;  %v13110_v15 = vadd.f32 %v5266_v29, %v12864_v52  ;;  %6113 = vmatpush2.bf16.msra.mxu0 %v10811_v42  ;;  %v11460_v40 = vld [vmem:[%s14250_s0 + $0x2dc] ss:$68 sps:$4 sm:$0xff]  }
 0x29c   :  { %v13113_v36 = vadd.f32 %v5379_v22, %v12950_v60  ;;  %5952 = vmatprep.mubr.bf16.mxu0 %v11459_v16  ;;  %v5268_v54 = vpop.f32.mrf.mxu0  ;;  %6114 = vmatprep.subr.bf16.mxu0 %v10819_v9  ;;  %v10822_v52 = vld [vmem:[#allocation2 + $0xfac] ss:$16 sps:$4 sm:$0xff]   ;;  %v10850_v22 = vld [vmem:[#allocation2 + $0x1008] ss:$16 sps:$4 sm:$0xff]  }
 0x29d   :  { %14298 = vst [vmem:[#allocation42_spill] sm:$0xff] %v13110_v15  ;;  %v5381_v37 = vpop.f32.mrf.mxu1  ;;  %6065 = vmatprep.mubr.bf16.mxu1 %v11460_v40  ;;  %v13122_v29 = vadd.f32 %v5268_v54, %v12873_v0  ;;  %v10820_v40 = vld [vmem:[#allocation2 + $0xfa8] ss:$16 sps:$4 sm:$0xff]   ;;  %v10828_v0 = vld [vmem:[#allocation2 + $0xf8c] ss:$16 sps:$4 sm:$0xff]   ;;  %6224 = vmatpush1.bf16.msra.mxu1 %v10850_v22 }
 0x29e   :  { %v13125_v42 = vadd.f32 %v5381_v37, %v12955_v12  ;;  %v5270_v30 = vpop.f32.mrf.mxu0  ;;  %v11463_v37 = vld [vmem:[%s14250_s0 + $0x35c] ss:$68 sps:$4 sm:$0xff]   ;;  %6557 = vmatprep.subr.bf16.mxu1 %v13139_v56 }
 0x29f   :  { %14299 = vst [vmem:[#allocation43_spill] sm:$0xff] %v13122_v29  ;;  %v5383_v10 = vpop.f32.mrf.mxu1  ;;  %v13128_v16 = vadd.f32 %v5270_v30, %v12876_v17  ;;  %6115 = vmatpush2.bf16.msra.mxu0 %v10817_v3  ;;  %v11462_v3 = vld [vmem:[%s14250_s0 + $0x2d8] ss:$68 sps:$4 sm:$0xff]  }
 0x2a0   :  { %v13131_v9 = vadd.f32 %v5383_v10, %v12950_v60  ;;  %v5272_v35 = vpop.f32.mrf.mxu0  ;;  %6116 = vmatprep.subr.bf16.mxu0 %v10822_v52  ;;  %v11461_v10 = vld [vmem:[%s14250_s0 + $0x2d0] ss:$68 sps:$4 sm:$0xff]  }
 0x2a1   :  { %14300 = vst [vmem:[#allocation44_spill] sm:$0xff] %v13128_v16  ;;  %v5385_v5 = vpop.f32.mrf.mxu1  ;;  %v13134_v54 = vadd.f32 %v5272_v35, %v12885_v41  ;;  %v10826_v35 = vld [vmem:[#allocation2 + $0xf88] ss:$16 sps:$4 sm:$0xff]  }
 0x2a2   :  { %v13137_v63 = vadd.f32 %v5385_v5, %v12955_v12  ;;  %v5276_v30 = vpop.f32.mrf.mxu0  ;;  %5953 = vmatmul.mubr.bf16.gmra.mxu0 %v11461_v10  ;;  %v11464_v10 = vld [vmem:[%s14250_s0 + $0x364] ss:$68 sps:$4 sm:$0xff]  }
 0x2a3   :  { %14301 = vst [vmem:[#allocation45_spill] sm:$0xff] %v13134_v54  ;;  %v5389_v17 = vpop.f32.mrf.mxu1  ;;  %6066 = vmatmul.mubr.bf16.gmra.mxu1 %v11462_v3  ;;  %v13148_v41 = vadd.f32 %v5276_v30, %v12888_v45  ;;  %6117 = vmatpush2.bf16.msra.mxu0 %v10820_v40  ;;  %v10831_v45 = vld [vmem:[#allocation2 + $0xf6c] ss:$16 sps:$4 sm:$0xff]  }
 0x2a4   :  { %v13151_v5 = vadd.f32 %v5389_v17, %v12950_v60  ;;  %5962 = vmatprep.mubr.bf16.mxu0 %v11463_v37  ;;  %v5278_v52 = vpop.f32.mrf.mxu0  ;;  %6118 = vmatprep.subr.bf16.mxu0 %v10828_v0 }
 0x2a5   :  { %14302 = vst [vmem:[#allocation46_spill] sm:$0xff] %v13148_v41  ;;  %v5391_v22 = vpop.f32.mrf.mxu1  ;;  %6075 = vmatprep.mubr.bf16.mxu1 %v11464_v10  ;;  %v13160_v30 = vadd.f32 %v5278_v52, %v12897_v28  ;;  %v10837_v28 = vld [vmem:[#allocation2 + $0xf4c] ss:$16 sps:$4 sm:$0xff]   ;;  %v13291_v41 = vld [vmem:[#allocation4 + $0x84] ss:$16 sps:$4 sm:$0xff]  }
 0x2a6   :  { %v13163_v40 = vadd.f32 %v5391_v22, %v12955_v12  ;;  %v5280_v17 = vpop.f32.mrf.mxu0 }
 0x2a7   :  { %14303 = vst [vmem:[#allocation47_spill] sm:$0xff] %v13160_v30  ;;  %v5393_v3 = vpop.f32.mrf.mxu1  ;;  %v13167_v37 = vadd.f32 %v5280_v17, %v12900_v6  ;;  %6119 = vmatpush2.bf16.msra.mxu0 %v10826_v35  ;;  %v11465_v6 = vld [vmem:[%s14250_s0 + $0x358] ss:$68 sps:$4 sm:$0xff]   ;;  %v11466_v35 = vld [vmem:[%s14250_s0 + $0x360] ss:$68 sps:$4 sm:$0xff]  }
 0x2a8   :  { %v13170_v0 = vadd.f32 %v5393_v3, %v12950_v60  ;;  %v5282_v10 = vpop.f32.mrf.mxu0  ;;  %6120 = vmatprep.subr.bf16.mxu0 %v10831_v45  ;;  %v11467_v17 = vld [vmem:[%s14250_s0 + $0x3e4] ss:$68 sps:$4 sm:$0xff]  }
 0x2a9   :  { %14304 = vst [vmem:[#allocation48_spill] sm:$0xff] %v13167_v37  ;;  %v5395_v59 = vpop.f32.mrf.mxu1  ;;  %v13173_v52 = vadd.f32 %v5282_v10, %v12909_v18 }
 0x2aa   :  { %v13176_v22 = vadd.f32 %v5395_v59, %v12955_v12  ;;  %v5286_v26 = vpop.f32.mrf.mxu0  ;;  %5963 = vmatmul.mubr.bf16.gmra.mxu0 %v11465_v6  ;;  %v10835_v59 = vld [vmem:[#allocation2 + $0xf48] ss:$16 sps:$4 sm:$0xff]   ;;  %v11468_v6 = vld [vmem:[%s14250_s0 + $0x3ec] ss:$68 sps:$4 sm:$0xff]  }
 0x2ab   :  { %14305 = vst [vmem:[#allocation49_spill] sm:$0xff] %v13173_v52  ;;  %v5399_v38 = vpop.f32.mrf.mxu1  ;;  %6076 = vmatmul.mubr.bf16.gmra.mxu1 %v11466_v35  ;;  %v13185_v45 = vadd.f32 %v5286_v26, %v12912_v55  ;;  %6121 = vmatpush2.bf16.msra.mxu0 %v10829_v8  ;;  %v10843_v55 = vld [vmem:[#allocation2 + $0xf2c] ss:$16 sps:$4 sm:$0xff]  }
 0x2ac   :  { %14306 = vst [vmem:[#allocation50_spill] sm:$0xff] %v13176_v22  ;;  %v13188_v18 = vadd.f32 %v5399_v38, %v12950_v60  ;;  %5972 = vmatprep.mubr.bf16.mxu0 %v11467_v17  ;;  %v5288_v3 = vpop.f32.mrf.mxu0  ;;  %6122 = vmatprep.subr.bf16.mxu0 %v10837_v28  ;;  %v10841_v28 = vld [vmem:[#allocation2 + $0xf28] ss:$16 sps:$4 sm:$0xff]  }
 0x2ad   :  { %14307 = vst [vmem:[#allocation51_spill] sm:$0xff] %v13185_v45  ;;  %v5401_v10 = vpop.f32.mrf.mxu1  ;;  %6085 = vmatprep.mubr.bf16.mxu1 %v11468_v6  ;;  %v13197_v26 = vadd.f32 %v5288_v3, %v12921_v62  ;;  %v10849_v6 = vld [vmem:[#allocation2 + $0xf0c] ss:$16 sps:$4 sm:$0xff]   ;;  %v11480_v22 = vld [vmem:[%s14250_s0 + $0x1d4] ss:$68 sps:$4 sm:$0xff]  }
 0x2ae   :  { %v13200_v8 = vadd.f32 %v5401_v10, %v12955_v12  ;;  %v5290_v38 = vpop.f32.mrf.mxu0 }
 0x2af   :  { %14308 = vst [vmem:[#allocation52_spill] sm:$0xff] %v13197_v26  ;;  %v5403_v35 = vpop.f32.mrf.mxu1  ;;  %v13203_v39 = vadd.f32 %v5290_v38, %v12924_v61  ;;  %6123 = vmatpush2.bf16.msra.mxu0 %v10835_v59  ;;  %v11469_v61 = vld [vmem:[%s14250_s0 + $0x3e0] ss:$68 sps:$4 sm:$0xff]   ;;  %v11470_v59 = vld [vmem:[%s14250_s0 + $0x3e8] ss:$68 sps:$4 sm:$0xff]  }
 0x2b0   :  { %v13206_v17 = vadd.f32 %v5403_v35, %v12950_v60  ;;  %v5292_v24 = vpop.f32.mrf.mxu0  ;;  %6124 = vmatprep.subr.bf16.mxu0 %v10843_v55  ;;  %v14313_v35 = vmov 0   ;;  %v13312_v26 = vld [vmem:[#allocation4 + $0x80] ss:$16 sps:$4 sm:$0xff]  }
 0x2b1   :  { %14309 = vst [vmem:[#allocation53_spill] sm:$0xff] %v13203_v39  ;;  %v5405_v58 = vpop.f32.mrf.mxu1  ;;  %v13209_v62 = vadd.f32 %v5292_v24, %v12933_v2  ;;  %v10847_v2 = vld [vmem:[#allocation2 + $0xf08] ss:$16 sps:$4 sm:$0xff]  }
 0x2b2   :  { %v13212_v3 = vadd.f32 %v5405_v58, %v12955_v12  ;;  %v5296_v10 = vpop.f32.mrf.mxu0  ;;  %5973 = vmatmul.mubr.bf16.gmra.mxu0 %v11469_v61  ;;  %v11471_v58 = vld [vmem:[%s14250_s0 + $0x3c] ss:$68 sps:$4 sm:$0xff]   ;;  %v13231_v61 = vld [vmem:[#allocation4 + $0xe4] ss:$16 sps:$4 sm:$0xff]  }
 0x2b3   :  { %14310 = vst [vmem:[#allocation54_spill] sm:$0xff] %v13209_v62  ;;  %v13214_v13 = vpop.f32.mrf.mxu1  ;;  %6086 = vmatmul.mubr.bf16.gmra.mxu1 %v11470_v59  ;;  %v13223_v55 = vadd.f32 %v5296_v10, %v12937_v27  ;;  %6125 = vmatpush2.bf16.msra.mxu0 %v10841_v28  ;;  %14314 = vst [vmem:[#allocation57_spill] sm:$0xff] %v13231_v61  ;;  %v11477_v62 = vld [vmem:[%s14250_s0 + $0x14c] ss:$68 sps:$4 sm:$0xff]  }
 0x2b4   :  { %14311 = vst [vmem:[#allocation55_spill] sm:$0xff] %v13212_v3  ;;  %6128 = vmatprep.mubr.bf16.mxu0 %v11471_v58  ;;  %v5298_v24 = vpop.f32.mrf.mxu0  ;;  %6126 = vmatprep.subr.bf16.mxu0 %v10849_v6  ;;  %v13246_v6 = vld [vmem:[#allocation4 + $0xc4] ss:$16 sps:$4 sm:$0xff]  }
 0x2b5   :  { %14312 = vst [vmem:[#allocation56_spill] sm:$0xff] %v13223_v55  ;;  %v13228_v38 = vpop.f32.mrf.mxu1  ;;  %6241 = vmatprep.mubr.bf16.mxu1 %v14313_v35  ;;  %v13234_v59 = vadd.f32 %v5298_v24, %v12947_v43  ;;  %v13251_v43 = vld [vmem:[#allocation4 + $0xe8] ss:$16 sps:$4 sm:$0xff]   ;;  %v13337_v55 = vld [vmem:[#allocation4 + $0x44] ss:$16 sps:$4 sm:$0xff]  }
 0x2b6   :  { %v5300_v27 = vpop.f32.mrf.mxu0  ;;  %14320 = vst [vmem:[#allocation63_spill] sm:$0xff] %v13337_v55 }
 0x2b7   :  { %14315 = vst [vmem:[#allocation58_spill] sm:$0xff] %v13234_v59  ;;  %v13236_v10 = vpop.f32.mrf.mxu1  ;;  %v13239_v28 = vadd.f32 %v5300_v27, %v12952_v57  ;;  %6127 = vmatpush2.bf16.msra.mxu0 %v10847_v2  ;;  %v11472_v57 = vld [vmem:[%s14250_s0 + $0x38] ss:$68 sps:$4 sm:$0xff]   ;;  %v11473_v2 = vld [vmem:[%s14250_s0 + $0x40] ss:$68 sps:$4 sm:$0xff]  }
 0x2b8   :  { %v5302_v58 = vpop.f32.mrf.mxu0  ;;  %6514 = vmatprep.subr.bf16.mxu0 %v13231_v61  ;;  %v13259_v27 = vld [vmem:[#allocation4 + $0xcc] ss:$16 sps:$4 sm:$0xff]  }
 0x2b9   :  { %14316 = vst [vmem:[#allocation59_spill] sm:$0xff] %v13239_v28  ;;  %v13243_v11 = vpop.f32.mrf.mxu1  ;;  %v13249_v14 = vadd.f32 %v5302_v58, %v12963_v19  ;;  %v11474_v19 = vld [vmem:[%s14250_s0 + $0xc4] ss:$68 sps:$4 sm:$0xff]   ;;  %v13266_v58 = vld [vmem:[#allocation4 + $0xc0] ss:$16 sps:$4 sm:$0xff]  }
 0x2ba   :  { %14317 = vst [vmem:[#allocation60_spill] sm:$0xff] %v13243_v11  ;;  %v5452_v24 = vpop.f32.mrf.mxu0  ;;  %6129 = vmatmul.mubr.bf16.vlgmr.msra.gmra.mxu0 %v11472_v57  ;;  %v13358_v11 = vld [vmem:[#allocation4 + $0x40] ss:$16 sps:$4 sm:$0xff]  }
 0x2bb   :  { %14318 = vst [vmem:[#allocation61_spill] sm:$0xff] %v13249_v14  ;;  %v5565_v53 = vpop.f32.mrf.mxu1  ;;  %6242 = vmatmul.mubr.bf16.vlgmr.msra.gmra.mxu1 %v11473_v2  ;;  %v5453_v1 = vadd.f32 %v5452_v24, %v12969_v34  ;;  %6515 = vmatpush1.bf16.msra.mxu0 %v13241_v51  ;;  %v13270_v2 = vld [vmem:[#allocation4 + $0xa4] ss:$16 sps:$4 sm:$0xff]   ;;  %v13276_v24 = vld [vmem:[#allocation4 + $0xc8] ss:$16 sps:$4 sm:$0xff]   ;;  %14323 = vst [vmem:[#allocation66_spill] sm:$0xff] %v13358_v11 }
 0x2bc   :  { %6138 = vmatprep.mubr.bf16.mxu0 %v11474_v19  ;;  %v5454_v54 = vpop.f32.mrf.mxu0  ;;  %6251 = vmatprep.mubr.bf16.mxu1 %v14313_v35 }
 0x2bd   :  { %v5567_v57 = vpop.f32.mrf.mxu1  ;;  %6516 = vmatprep.subr.bf16.mxu0 %v13246_v6  ;;  %v13272_v16 = vadd.f32 %v5565_v53, %v5453_v1  ;;  %v5455_v34 = vadd.f32 %v5454_v54, %v12981_v33  ;;  %6558 = vmatpush1.bf16.msra.mxu1 %v13251_v43  ;;  %v13284_v1 = vld [vmem:[#allocation4 + $0xa0] ss:$16 sps:$4 sm:$0xff]   ;;  %v13286_v33 = vld [vmem:[#allocation4 + $0xac] ss:$16 sps:$4 sm:$0xff]  }
 0x2be   :  { %v5456_v29 = vpop.f32.mrf.mxu0  ;;  %6559 = vmatprep.subr.bf16.mxu1 %v13259_v27 }
 0x2bf   :  { %v5569_v19 = vpop.f32.mrf.mxu1  ;;  %v13279_v15 = vadd.f32 %v5567_v57, %v5455_v34  ;;  %v5457_v52 = vadd.f32 %v5456_v29, %v12987_v46  ;;  %6517 = vmatpush1.bf16.msra.mxu0 %v13266_v58  ;;  %v13294_v57 = vld [vmem:[#allocation4 + $0xa8] ss:$16 sps:$4 sm:$0xff]   ;;  %v11475_v34 = vld [vmem:[%s14250_s0 + $0xc0] ss:$68 sps:$4 sm:$0xff]  }
 0x2c0   :  { %v5458_v37 = vpop.f32.mrf.mxu0  ;;  %6518 = vmatprep.subr.bf16.mxu0 %v13270_v2 }
 0x2c1   :  { %v5571_v30 = vpop.f32.mrf.mxu1  ;;  %v13288_v53 = vadd.f32 %v5569_v19, %v5457_v52  ;;  %v5459_v54 = vadd.f32 %v5458_v37, %v12993_v48  ;;  %6560 = vmatpush1.bf16.msra.mxu1 %v13276_v24  ;;  %v11476_v52 = vld [vmem:[%s14250_s0 + $0xc8] ss:$68 sps:$4 sm:$0xff]  }
 0x2c2   :  { %v5462_v46 = vpop.f32.mrf.mxu0  ;;  %6139 = vmatmul.mubr.bf16.gmra.mxu0 %v11475_v34  ;;  %v13302_v19 = vld [vmem:[#allocation4 + $0x8c] ss:$16 sps:$4 sm:$0xff]   ;;  %6561 = vmatprep.subr.bf16.mxu1 %v13286_v33 }
 0x2c3   :  { %v5575_v29 = vpop.f32.mrf.mxu1  ;;  %6252 = vmatmul.mubr.bf16.gmra.mxu1 %v11476_v52  ;;  %v13304_v48 = vadd.f32 %v5571_v30, %v5459_v54  ;;  %v5463_v37 = vadd.f32 %v5462_v46, %v13005_v44  ;;  %6148 = vmatprep.mubr.bf16.mxu0 %v11477_v62  ;;  %v13319_v44 = vld [vmem:[#allocation4 + $0x64] ss:$16 sps:$4 sm:$0xff]   ;;  %v13322_v62 = vld [vmem:[#allocation4 + $0x88] ss:$16 sps:$4 sm:$0xff]  }
 0x2c4   :  { %6261 = vmatprep.mubr.bf16.mxu1 %v14313_v35  ;;  %v5464_v39 = vpop.f32.mrf.mxu0  ;;  %6519 = vmatpush1.bf16.msra.mxu0 %v13284_v1 }
 0x2c5   :  { %14319 = vst [vmem:[#allocation62_spill] sm:$0xff] %v13304_v48  ;;  %v5577_v34 = vpop.f32.mrf.mxu1  ;;  %v13315_v52 = vadd.f32 %v5575_v29, %v5463_v37  ;;  %v5465_v30 = vadd.f32 %v5464_v39, %v13017_v21  ;;  %6520 = vmatprep.subr.bf16.mxu0 %v13291_v41  ;;  %6562 = vmatpush1.bf16.msra.mxu1 %v13294_v57  ;;  %v13329_v39 = vld [vmem:[#allocation4 + $0x60] ss:$16 sps:$4 sm:$0xff]   ;;  %v13331_v21 = vld [vmem:[#allocation4 + $0x6c] ss:$16 sps:$4 sm:$0xff]  }
 0x2c6   :  { %v5466_v54 = vpop.f32.mrf.mxu0  ;;  %6563 = vmatprep.subr.bf16.mxu1 %v13302_v19 }
 0x2c7   :  { %v5579_v46 = vpop.f32.mrf.mxu1  ;;  %v13325_v45 = vadd.f32 %v5577_v34, %v5465_v30  ;;  %v5467_v14 = vadd.f32 %v5466_v54, %v13023_v47  ;;  %v13340_v34 = vld [vmem:[#allocation4 + $0x68] ss:$16 sps:$4 sm:$0xff]  }
 0x2c8   :  { %v5468_v29 = vpop.f32.mrf.mxu0  ;;  %6521 = vmatpush1.bf16.msra.mxu0 %v13312_v26  ;;  %14321 = vst [vmem:[#allocation64_spill] sm:$0xff] %v13340_v34  ;;  %v11478_v54 = vld [vmem:[%s14250_s0 + $0x148] ss:$68 sps:$4 sm:$0xff]  }
 0x2c9   :  { %v5581_v37 = vpop.f32.mrf.mxu1  ;;  %v13333_v28 = vadd.f32 %v5579_v46, %v5467_v14  ;;  %v5469_v59 = vadd.f32 %v5468_v29, %v13029_v31  ;;  %6522 = vmatprep.subr.bf16.mxu0 %v13319_v44  ;;  %6564 = vmatpush1.bf16.msra.mxu1 %v13322_v62  ;;  %v11479_v14 = vld [vmem:[%s14250_s0 + $0x150] ss:$68 sps:$4 sm:$0xff]   ;;  %v13348_v31 = vld [vmem:[#allocation4 + $0x4c] ss:$16 sps:$4 sm:$0xff]  }
 0x2ca   :  { %v5472_v47 = vpop.f32.mrf.mxu0  ;;  %6149 = vmatmul.mubr.bf16.gmra.mxu0 %v11478_v54  ;;  %6565 = vmatprep.subr.bf16.mxu1 %v13331_v21 }
 0x2cb   :  { %v5585_v30 = vpop.f32.mrf.mxu1  ;;  %6262 = vmatmul.mubr.bf16.gmra.mxu1 %v11479_v14  ;;  %v13350_v46 = vadd.f32 %v5581_v37, %v5469_v59  ;;  %v5473_v29 = vadd.f32 %v5472_v47, %v13041_v20  ;;  %6158 = vmatprep.mubr.bf16.mxu0 %v11480_v22  ;;  %v13365_v20 = vld [vmem:[#allocation4 + $0x24] ss:$16 sps:$4 sm:$0xff]   ;;  %v13368_v22 = vld [vmem:[#allocation4 + $0x48] ss:$16 sps:$4 sm:$0xff]  }
 0x2cc   :  { %6271 = vmatprep.mubr.bf16.mxu1 %v14313_v35  ;;  %v5474_v48 = vpop.f32.mrf.mxu0  ;;  %6523 = vmatpush1.bf16.msra.mxu0 %v13329_v39  ;;  %14324 = vst [vmem:[#allocation67_spill] sm:$0xff] %v13365_v20  ;;  %14325 = vst [vmem:[#allocation68_spill] sm:$0xff] %v13368_v22 }
 0x2cd   :  { %14322 = vst [vmem:[#allocation65_spill] sm:$0xff] %v13350_v46  ;;  %v5587_v54 = vpop.f32.mrf.mxu1  ;;  %v13361_v14 = vadd.f32 %v5585_v30, %v5473_v29  ;;  %v5475_v59 = vadd.f32 %v5474_v48, %v13053_v23  ;;  %6524 = vmatprep.subr.bf16.mxu0 %v13337_v55  ;;  %6566 = vmatpush1.bf16.msra.mxu1 %v13340_v34  ;;  %v13375_v23 = vld [vmem:[#allocation4 + $0x20] ss:$16 sps:$4 sm:$0xff]   ;;  %v13377_v48 = vld [vmem:[#allocation4 + $0x2c] ss:$16 sps:$4 sm:$0xff]  }
 0x2ce   :  { %v5476_v37 = vpop.f32.mrf.mxu0  ;;  %6567 = vmatprep.subr.bf16.mxu1 %v13348_v31  ;;  %14326 = vst [vmem:[#allocation69_spill] sm:$0xff] %v13375_v23  ;;  %14327 = vst [vmem:[#allocation70_spill] sm:$0xff] %v13377_v48 }
 0x2cf   :  { %v5589_v47 = vpop.f32.mrf.mxu1  ;;  %v13371_v46 = vadd.f32 %v5587_v54, %v5475_v59  ;;  %v5477_v3 = vadd.f32 %v5476_v37, %v13059_v50  ;;  %v13384_v54 = vld [vmem:[#allocation4 + $0x4] ss:$16 sps:$4 sm:$0xff]   ;;  %v13386_v59 = vld [vmem:[#allocation4 + $0x28] ss:$16 sps:$4 sm:$0xff]  }
 0x2d0   :  { %v5478_v30 = vpop.f32.mrf.mxu0  ;;  %6525 = vmatpush1.bf16.msra.mxu0 %v13358_v11  ;;  %v11481_v11 = vld [vmem:[%s14250_s0 + $0x1d0] ss:$68 sps:$4 sm:$0xff]  }
 0x2d1   :  { %v5591_v29 = vpop.f32.mrf.mxu1  ;;  %v13379_v55 = vadd.f32 %v5589_v47, %v5477_v3  ;;  %v5479_v34 = vadd.f32 %v5478_v30, %v13065_v4  ;;  %6526 = vmatprep.subr.bf16.mxu0 %v13365_v20  ;;  %6568 = vmatpush1.bf16.msra.mxu1 %v13368_v22  ;;  %v11482_v3 = vld [vmem:[%s14250_s0 + $0x1d8] ss:$68 sps:$4 sm:$0xff]  }
 0x2d2   :  { %v5482_v50 = vpop.f32.mrf.mxu0  ;;  %6159 = vmatmul.mubr.bf16.gmra.mxu0 %v11481_v11  ;;  %v13394_v4 = vld [vmem:[#allocation4 + $0xc] ss:$16 sps:$4 sm:$0xff]   ;;  %6569 = vmatprep.subr.bf16.mxu1 %v13377_v48 }
 0x2d3   :  { %14328 = vst [vmem:[#allocation71_spill] sm:$0xff] %v13379_v55  ;;  %v5595_v37 = vpop.f32.mrf.mxu1  ;;  %6272 = vmatmul.mubr.bf16.gmra.mxu1 %v11482_v3  ;;  %v13396_v47 = vadd.f32 %v5591_v29, %v5479_v34  ;;  %v5483_v30 = vadd.f32 %v5482_v50, %v13077_v7  ;;  %v11483_v20 = vld [vmem:[%s14250_s0 + $0x25c] ss:$68 sps:$4 sm:$0xff]   ;;  %v13412_v7 = vld [vmem:[#allocation4 + $0x8] ss:$16 sps:$4 sm:$0xff]  }
 0x2d4   :  { %6168 = vmatprep.mubr.bf16.mxu0 %v11483_v20  ;;  %6281 = vmatprep.mubr.bf16.mxu1 %v14313_v35  ;;  %v5484_v22 = vpop.f32.mrf.mxu0  ;;  %v13405_v3 = vld [vmem:[#allocation4] ss:$16 sps:$4 sm:$0xff]   ;;  %14331 = vst [vmem:[#allocation74_spill] sm:$0xff] %v13412_v7 }
 0x2d5   :  { %14329 = vst [vmem:[#allocation72_spill] sm:$0xff] %v13396_v47  ;;  %v5597_v11 = vpop.f32.mrf.mxu1  ;;  %6527 = vmatpush1.bf16.msra.mxu0 %v13375_v23  ;;  %14330 = vst [vmem:[#allocation73_spill] sm:$0xff] %v13405_v3  ;;  %v13407_v55 = vadd.f32 %v5595_v37, %v5483_v30  ;;  %v5485_v34 = vadd.f32 %v5484_v22, %v13089_v49  ;;  %6570 = vmatpush1.bf16.msra.mxu1 %v13386_v59 }
 0x2d6   :  { %6528 = vmatprep.subr.bf16.mxu0 %v13384_v54  ;;  %v5486_v20 = vpop.f32.mrf.mxu0  ;;  %6571 = vmatprep.subr.bf16.mxu1 %v13394_v4 }
 0x2d7   :  { %v5599_v29 = vpop.f32.mrf.mxu1  ;;  %v13415_v50 = vadd.f32 %v5597_v11, %v5485_v34  ;;  %v5487_v47 = vadd.f32 %v5486_v20, %v13095_v25  ;;  %v11484_v11 = vld [vmem:[%s14250_s0 + $0x258] ss:$68 sps:$4 sm:$0xff]   ;;  %v11485_v25 = vld [vmem:[%s14250_s0 + $0x260] ss:$68 sps:$4 sm:$0xff]  }
 0x2d8   :  { %v5488_v23 = vpop.f32.mrf.mxu0 }
 0x2d9   :  { %v5601_v48 = vpop.f32.mrf.mxu1  ;;  %6529 = vmatpush1.bf16.msra.mxu0 %v13405_v3  ;;  %v13419_v37 = vadd.f32 %v5599_v29, %v5487_v47  ;;  %v5489_v49 = vadd.f32 %v5488_v23, %v13101_v32  ;;  %6572 = vmatpush1.bf16.msra.mxu1 %v13412_v7  ;;  %v11486_v23 = vld [vmem:[%s14250_s0 + $0x2e4] ss:$68 sps:$4 sm:$0xff]  }
 0x2da   :  { %6657 = vmatprep.subr.bf16.mxu0 %v13231_v61  ;;  %v5492_v22 = vpop.f32.mrf.mxu0  ;;  %6169 = vmatmul.mubr.bf16.gmra.mxu0 %v11484_v11 }
 0x2db   :  { %v5605_v30 = vpop.f32.mrf.mxu1  ;;  %6282 = vmatmul.mubr.bf16.gmra.mxu1 %v11485_v25  ;;  %v13430_v47 = vadd.f32 %v5601_v48, %v5489_v49  ;;  %v5493_v32 = vadd.f32 %v5492_v22, %v13113_v36  ;;  %6178 = vmatprep.mubr.bf16.mxu0 %v11486_v23 }
 0x2dc   :  { %6291 = vmatprep.mubr.bf16.mxu1 %v14313_v35  ;;  %v5494_v34 = vpop.f32.mrf.mxu0  ;;  %6700 = vmatprep.subr.bf16.mxu1 %v13139_v56 }
 0x2dd   :  { %14332 = vst [vmem:[#allocation75_spill] sm:$0xff] %v13430_v47  ;;  %v5607_v20 = vpop.f32.mrf.mxu1  ;;  %v13438_v29 = vadd.f32 %v5605_v30, %v5493_v32  ;;  %v5495_v11 = vadd.f32 %v5494_v34, %v13125_v42  ;;  %v11487_v30 = vld [vmem:[%s14250_s0 + $0x2e0] ss:$68 sps:$4 sm:$0xff]   ;;  %v11488_v42 = vld [vmem:[%s14250_s0 + $0x2e8] ss:$68 sps:$4 sm:$0xff]  }
 0x2de   :  { %v5496_v25 = vpop.f32.mrf.mxu0 }
 0x2df   :  { %v5609_v48 = vpop.f32.mrf.mxu1  ;;  %v13441_v49 = vadd.f32 %v5607_v20, %v5495_v11  ;;  %v5497_v36 = vadd.f32 %v5496_v25, %v13131_v9 }
 0x2e0   :  { %v5498_v22 = vpop.f32.mrf.mxu0 }
 0x2e1   :  { %v5611_v47 = vpop.f32.mrf.mxu1  ;;  %v13444_v61 = vadd.f32 %v5609_v48, %v5497_v36  ;;  %v5499_v23 = vadd.f32 %v5498_v22, %v13137_v63  ;;  %v11489_v63 = vld [vmem:[%s14250_s0 + $0x36c] ss:$68 sps:$4 sm:$0xff]  }
 0x2e2   :  { %v5502_v7 = vpop.f32.mrf.mxu0  ;;  %6179 = vmatmul.mubr.bf16.gmra.mxu0 %v11487_v30 }
 0x2e3   :  { %v5615_v3 = vpop.f32.mrf.mxu1  ;;  %6292 = vmatmul.mubr.bf16.gmra.mxu1 %v11488_v42  ;;  %v13453_v32 = vadd.f32 %v5611_v47, %v5499_v23  ;;  %v5503_v9 = vadd.f32 %v5502_v7, %v13151_v5  ;;  %6188 = vmatprep.mubr.bf16.mxu0 %v11489_v63 }
 0x2e4   :  { %6301 = vmatprep.mubr.bf16.mxu1 %v14313_v35  ;;  %v5504_v34 = vpop.f32.mrf.mxu0 }
 0x2e5   :  { %14333 = vst [vmem:[#allocation76_spill] sm:$0xff] %v13453_v32  ;;  %v5617_v20 = vpop.f32.mrf.mxu1  ;;  %v13460_v11 = vadd.f32 %v5615_v3, %v5503_v9  ;;  %v5505_v25 = vadd.f32 %v5504_v34, %v13163_v40  ;;  %v11490_v3 = vld [vmem:[%s14250_s0 + $0x368] ss:$68 sps:$4 sm:$0xff]   ;;  %v11491_v40 = vld [vmem:[%s14250_s0 + $0x370] ss:$68 sps:$4 sm:$0xff]  }
 0x2e6   :  { %v5506_v48 = vpop.f32.mrf.mxu0  ;;  %v11492_v9 = vld [vmem:[%s14250_s0 + $0x3f4] ss:$68 sps:$4 sm:$0xff]  }
 0x2e7   :  { %v5619_v36 = vpop.f32.mrf.mxu1  ;;  %v13463_v22 = vadd.f32 %v5617_v20, %v5505_v25  ;;  %v5507_v47 = vadd.f32 %v5506_v48, %v13170_v0 }
 0x2e8   :  { %v13466_v5 = vpop.f32.mrf.mxu0 }
 0x2e9   :  { %14334 = vst [vmem:[#allocation77_spill] sm:$0xff] %v13466_v5  ;;  %v13468_v7 = vpop.f32.mrf.mxu1  ;;  %v13470_v23 = vadd.f32 %v5619_v36, %v5507_v47 }
 0x2ea   :  { %14335 = vst [vmem:[#allocation78_spill] sm:$0xff] %v13468_v7  ;;  %v5512_v30 = vpop.f32.mrf.mxu0  ;;  %6189 = vmatmul.mubr.bf16.gmra.mxu0 %v11490_v3 }
 0x2eb   :  { %v5625_v42 = vpop.f32.mrf.mxu1  ;;  %6302 = vmatmul.mubr.bf16.gmra.mxu1 %v11491_v40  ;;  %v5513_v0 = vadd.f32 %v5512_v30, %v13188_v18  ;;  %6198 = vmatprep.mubr.bf16.mxu0 %v11492_v9  ;;  %v5410_v40 = vadd.f32 %v13214_v13, %v12950_v60 }
 0x2ec   :  { %6311 = vmatprep.mubr.bf16.mxu1 %v14313_v35  ;;  %v5514_v63 = vpop.f32.mrf.mxu0 }
 0x2ed   :  { %v5627_v34 = vpop.f32.mrf.mxu1  ;;  %v13483_v20 = vadd.f32 %v5625_v42, %v5513_v0  ;;  %v5515_v25 = vadd.f32 %v5514_v63, %v13200_v8  ;;  %v11493_v8 = vld [vmem:[%s14250_s0 + $0x3f0] ss:$68 sps:$4 sm:$0xff]   ;;  %v5412_v0 = vadd.f32 %v13228_v38, %v12955_v12 }
 0x2ee   :  { %v5516_v48 = vpop.f32.mrf.mxu0 }
 0x2ef   :  { %v5629_v36 = vpop.f32.mrf.mxu1  ;;  %v13486_v47 = vadd.f32 %v5627_v34, %v5515_v25  ;;  %v5517_v3 = vadd.f32 %v5516_v48, %v13206_v17  ;;  %v11494_v17 = vld [vmem:[%s14250_s0 + $0x3f8] ss:$68 sps:$4 sm:$0xff]   ;;  %v5414_v25 = vadd.f32 %v13236_v10, %v12950_v60 }
 0x2f0   :  { %v13489_v18 = vpop.f32.mrf.mxu0 }
 0x2f1   :  { %v13491_v30 = vpop.f32.mrf.mxu1  ;;  %v13495_v9 = vadd.f32 %v5629_v36, %v5517_v3 }
 0x2f2   :  { %v5522_v7 = vpop.f32.mrf.mxu0  ;;  %6199 = vmatmul.mubr.bf16.gmra.mxu0 %v11493_v8 }
 0x2f3   :  { %v5635_v42 = vpop.f32.mrf.mxu1  ;;  %6312 = vmatmul.mubr.bf16.gmra.mxu1 %v11494_v17  ;;  %v5523_v63 = vadd.f32 %v5522_v7, %v5410_v40  ;;  %6546 = vmatprep.mubr.bf16.mxu0 %v14313_v35 }
 0x2f4   :  { %6589 = vmatprep.mubr.bf16.mxu1 %v14313_v35  ;;  %v5524_v13 = vpop.f32.mrf.mxu0 }
 0x2f5   :  { %v5637_v34 = vpop.f32.mrf.mxu1  ;;  %v13509_v48 = vadd.f32 %v5635_v42, %v5523_v63  ;;  %v5525_v36 = vadd.f32 %v5524_v13, %v5412_v0 }
 0x2f6   :  { %v5526_v3 = vpop.f32.mrf.mxu0 }
 0x2f7   :  { %v5639_v8 = vpop.f32.mrf.mxu1  ;;  %v13511_v5 = vadd.f32 %v5637_v34, %v5525_v36  ;;  %v5527_v17 = vadd.f32 %v5526_v3, %v5414_v25 }
 0x2f8   :  { %v13513_v32 = vpop.f32.mrf.mxu0 }
 0x2f9   :  { %v13515_v38 = vpop.f32.mrf.mxu1  ;;  %v13517_v7 = vadd.f32 %v5639_v8, %v5527_v17  ;;  %v14337_v17 = vld [vmem:[#allocation63_spill] sm:$0xff] }
 0x2fa   :  { %v5678_v40 = vpop.f32.mrf.mxu0  ;;  %6547 = vmatmul.mubr.bf16.vlgmr.msra.gmra.mxu0 %v14313_v35 }
 0x2fb   :  { %v5791_v12 = vpop.f32.mrf.mxu1  ;;  %6590 = vmatmul.mubr.bf16.vlgmr.msra.gmra.mxu1 %v14313_v35  ;;  %v5679_v60 = vadd.f32 %v5678_v40, %v13272_v16  ;;  %6658 = vmatpush1.bf16.msra.mxu0 %v13241_v51 }
 0x2fc   :  { %6701 = vmatpush1.bf16.msra.mxu1 %v13251_v43  ;;  %v5680_v10 = vpop.f32.mrf.mxu0  ;;  %6659 = vmatprep.subr.bf16.mxu0 %v13246_v6 }
 0x2fd   :  { %v5793_v42 = vpop.f32.mrf.mxu1  ;;  %6702 = vmatprep.subr.bf16.mxu1 %v13259_v27  ;;  %v13526_v0 = vadd.f32 %v5791_v12, %v5679_v60  ;;  %v5681_v63 = vadd.f32 %v5680_v10, %v13279_v15  ;;  %6689 = vmatprep.mubr.bf16.mxu0 %v14313_v35 }
 0x2fe   :  { %6732 = vmatprep.mubr.bf16.mxu1 %v14313_v35  ;;  %v5682_v13 = vpop.f32.mrf.mxu0 }
 0x2ff   :  { %v5795_v16 = vpop.f32.mrf.mxu1  ;;  %v13531_v34 = vadd.f32 %v5793_v42, %v5681_v63  ;;  %v5683_v51 = vadd.f32 %v5682_v13, %v13288_v53  ;;  %6660 = vmatpush1.bf16.msra.mxu0 %v13266_v58  ;;  %v14338_v42 = vld [vmem:[#allocation71_spill] sm:$0xff]  ;;  %v14339_v63 = vld [vmem:[#allocation66_spill] sm:$0xff] }
 0x300   :  { %6703 = vmatpush1.bf16.msra.mxu1 %v13276_v24  ;;  %v13536_v6 = vpop.f32.mrf.mxu0  ;;  %6661 = vmatprep.subr.bf16.mxu0 %v13270_v2 }
 0x301   :  { %v13538_v12 = vpop.f32.mrf.mxu1  ;;  %6704 = vmatprep.subr.bf16.mxu1 %v13286_v33  ;;  %v13542_v15 = vadd.f32 %v5795_v16, %v5683_v51  ;;  %v14341_v51 = vld [vmem:[#allocation67_spill] sm:$0xff] }
 0x302   :  { %v5688_v43 = vpop.f32.mrf.mxu0 }
 0x303   :  { %v5801_v27 = vpop.f32.mrf.mxu1  ;;  %v5689_v25 = vadd.f32 %v5688_v43, %v13315_v52  ;;  %6662 = vmatpush1.bf16.msra.mxu0 %v13284_v1 }
 0x304   :  { %6705 = vmatpush1.bf16.msra.mxu1 %v13294_v57  ;;  %v5690_v58 = vpop.f32.mrf.mxu0  ;;  %6663 = vmatprep.subr.bf16.mxu0 %v13291_v41 }
 0x305   :  { %v5803_v24 = vpop.f32.mrf.mxu1  ;;  %6706 = vmatprep.subr.bf16.mxu1 %v13302_v19  ;;  %v13549_v53 = vadd.f32 %v5801_v27, %v5689_v25  ;;  %v5691_v2 = vadd.f32 %v5690_v58, %v13325_v45  ;;  %v14343_v58 = vld [vmem:[#allocation69_spill] sm:$0xff] }
 0x306   :  { %v5692_v33 = vpop.f32.mrf.mxu0 }
 0x307   :  { %v5805_v36 = vpop.f32.mrf.mxu1  ;;  %v13552_v3 = vadd.f32 %v5803_v24, %v5691_v2  ;;  %v5693_v52 = vadd.f32 %v5692_v33, %v13333_v28  ;;  %6664 = vmatpush1.bf16.msra.mxu0 %v13312_v26  ;;  %v14336_v28 = vld [vmem:[#allocation64_spill] sm:$0xff] }
 0x308   :  { %6707 = vmatpush1.bf16.msra.mxu1 %v13322_v62  ;;  %v13557_v1 = vpop.f32.mrf.mxu0  ;;  %6665 = vmatprep.subr.bf16.mxu0 %v13319_v44 }
 0x309   :  { %v13559_v57 = vpop.f32.mrf.mxu1  ;;  %6708 = vmatprep.subr.bf16.mxu1 %v13331_v21  ;;  %v13563_v41 = vadd.f32 %v5805_v36, %v5693_v52 }
 0x30a   :  { %v5698_v45 = vpop.f32.mrf.mxu0 }
 0x30b   :  { %v5811_v19 = vpop.f32.mrf.mxu1  ;;  %v5699_v8 = vadd.f32 %v5698_v45, %v13361_v14  ;;  %6666 = vmatpush1.bf16.msra.mxu0 %v13329_v39  ;;  %v14340_v39 = vld [vmem:[#allocation68_spill] sm:$0xff] }
 0x30c   :  { %6709 = vmatpush1.bf16.msra.mxu1 %v14336_v28  ;;  %v5700_v26 = vpop.f32.mrf.mxu0  ;;  %6667 = vmatprep.subr.bf16.mxu0 %v14337_v17  ;;  %v14345_v28 = vld [vmem:[#allocation74_spill] sm:$0xff] }
 0x30d   :  { %v5813_v62 = vpop.f32.mrf.mxu1  ;;  %6710 = vmatprep.subr.bf16.mxu1 %v13348_v31  ;;  %v13570_v40 = vadd.f32 %v5811_v19, %v5699_v8  ;;  %v5701_v44 = vadd.f32 %v5700_v26, %v13371_v46  ;;  %v14342_v31 = vld [vmem:[#allocation70_spill] sm:$0xff]  ;;  %v14344_v8 = vld [vmem:[#allocation73_spill] sm:$0xff] }
 0x30e   :  { %v5702_v21 = vpop.f32.mrf.mxu0 }
 0x30f   :  { %v5815_v60 = vpop.f32.mrf.mxu1  ;;  %v13573_v10 = vadd.f32 %v5813_v62, %v5701_v44  ;;  %v5703_v14 = vadd.f32 %v5702_v21, %v14338_v42  ;;  %6668 = vmatpush1.bf16.msra.mxu0 %v14339_v63 }
 0x310   :  { %6711 = vmatpush1.bf16.msra.mxu1 %v14340_v39  ;;  %v13578_v13 = vpop.f32.mrf.mxu0  ;;  %6669 = vmatprep.subr.bf16.mxu0 %v14341_v51 }
 0x311   :  { %v13580_v16 = vpop.f32.mrf.mxu1  ;;  %6712 = vmatprep.subr.bf16.mxu1 %v14342_v31  ;;  %v13584_v43 = vadd.f32 %v5815_v60, %v5703_v14 }
 0x312   :  { %v5708_v46 = vpop.f32.mrf.mxu0 }
 0x313   :  { %v5821_v27 = vpop.f32.mrf.mxu1  ;;  %v5709_v25 = vadd.f32 %v5708_v46, %v13407_v55  ;;  %6670 = vmatpush1.bf16.msra.mxu0 %v14343_v58 }
 0x314   :  { %6713 = vmatpush1.bf16.msra.mxu1 %v13386_v59  ;;  %v5710_v24 = vpop.f32.mrf.mxu0  ;;  %6671 = vmatprep.subr.bf16.mxu0 %v13384_v54  ;;  %v14346_v54 = vld [vmem:[#allocation57_spill] sm:$0xff] }
 0x315   :  { %v5823_v2 = vpop.f32.mrf.mxu1  ;;  %6714 = vmatprep.subr.bf16.mxu1 %v13394_v4  ;;  %v13591_v33 = vadd.f32 %v5821_v27, %v5709_v25  ;;  %v5711_v36 = vadd.f32 %v5710_v24, %v13415_v50 }
 0x316   :  { %v5712_v52 = vpop.f32.mrf.mxu0 }
 0x317   :  { %v5825_v45 = vpop.f32.mrf.mxu1  ;;  %v13594_v19 = vadd.f32 %v5823_v2, %v5711_v36  ;;  %v5713_v55 = vadd.f32 %v5712_v52, %v13419_v37  ;;  %6672 = vmatpush1.bf16.msra.mxu0 %v14344_v8 }
 0x318   :  { %6715 = vmatpush1.bf16.msra.mxu1 %v14345_v28  ;;  %v13599_v59 = vpop.f32.mrf.mxu0  ;;  %6800 = vmatprep.subr.bf16.mxu0 %v14346_v54  ;;  %v14347_v54 = vld [vmem:[#allocation55_spill] sm:$0xff] }
 0x319   :  { %v13601_v26 = vpop.f32.mrf.mxu1  ;;  %6843 = vmatprep.subr.bf16.mxu1 %v13139_v56  ;;  %v13605_v4 = vadd.f32 %v5825_v45, %v5713_v55 }
 0x31a   :  { %v5718_v50 = vpop.f32.mrf.mxu0 }
 0x31b   :  { %v5831_v62 = vpop.f32.mrf.mxu1  ;;  %v5719_v17 = vadd.f32 %v5718_v50, %v13438_v29  ;;  %v5519_v50 = vadd.f32 %v13489_v18, %v14347_v54  ;;  %v14349_v18 = vld [vmem:[#allocation60_spill] sm:$0xff] }
 0x31c   :  { %v5720_v44 = vpop.f32.mrf.mxu0 }
 0x31d   :  { %v5833_v37 = vpop.f32.mrf.mxu1  ;;  %v13608_v21 = vadd.f32 %v5831_v62, %v5719_v17  ;;  %v5721_v60 = vadd.f32 %v5720_v44, %v13441_v49 }
 0x31e   :  { %v5722_v42 = vpop.f32.mrf.mxu0 }
 0x31f   :  { %v5835_v14 = vpop.f32.mrf.mxu1  ;;  %v13611_v63 = vadd.f32 %v5833_v37, %v5721_v60  ;;  %v5723_v39 = vadd.f32 %v5722_v42, %v13444_v61  ;;  %v5632_v42 = vadd.f32 %v13491_v30, %v5519_v50 }
 0x320   :  { %v13614_v51 = vpop.f32.mrf.mxu0 }
 0x321   :  { %v13616_v56 = vpop.f32.mrf.mxu1  ;;  %v13618_v31 = vadd.f32 %v5835_v14, %v5723_v39 }
 0x322   :  { %v5728_v46 = vpop.f32.mrf.mxu0 }
 0x323   :  { %v5841_v29 = vpop.f32.mrf.mxu1  ;;  %v5729_v27 = vadd.f32 %v5728_v46, %v13460_v11 }
 0x324   :  { %v5730_v25 = vpop.f32.mrf.mxu0 }
 0x325   :  { %v5843_v58 = vpop.f32.mrf.mxu1  ;;  %v13621_v24 = vadd.f32 %v5841_v29, %v5729_v27  ;;  %v5731_v49 = vadd.f32 %v5730_v25, %v13463_v22  ;;  %v14348_v27 = vld [vmem:[#allocation25_spill] sm:$0xff] }
 0x326   :  { %v5732_v2 = vpop.f32.mrf.mxu0  ;;  %v5416_v25 = vadd.f32 %v14349_v18, %v14348_v27 }
 0x327   :  { %v5845_v36 = vpop.f32.mrf.mxu1  ;;  %v13624_v52 = vadd.f32 %v5843_v58, %v5731_v49  ;;  %v5733_v61 = vadd.f32 %v5732_v2, %v13470_v23 }
 0x328   :  { %v13627_v45 = vpop.f32.mrf.mxu0 }
 0x329   :  { %v13629_v55 = vpop.f32.mrf.mxu1  ;;  %v13631_v8 = vadd.f32 %v5845_v36, %v5733_v61 }
 0x32a   :  { %v5738_v28 = vpop.f32.mrf.mxu0 }
 0x32b   :  { %v5851_v11 = vpop.f32.mrf.mxu1  ;;  %v5739_v62 = vadd.f32 %v5738_v28, %v13483_v20 }
 0x32c   :  { %v5740_v22 = vpop.f32.mrf.mxu0 }
 0x32d   :  { %v5853_v17 = vpop.f32.mrf.mxu1  ;;  %v13636_v44 = vadd.f32 %v5851_v11, %v5739_v62  ;;  %v5741_v37 = vadd.f32 %v5740_v22, %v13486_v47  ;;  %v5529_v47 = vadd.f32 %v13513_v32, %v5416_v25 }
 0x32e   :  { %v5742_v23 = vpop.f32.mrf.mxu0 }
 0x32f   :  { %v5855_v60 = vpop.f32.mrf.mxu1  ;;  %v13640_v14 = vadd.f32 %v5853_v17, %v5741_v37  ;;  %v5743_v39 = vadd.f32 %v5742_v23, %v13495_v9  ;;  %v5642_v62 = vadd.f32 %v13515_v38, %v5529_v47 }
 0x330   :  { %v5744_v46 = vpop.f32.mrf.mxu0 }
 0x331   :  { %v5857_v29 = vpop.f32.mrf.mxu1  ;;  %v13645_v20 = vadd.f32 %v5855_v60, %v5743_v39  ;;  %v5745_v58 = vadd.f32 %v5744_v46, %v5632_v42  ;;  %v14350_v39 = vld [vmem:[#allocation62_spill] sm:$0xff] }
 0x332   :  { %v5748_v49 = vpop.f32.mrf.mxu0  ;;  %v5685_v46 = vadd.f32 %v13536_v6, %v14350_v39 }
 0x333   :  { %v5861_v2 = vpop.f32.mrf.mxu1  ;;  %v13648_v36 = vadd.f32 %v5857_v29, %v5745_v58  ;;  %v5749_v30 = vadd.f32 %v5748_v49, %v13509_v48 }
 0x334   :  { %v5750_v61 = vpop.f32.mrf.mxu0  ;;  %v5798_v49 = vadd.f32 %v13538_v12, %v5685_v46 }
 0x335   :  { %v5863_v28 = vpop.f32.mrf.mxu1  ;;  %v13651_v11 = vadd.f32 %v5861_v2, %v5749_v30  ;;  %v5751_v9 = vadd.f32 %v5750_v61, %v13511_v5 }
 0x336   :  { %v5752_v54 = vpop.f32.mrf.mxu0 }
 0x337   :  { %v5865_v50 = vpop.f32.mrf.mxu1  ;;  %v13655_v22 = vadd.f32 %v5863_v28, %v5751_v9  ;;  %v5753_v17 = vadd.f32 %v5752_v54, %v13517_v7  ;;  %v14351_v54 = vld [vmem:[#allocation65_spill] sm:$0xff] }
 0x338   :  { %v5754_v37 = vpop.f32.mrf.mxu0 }
 0x339   :  { %v5867_v32 = vpop.f32.mrf.mxu1  ;;  %v13658_v23 = vadd.f32 %v5865_v50, %v5753_v17  ;;  %v5755_v60 = vadd.f32 %v5754_v37, %v5642_v62  ;;  %v5695_v50 = vadd.f32 %v13557_v1, %v14351_v54 }
 0x33a   :  { %v5904_v48 = vpop.f32.mrf.mxu0 }
 0x33b   :  { %v6017_v42 = vpop.f32.mrf.mxu1  ;;  %v13662_v29 = vadd.f32 %v5867_v32, %v5755_v60  ;;  %v5905_v5 = vadd.f32 %v5904_v48, %v13526_v0  ;;  %v5808_v48 = vadd.f32 %v13559_v57, %v5695_v50 }
 0x33c   :  { %v5906_v27 = vpop.f32.mrf.mxu0 }
 0x33d   :  { %v6019_v38 = vpop.f32.mrf.mxu1  ;;  %v13665_v18 = vadd.f32 %v6017_v42, %v5905_v5  ;;  %v5907_v7 = vadd.f32 %v5906_v27, %v13531_v34 }
 0x33e   :  { %v5908_v25 = vpop.f32.mrf.mxu0 }
 0x33f   :  { %v6021_v58 = vpop.f32.mrf.mxu1  ;;  %v13669_v2 = vadd.f32 %v6019_v38, %v5907_v7  ;;  %v5909_v47 = vadd.f32 %v5908_v25, %v13542_v15  ;;  %v14352_v7 = vld [vmem:[#allocation72_spill] sm:$0xff] }
 0x340   :  { %v5910_v30 = vpop.f32.mrf.mxu0  ;;  %v5705_v25 = vadd.f32 %v13578_v13, %v14352_v7 }
 0x341   :  { %v6023_v6 = vpop.f32.mrf.mxu1  ;;  %v13672_v61 = vadd.f32 %v6021_v58, %v5909_v47  ;;  %v5911_v28 = vadd.f32 %v5910_v30, %v5798_v49 }
 0x342   :  { %v5914_v0 = vpop.f32.mrf.mxu0 }
 0x343   :  { %v6027_v9 = vpop.f32.mrf.mxu1  ;;  %v13676_v62 = vadd.f32 %v6023_v6, %v5911_v28  ;;  %v5915_v34 = vadd.f32 %v5914_v0, %v13549_v53  ;;  %v5818_v28 = vadd.f32 %v13580_v16, %v5705_v25 }
 0x344   :  { %v5916_v17 = vpop.f32.mrf.mxu0 }
 0x345   :  { %v6029_v12 = vpop.f32.mrf.mxu1  ;;  %v13679_v37 = vadd.f32 %v6027_v9, %v5915_v34  ;;  %v5917_v15 = vadd.f32 %v5916_v17, %v13552_v3 }
 0x346   :  { %v5918_v32 = vpop.f32.mrf.mxu0 }
 0x347   :  { %v6031_v60 = vpop.f32.mrf.mxu1  ;;  %v13683_v42 = vadd.f32 %v6029_v12, %v5917_v15  ;;  %v5919_v39 = vadd.f32 %v5918_v32, %v13563_v41  ;;  %v14353_v12 = vld [vmem:[#allocation75_spill] sm:$0xff] }
 0x348   :  { %v5920_v46 = vpop.f32.mrf.mxu0  ;;  %v5715_v15 = vadd.f32 %v13599_v59, %v14353_v12 }
 0x349   :  { %v6033_v1 = vpop.f32.mrf.mxu1  ;;  %v13686_v5 = vadd.f32 %v6031_v60, %v5919_v39  ;;  %v5921_v27 = vadd.f32 %v5920_v46, %v5808_v48 }
 0x34a   :  { %v5924_v53 = vpop.f32.mrf.mxu0 }
 0x34b   :  { %v6037_v38 = vpop.f32.mrf.mxu1  ;;  %v13690_v58 = vadd.f32 %v6033_v1, %v5921_v27  ;;  %v5925_v3 = vadd.f32 %v5924_v53, %v13570_v40  ;;  %v5828_v1 = vadd.f32 %v13601_v26, %v5715_v15 }
 0x34c   :  { %v5926_v49 = vpop.f32.mrf.mxu0 }
 0x34d   :  { %v6039_v57 = vpop.f32.mrf.mxu1  ;;  %v13693_v47 = vadd.f32 %v6037_v38, %v5925_v3  ;;  %v5927_v41 = vadd.f32 %v5926_v49, %v13573_v10  ;;  %v14354_v49 = vld [vmem:[#allocation76_spill] sm:$0xff] }
 0x34e   :  { %v5928_v30 = vpop.f32.mrf.mxu0 }
 0x34f   :  { %v6041_v6 = vpop.f32.mrf.mxu1  ;;  %v13697_v0 = vadd.f32 %v6039_v57, %v5927_v41  ;;  %v5929_v9 = vadd.f32 %v5928_v30, %v13584_v43  ;;  %v5725_v57 = vadd.f32 %v13614_v51, %v14354_v49 }
 0x350   :  { %v5930_v54 = vpop.f32.mrf.mxu0 }
 0x351   :  { %v6043_v13 = vpop.f32.mrf.mxu1  ;;  %v13700_v50 = vadd.f32 %v6041_v6, %v5929_v9  ;;  %v5931_v34 = vadd.f32 %v5930_v54, %v5818_v28  ;;  %v14355_v6 = vld [vmem:[#allocation50_spill] sm:$0xff]  ;;  %v14356_v28 = vld [vmem:[#allocation77_spill] sm:$0xff] }
 0x352   :  { %v5934_v40 = vpop.f32.mrf.mxu0  ;;  %v5509_v9 = vadd.f32 %v14356_v28, %v14355_v6 }
 0x353   :  { %v6047_v17 = vpop.f32.mrf.mxu1  ;;  %v13704_v32 = vadd.f32 %v6043_v13, %v5931_v34  ;;  %v5935_v10 = vadd.f32 %v5934_v40, %v13591_v33  ;;  %v5838_v40 = vadd.f32 %v13616_v56, %v5725_v57 }
 0x354   :  { %v5936_v60 = vpop.f32.mrf.mxu0 }
 0x355   :  { %v6049_v16 = vpop.f32.mrf.mxu1  ;;  %v13707_v48 = vadd.f32 %v6047_v17, %v5935_v10  ;;  %v5937_v43 = vadd.f32 %v5936_v60, %v13594_v19 }
 0x356   :  { %v5938_v39 = vpop.f32.mrf.mxu0 }
 0x357   :  { %v6051_v46 = vpop.f32.mrf.mxu1  ;;  %v13711_v27 = vadd.f32 %v6049_v16, %v5937_v43  ;;  %v5939_v53 = vadd.f32 %v5938_v39, %v13605_v4 }
 0x358   :  { %v5940_v38 = vpop.f32.mrf.mxu0 }
 0x359   :  { %v6053_v59 = vpop.f32.mrf.mxu1  ;;  %v13714_v7 = vadd.f32 %v6051_v46, %v5939_v53  ;;  %v5941_v25 = vadd.f32 %v5940_v38, %v5828_v1 }
 0x35a   :  { %v5944_v33 = vpop.f32.mrf.mxu0 }
 0x35b   :  { %v6057_v3 = vpop.f32.mrf.mxu1  ;;  %v13718_v41 = vadd.f32 %v6053_v59, %v5941_v25  ;;  %v5945_v19 = vadd.f32 %v5944_v33, %v13608_v21  ;;  %v14357_v21 = vld [vmem:[#allocation78_spill] sm:$0xff] }
 0x35c   :  { %v5946_v30 = vpop.f32.mrf.mxu0  ;;  %v5622_v10 = vadd.f32 %v14357_v21, %v5509_v9 }
 0x35d   :  { %v6059_v26 = vpop.f32.mrf.mxu1  ;;  %v13723_v4 = vadd.f32 %v6057_v3, %v5945_v19  ;;  %v5947_v54 = vadd.f32 %v5946_v30, %v13611_v63 }
 0x35e   :  { %v5948_v13 = vpop.f32.mrf.mxu0  ;;  %v5735_v46 = vadd.f32 %v13627_v45, %v5622_v10 }
 0x35f   :  { %v6061_v34 = vpop.f32.mrf.mxu1  ;;  %v13727_v17 = vadd.f32 %v6059_v26, %v5947_v54  ;;  %v5949_v51 = vadd.f32 %v5948_v13, %v13618_v31 }
 0x360   :  { %v5950_v12 = vpop.f32.mrf.mxu0  ;;  %v5848_v33 = vadd.f32 %v13629_v55, %v5735_v46 }
 0x361   :  { %v6063_v15 = vpop.f32.mrf.mxu1  ;;  %v13731_v60 = vadd.f32 %v6061_v34, %v5949_v51  ;;  %v5951_v16 = vadd.f32 %v5950_v12, %v5838_v40 }
 0x362   :  { %v5954_v43 = vpop.f32.mrf.mxu0 }
 0x363   :  { %v6067_v39 = vpop.f32.mrf.mxu1  ;;  %v13734_v63 = vadd.f32 %v6063_v15, %v5951_v16  ;;  %v5955_v1 = vadd.f32 %v5954_v43, %v13621_v24 }
 0x364   :  { %v5956_v56 = vpop.f32.mrf.mxu0 }
 0x365   :  { %v6069_v53 = vpop.f32.mrf.mxu1  ;;  %v13737_v38 = vadd.f32 %v6067_v39, %v5955_v1  ;;  %v5957_v31 = vadd.f32 %v5956_v56, %v13624_v52 }
 0x366   :  { %v5958_v59 = vpop.f32.mrf.mxu0 }
 0x367   :  { %v6071_v25 = vpop.f32.mrf.mxu1  ;;  %v13741_v3 = vadd.f32 %v6069_v53, %v5957_v31  ;;  %v5959_v49 = vadd.f32 %v5958_v59, %v13631_v8 }
 0x368   :  { %v5960_v57 = vpop.f32.mrf.mxu0 }
 0x369   :  { %v6073_v45 = vpop.f32.mrf.mxu1  ;;  %v13744_v19 = vadd.f32 %v6071_v25, %v5959_v49  ;;  %v5961_v30 = vadd.f32 %v5960_v57, %v5848_v33 }
 0x36a   :  { %v5964_v24 = vpop.f32.mrf.mxu0 }
 0x36b   :  { %v6077_v26 = vpop.f32.mrf.mxu1  ;;  %v13746_v6 = vadd.f32 %v6073_v45, %v5961_v30  ;;  %v5965_v28 = vadd.f32 %v5964_v24, %v13636_v44 }
 0x36c   :  { %v5966_v52 = vpop.f32.mrf.mxu0 }
 0x36d   :  { %v6079_v9 = vpop.f32.mrf.mxu1  ;;  %v13749_v54 = vadd.f32 %v6077_v26, %v5965_v28  ;;  %v5967_v55 = vadd.f32 %v5966_v52, %v13640_v14 }
 0x36e   :  { %v5968_v13 = vpop.f32.mrf.mxu0 }
 0x36f   :  { %v6081_v34 = vpop.f32.mrf.mxu1  ;;  %v13752_v8 = vadd.f32 %v6079_v9, %v5967_v55  ;;  %v5969_v40 = vadd.f32 %v5968_v13, %v13645_v20 }
 0x370   :  { %v5970_v51 = vpop.f32.mrf.mxu0 }
 0x371   :  { %v6083_v12 = vpop.f32.mrf.mxu1  ;;  %v13755_v15 = vadd.f32 %v6081_v34, %v5969_v40  ;;  %v5971_v21 = vadd.f32 %v5970_v51, %v13648_v36 }
 0x372   :  { %v5974_v10 = vpop.f32.mrf.mxu0 }
 0x373   :  { %v6087_v44 = vpop.f32.mrf.mxu1  ;;  %v13758_v16 = vadd.f32 %v6083_v12, %v5971_v21  ;;  %v5975_v43 = vadd.f32 %v5974_v10, %v13651_v11 }
 0x374   :  { %v5976_v39 = vpop.f32.mrf.mxu0 }
 0x375   :  { %v6089_v14 = vpop.f32.mrf.mxu1  ;;  %v13761_v46 = vadd.f32 %v6087_v44, %v5975_v43  ;;  %v5977_v1 = vadd.f32 %v5976_v39, %v13655_v22 }
 0x376   :  { %v5978_v56 = vpop.f32.mrf.mxu0 }
 0x377   :  { %v6091_v20 = vpop.f32.mrf.mxu1  ;;  %v13764_v53 = vadd.f32 %v6089_v14, %v5977_v1  ;;  %v5979_v31 = vadd.f32 %v5978_v56, %v13658_v23 }
 0x378   :  { %v5980_v59 = vpop.f32.mrf.mxu0 }
 0x379   :  { %v6093_v36 = vpop.f32.mrf.mxu1  ;;  %v13767_v25 = vadd.f32 %v6091_v20, %v5979_v31  ;;  %v5981_v33 = vadd.f32 %v5980_v59, %v13662_v29 }
 0x37a   :  { %v6130_v49 = vpop.f32.mrf.mxu0 }
 0x37b   :  { %v6243_v11 = vpop.f32.mrf.mxu1  ;;  %v13770_v57 = vadd.f32 %v6093_v36, %v5981_v33  ;;  %v6131_v45 = vadd.f32 %v6130_v49, %v13665_v18 }
 0x37c   :  { %v6132_v30 = vpop.f32.mrf.mxu0 }
 0x37d   :  { %v6245_v22 = vpop.f32.mrf.mxu1  ;;  %v13773_v24 = vadd.f32 %v6243_v11, %v6131_v45  ;;  %v6133_v26 = vadd.f32 %v6132_v30, %v13669_v2 }
 0x37e   :  { %v6134_v28 = vpop.f32.mrf.mxu0 }
 0x37f   :  { %14358 = vst [vmem:[#allocation64_spill] sm:$0xff] %v13773_v24  ;;  %v6247_v23 = vpop.f32.mrf.mxu1  ;;  %v13776_v52 = vadd.f32 %v6245_v22, %v6133_v26  ;;  %v6135_v9 = vadd.f32 %v6134_v28, %v13672_v61 }
 0x380   :  { %v6136_v55 = vpop.f32.mrf.mxu0 }
 0x381   :  { %14359 = vst [vmem:[#allocation63_spill] sm:$0xff] %v13776_v52  ;;  %v6249_v29 = vpop.f32.mrf.mxu1  ;;  %v13779_v13 = vadd.f32 %v6247_v23, %v6135_v9  ;;  %v6137_v34 = vadd.f32 %v6136_v55, %v13676_v62 }
 0x382   :  { %v6140_v40 = vpop.f32.mrf.mxu0 }
 0x383   :  { %14360 = vst [vmem:[#allocation71_spill] sm:$0xff] %v13779_v13  ;;  %v6253_v18 = vpop.f32.mrf.mxu1  ;;  %v13782_v51 = vadd.f32 %v6249_v29, %v6137_v34  ;;  %v6141_v12 = vadd.f32 %v6140_v40, %v13679_v37 }
 0x384   :  { %v6142_v21 = vpop.f32.mrf.mxu0 }
 0x385   :  { %14361 = vst [vmem:[#allocation66_spill] sm:$0xff] %v13782_v51  ;;  %v6255_v2 = vpop.f32.mrf.mxu1  ;;  %v13785_v10 = vadd.f32 %v6253_v18, %v6141_v12  ;;  %v6143_v44 = vadd.f32 %v6142_v21, %v13683_v42  ;;  %v14379_v51 = vld [vmem:[#allocation51_spill] sm:$0xff] }
 0x386   :  { %v6144_v43 = vpop.f32.mrf.mxu0 }
 0x387   :  { %14362 = vst [vmem:[#allocation68_spill] sm:$0xff] %v13785_v10  ;;  %v6257_v61 = vpop.f32.mrf.mxu1  ;;  %v13788_v39 = vadd.f32 %v6255_v2, %v6143_v44  ;;  %v6145_v14 = vadd.f32 %v6144_v43, %v13686_v5 }
 0x388   :  { %v6146_v1 = vpop.f32.mrf.mxu0 }
 0x389   :  { %14363 = vst [vmem:[#allocation67_spill] sm:$0xff] %v13788_v39  ;;  %v6259_v62 = vpop.f32.mrf.mxu1  ;;  %v13791_v56 = vadd.f32 %v6257_v61, %v6145_v14  ;;  %v6147_v20 = vadd.f32 %v6146_v1, %v13690_v58  ;;  %v14380_v39 = vld [vmem:[#allocation52_spill] sm:$0xff] }
 0x38a   :  { %v6150_v31 = vpop.f32.mrf.mxu0 }
 0x38b   :  { %14364 = vst [vmem:[#allocation70_spill] sm:$0xff] %v13791_v56  ;;  %v6263_v37 = vpop.f32.mrf.mxu1  ;;  %v13794_v59 = vadd.f32 %v6259_v62, %v6147_v20  ;;  %v6151_v36 = vadd.f32 %v6150_v31, %v13693_v47 }
 0x38c   :  { %v6152_v33 = vpop.f32.mrf.mxu0 }
 0x38d   :  { %14365 = vst [vmem:[#allocation69_spill] sm:$0xff] %v13794_v59  ;;  %v6265_v42 = vpop.f32.mrf.mxu1  ;;  %v13797_v49 = vadd.f32 %v6263_v37, %v6151_v36  ;;  %v6153_v11 = vadd.f32 %v6152_v33, %v13697_v0 }
 0x38e   :  { %v6154_v45 = vpop.f32.mrf.mxu0 }
 0x38f   :  { %14366 = vst [vmem:[#allocation73_spill] sm:$0xff] %v13797_v49  ;;  %v6267_v5 = vpop.f32.mrf.mxu1  ;;  %v13800_v30 = vadd.f32 %v6265_v42, %v6153_v11  ;;  %v6155_v22 = vadd.f32 %v6154_v45, %v13700_v50 }
 0x390   :  { %v6156_v26 = vpop.f32.mrf.mxu0 }
 0x391   :  { %14367 = vst [vmem:[#allocation74_spill] sm:$0xff] %v13800_v30  ;;  %v6269_v58 = vpop.f32.mrf.mxu1  ;;  %v13803_v28 = vadd.f32 %v6267_v5, %v6155_v22  ;;  %v6157_v23 = vadd.f32 %v6156_v26, %v13704_v32  ;;  %v14381_v30 = vld [vmem:[#allocation53_spill] sm:$0xff] }
 0x392   :  { %v6160_v9 = vpop.f32.mrf.mxu0 }
 0x393   :  { %14368 = vst [vmem:[#allocation57_spill] sm:$0xff] %v13803_v28  ;;  %v6273_v47 = vpop.f32.mrf.mxu1  ;;  %v13806_v55 = vadd.f32 %v6269_v58, %v6157_v23  ;;  %v6161_v29 = vadd.f32 %v6160_v9, %v13707_v48 }
 0x394   :  { %v6162_v34 = vpop.f32.mrf.mxu0 }
 0x395   :  { %14369 = vst [vmem:[#allocation55_spill] sm:$0xff] %v13806_v55  ;;  %v6275_v0 = vpop.f32.mrf.mxu1  ;;  %v13809_v40 = vadd.f32 %v6273_v47, %v6161_v29  ;;  %v6163_v18 = vadd.f32 %v6162_v34, %v13711_v27 }
 0x396   :  { %v6164_v12 = vpop.f32.mrf.mxu0 }
 0x397   :  { %14370 = vst [vmem:[#allocation25_spill] sm:$0xff] %v13809_v40  ;;  %v6277_v50 = vpop.f32.mrf.mxu1  ;;  %v13812_v21 = vadd.f32 %v6275_v0, %v6163_v18  ;;  %v6165_v2 = vadd.f32 %v6164_v12, %v13714_v7 }
 0x398   :  { %v6166_v44 = vpop.f32.mrf.mxu0 }
 0x399   :  { %14371 = vst [vmem:[#allocation60_spill] sm:$0xff] %v13812_v21  ;;  %v6279_v32 = vpop.f32.mrf.mxu1  ;;  %v13815_v43 = vadd.f32 %v6277_v50, %v6165_v2  ;;  %v6167_v61 = vadd.f32 %v6166_v44, %v13718_v41 }
 0x39a   :  { %v6170_v14 = vpop.f32.mrf.mxu0 }
 0x39b   :  { %14372 = vst [vmem:[#allocation62_spill] sm:$0xff] %v13815_v43  ;;  %v6283_v48 = vpop.f32.mrf.mxu1  ;;  %v13818_v1 = vadd.f32 %v6279_v32, %v6167_v61  ;;  %v6171_v62 = vadd.f32 %v6170_v14, %v13723_v4  ;;  %v14382_v43 = vld [vmem:[#allocation54_spill] sm:$0xff] }
 0x39c   :  { %v6172_v20 = vpop.f32.mrf.mxu0 }
 0x39d   :  { %14373 = vst [vmem:[#allocation65_spill] sm:$0xff] %v13818_v1  ;;  %v6285_v27 = vpop.f32.mrf.mxu1  ;;  %v13821_v31 = vadd.f32 %v6283_v48, %v6171_v62  ;;  %v6173_v37 = vadd.f32 %v6172_v20, %v13727_v17 }
 0x39e   :  { %v6174_v36 = vpop.f32.mrf.mxu0 }
 0x39f   :  { %v6287_v7 = vpop.f32.mrf.mxu1  ;;  %v13824_v33 = vadd.f32 %v6285_v27, %v6173_v37  ;;  %v6175_v42 = vadd.f32 %v6174_v36, %v13731_v60 }
 0x3a0   :  { %v6176_v11 = vpop.f32.mrf.mxu0 }
 0x3a1   :  { %v6289_v41 = vpop.f32.mrf.mxu1  ;;  %v13827_v45 = vadd.f32 %v6287_v7, %v6175_v42  ;;  %v6177_v5 = vadd.f32 %v6176_v11, %v13734_v63 }
 0x3a2   :  { %v6180_v22 = vpop.f32.mrf.mxu0 }
 0x3a3   :  { %v6293_v4 = vpop.f32.mrf.mxu1  ;;  %v13830_v26 = vadd.f32 %v6289_v41, %v6177_v5  ;;  %v6181_v58 = vadd.f32 %v6180_v22, %v13737_v38 }
 0x3a4   :  { %v6182_v23 = vpop.f32.mrf.mxu0 }
 0x3a5   :  { %14374 = vst [vmem:[#allocation72_spill] sm:$0xff] %v13830_v26  ;;  %v6295_v17 = vpop.f32.mrf.mxu1  ;;  %v13833_v9 = vadd.f32 %v6293_v4, %v6181_v58  ;;  %v6183_v47 = vadd.f32 %v6182_v23, %v13741_v3 }
 0x3a6   :  { %v6184_v29 = vpop.f32.mrf.mxu0 }
 0x3a7   :  { %v6297_v60 = vpop.f32.mrf.mxu1  ;;  %v13836_v34 = vadd.f32 %v6295_v17, %v6183_v47  ;;  %v6185_v0 = vadd.f32 %v6184_v29, %v13744_v19  ;;  %v14375_v17 = vld [vmem:[#allocation56_spill] sm:$0xff] }
 0x3a8   :  { %v6186_v18 = vpop.f32.mrf.mxu0 }
 0x3a9   :  { %v6299_v63 = vpop.f32.mrf.mxu1  ;;  %v13839_v12 = vadd.f32 %v6297_v60, %v6185_v0  ;;  %v6187_v50 = vadd.f32 %v6186_v18, %v13746_v6  ;;  %v14376_v0 = vld [vmem:[#allocation58_spill] sm:$0xff] }
 0x3aa   :  { %v6190_v2 = vpop.f32.mrf.mxu0 }
 0x3ab   :  { %v6303_v38 = vpop.f32.mrf.mxu1  ;;  %v13842_v44 = vadd.f32 %v6299_v63, %v6187_v50  ;;  %v6191_v32 = vadd.f32 %v6190_v2, %v13749_v54  ;;  %v14377_v2 = vld [vmem:[#allocation59_spill] sm:$0xff] }
 0x3ac   :  { %v6192_v61 = vpop.f32.mrf.mxu0 }
 0x3ad   :  { %v6305_v3 = vpop.f32.mrf.mxu1  ;;  %v13845_v14 = vadd.f32 %v6303_v38, %v6191_v32  ;;  %v6193_v48 = vadd.f32 %v6192_v61, %v13752_v8 }
 0x3ae   :  { %v6194_v62 = vpop.f32.mrf.mxu0 }
 0x3af   :  { %v6307_v19 = vpop.f32.mrf.mxu1  ;;  %v13848_v20 = vadd.f32 %v6305_v3, %v6193_v48  ;;  %v6195_v27 = vadd.f32 %v6194_v62, %v13755_v15  ;;  %v14378_v48 = vld [vmem:[#allocation61_spill] sm:$0xff] }
 0x3b0   :  { %v6196_v37 = vpop.f32.mrf.mxu0 }
 0x3b1   :  { %v6309_v6 = vpop.f32.mrf.mxu1  ;;  %v13851_v36 = vadd.f32 %v6307_v19, %v6195_v27  ;;  %v6197_v7 = vadd.f32 %v6196_v37, %v13758_v16 }
 0x3b2   :  { %v6200_v42 = vpop.f32.mrf.mxu0 }
 0x3b3   :  { %v6313_v54 = vpop.f32.mrf.mxu1  ;;  %v13854_v11 = vadd.f32 %v6309_v6, %v6197_v7  ;;  %v6201_v16 = vadd.f32 %v6200_v42, %v13761_v46 }
 0x3b4   :  { %v6202_v41 = vpop.f32.mrf.mxu0 }
 0x3b5   :  { %v6315_v5 = vpop.f32.mrf.mxu1  ;;  %v6314_v27 = vadd.f32 %v6313_v54, %v6201_v16  ;;  %v6203_v6 = vadd.f32 %v6202_v41, %v13764_v53 }
 0x3b6   :  { %v6204_v22 = vpop.f32.mrf.mxu0 }
 0x3b7   :  { %v6317_v8 = vpop.f32.mrf.mxu1  ;;  %v6205_v19 = vadd.f32 %v6204_v22, %v13767_v25  ;;  %v6316_v42 = vadd.f32 %v6315_v5, %v6203_v6 }
 0x3b8   :  { %v6206_v4 = vpop.f32.mrf.mxu0 }
 0x3b9   :  { %v6319_v58 = vpop.f32.mrf.mxu1  ;;  %v6318_v46 = vadd.f32 %v6317_v8, %v6205_v19 }
 0x3ba   :  { %v6548_v23 = vpop.f32.mrf.mxu0 }
 0x3bb   :  { %v6600_v47 = vadd.f32 %v6548_v23, %v14375_v17  ;;  %v6591_v60 = vpop.f32.mrf.mxu1  ;;  %v6207_v17 = vadd.f32 %v6206_v4, %v13770_v57 }
 0x3bc   :  { %v6550_v15 = vpop.f32.mrf.mxu0  ;;  %v6602_v7 = vadd.f32 %v6591_v60, %v6314_v27 }
 0x3bd   :  { %v9575_v29 = vmul.f32 -1.442695, %v6600_v47  ;;  %v6601_v18 = vadd.f32 %v6550_v15, %v14376_v0  ;;  %v6593_v61 = vpop.f32.mrf.mxu1 }
 0x3be   :  { %v6552_v63 = vpop.f32.mrf.mxu0  ;;  %v9577_v15 = vmul.f32 -1.442695, %v6602_v7 }
 0x3bf   :  { %11102 = vpow2.f32 %v9575_v29  ;;  %v9576_v50 = vmul.f32 -1.442695, %v6601_v18  ;;  %v6604_v38 = vadd.f32 %v6552_v63, %v14377_v2  ;;  %v6595_v23 = vpop.f32.mrf.mxu1  ;;  %v6603_v29 = vadd.f32 %v6593_v61, %v6316_v42 }
 0x3c0   :  { %v6554_v32 = vpop.f32.mrf.mxu0  ;;  %v6606_v47 = vadd.f32 %v6595_v23, %v6318_v46  ;;  %v6320_v63 = vadd.f32 %v6319_v58, %v6207_v17 }
 0x3c1   :  { %11104 = vpow2.f32 %v9576_v50  ;;  %v9578_v3 = vmul.f32 -1.442695, %v6604_v38  ;;  %v6605_v62 = vadd.f32 %v6554_v32, %v14378_v48  ;;  %v6597_v0 = vpop.f32.mrf.mxu1 }
 0x3c2   :  { %v9580_v50 = vmul.f32 -1.442695, %v6606_v47  ;;  %v6607_v22 = vadd.f32 %v6597_v0, %v6320_v63  ;;  %v13870_v0 = vld [vmem:[#allocation4 + $0xe0] ss:$16 sps:$4 sm:$0xff]   ;;  %v13876_v63 = vld [vmem:[#allocation4 + $0xc4] ss:$16 sps:$4 sm:$0xff]  }
 0x3c3   :  { %11106 = vpow2.f32 %v9578_v3  ;;  %v9579_v37 = vmul.f32 -1.442695, %v6605_v62 }
 0x3c5   :  { %11108 = vpow2.f32 %v9579_v37 }
 0x3c6   :  { %11110 = vpow2.f32 %v9577_v15 }
 0x3c7   :  { %11112 = vtanh.f32 %v6603_v29 }
 0x3cc   :  { %v11103_v18 = vpop.eup %11102 }
 0x3cd   :  { %v6626_v25 = vadd.f32 1.0, %v11103_v18  ;;  %v13873_v18 = vld [vmem:[#allocation4 + $0xe8] ss:$16 sps:$4 sm:$0xff]  }
 0x3ce   :  { %v11105_v54 = vpop.eup %11104 }
 0x3cf   :  { %11114 = vrcp.f32 %v6626_v25  ;;  %v6627_v53 = vadd.f32 1.0, %v11105_v54  ;;  %v13884_v25 = vld [vmem:[#allocation4 + $0xc0] ss:$16 sps:$4 sm:$0xff]   ;;  %v13887_v54 = vld [vmem:[#allocation4 + $0xc8] ss:$16 sps:$4 sm:$0xff]  }
 0x3d0   :  { %v11107_v41 = vpop.eup %11106  ;;  %11116 = vpow2.f32 %v9580_v50  ;;  %v13879_v50 = vld [vmem:[#allocation4 + $0xcc] ss:$16 sps:$4 sm:$0xff]  }
 0x3d1   :  { %11118 = vrcp.f32 %v6627_v53  ;;  %v6629_v5 = vadd.f32 1.0, %v11107_v41  ;;  %v13893_v53 = vld [vmem:[#allocation4 + $0xac] ss:$16 sps:$4 sm:$0xff]   ;;  %v13896_v41 = vld [vmem:[#allocation4 + $0xa0] ss:$16 sps:$4 sm:$0xff]  }
 0x3d2   :  { %v11109_v8 = vpop.eup %11108  ;;  %11120 = vtanh.f32 %v6607_v22  ;;  %v13890_v22 = vld [vmem:[#allocation4 + $0xa4] ss:$16 sps:$4 sm:$0xff]  }
 0x3d3   :  { %11122 = vrcp.f32 %v6629_v5  ;;  %v6630_v57 = vadd.f32 1.0, %v11109_v8  ;;  %v11111_v4 = vpop.eup %11110  ;;  %v13899_v5 = vld [vmem:[#allocation4 + $0xa8] ss:$16 sps:$4 sm:$0xff]   ;;  %v13902_v8 = vld [vmem:[#allocation4 + $0x84] ss:$16 sps:$4 sm:$0xff]  }
 0x3d4   :  { %v11113_v60 = vpop.eup %11112  ;;  %v6628_v48 = vadd.f32 1.0, %v11111_v4  ;;  %v13908_v4 = vld [vmem:[#allocation4 + $0x80] ss:$16 sps:$4 sm:$0xff]  }
 0x3d5   :  { %11124 = vrcp.f32 %v6630_v57  ;;  %v13905_v57 = vld [vmem:[#allocation4 + $0x8c] ss:$16 sps:$4 sm:$0xff]  }
 0x3d6   :  { %11126 = vrcp.f32 %v6628_v48  ;;  %v13935_v48 = vld [vmem:[#allocation4 + $0x48] ss:$16 sps:$4 sm:$0xff]  }
 0x3dc   :  { %v11115_v58 = vpop.eup %11114 }
 0x3dd   :  { %v11117_v16 = vpop.eup %11116  ;;  %v6648_v2 = vmul.f32 %v11115_v58, %v11113_v60  ;;  %v13911_v60 = vld [vmem:[#allocation4 + $0x88] ss:$16 sps:$4 sm:$0xff]   ;;  %v13914_v58 = vld [vmem:[#allocation4 + $0x64] ss:$16 sps:$4 sm:$0xff]  }
 0x3de   :  { %v11119_v38 = vpop.eup %11118  ;;  %v6631_v37 = vadd.f32 1.0, %v11117_v16  ;;  %v13917_v16 = vld [vmem:[#allocation4 + $0x6c] ss:$16 sps:$4 sm:$0xff]  }
 0x3df   :  { %v11121_v32 = vpop.eup %11120  ;;  %v6646_v61 = vmul.f32 0.0, %v11119_v38  ;;  %v13923_v38 = vld [vmem:[#allocation4 + $0x68] ss:$16 sps:$4 sm:$0xff]  }
 0x3e0   :  { %v11123_v3 = vpop.eup %11122 }
 0x3e1   :  { %v13864_v62 = vadd.f32 %v6648_v2, %v6646_v61  ;;  %v6649_v19 = vmul.f32 %v11123_v3, %v11121_v32  ;;  %v13920_v2 = vld [vmem:[#allocation4 + $0x60] ss:$16 sps:$4 sm:$0xff]   ;;  %v13926_v32 = vld [vmem:[#allocation4 + $0x44] ss:$16 sps:$4 sm:$0xff]   ;;  %v13929_v61 = vld [vmem:[#allocation4 + $0x4c] ss:$16 sps:$4 sm:$0xff]  }
 0x3e2   :  { %v11125_v27 = vpop.eup %11124  ;;  %v13932_v3 = vld [vmem:[#allocation4 + $0x40] ss:$16 sps:$4 sm:$0xff]  }
 0x3e3   :  { %v6647_v6 = vmul.f32 0.0, %v11125_v27  ;;  %11128 = vtanh.f32 %v13864_v62  ;;  %v11127_v23 = vpop.eup %11126  ;;  %v13941_v27 = vld [vmem:[#allocation4 + $0x2c] ss:$16 sps:$4 sm:$0xff]  }
 0x3e4   :  { %11130 = vrcp.f32 %v6631_v37  ;;  %v13944_v37 = vld [vmem:[#allocation4 + $0x20] ss:$16 sps:$4 sm:$0xff]  }
 0x3e5   :  { %v13867_v7 = vadd.f32 %v6649_v19, %v6647_v6  ;;  %v13938_v19 = vld [vmem:[#allocation4 + $0x24] ss:$16 sps:$4 sm:$0xff]   ;;  %v13947_v6 = vld [vmem:[#allocation4 + $0x28] ss:$16 sps:$4 sm:$0xff]  }
 0x3e7   :  { %11132 = vtanh.f32 %v13867_v7 }
 0x3f0   :  { %v11129_v46 = vpop.eup %11128 }
 0x3f1   :  { %v11131_v42 = vpop.eup %11130  ;;  %v6654_v47 = vmul.f32 %v11129_v46, %v11127_v23  ;;  %v13950_v23 = vld [vmem:[#allocation4 + $0x4] ss:$16 sps:$4 sm:$0xff]   ;;  %v13953_v46 = vld [vmem:[#allocation4 + $0xc] ss:$16 sps:$4 sm:$0xff]  }
 0x3f4   :  { %v11133_v17 = vpop.eup %11132 }
 0x3f5   :  { %v6655_v15 = vmul.f32 %v11133_v17, %v11131_v42  ;;  %v13956_v42 = vld [vmem:[#allocation4] ss:$16 sps:$4 sm:$0xff]   ;;  %v13959_v17 = vld [vmem:[#allocation4 + $0x8] ss:$16 sps:$4 sm:$0xff]  }
 0x3f7   :  { %v6656_v29 = vpack.c.bf16 %v6655_v15, %v6654_v47  ;;  %v13962_v47 = vld [vmem:[#allocation4 + $0xe4] ss:$16 sps:$4 sm:$0xff]   ;;  %v13965_v15 = vld [vmem:[#allocation4 + $0xec] ss:$16 sps:$4 sm:$0xff]  }
 0x3f9   :  { %6690 = vmatmul.mubr.bf16.vlgmr.msra.gmra.mxu0 %v6656_v29  ;;  %6733 = vmatmul.mubr.bf16.vlgmr.msra.gmra.mxu1 %v6656_v29 }
 0x3fa   :  { %6801 = vmatpush1.bf16.msra.mxu0 %v13870_v0  ;;  %6844 = vmatpush1.bf16.msra.mxu1 %v13873_v18 }
 0x3fb   :  { %6802 = vmatprep.subr.bf16.mxu0 %v13876_v63  ;;  %6845 = vmatprep.subr.bf16.mxu1 %v13879_v50 }
 0x3fc   :  { %6832 = vmatprep.mubr.bf16.mxu0 %v14313_v35  ;;  %6875 = vmatprep.mubr.bf16.mxu1 %v14313_v35 }
 0x3fe   :  { %6803 = vmatpush1.bf16.msra.mxu0 %v13884_v25  ;;  %6846 = vmatpush1.bf16.msra.mxu1 %v13887_v54 }
 0x3ff   :  { %6804 = vmatprep.subr.bf16.mxu0 %v13890_v22  ;;  %6847 = vmatprep.subr.bf16.mxu1 %v13893_v53 }
 0x402   :  { %6805 = vmatpush1.bf16.msra.mxu0 %v13896_v41  ;;  %6848 = vmatpush1.bf16.msra.mxu1 %v13899_v5 }
 0x403   :  { %6806 = vmatprep.subr.bf16.mxu0 %v13902_v8  ;;  %6849 = vmatprep.subr.bf16.mxu1 %v13905_v57 }
 0x406   :  { %6807 = vmatpush1.bf16.msra.mxu0 %v13908_v4  ;;  %6850 = vmatpush1.bf16.msra.mxu1 %v13911_v60 }
 0x407   :  { %6808 = vmatprep.subr.bf16.mxu0 %v13914_v58  ;;  %6851 = vmatprep.subr.bf16.mxu1 %v13917_v16 }
 0x40a   :  { %6809 = vmatpush1.bf16.msra.mxu0 %v13920_v2  ;;  %6852 = vmatpush1.bf16.msra.mxu1 %v13923_v38 }
 0x40b   :  { %6810 = vmatprep.subr.bf16.mxu0 %v13926_v32  ;;  %6853 = vmatprep.subr.bf16.mxu1 %v13929_v61 }
 0x40e   :  { %6811 = vmatpush1.bf16.msra.mxu0 %v13932_v3  ;;  %6854 = vmatpush1.bf16.msra.mxu1 %v13935_v48 }
 0x40f   :  { %6812 = vmatprep.subr.bf16.mxu0 %v13938_v19  ;;  %6855 = vmatprep.subr.bf16.mxu1 %v13941_v27 }
 0x412   :  { %6813 = vmatpush1.bf16.msra.mxu0 %v13944_v37  ;;  %6856 = vmatpush1.bf16.msra.mxu1 %v13947_v6 }
 0x413   :  { %6814 = vmatprep.subr.bf16.mxu0 %v13950_v23  ;;  %6857 = vmatprep.subr.bf16.mxu1 %v13953_v46 }
 0x416   :  { %6815 = vmatpush1.bf16.msra.mxu0 %v13956_v42  ;;  %6858 = vmatpush1.bf16.msra.mxu1 %v13959_v17 }
 0x417   :  { %6943 = vmatprep.subr.bf16.mxu0 %v13962_v47  ;;  %6986 = vmatprep.subr.bf16.mxu1 %v13965_v15 }
 0x4b9   :  { %v6691_v29 = vpop.f32.mrf.mxu0  ;;  %v6734_v59 = vpop.f32.mrf.mxu1 }
 0x4ba   :  { %v6743_v52 = vadd.f32 %v6691_v29, %v14379_v51  ;;  %v6745_v51 = vadd.f32 %v6734_v59, %v13845_v14 }
 0x4bb   :  { %v6693_v13 = vpop.f32.mrf.mxu0  ;;  %v6736_v1 = vpop.f32.mrf.mxu1 }
 0x4bc   :  { %v9581_v24 = vmul.f32 -1.442695, %v6743_v52  ;;  %v6744_v56 = vadd.f32 %v6693_v13, %v14380_v39  ;;  %v9583_v13 = vmul.f32 -1.442695, %v6745_v51 }
 0x4bd   :  { %v6695_v10 = vpop.f32.mrf.mxu0  ;;  %v6738_v29 = vpop.f32.mrf.mxu1 }
 0x4be   :  { %11134 = vpow2.f32 %v9581_v24  ;;  %v9582_v55 = vmul.f32 -1.442695, %v6744_v56  ;;  %v6747_v28 = vadd.f32 %v6695_v10, %v14381_v30  ;;  %v6749_v52 = vadd.f32 %v6738_v29, %v13851_v36 }
 0x4bf   :  { %v6697_v49 = vpop.f32.mrf.mxu0  ;;  %v6746_v24 = vadd.f32 %v6736_v1, %v13848_v20  ;;  %v6740_v39 = vpop.f32.mrf.mxu1 }
 0x4c0   :  { %11136 = vpow2.f32 %v9582_v55  ;;  %v9584_v21 = vmul.f32 -1.442695, %v6747_v28  ;;  %v6748_v40 = vadd.f32 %v6697_v49, %v14382_v43  ;;  %v9586_v10 = vmul.f32 -1.442695, %v6749_v52 }
 0x4c1   :  { %v6750_v49 = vadd.f32 %v6740_v39, %v13854_v11 }
 0x4c2   :  { %11138 = vpow2.f32 %v9584_v21  ;;  %v9585_v26 = vmul.f32 -1.442695, %v6748_v40 }
 0x4c4   :  { %11140 = vpow2.f32 %v9585_v26 }
 0x4c5   :  { %11142 = vpow2.f32 %v9583_v13 }
 0x4c6   :  { %11144 = vtanh.f32 %v6746_v24 }
 0x4cb   :  { %v11135_v56 = vpop.eup %11134 }
 0x4cc   :  { %v6769_v30 = vadd.f32 1.0, %v11135_v56 }
 0x4cd   :  { %v11137_v55 = vpop.eup %11136 }
 0x4ce   :  { %11146 = vrcp.f32 %v6769_v30  ;;  %v6770_v28 = vadd.f32 1.0, %v11137_v55 }
 0x4cf   :  { %v11139_v40 = vpop.eup %11138  ;;  %11148 = vpow2.f32 %v9586_v10 }
 0x4d0   :  { %11150 = vrcp.f32 %v6770_v28  ;;  %v6772_v59 = vadd.f32 1.0, %v11139_v40 }
 0x4d1   :  { %v11141_v21 = vpop.eup %11140  ;;  %11152 = vtanh.f32 %v6750_v49 }
 0x4d2   :  { %11154 = vrcp.f32 %v6772_v59  ;;  %v6773_v43 = vadd.f32 1.0, %v11141_v21  ;;  %v11143_v1 = vpop.eup %11142 }
 0x4d3   :  { %v11145_v26 = vpop.eup %11144  ;;  %v6771_v13 = vadd.f32 1.0, %v11143_v1  ;;  %v14383_v1 = vld [vmem:[#allocation46_spill] sm:$0xff] }
 0x4d4   :  { %11156 = vrcp.f32 %v6773_v43 }
 0x4d5   :  { %11158 = vrcp.f32 %v6771_v13  ;;  %v14385_v13 = vld [vmem:[#allocation48_spill] sm:$0xff] }
 0x4db   :  { %v11147_v14 = vpop.eup %11146 }
 0x4dc   :  { %v11149_v20 = vpop.eup %11148  ;;  %v6791_v36 = vmul.f32 %v11147_v14, %v11145_v26 }
 0x4dd   :  { %v11151_v51 = vpop.eup %11150  ;;  %v6774_v10 = vadd.f32 1.0, %v11149_v20 }
 0x4de   :  { %v11153_v29 = vpop.eup %11152  ;;  %v6789_v11 = vmul.f32 %v11151_v51, %v13864_v62  ;;  %v14384_v51 = vld [vmem:[#allocation47_spill] sm:$0xff] }
 0x4df   :  { %v11155_v52 = vpop.eup %11154 }
 0x4e0   :  { %v13977_v24 = vadd.f32 %v6791_v36, %v6789_v11  ;;  %v6792_v39 = vmul.f32 %v11155_v52, %v11153_v29 }
 0x4e1   :  { %v11157_v56 = vpop.eup %11156 }
 0x4e2   :  { %v6790_v30 = vmul.f32 %v11157_v56, %v13867_v7  ;;  %11160 = vtanh.f32 %v13977_v24  ;;  %v11159_v49 = vpop.eup %11158 }
 0x4e3   :  { %11162 = vrcp.f32 %v6774_v10 }
 0x4e4   :  { %v13981_v55 = vadd.f32 %v6792_v39, %v6790_v30 }
 0x4e6   :  { %11164 = vtanh.f32 %v13981_v55 }
 0x4ef   :  { %v11161_v28 = vpop.eup %11160 }
 0x4f0   :  { %v11163_v62 = vpop.eup %11162  ;;  %v6797_v59 = vmul.f32 %v11161_v28, %v11159_v49  ;;  %v14386_v49 = vld [vmem:[#allocation49_spill] sm:$0xff] }
 0x4f3   :  { %v11165_v40 = vpop.eup %11164 }
 0x4f4   :  { %v6798_v21 = vmul.f32 %v11165_v40, %v11163_v62 }
 0x4f6   :  { %v6799_v43 = vpack.c.bf16 %v6798_v21, %v6797_v59 }
 0x4f8   :  { %6833 = vmatmul.mubr.bf16.vlgmr.msra.gmra.mxu0 %v6799_v43  ;;  %6876 = vmatmul.mubr.bf16.vlgmr.msra.gmra.mxu1 %v6799_v43 }
 0x4f9   :  { %6944 = vmatpush1.bf16.msra.mxu0 %v13870_v0  ;;  %6987 = vmatpush1.bf16.msra.mxu1 %v13873_v18 }
 0x4fa   :  { %6945 = vmatprep.subr.bf16.mxu0 %v13876_v63  ;;  %6988 = vmatprep.subr.bf16.mxu1 %v13879_v50 }
 0x4fb   :  { %6975 = vmatprep.mubr.bf16.mxu0 %v14313_v35  ;;  %7018 = vmatprep.mubr.bf16.mxu1 %v14313_v35 }
 0x4fd   :  { %6946 = vmatpush1.bf16.msra.mxu0 %v13884_v25  ;;  %6989 = vmatpush1.bf16.msra.mxu1 %v13887_v54 }
 0x4fe   :  { %6947 = vmatprep.subr.bf16.mxu0 %v13890_v22  ;;  %6990 = vmatprep.subr.bf16.mxu1 %v13893_v53 }
 0x501   :  { %6948 = vmatpush1.bf16.msra.mxu0 %v13896_v41  ;;  %6991 = vmatpush1.bf16.msra.mxu1 %v13899_v5 }
 0x502   :  { %6949 = vmatprep.subr.bf16.mxu0 %v13902_v8  ;;  %6992 = vmatprep.subr.bf16.mxu1 %v13905_v57 }
 0x505   :  { %6950 = vmatpush1.bf16.msra.mxu0 %v13908_v4  ;;  %6993 = vmatpush1.bf16.msra.mxu1 %v13911_v60 }
 0x506   :  { %6951 = vmatprep.subr.bf16.mxu0 %v13914_v58  ;;  %6994 = vmatprep.subr.bf16.mxu1 %v13917_v16 }
 0x509   :  { %6952 = vmatpush1.bf16.msra.mxu0 %v13920_v2  ;;  %6995 = vmatpush1.bf16.msra.mxu1 %v13923_v38 }
 0x50a   :  { %6953 = vmatprep.subr.bf16.mxu0 %v13926_v32  ;;  %6996 = vmatprep.subr.bf16.mxu1 %v13929_v61 }
 0x50d   :  { %6954 = vmatpush1.bf16.msra.mxu0 %v13932_v3  ;;  %6997 = vmatpush1.bf16.msra.mxu1 %v13935_v48 }
 0x50e   :  { %6955 = vmatprep.subr.bf16.mxu0 %v13938_v19  ;;  %6998 = vmatprep.subr.bf16.mxu1 %v13941_v27 }
 0x511   :  { %6956 = vmatpush1.bf16.msra.mxu0 %v13944_v37  ;;  %6999 = vmatpush1.bf16.msra.mxu1 %v13947_v6 }
 0x512   :  { %6957 = vmatprep.subr.bf16.mxu0 %v13950_v23  ;;  %7000 = vmatprep.subr.bf16.mxu1 %v13953_v46 }
 0x515   :  { %6958 = vmatpush1.bf16.msra.mxu0 %v13956_v42  ;;  %7001 = vmatpush1.bf16.msra.mxu1 %v13959_v17 }
 0x516   :  { %7086 = vmatprep.subr.bf16.mxu0 %v13962_v47  ;;  %7129 = vmatprep.subr.bf16.mxu1 %v13965_v15 }
 0x5b8   :  { %v6834_v7 = vpop.f32.mrf.mxu0  ;;  %v6877_v36 = vpop.f32.mrf.mxu1 }
 0x5b9   :  { %v6886_v26 = vadd.f32 %v6834_v7, %v14383_v1  ;;  %v6888_v40 = vadd.f32 %v6877_v36, %v13833_v9 }
 0x5ba   :  { %v6836_v14 = vpop.f32.mrf.mxu0  ;;  %v6879_v10 = vpop.f32.mrf.mxu1 }
 0x5bb   :  { %v9587_v20 = vmul.f32 -1.442695, %v6886_v26  ;;  %v6887_v29 = vadd.f32 %v6836_v14, %v14384_v51  ;;  %v9589_v43 = vmul.f32 -1.442695, %v6888_v40  ;;  %v6889_v7 = vadd.f32 %v6879_v10, %v13836_v34 }
 0x5bc   :  { %v6838_v11 = vpop.f32.mrf.mxu0  ;;  %v6881_v59 = vpop.f32.mrf.mxu1 }
 0x5bd   :  { %11166 = vpow2.f32 %v9587_v20  ;;  %v9588_v52 = vmul.f32 -1.442695, %v6887_v29  ;;  %v6890_v39 = vadd.f32 %v6838_v11, %v14385_v13  ;;  %v6892_v21 = vadd.f32 %v6881_v59, %v13839_v12 }
 0x5be   :  { %v6840_v56 = vpop.f32.mrf.mxu0  ;;  %v6883_v1 = vpop.f32.mrf.mxu1 }
 0x5bf   :  { %11168 = vpow2.f32 %v9588_v52  ;;  %v9590_v30 = vmul.f32 -1.442695, %v6890_v39  ;;  %v6891_v28 = vadd.f32 %v6840_v56, %v14386_v49  ;;  %v9592_v14 = vmul.f32 -1.442695, %v6892_v21 }
 0x5c0   :  { %v6893_v29 = vadd.f32 %v6883_v1, %v13842_v44 }
 0x5c1   :  { %11170 = vpow2.f32 %v9590_v30  ;;  %v9591_v62 = vmul.f32 -1.442695, %v6891_v28 }
 0x5c3   :  { %11172 = vpow2.f32 %v9591_v62 }
 0x5c4   :  { %11174 = vpow2.f32 %v9589_v43 }
 0x5c5   :  { %11176 = vtanh.f32 %v6889_v7 }
 0x5ca   :  { %v11167_v26 = vpop.eup %11166 }
 0x5cb   :  { %v6912_v20 = vadd.f32 1.0, %v11167_v26 }
 0x5cc   :  { %v11169_v51 = vpop.eup %11168 }
 0x5cd   :  { %11178 = vrcp.f32 %v6912_v20  ;;  %v6913_v11 = vadd.f32 1.0, %v11169_v51 }
 0x5ce   :  { %v11171_v52 = vpop.eup %11170  ;;  %11180 = vpow2.f32 %v9592_v14 }
 0x5cf   :  { %11182 = vrcp.f32 %v6913_v11  ;;  %v6915_v9 = vadd.f32 1.0, %v11171_v52  ;;  %v14387_v52 = vld [vmem:[#allocation42_spill] sm:$0xff] }
 0x5d0   :  { %v11173_v36 = vpop.eup %11172  ;;  %11184 = vtanh.f32 %v6893_v29 }
 0x5d1   :  { %11186 = vrcp.f32 %v6915_v9  ;;  %v6916_v12 = vadd.f32 1.0, %v11173_v36  ;;  %v11175_v34 = vpop.eup %11174 }
 0x5d2   :  { %v11177_v13 = vpop.eup %11176  ;;  %v6914_v62 = vadd.f32 1.0, %v11175_v34 }
 0x5d3   :  { %11188 = vrcp.f32 %v6916_v12 }
 0x5d4   :  { %11190 = vrcp.f32 %v6914_v62 }
 0x5da   :  { %v11179_v39 = vpop.eup %11178 }
 0x5db   :  { %v11181_v56 = vpop.eup %11180  ;;  %v6934_v10 = vmul.f32 %v11179_v39, %v11177_v13  ;;  %v14388_v13 = vld [vmem:[#allocation43_spill] sm:$0xff] }
 0x5dc   :  { %v11183_v30 = vpop.eup %11182  ;;  %v6917_v43 = vadd.f32 1.0, %v11181_v56 }
 0x5dd   :  { %v11185_v49 = vpop.eup %11184  ;;  %v6932_v44 = vmul.f32 %v11183_v30, %v13977_v24  ;;  %v14389_v30 = vld [vmem:[#allocation44_spill] sm:$0xff] }
 0x5de   :  { %v11187_v28 = vpop.eup %11186 }
 0x5df   :  { %v14027_v40 = vadd.f32 %v6934_v10, %v6932_v44  ;;  %v6935_v59 = vmul.f32 %v11187_v28, %v11185_v49 }
 0x5e0   :  { %v11189_v21 = vpop.eup %11188 }
 0x5e1   :  { %v6933_v7 = vmul.f32 %v11189_v21, %v13981_v55  ;;  %11192 = vtanh.f32 %v14027_v40  ;;  %v11191_v26 = vpop.eup %11190 }
 0x5e2   :  { %11194 = vrcp.f32 %v6917_v43 }
 0x5e3   :  { %v14031_v1 = vadd.f32 %v6935_v59, %v6933_v7  ;;  %v14390_v59 = vld [vmem:[#allocation45_spill] sm:$0xff] }
 0x5e5   :  { %11196 = vtanh.f32 %v14031_v1 }
 0x5ee   :  { %v11193_v14 = vpop.eup %11192 }
 0x5ef   :  { %v11195_v24 = vpop.eup %11194  ;;  %v6940_v51 = vmul.f32 %v11193_v14, %v11191_v26 }
 0x5f2   :  { %v11197_v20 = vpop.eup %11196 }
 0x5f3   :  { %v6941_v29 = vmul.f32 %v11197_v20, %v11195_v24 }
 0x5f5   :  { %v6942_v11 = vpack.c.bf16 %v6941_v29, %v6940_v51 }
 0x5f7   :  { %6976 = vmatmul.mubr.bf16.vlgmr.msra.gmra.mxu0 %v6942_v11  ;;  %7019 = vmatmul.mubr.bf16.vlgmr.msra.gmra.mxu1 %v6942_v11 }
 0x5f8   :  { %7087 = vmatpush1.bf16.msra.mxu0 %v13870_v0  ;;  %7130 = vmatpush1.bf16.msra.mxu1 %v13873_v18 }
 0x5f9   :  { %7088 = vmatprep.subr.bf16.mxu0 %v13876_v63  ;;  %7131 = vmatprep.subr.bf16.mxu1 %v13879_v50 }
 0x5fa   :  { %7118 = vmatprep.mubr.bf16.mxu0 %v14313_v35  ;;  %7161 = vmatprep.mubr.bf16.mxu1 %v14313_v35 }
 0x5fc   :  { %7089 = vmatpush1.bf16.msra.mxu0 %v13884_v25  ;;  %7132 = vmatpush1.bf16.msra.mxu1 %v13887_v54 }
 0x5fd   :  { %7090 = vmatprep.subr.bf16.mxu0 %v13890_v22  ;;  %7133 = vmatprep.subr.bf16.mxu1 %v13893_v53 }
 0x600   :  { %7091 = vmatpush1.bf16.msra.mxu0 %v13896_v41  ;;  %7134 = vmatpush1.bf16.msra.mxu1 %v13899_v5 }
 0x601   :  { %7092 = vmatprep.subr.bf16.mxu0 %v13902_v8  ;;  %7135 = vmatprep.subr.bf16.mxu1 %v13905_v57 }
 0x604   :  { %7093 = vmatpush1.bf16.msra.mxu0 %v13908_v4  ;;  %7136 = vmatpush1.bf16.msra.mxu1 %v13911_v60 }
 0x605   :  { %7094 = vmatprep.subr.bf16.mxu0 %v13914_v58  ;;  %7137 = vmatprep.subr.bf16.mxu1 %v13917_v16 }
 0x608   :  { %7095 = vmatpush1.bf16.msra.mxu0 %v13920_v2  ;;  %7138 = vmatpush1.bf16.msra.mxu1 %v13923_v38 }
 0x609   :  { %7096 = vmatprep.subr.bf16.mxu0 %v13926_v32  ;;  %7139 = vmatprep.subr.bf16.mxu1 %v13929_v61 }
 0x60c   :  { %7097 = vmatpush1.bf16.msra.mxu0 %v13932_v3  ;;  %7140 = vmatpush1.bf16.msra.mxu1 %v13935_v48 }
 0x60d   :  { %7098 = vmatprep.subr.bf16.mxu0 %v13938_v19  ;;  %7141 = vmatprep.subr.bf16.mxu1 %v13941_v27 }
 0x610   :  { %7099 = vmatpush1.bf16.msra.mxu0 %v13944_v37  ;;  %7142 = vmatpush1.bf16.msra.mxu1 %v13947_v6 }
 0x611   :  { %7100 = vmatprep.subr.bf16.mxu0 %v13950_v23  ;;  %7143 = vmatprep.subr.bf16.mxu1 %v13953_v46 }
 0x614   :  { %7101 = vmatpush1.bf16.msra.mxu0 %v13956_v42  ;;  %7144 = vmatpush1.bf16.msra.mxu1 %v13959_v17 }
 0x615   :  { %7229 = vmatprep.subr.bf16.mxu0 %v13962_v47  ;;  %7272 = vmatprep.subr.bf16.mxu1 %v13965_v15 }
 0x6b7   :  { %v6977_v55 = vpop.f32.mrf.mxu0  ;;  %v7020_v34 = vpop.f32.mrf.mxu1 }
 0x6b8   :  { %v7029_v9 = vadd.f32 %v6977_v55, %v14387_v52  ;;  %v7031_v7 = vadd.f32 %v7020_v34, %v13821_v31 }
 0x6b9   :  { %v6979_v36 = vpop.f32.mrf.mxu0  ;;  %v7022_v28 = vpop.f32.mrf.mxu1 }
 0x6ba   :  { %v9593_v12 = vmul.f32 -1.442695, %v7029_v9  ;;  %v7030_v39 = vadd.f32 %v6979_v36, %v14388_v13  ;;  %v9595_v24 = vmul.f32 -1.442695, %v7031_v7  ;;  %v7032_v20 = vadd.f32 %v7022_v28, %v13824_v33  ;;  %v14391_v9 = vld [vmem:[#allocation72_spill] sm:$0xff] }
 0x6bb   :  { %v6981_v56 = vpop.f32.mrf.mxu0  ;;  %v7024_v26 = vpop.f32.mrf.mxu1 }
 0x6bc   :  { %11198 = vpow2.f32 %v9593_v12  ;;  %v9594_v10 = vmul.f32 -1.442695, %v7030_v39  ;;  %v7033_v49 = vadd.f32 %v6981_v56, %v14389_v30  ;;  %v7035_v14 = vadd.f32 %v7024_v26, %v13827_v45 }
 0x6bd   :  { %v6983_v44 = vpop.f32.mrf.mxu0  ;;  %v7026_v51 = vpop.f32.mrf.mxu1 }
 0x6be   :  { %11200 = vpow2.f32 %v9594_v10  ;;  %v9596_v62 = vmul.f32 -1.442695, %v7033_v49  ;;  %v7034_v21 = vadd.f32 %v6983_v44, %v14390_v59  ;;  %v9598_v11 = vmul.f32 -1.442695, %v7035_v14 }
 0x6bf   :  { %v7036_v36 = vadd.f32 %v7026_v51, %v14391_v9  ;;  %v14392_v9 = vld [vmem:[#allocation38_spill] sm:$0xff] }
 0x6c0   :  { %11202 = vpow2.f32 %v9596_v62  ;;  %v9597_v43 = vmul.f32 -1.442695, %v7034_v21 }
 0x6c2   :  { %11204 = vpow2.f32 %v9597_v43 }
 0x6c3   :  { %11206 = vpow2.f32 %v9595_v24 }
 0x6c4   :  { %11208 = vtanh.f32 %v7032_v20 }
 0x6c9   :  { %v11199_v29 = vpop.eup %11198 }
 0x6ca   :  { %v7055_v55 = vadd.f32 1.0, %v11199_v29 }
 0x6cb   :  { %v11201_v52 = vpop.eup %11200 }
 0x6cc   :  { %11210 = vrcp.f32 %v7055_v55  ;;  %v7056_v12 = vadd.f32 1.0, %v11201_v52 }
 0x6cd   :  { %v11203_v13 = vpop.eup %11202  ;;  %11212 = vpow2.f32 %v9598_v11 }
 0x6ce   :  { %11214 = vrcp.f32 %v7056_v12  ;;  %v7058_v31 = vadd.f32 1.0, %v11203_v13 }
 0x6cf   :  { %v11205_v34 = vpop.eup %11204  ;;  %11216 = vtanh.f32 %v7036_v36 }
 0x6d0   :  { %11218 = vrcp.f32 %v7058_v31  ;;  %v7059_v45 = vadd.f32 1.0, %v11205_v34  ;;  %v11207_v33 = vpop.eup %11206  ;;  %v14393_v34 = vld [vmem:[#allocation39_spill] sm:$0xff] }
 0x6d1   :  { %v11209_v39 = vpop.eup %11208  ;;  %v7057_v59 = vadd.f32 1.0, %v11207_v33 }
 0x6d2   :  { %11220 = vrcp.f32 %v7059_v45 }
 0x6d3   :  { %11222 = vrcp.f32 %v7057_v59 }
 0x6d9   :  { %v11211_v56 = vpop.eup %11210 }
 0x6da   :  { %v11213_v10 = vpop.eup %11212  ;;  %v7077_v30 = vmul.f32 %v11211_v56, %v11209_v39  ;;  %v14394_v56 = vld [vmem:[#allocation40_spill] sm:$0xff] }
 0x6db   :  { %v11215_v49 = vpop.eup %11214  ;;  %v7060_v26 = vadd.f32 1.0, %v11213_v10 }
 0x6dc   :  { %v11217_v44 = vpop.eup %11216  ;;  %v7075_v28 = vmul.f32 %v11215_v49, %v14027_v40 }
 0x6dd   :  { %v11219_v62 = vpop.eup %11218 }
 0x6de   :  { %v14077_v21 = vadd.f32 %v7077_v30, %v7075_v28  ;;  %v7078_v43 = vmul.f32 %v11219_v62, %v11217_v44  ;;  %v14395_v28 = vld [vmem:[#allocation41_spill] sm:$0xff] }
 0x6df   :  { %v11221_v7 = vpop.eup %11220 }
 0x6e0   :  { %v7076_v14 = vmul.f32 %v11221_v7, %v14031_v1  ;;  %11224 = vtanh.f32 %v14077_v21  ;;  %v11223_v20 = vpop.eup %11222 }
 0x6e1   :  { %11226 = vrcp.f32 %v7060_v26 }
 0x6e2   :  { %v14081_v24 = vadd.f32 %v7078_v43, %v7076_v14  ;;  %v14396_v43 = vld [vmem:[#allocation25_spill] sm:$0xff]  ;;  %v14397_v14 = vld [vmem:[#allocation62_spill] sm:$0xff] }
 0x6e4   :  { %11228 = vtanh.f32 %v14081_v24 }
 0x6ed   :  { %v11225_v51 = vpop.eup %11224 }
 0x6ee   :  { %v11227_v40 = vpop.eup %11226  ;;  %v7083_v11 = vmul.f32 %v11225_v51, %v11223_v20 }
 0x6f1   :  { %v11229_v29 = vpop.eup %11228 }
 0x6f2   :  { %v7084_v55 = vmul.f32 %v11229_v29, %v11227_v40  ;;  %v14398_v40 = vld [vmem:[#allocation60_spill] sm:$0xff] }
 0x6f4   :  { %v7085_v52 = vpack.c.bf16 %v7084_v55, %v7083_v11 }
 0x6f6   :  { %7119 = vmatmul.mubr.bf16.vlgmr.msra.gmra.mxu0 %v7085_v52  ;;  %7162 = vmatmul.mubr.bf16.vlgmr.msra.gmra.mxu1 %v7085_v52 }
 0x6f7   :  { %7230 = vmatpush1.bf16.msra.mxu0 %v13870_v0  ;;  %7273 = vmatpush1.bf16.msra.mxu1 %v13873_v18 }
 0x6f8   :  { %7231 = vmatprep.subr.bf16.mxu0 %v13876_v63  ;;  %7274 = vmatprep.subr.bf16.mxu1 %v13879_v50 }
 0x6f9   :  { %7261 = vmatprep.mubr.bf16.mxu0 %v14313_v35  ;;  %7304 = vmatprep.mubr.bf16.mxu1 %v14313_v35 }
 0x6fb   :  { %7232 = vmatpush1.bf16.msra.mxu0 %v13884_v25  ;;  %7275 = vmatpush1.bf16.msra.mxu1 %v13887_v54 }
 0x6fc   :  { %7233 = vmatprep.subr.bf16.mxu0 %v13890_v22  ;;  %7276 = vmatprep.subr.bf16.mxu1 %v13893_v53 }
 0x6ff   :  { %7234 = vmatpush1.bf16.msra.mxu0 %v13896_v41  ;;  %7277 = vmatpush1.bf16.msra.mxu1 %v13899_v5 }
 0x700   :  { %7235 = vmatprep.subr.bf16.mxu0 %v13902_v8  ;;  %7278 = vmatprep.subr.bf16.mxu1 %v13905_v57 }
 0x703   :  { %7236 = vmatpush1.bf16.msra.mxu0 %v13908_v4  ;;  %7279 = vmatpush1.bf16.msra.mxu1 %v13911_v60 }
 0x704   :  { %7237 = vmatprep.subr.bf16.mxu0 %v13914_v58  ;;  %7280 = vmatprep.subr.bf16.mxu1 %v13917_v16 }
 0x707   :  { %7238 = vmatpush1.bf16.msra.mxu0 %v13920_v2  ;;  %7281 = vmatpush1.bf16.msra.mxu1 %v13923_v38 }
 0x708   :  { %7239 = vmatprep.subr.bf16.mxu0 %v13926_v32  ;;  %7282 = vmatprep.subr.bf16.mxu1 %v13929_v61 }
 0x70b   :  { %7240 = vmatpush1.bf16.msra.mxu0 %v13932_v3  ;;  %7283 = vmatpush1.bf16.msra.mxu1 %v13935_v48 }
 0x70c   :  { %7241 = vmatprep.subr.bf16.mxu0 %v13938_v19  ;;  %7284 = vmatprep.subr.bf16.mxu1 %v13941_v27 }
 0x70f   :  { %7242 = vmatpush1.bf16.msra.mxu0 %v13944_v37  ;;  %7285 = vmatpush1.bf16.msra.mxu1 %v13947_v6 }
 0x710   :  { %7243 = vmatprep.subr.bf16.mxu0 %v13950_v23  ;;  %7286 = vmatprep.subr.bf16.mxu1 %v13953_v46 }
 0x713   :  { %7244 = vmatpush1.bf16.msra.mxu0 %v13956_v42  ;;  %7287 = vmatpush1.bf16.msra.mxu1 %v13959_v17 }
 0x714   :  { %7372 = vmatprep.subr.bf16.mxu0 %v13962_v47  ;;  %7415 = vmatprep.subr.bf16.mxu1 %v13965_v15 }
 0x7b6   :  { %v7120_v1 = vpop.f32.mrf.mxu0  ;;  %v7163_v31 = vpop.f32.mrf.mxu1 }
 0x7b7   :  { %v7172_v36 = vadd.f32 %v7120_v1, %v14392_v9  ;;  %v7174_v7 = vadd.f32 %v7163_v31, %v14396_v43 }
 0x7b8   :  { %v7122_v12 = vpop.f32.mrf.mxu0  ;;  %v7165_v49 = vpop.f32.mrf.mxu1 }
 0x7b9   :  { %v9599_v13 = vmul.f32 -1.442695, %v7172_v36  ;;  %v7173_v45 = vadd.f32 %v7122_v12, %v14393_v34  ;;  %v9601_v51 = vmul.f32 -1.442695, %v7174_v7  ;;  %v7175_v29 = vadd.f32 %v7165_v49, %v14398_v40  ;;  %v14399_v36 = vld [vmem:[#allocation65_spill] sm:$0xff] }
 0x7ba   :  { %v7124_v33 = vpop.f32.mrf.mxu0  ;;  %v7167_v26 = vpop.f32.mrf.mxu1 }
 0x7bb   :  { %11230 = vpow2.f32 %v9599_v13  ;;  %v9600_v39 = vmul.f32 -1.442695, %v7173_v45  ;;  %v7176_v10 = vadd.f32 %v7124_v33, %v14394_v56  ;;  %v7178_v20 = vadd.f32 %v7167_v26, %v14397_v14 }
 0x7bc   :  { %v7126_v30 = vpop.f32.mrf.mxu0  ;;  %v7169_v11 = vpop.f32.mrf.mxu1 }
 0x7bd   :  { %11232 = vpow2.f32 %v9600_v39  ;;  %v9602_v44 = vmul.f32 -1.442695, %v7176_v10  ;;  %v7177_v62 = vadd.f32 %v7126_v30, %v14395_v28  ;;  %v9604_v52 = vmul.f32 -1.442695, %v7178_v20 }
 0x7be   :  { %v7179_v12 = vadd.f32 %v7169_v11, %v14399_v36 }
 0x7bf   :  { %11234 = vpow2.f32 %v9602_v44  ;;  %v9603_v59 = vmul.f32 -1.442695, %v7177_v62 }
 0x7c1   :  { %11236 = vpow2.f32 %v9603_v59 }
 0x7c2   :  { %11238 = vpow2.f32 %v9601_v51 }
 0x7c3   :  { %11240 = vtanh.f32 %v7175_v29 }
 0x7c8   :  { %v11231_v55 = vpop.eup %11230 }
 0x7c9   :  { %v7198_v1 = vadd.f32 1.0, %v11231_v55 }
 0x7ca   :  { %v11233_v9 = vpop.eup %11232 }
 0x7cb   :  { %11242 = vrcp.f32 %v7198_v1  ;;  %v7199_v13 = vadd.f32 1.0, %v11233_v9 }
 0x7cc   :  { %v11235_v34 = vpop.eup %11234  ;;  %11244 = vpow2.f32 %v9604_v52 }
 0x7cd   :  { %11246 = vrcp.f32 %v7199_v13  ;;  %v7201_v31 = vadd.f32 1.0, %v11235_v34 }
 0x7ce   :  { %v11237_v45 = vpop.eup %11236  ;;  %11248 = vtanh.f32 %v7179_v12 }
 0x7cf   :  { %11250 = vrcp.f32 %v7201_v31  ;;  %v7202_v33 = vadd.f32 1.0, %v11237_v45  ;;  %v11239_v39 = vpop.eup %11238 }
 0x7d0   :  { %v11241_v56 = vpop.eup %11240  ;;  %v7200_v43 = vadd.f32 1.0, %v11239_v39 }
 0x7d1   :  { %11252 = vrcp.f32 %v7202_v33 }
 0x7d2   :  { %11254 = vrcp.f32 %v7200_v43 }
 0x7d8   :  { %v11243_v10 = vpop.eup %11242 }
 0x7d9   :  { %v11245_v30 = vpop.eup %11244  ;;  %v7220_v49 = vmul.f32 %v11243_v10, %v11241_v56 }
 0x7da   :  { %v11247_v44 = vpop.eup %11246  ;;  %v7203_v20 = vadd.f32 1.0, %v11245_v30 }
 0x7db   :  { %v11249_v28 = vpop.eup %11248  ;;  %v7218_v62 = vmul.f32 %v11247_v44, %v14077_v21 }
 0x7dc   :  { %v11251_v59 = vpop.eup %11250 }
 0x7dd   :  { %v14127_v7 = vadd.f32 %v7220_v49, %v7218_v62  ;;  %v7221_v26 = vmul.f32 %v11251_v59, %v11249_v28 }
 0x7de   :  { %v11253_v14 = vpop.eup %11252 }
 0x7df   :  { %v7219_v51 = vmul.f32 %v11253_v14, %v14081_v24  ;;  %11256 = vtanh.f32 %v14127_v7  ;;  %v11255_v29 = vpop.eup %11254 }
 0x7e0   :  { %11258 = vrcp.f32 %v7203_v20 }
 0x7e1   :  { %v14131_v40 = vadd.f32 %v7221_v26, %v7219_v51 }
 0x7e3   :  { %11260 = vtanh.f32 %v14131_v40 }
 0x7ec   :  { %v11257_v11 = vpop.eup %11256 }
 0x7ed   :  { %v11259_v21 = vpop.eup %11258  ;;  %v7226_v52 = vmul.f32 %v11257_v11, %v11255_v29 }
 0x7f0   :  { %v11261_v55 = vpop.eup %11260 }
 0x7f1   :  { %v7227_v1 = vmul.f32 %v11261_v55, %v11259_v21 }
 0x7f3   :  { %v7228_v9 = vpack.c.bf16 %v7227_v1, %v7226_v52 }
 0x7f5   :  { %7262 = vmatmul.mubr.bf16.vlgmr.msra.gmra.mxu0 %v7228_v9  ;;  %7305 = vmatmul.mubr.bf16.vlgmr.msra.gmra.mxu1 %v7228_v9  ;;  %v11527_v9 = vld [vmem:[#allocation4 + $0xe0] ss:$16 sps:$4 sm:$0xff]  }
 0x7f6   :  { %7373 = vmatpush1.bf16.msra.mxu0 %v13870_v0  ;;  %7416 = vmatpush1.bf16.msra.mxu1 %v13873_v18  ;;  %v14400_v18 = vld [vmem:[#allocation34_spill] sm:$0xff] }
 0x7f7   :  { %7374 = vmatprep.subr.bf16.mxu0 %v13876_v63  ;;  %7417 = vmatprep.subr.bf16.mxu1 %v13879_v50 }
 0x7f8   :  { %7404 = vmatprep.mubr.bf16.mxu0 %v14313_v35  ;;  %7447 = vmatprep.mubr.bf16.mxu1 %v14313_v35 }
 0x7fa   :  { %7375 = vmatpush1.bf16.msra.mxu0 %v13884_v25  ;;  %7418 = vmatpush1.bf16.msra.mxu1 %v13887_v54 }
 0x7fb   :  { %7376 = vmatprep.subr.bf16.mxu0 %v13890_v22  ;;  %7419 = vmatprep.subr.bf16.mxu1 %v13893_v53  ;;  %v14401_v22 = vld [vmem:[#allocation35_spill] sm:$0xff] }
 0x7fe   :  { %7377 = vmatpush1.bf16.msra.mxu0 %v13896_v41  ;;  %7420 = vmatpush1.bf16.msra.mxu1 %v13899_v5 }
 0x7ff   :  { %7378 = vmatprep.subr.bf16.mxu0 %v13902_v8  ;;  %7421 = vmatprep.subr.bf16.mxu1 %v13905_v57  ;;  %v14402_v8 = vld [vmem:[#allocation36_spill] sm:$0xff] }
 0x802   :  { %7379 = vmatpush1.bf16.msra.mxu0 %v13908_v4  ;;  %7422 = vmatpush1.bf16.msra.mxu1 %v13911_v60 }
 0x803   :  { %7380 = vmatprep.subr.bf16.mxu0 %v13914_v58  ;;  %7423 = vmatprep.subr.bf16.mxu1 %v13917_v16  ;;  %v14403_v16 = vld [vmem:[#allocation37_spill] sm:$0xff] }
 0x806   :  { %7381 = vmatpush1.bf16.msra.mxu0 %v13920_v2  ;;  %7424 = vmatpush1.bf16.msra.mxu1 %v13923_v38 }
 0x807   :  { %7382 = vmatprep.subr.bf16.mxu0 %v13926_v32  ;;  %7425 = vmatprep.subr.bf16.mxu1 %v13929_v61  ;;  %v14404_v32 = vld [vmem:[#allocation73_spill] sm:$0xff] }
 0x80a   :  { %7383 = vmatpush1.bf16.msra.mxu0 %v13932_v3  ;;  %7426 = vmatpush1.bf16.msra.mxu1 %v13935_v48  ;;  %v14405_v48 = vld [vmem:[#allocation57_spill] sm:$0xff] }
 0x80b   :  { %7384 = vmatprep.subr.bf16.mxu0 %v13938_v19  ;;  %7427 = vmatprep.subr.bf16.mxu1 %v13941_v27 }
 0x80e   :  { %7385 = vmatpush1.bf16.msra.mxu0 %v13944_v37  ;;  %7428 = vmatpush1.bf16.msra.mxu1 %v13947_v6  ;;  %v14406_v37 = vld [vmem:[#allocation74_spill] sm:$0xff] }
 0x80f   :  { %7386 = vmatprep.subr.bf16.mxu0 %v13950_v23  ;;  %7429 = vmatprep.subr.bf16.mxu1 %v13953_v46 }
 0x812   :  { %7387 = vmatpush1.bf16.msra.mxu0 %v13956_v42  ;;  %7430 = vmatpush1.bf16.msra.mxu1 %v13959_v17 }
 0x813   :  { %7515 = vmatprep.subr.bf16.mxu0 %v13962_v47  ;;  %7558 = vmatprep.subr.bf16.mxu1 %v13965_v15  ;;  %v14407_v15 = vld [vmem:[#allocation55_spill] sm:$0xff] }
 0x8b5   :  { %v7263_v0 = vpop.f32.mrf.mxu0  ;;  %v7306_v54 = vpop.f32.mrf.mxu1 }
 0x8b6   :  { %v7315_v63 = vadd.f32 %v7263_v0, %v14400_v18  ;;  %v7317_v61 = vadd.f32 %v7306_v54, %v14404_v32  ;;  %v11529_v0 = vld [vmem:[#allocation4 + $0xc4] ss:$16 sps:$4 sm:$0xff]   ;;  %v11530_v18 = vld [vmem:[#allocation4 + $0xcc] ss:$16 sps:$4 sm:$0xff]   ;;  %v11547_v32 = vld [vmem:[#allocation4 + $0x40] ss:$16 sps:$4 sm:$0xff]  }
 0x8b7   :  { %v7265_v50 = vpop.f32.mrf.mxu0  ;;  %v7308_v60 = vpop.f32.mrf.mxu1  ;;  %v11534_v54 = vld [vmem:[#allocation4 + $0xac] ss:$16 sps:$4 sm:$0xff]  }
 0x8b8   :  { %v9605_v25 = vmul.f32 -1.442695, %v7315_v63  ;;  %v7316_v53 = vadd.f32 %v7265_v50, %v14401_v22  ;;  %v9607_v27 = vmul.f32 -1.442695, %v7317_v61  ;;  %v7318_v6 = vadd.f32 %v7308_v60, %v14406_v37  ;;  %v11531_v63 = vld [vmem:[#allocation4 + $0xc0] ss:$16 sps:$4 sm:$0xff]  }
 0x8b9   :  { %v7267_v41 = vpop.f32.mrf.mxu0  ;;  %v7310_v3 = vpop.f32.mrf.mxu1  ;;  %v11532_v50 = vld [vmem:[#allocation4 + $0xc8] ss:$16 sps:$4 sm:$0xff]   ;;  %v11535_v22 = vld [vmem:[#allocation4 + $0xa0] ss:$16 sps:$4 sm:$0xff]   ;;  %v11542_v60 = vld [vmem:[#allocation4 + $0x6c] ss:$16 sps:$4 sm:$0xff]  }
 0x8ba   :  { %11262 = vpow2.f32 %v9605_v25  ;;  %v9606_v5 = vmul.f32 -1.442695, %v7316_v53  ;;  %v7319_v57 = vadd.f32 %v7267_v41, %v14402_v8  ;;  %v7321_v19 = vadd.f32 %v7310_v3, %v14405_v48  ;;  %v11533_v25 = vld [vmem:[#allocation4 + $0xa4] ss:$16 sps:$4 sm:$0xff]   ;;  %v11536_v53 = vld [vmem:[#allocation4 + $0xa8] ss:$16 sps:$4 sm:$0xff]  }
 0x8bb   :  { %v7269_v4 = vpop.f32.mrf.mxu0  ;;  %v7312_v23 = vpop.f32.mrf.mxu1  ;;  %v11537_v41 = vld [vmem:[#allocation4 + $0x84] ss:$16 sps:$4 sm:$0xff]   ;;  %v11539_v8 = vld [vmem:[#allocation4 + $0x80] ss:$16 sps:$4 sm:$0xff]   ;;  %v11548_v61 = vld [vmem:[#allocation4 + $0x48] ss:$16 sps:$4 sm:$0xff]  }
 0x8bc   :  { %11264 = vpow2.f32 %v9606_v5  ;;  %v9608_v58 = vmul.f32 -1.442695, %v7319_v57  ;;  %v7320_v2 = vadd.f32 %v7269_v4, %v14403_v16  ;;  %v9610_v42 = vmul.f32 -1.442695, %v7321_v19  ;;  %v11538_v5 = vld [vmem:[#allocation4 + $0x8c] ss:$16 sps:$4 sm:$0xff]  }
 0x8bd   :  { %v7322_v24 = vadd.f32 %v7312_v23, %v14407_v15  ;;  %v11540_v57 = vld [vmem:[#allocation4 + $0x88] ss:$16 sps:$4 sm:$0xff]   ;;  %v11541_v4 = vld [vmem:[#allocation4 + $0x64] ss:$16 sps:$4 sm:$0xff]   ;;  %v11550_v48 = vld [vmem:[#allocation4 + $0x2c] ss:$16 sps:$4 sm:$0xff]  }
 0x8be   :  { %11266 = vpow2.f32 %v9608_v58  ;;  %v9609_v38 = vmul.f32 -1.442695, %v7320_v2  ;;  %v11543_v58 = vld [vmem:[#allocation4 + $0x60] ss:$16 sps:$4 sm:$0xff]   ;;  %v11544_v16 = vld [vmem:[#allocation4 + $0x68] ss:$16 sps:$4 sm:$0xff]  }
 0x8bf   :  { %v11545_v2 = vld [vmem:[#allocation4 + $0x44] ss:$16 sps:$4 sm:$0xff]   ;;  %v11551_v19 = vld [vmem:[#allocation4 + $0x20] ss:$16 sps:$4 sm:$0xff]  }
 0x8c0   :  { %11268 = vpow2.f32 %v9609_v38  ;;  %v11546_v38 = vld [vmem:[#allocation4 + $0x4c] ss:$16 sps:$4 sm:$0xff]   ;;  %v11549_v3 = vld [vmem:[#allocation4 + $0x24] ss:$16 sps:$4 sm:$0xff]   ;;  %v11555_v23 = vld [vmem:[#allocation4] ss:$16 sps:$4 sm:$0xff]  }
 0x8c1   :  { %11270 = vpow2.f32 %v9607_v27  ;;  %v11552_v27 = vld [vmem:[#allocation4 + $0x28] ss:$16 sps:$4 sm:$0xff]   ;;  %v11553_v37 = vld [vmem:[#allocation4 + $0x4] ss:$16 sps:$4 sm:$0xff]  }
 0x8c2   :  { %11272 = vtanh.f32 %v7318_v6  ;;  %v11554_v6 = vld [vmem:[#allocation4 + $0xc] ss:$16 sps:$4 sm:$0xff]  }
 0x8c7   :  { %v11263_v46 = vpop.eup %11262 }
 0x8c8   :  { %v7341_v17 = vadd.f32 1.0, %v11263_v46  ;;  %v11556_v46 = vld [vmem:[#allocation4 + $0x8] ss:$16 sps:$4 sm:$0xff]  }
 0x8c9   :  { %v11265_v47 = vpop.eup %11264 }
 0x8ca   :  { %11274 = vrcp.f32 %v7341_v17  ;;  %v7342_v36 = vadd.f32 1.0, %v11265_v47  ;;  %v14408_v47 = vld [vmem:[#allocation30_spill] sm:$0xff] }
 0x8cb   :  { %v11267_v12 = vpop.eup %11266  ;;  %11276 = vpow2.f32 %v9610_v42  ;;  %v10903_v42 = vld [vmem:[#allocation7 + $0x74] ss:$8 sps:$4 sm:$0xff]  }
 0x8cc   :  { %11278 = vrcp.f32 %v7342_v36  ;;  %v7344_v13 = vadd.f32 1.0, %v11267_v12 }
 0x8cd   :  { %v11269_v34 = vpop.eup %11268  ;;  %11280 = vtanh.f32 %v7322_v24 }
 0x8ce   :  { %11282 = vrcp.f32 %v7344_v13  ;;  %v7345_v31 = vadd.f32 1.0, %v11269_v34  ;;  %v11271_v45 = vpop.eup %11270  ;;  %v14409_v13 = vld [vmem:[#allocation31_spill] sm:$0xff] }
 0x8cf   :  { %v11273_v33 = vpop.eup %11272  ;;  %v7343_v62 = vadd.f32 1.0, %v11271_v45 }
 0x8d0   :  { %11284 = vrcp.f32 %v7345_v31 }
 0x8d1   :  { %11286 = vrcp.f32 %v7343_v62  ;;  %v14412_v62 = vld [vmem:[#allocation68_spill] sm:$0xff] }
 0x8d7   :  { %v11275_v39 = vpop.eup %11274 }
 0x8d8   :  { %v11277_v56 = vpop.eup %11276  ;;  %v7363_v10 = vmul.f32 %v11275_v39, %v11273_v33  ;;  %v14410_v33 = vld [vmem:[#allocation32_spill] sm:$0xff] }
 0x8d9   :  { %v11279_v30 = vpop.eup %11278  ;;  %v7346_v14 = vadd.f32 1.0, %v11277_v56 }
 0x8da   :  { %v11281_v49 = vpop.eup %11280  ;;  %v7361_v44 = vmul.f32 %v11279_v30, %v14127_v7 }
 0x8db   :  { %v11283_v28 = vpop.eup %11282 }
 0x8dc   :  { %v14177_v59 = vadd.f32 %v7363_v10, %v7361_v44  ;;  %v7364_v43 = vmul.f32 %v11283_v28, %v11281_v49  ;;  %v14411_v49 = vld [vmem:[#allocation33_spill] sm:$0xff] }
 0x8dd   :  { %v11285_v26 = vpop.eup %11284 }
 0x8de   :  { %v7362_v20 = vmul.f32 %v11285_v26, %v14131_v40  ;;  %11288 = vtanh.f32 %v14177_v59  ;;  %v11287_v29 = vpop.eup %11286  ;;  %v11528_v40 = vld [vmem:[#allocation4 + $0xe8] ss:$16 sps:$4 sm:$0xff]  }
 0x8df   :  { %11290 = vrcp.f32 %v7346_v14  ;;  %v14413_v14 = vld [vmem:[#allocation70_spill] sm:$0xff] }
 0x8e0   :  { %v14181_v51 = vadd.f32 %v7364_v43, %v7362_v20 }
 0x8e2   :  { %11292 = vtanh.f32 %v14181_v51 }
 0x8eb   :  { %v11289_v11 = vpop.eup %11288 }
 0x8ec   :  { %v11291_v7 = vpop.eup %11290  ;;  %v7369_v55 = vmul.f32 %v11289_v11, %v11287_v29  ;;  %v14414_v11 = vld [vmem:[#allocation67_spill] sm:$0xff] }
 0x8ef   :  { %v11293_v21 = vpop.eup %11292 }
 0x8f0   :  { %v7370_v52 = vmul.f32 %v11293_v21, %v11291_v7 }
 0x8f2   :  { %v7371_v1 = vpack.c.bf16 %v7370_v52, %v7369_v55 }
 0x8f4   :  { %7405 = vmatmul.mubr.bf16.vlgmr.msra.gmra.mxu0 %v7371_v1  ;;  %7448 = vmatmul.mubr.bf16.vlgmr.msra.gmra.mxu1 %v7371_v1 }
 0x8f5   :  { %7516 = vmatpush1.bf16.msra.mxu0 %v11527_v9  ;;  %7559 = vmatpush1.bf16.msra.mxu1 %v11528_v40  ;;  %v14415_v40 = vld [vmem:[#allocation69_spill] sm:$0xff] }
 0x8f6   :  { %7517 = vmatprep.subr.bf16.mxu0 %v11529_v0  ;;  %7560 = vmatprep.subr.bf16.mxu1 %v11530_v18 }
 0x8f7   :  { %7547 = vmatprep.mubr.bf16.mxu0 %v14313_v35  ;;  %7590 = vmatprep.mubr.bf16.mxu1 %v14313_v35 }
 0x8f9   :  { %7518 = vmatpush1.bf16.msra.mxu0 %v11531_v63  ;;  %7561 = vmatpush1.bf16.msra.mxu1 %v11532_v50 }
 0x8fa   :  { %7519 = vmatprep.subr.bf16.mxu0 %v11533_v25  ;;  %7562 = vmatprep.subr.bf16.mxu1 %v11534_v54 }
 0x8fd   :  { %7520 = vmatpush1.bf16.msra.mxu0 %v11535_v22  ;;  %7563 = vmatpush1.bf16.msra.mxu1 %v11536_v53 }
 0x8fe   :  { %7521 = vmatprep.subr.bf16.mxu0 %v11537_v41  ;;  %7564 = vmatprep.subr.bf16.mxu1 %v11538_v5 }
 0x901   :  { %7522 = vmatpush1.bf16.msra.mxu0 %v11539_v8  ;;  %7565 = vmatpush1.bf16.msra.mxu1 %v11540_v57 }
 0x902   :  { %7523 = vmatprep.subr.bf16.mxu0 %v11541_v4  ;;  %7566 = vmatprep.subr.bf16.mxu1 %v11542_v60 }
 0x905   :  { %7524 = vmatpush1.bf16.msra.mxu0 %v11543_v58  ;;  %7567 = vmatpush1.bf16.msra.mxu1 %v11544_v16 }
 0x906   :  { %7525 = vmatprep.subr.bf16.mxu0 %v11545_v2  ;;  %7568 = vmatprep.subr.bf16.mxu1 %v11546_v38 }
 0x909   :  { %7526 = vmatpush1.bf16.msra.mxu0 %v11547_v32  ;;  %7569 = vmatpush1.bf16.msra.mxu1 %v11548_v61 }
 0x90a   :  { %7527 = vmatprep.subr.bf16.mxu0 %v11549_v3  ;;  %7570 = vmatprep.subr.bf16.mxu1 %v11550_v48 }
 0x90d   :  { %7528 = vmatpush1.bf16.msra.mxu0 %v11551_v19  ;;  %7571 = vmatpush1.bf16.msra.mxu1 %v11552_v27 }
 0x90e   :  { %7529 = vmatprep.subr.bf16.mxu0 %v11553_v37  ;;  %7572 = vmatprep.subr.bf16.mxu1 %v11554_v6 }
 0x911   :  { %7530 = vmatpush1.bf16.msra.mxu0 %v11555_v23  ;;  %7573 = vmatpush1.bf16.msra.mxu1 %v11556_v46  ;;  %v10901_v46 = vld [vmem:[#allocation7 + $0x70] ss:$8 sps:$4 sm:$0xff]  }
 0x912   :  { %8409 = vmatprep.subr.bf16.mxu1 %v10903_v42 }
 0x9b4   :  { %v7406_v17 = vpop.f32.mrf.mxu0  ;;  %v7449_v12 = vpop.f32.mrf.mxu1 }
 0x9b5   :  { %v7458_v15 = vadd.f32 %v7406_v17, %v14408_v47  ;;  %v7460_v43 = vadd.f32 %v7449_v12, %v14412_v62  ;;  %v10906_v17 = vld [vmem:[#allocation7 + $0x64] ss:$8 sps:$4 sm:$0xff]   ;;  %v10909_v47 = vld [vmem:[#allocation7 + $0x54] ss:$8 sps:$4 sm:$0xff]  }
 0x9b6   :  { %v7408_v24 = vpop.f32.mrf.mxu0  ;;  %v7451_v10 = vpop.f32.mrf.mxu1  ;;  %v10915_v12 = vld [vmem:[#allocation7 + $0x34] ss:$8 sps:$4 sm:$0xff]   ;;  %v10936_v62 = vld [vmem:[#allocation9 + $0x64] ss:$8 sps:$4 sm:$0xff]  }
 0x9b7   :  { %v9611_v36 = vmul.f32 -1.442695, %v7458_v15  ;;  %v7459_v34 = vadd.f32 %v7408_v24, %v14409_v13  ;;  %v9613_v29 = vmul.f32 -1.442695, %v7460_v43  ;;  %v7461_v7 = vadd.f32 %v7451_v10, %v14414_v11  ;;  %v10907_v15 = vld [vmem:[#allocation7 + $0x50] ss:$8 sps:$4 sm:$0xff]  }
 0x9b8   :  { %v7410_v31 = vpop.f32.mrf.mxu0  ;;  %v7453_v26 = vpop.f32.mrf.mxu1  ;;  %v10912_v24 = vld [vmem:[#allocation7 + $0x44] ss:$8 sps:$4 sm:$0xff]   ;;  %v10913_v13 = vld [vmem:[#allocation7 + $0x30] ss:$8 sps:$4 sm:$0xff]   ;;  %v10939_v43 = vld [vmem:[#allocation7 + $0xd4] ss:$8 sps:$4 sm:$0xff]  }
 0x9b9   :  { %11294 = vpow2.f32 %v9611_v36  ;;  %v9612_v45 = vmul.f32 -1.442695, %v7459_v34  ;;  %v7462_v39 = vadd.f32 %v7410_v31, %v14410_v33  ;;  %v7464_v20 = vadd.f32 %v7453_v26, %v14413_v14  ;;  %v10910_v36 = vld [vmem:[#allocation7 + $0x40] ss:$8 sps:$4 sm:$0xff]   ;;  %v10918_v34 = vld [vmem:[#allocation7 + $0x24] ss:$8 sps:$4 sm:$0xff]  }
 0x9ba   :  { %v7412_v56 = vpop.f32.mrf.mxu0  ;;  %v7455_v21 = vpop.f32.mrf.mxu1  ;;  %v10916_v31 = vld [vmem:[#allocation7 + $0x20] ss:$8 sps:$4 sm:$0xff]   ;;  %v10924_v33 = vld [vmem:[#allocation7 + $0x4] ss:$8 sps:$4 sm:$0xff]   ;;  %v10925_v10 = vld [vmem:[#allocation7 + $0xf0] ss:$8 sps:$4 sm:$0xff]  }
 0x9bb   :  { %11296 = vpow2.f32 %v9612_v45  ;;  %v9614_v30 = vmul.f32 -1.442695, %v7462_v39  ;;  %v7463_v44 = vadd.f32 %v7412_v56, %v14411_v49  ;;  %v9616_v52 = vmul.f32 -1.442695, %v7464_v20  ;;  %v10921_v45 = vld [vmem:[#allocation7 + $0x14] ss:$8 sps:$4 sm:$0xff]  }
 0x9bc   :  { %v7465_v0 = vadd.f32 %v7455_v21, %v14415_v40  ;;  %v10922_v39 = vld [vmem:[#allocation7] ss:$8 sps:$4 sm:$0xff]   ;;  %v10927_v56 = vld [vmem:[#allocation7 + $0xf4] ss:$8 sps:$4 sm:$0xff]   ;;  %v10933_v49 = vld [vmem:[#allocation7 + $0xe4] ss:$8 sps:$4 sm:$0xff]  }
 0x9bd   :  { %11298 = vpow2.f32 %v9614_v30  ;;  %v9615_v28 = vmul.f32 -1.442695, %v7463_v44  ;;  %v10930_v30 = vld [vmem:[#allocation9 + $0x74] ss:$8 sps:$4 sm:$0xff]   ;;  %v10928_v44 = vld [vmem:[#allocation9 + $0x70] ss:$8 sps:$4 sm:$0xff]  }
 0x9be   :  { %7856 = vmatprep.subr.bf16.mxu0 %v10930_v30  ;;  %v10934_v26 = vld [vmem:[#allocation9 + $0x60] ss:$8 sps:$4 sm:$0xff]   ;;  %v10937_v14 = vld [vmem:[#allocation7 + $0xd0] ss:$8 sps:$4 sm:$0xff]   ;;  %v10942_v20 = vld [vmem:[#allocation9 + $0x54] ss:$8 sps:$4 sm:$0xff]  }
 0x9bf   :  { %11300 = vpow2.f32 %v9615_v28  ;;  %v10931_v28 = vld [vmem:[#allocation7 + $0xe0] ss:$8 sps:$4 sm:$0xff]   ;;  %v10940_v11 = vld [vmem:[#allocation9 + $0x50] ss:$8 sps:$4 sm:$0xff]   ;;  %v10948_v21 = vld [vmem:[#allocation9 + $0x44] ss:$8 sps:$4 sm:$0xff]  }
 0x9c0   :  { %11302 = vpow2.f32 %v9613_v29  ;;  %v10945_v29 = vld [vmem:[#allocation7 + $0xc4] ss:$8 sps:$4 sm:$0xff]   ;;  %v10952_v40 = vld [vmem:[#allocation9 + $0x30] ss:$8 sps:$4 sm:$0xff]  }
 0x9c1   :  { %11304 = vtanh.f32 %v7461_v7  ;;  %v10943_v7 = vld [vmem:[#allocation7 + $0xc0] ss:$8 sps:$4 sm:$0xff]   ;;  %v11060_v30 = vld [vmem:[#allocation7 + $0x290] ss:$8 sps:$4 sm:$0xff]  }
 0x9c6   :  { %v11295_v55 = vpop.eup %11294 }
 0x9c7   :  { %v7484_v1 = vadd.f32 1.0, %v11295_v55  ;;  %v10951_v55 = vld [vmem:[#allocation7 + $0xb4] ss:$8 sps:$4 sm:$0xff]  }
 0x9c8   :  { %v11297_v9 = vpop.eup %11296 }
 0x9c9   :  { %11306 = vrcp.f32 %v7484_v1  ;;  %v7485_v18 = vadd.f32 1.0, %v11297_v9  ;;  %v10949_v1 = vld [vmem:[#allocation7 + $0xb0] ss:$8 sps:$4 sm:$0xff]   ;;  %v10954_v9 = vld [vmem:[#allocation9 + $0x34] ss:$8 sps:$4 sm:$0xff]  }
 0x9ca   :  { %v11299_v63 = vpop.eup %11298  ;;  %11308 = vpow2.f32 %v9616_v52  ;;  %v10946_v52 = vld [vmem:[#allocation9 + $0x40] ss:$8 sps:$4 sm:$0xff]  }
 0x9cb   :  { %11310 = vrcp.f32 %v7485_v18  ;;  %v7487_v50 = vadd.f32 1.0, %v11299_v63  ;;  %v10957_v18 = vld [vmem:[#allocation7 + $0xa4] ss:$8 sps:$4 sm:$0xff]  }
 0x9cc   :  { %v11301_v25 = vpop.eup %11300  ;;  %11312 = vtanh.f32 %v7465_v0  ;;  %v10955_v0 = vld [vmem:[#allocation7 + $0xa0] ss:$8 sps:$4 sm:$0xff]   ;;  %v10960_v63 = vld [vmem:[#allocation9 + $0x24] ss:$8 sps:$4 sm:$0xff]  }
 0x9cd   :  { %11314 = vrcp.f32 %v7487_v50  ;;  %v7488_v54 = vadd.f32 1.0, %v11301_v25  ;;  %v11303_v22 = vpop.eup %11302  ;;  %v10963_v50 = vld [vmem:[#allocation7 + $0x94] ss:$8 sps:$4 sm:$0xff]   ;;  %v10958_v25 = vld [vmem:[#allocation9 + $0x20] ss:$8 sps:$4 sm:$0xff]  }
 0x9ce   :  { %v11305_v53 = vpop.eup %11304  ;;  %v7486_v16 = vadd.f32 1.0, %v11303_v22  ;;  %v10975_v22 = vld [vmem:[%s14251_s1 + $0x4] ss:$24 sps:$4 sm:$0xff]  }
 0x9cf   :  { %11316 = vrcp.f32 %v7488_v54  ;;  %v10961_v54 = vld [vmem:[#allocation7 + $0x90] ss:$8 sps:$4 sm:$0xff]  }
 0x9d0   :  { %11318 = vrcp.f32 %v7486_v16  ;;  %v10976_v16 = vld [vmem:[#allocation7 + $0x270] ss:$8 sps:$4 sm:$0xff]  }
 0x9d6   :  { %v11307_v41 = vpop.eup %11306 }
 0x9d7   :  { %v11309_v5 = vpop.eup %11308  ;;  %v7506_v8 = vmul.f32 %v11307_v41, %v11305_v53  ;;  %v10966_v53 = vld [vmem:[#allocation9 + $0x14] ss:$8 sps:$4 sm:$0xff]   ;;  %v10969_v41 = vld [vmem:[#allocation7 + $0x84] ss:$8 sps:$4 sm:$0xff]  }
 0x9d8   :  { %v11311_v57 = vpop.eup %11310  ;;  %v7489_v61 = vadd.f32 1.0, %v11309_v5  ;;  %v10964_v5 = vld [vmem:[#allocation9 + $0x10] ss:$8 sps:$4 sm:$0xff]  }
 0x9d9   :  { %v11313_v4 = vpop.eup %11312  ;;  %v7504_v60 = vmul.f32 %v11311_v57, %v14177_v59  ;;  %v10972_v57 = vld [vmem:[#allocation9 + $0x4] ss:$8 sps:$4 sm:$0xff]  }
 0x9da   :  { %v11315_v58 = vpop.eup %11314 }
 0x9db   :  { %v14195_v2 = vadd.f32 %v7506_v8, %v7504_v60  ;;  %v7507_v38 = vmul.f32 %v11315_v58, %v11313_v4  ;;  %v10967_v8 = vld [vmem:[#allocation7 + $0x80] ss:$8 sps:$4 sm:$0xff]   ;;  %v10978_v4 = vld [vmem:[#allocation7 + $0x274] ss:$8 sps:$4 sm:$0xff]  }
 0x9dc   :  { %v11317_v32 = vpop.eup %11316  ;;  %v10973_v60 = vld [vmem:[%s14251_s1] ss:$24 sps:$4 sm:$0xff]   ;;  %v10970_v58 = vld [vmem:[#allocation9] ss:$8 sps:$4 sm:$0xff]  }
 0x9dd   :  { %v7505_v3 = vmul.f32 %v11317_v32, %v14181_v51  ;;  %11320 = vtanh.f32 %v14195_v2  ;;  %v11319_v19 = vpop.eup %11318  ;;  %v10904_v51 = vld [vmem:[#allocation7 + $0x60] ss:$8 sps:$4 sm:$0xff]   ;;  %v10984_v32 = vld [vmem:[#allocation7 + $0x264] ss:$8 sps:$4 sm:$0xff]  }
 0x9de   :  { %11322 = vrcp.f32 %v7489_v61  ;;  %v10982_v61 = vld [vmem:[#allocation7 + $0x260] ss:$8 sps:$4 sm:$0xff]  }
 0x9df   :  { %v14199_v48 = vadd.f32 %v7507_v38, %v7505_v3  ;;  %v10981_v38 = vld [vmem:[#allocation7 + $0x174] ss:$8 sps:$4 sm:$0xff]  }
 0x9e0   :  { %v10990_v3 = vld [vmem:[#allocation7 + $0x254] ss:$8 sps:$4 sm:$0xff]  }
 0x9e1   :  { %11324 = vtanh.f32 %v14199_v48 }
 0x9ea   :  { %v11321_v27 = vpop.eup %11320 }
 0x9eb   :  { %v11323_v59 = vpop.eup %11322  ;;  %v7512_v6 = vmul.f32 %v11321_v27, %v11319_v19  ;;  %v10988_v19 = vld [vmem:[#allocation7 + $0x250] ss:$8 sps:$4 sm:$0xff]   ;;  %v10996_v27 = vld [vmem:[#allocation7 + $0x244] ss:$8 sps:$4 sm:$0xff]  }
 0x9ee   :  { %v11325_v37 = vpop.eup %11324 }
 0x9ef   :  { %v7513_v23 = vmul.f32 %v11325_v37, %v11323_v59  ;;  %v10994_v59 = vld [vmem:[#allocation7 + $0x240] ss:$8 sps:$4 sm:$0xff]   ;;  %v11002_v37 = vld [vmem:[#allocation7 + $0x234] ss:$8 sps:$4 sm:$0xff]  }
 0x9f1   :  { %v7514_v42 = vpack.c.bf16 %v7513_v23, %v7512_v6  ;;  %v11000_v6 = vld [vmem:[#allocation7 + $0x230] ss:$8 sps:$4 sm:$0xff]   ;;  %v11008_v23 = vld [vmem:[#allocation7 + $0x224] ss:$8 sps:$4 sm:$0xff]  }
 0x9f3   :  { %7548 = vmatmul.mubr.bf16.vlgmr.msra.gmra.mxu0 %v7514_v42  ;;  %7591 = vmatmul.mubr.bf16.vlgmr.msra.gmra.mxu1 %v7514_v42  ;;  %v11014_v42 = vld [vmem:[#allocation7 + $0x214] ss:$8 sps:$4 sm:$0xff]  }
 0x9f4   :  { %8410 = vmatpush1.bf16.msra.mxu1 %v10901_v46  ;;  %7888 = vmatprep.mubr.bf16.mxu0 %v14313_v35  ;;  %v10919_v35 = vld [vmem:[#allocation7 + $0x10] ss:$8 sps:$4 sm:$0xff]   ;;  %v11006_v46 = vld [vmem:[#allocation7 + $0x220] ss:$8 sps:$4 sm:$0xff]  }
 0x9f5   :  { %8411 = vmatprep.subr.bf16.mxu1 %v10906_v17  ;;  %7857 = vmatpush1.bf16.msra.mxu0 %v10928_v44  ;;  %v11012_v17 = vld [vmem:[#allocation7 + $0x210] ss:$8 sps:$4 sm:$0xff]   ;;  %v11066_v44 = vld [vmem:[#allocation7 + $0x280] ss:$8 sps:$4 sm:$0xff]  }
 0x9f6   :  { %7858 = vmatprep.subr.bf16.mxu0 %v10936_v62  ;;  %8441 = vmatprep.mubr.bf16.mxu1 %v10975_v22  ;;  %v11074_v62 = vld [vmem:[%s14251_s1 + $0x14] ss:$24 sps:$4 sm:$0xff]  }
 0x9f8   :  { %8412 = vmatpush1.bf16.msra.mxu1 %v10904_v51  ;;  %v11020_v51 = vld [vmem:[#allocation7 + $0x204] ss:$8 sps:$4 sm:$0xff]  }
 0x9f9   :  { %8413 = vmatprep.subr.bf16.mxu1 %v10909_v47  ;;  %7859 = vmatpush1.bf16.msra.mxu0 %v10934_v26  ;;  %v11018_v47 = vld [vmem:[#allocation7 + $0x200] ss:$8 sps:$4 sm:$0xff]   ;;  %v14416_v26 = vld [vmem:[#allocation26_spill] sm:$0xff] }
 0x9fa   :  { %7860 = vmatprep.subr.bf16.mxu0 %v10942_v20 }
 0x9fc   :  { %8414 = vmatpush1.bf16.msra.mxu1 %v10907_v15  ;;  %v11026_v15 = vld [vmem:[#allocation7 + $0x2f4] ss:$8 sps:$4 sm:$0xff]  }
 0x9fd   :  { %8415 = vmatprep.subr.bf16.mxu1 %v10912_v24  ;;  %7861 = vmatpush1.bf16.msra.mxu0 %v10940_v11  ;;  %v11024_v24 = vld [vmem:[#allocation7 + $0x2f0] ss:$8 sps:$4 sm:$0xff]  }
 0x9fe   :  { %7862 = vmatprep.subr.bf16.mxu0 %v10948_v21 }
 0xa00   :  { %8416 = vmatpush1.bf16.msra.mxu1 %v10910_v36  ;;  %v11032_v36 = vld [vmem:[#allocation7 + $0x2e4] ss:$8 sps:$4 sm:$0xff]  }
 0xa01   :  { %8417 = vmatprep.subr.bf16.mxu1 %v10915_v12  ;;  %7863 = vmatpush1.bf16.msra.mxu0 %v10946_v52  ;;  %v11030_v12 = vld [vmem:[#allocation7 + $0x2e0] ss:$8 sps:$4 sm:$0xff]  }
 0xa02   :  { %7864 = vmatprep.subr.bf16.mxu0 %v10954_v9 }
 0xa04   :  { %8418 = vmatpush1.bf16.msra.mxu1 %v10913_v13  ;;  %v11038_v13 = vld [vmem:[#allocation7 + $0x2d4] ss:$8 sps:$4 sm:$0xff]  }
 0xa05   :  { %8419 = vmatprep.subr.bf16.mxu1 %v10918_v34  ;;  %7865 = vmatpush1.bf16.msra.mxu0 %v10952_v40  ;;  %v11036_v34 = vld [vmem:[#allocation7 + $0x2d0] ss:$8 sps:$4 sm:$0xff]  }
 0xa06   :  { %7866 = vmatprep.subr.bf16.mxu0 %v10960_v63  ;;  %v14419_v63 = vld [vmem:[#allocation29_spill] sm:$0xff] }
 0xa08   :  { %8420 = vmatpush1.bf16.msra.mxu1 %v10916_v31  ;;  %v11044_v31 = vld [vmem:[#allocation7 + $0x2c4] ss:$8 sps:$4 sm:$0xff]  }
 0xa09   :  { %8421 = vmatprep.subr.bf16.mxu1 %v10921_v45  ;;  %7867 = vmatpush1.bf16.msra.mxu0 %v10958_v25  ;;  %v11042_v45 = vld [vmem:[#allocation7 + $0x2c0] ss:$8 sps:$4 sm:$0xff]  }
 0xa0a   :  { %7868 = vmatprep.subr.bf16.mxu0 %v10966_v53 }
 0xa0c   :  { %8422 = vmatpush1.bf16.msra.mxu1 %v10919_v35  ;;  %v11050_v35 = vld [vmem:[#allocation7 + $0x2b4] ss:$8 sps:$4 sm:$0xff]  }
 0xa0d   :  { %8423 = vmatprep.subr.bf16.mxu1 %v10924_v33  ;;  %7869 = vmatpush1.bf16.msra.mxu0 %v10964_v5  ;;  %v11048_v33 = vld [vmem:[#allocation7 + $0x2b0] ss:$8 sps:$4 sm:$0xff]  }
 0xa0e   :  { %7870 = vmatprep.subr.bf16.mxu0 %v10972_v57  ;;  %v14422_v57 = vld [vmem:[#allocation63_spill] sm:$0xff] }
 0xa10   :  { %8424 = vmatpush1.bf16.msra.mxu1 %v10922_v39  ;;  %v11056_v39 = vld [vmem:[#allocation7 + $0x2a4] ss:$8 sps:$4 sm:$0xff]  }
 0xa11   :  { %8425 = vmatprep.subr.bf16.mxu1 %v10927_v56  ;;  %7871 = vmatpush1.bf16.msra.mxu0 %v10970_v58  ;;  %v11054_v56 = vld [vmem:[#allocation7 + $0x2a0] ss:$8 sps:$4 sm:$0xff]  }
 0xa12   :  { %8452 = vmatprep.subr.bf16.mxu0 %v10981_v38 }
 0xa14   :  { %8426 = vmatpush2.bf16.msra.mxu1 %v10925_v10  ;;  %v11062_v10 = vld [vmem:[#allocation7 + $0x294] ss:$8 sps:$4 sm:$0xff]  }
 0xa15   :  { %8427 = vmatprep.subr.bf16.mxu1 %v10933_v49  ;;  %v11068_v49 = vld [vmem:[#allocation7 + $0x284] ss:$8 sps:$4 sm:$0xff]  }
 0xa18   :  { %8428 = vmatpush2.bf16.msra.mxu1 %v10931_v28  ;;  %v11072_v28 = vld [vmem:[%s14251_s1 + $0x10] ss:$24 sps:$4 sm:$0xff]  }
 0xa19   :  { %8429 = vmatprep.subr.bf16.mxu1 %v10939_v43 }
 0xa1c   :  { %8430 = vmatpush2.bf16.msra.mxu1 %v10937_v14 }
 0xa1d   :  { %8431 = vmatprep.subr.bf16.mxu1 %v10945_v29 }
 0xa20   :  { %8432 = vmatpush2.bf16.msra.mxu1 %v10943_v7  ;;  %v14417_v7 = vld [vmem:[#allocation27_spill] sm:$0xff] }
 0xa21   :  { %8433 = vmatprep.subr.bf16.mxu1 %v10951_v55 }
 0xa24   :  { %8434 = vmatpush2.bf16.msra.mxu1 %v10949_v1  ;;  %v14418_v1 = vld [vmem:[#allocation28_spill] sm:$0xff] }
 0xa25   :  { %8435 = vmatprep.subr.bf16.mxu1 %v10957_v18 }
 0xa28   :  { %8436 = vmatpush2.bf16.msra.mxu1 %v10955_v0 }
 0xa29   :  { %8437 = vmatprep.subr.bf16.mxu1 %v10963_v50 }
 0xa2c   :  { %8438 = vmatpush2.bf16.msra.mxu1 %v10961_v54  ;;  %v14420_v54 = vld [vmem:[#allocation64_spill] sm:$0xff] }
 0xa2d   :  { %8439 = vmatprep.subr.bf16.mxu1 %v10969_v41  ;;  %v14421_v41 = vld [vmem:[#allocation71_spill] sm:$0xff] }
 0xa30   :  { %8440 = vmatpush2.bf16.msra.mxu1 %v10967_v8 }
 0xa31   :  { %8495 = vmatprep.subr.bf16.mxu1 %v10978_v4 }
 0xa33   :  { %8442 = vmatmul.mubr.bf16.vlgmr.msra.gmra.mxu1 %v10973_v60 }
 0xa34   :  { %8496 = vmatpush1.bf16.msra.mxu1 %v10976_v16  ;;  %8527 = vmatprep.mubr.bf16.mxu1 %v11074_v62 }
 0xa35   :  { %8497 = vmatprep.subr.bf16.mxu1 %v10984_v32 }
 0xa38   :  { %8498 = vmatpush1.bf16.msra.mxu1 %v10982_v61  ;;  %v14423_v61 = vld [vmem:[#allocation66_spill] sm:$0xff] }
 0xa39   :  { %8499 = vmatprep.subr.bf16.mxu1 %v10990_v3 }
 0xa3c   :  { %8500 = vmatpush1.bf16.msra.mxu1 %v10988_v19 }
 0xa3d   :  { %8501 = vmatprep.subr.bf16.mxu1 %v10996_v27 }
 0xa40   :  { %8502 = vmatpush1.bf16.msra.mxu1 %v10994_v59 }
 0xa41   :  { %8503 = vmatprep.subr.bf16.mxu1 %v11002_v37 }
 0xa44   :  { %8504 = vmatpush1.bf16.msra.mxu1 %v11000_v6 }
 0xa45   :  { %8505 = vmatprep.subr.bf16.mxu1 %v11008_v23 }
 0xa48   :  { %8506 = vmatpush1.bf16.msra.mxu1 %v11006_v46 }
 0xa49   :  { %8507 = vmatprep.subr.bf16.mxu1 %v11014_v42 }
 0xa4c   :  { %8508 = vmatpush1.bf16.msra.mxu1 %v11012_v17 }
 0xa4d   :  { %8509 = vmatprep.subr.bf16.mxu1 %v11020_v51 }
 0xa50   :  { %8510 = vmatpush1.bf16.msra.mxu1 %v11018_v47 }
 0xa51   :  { %8511 = vmatprep.subr.bf16.mxu1 %v11026_v15 }
 0xa54   :  { %8512 = vmatpush2.bf16.msra.mxu1 %v11024_v24 }
 0xa55   :  { %8513 = vmatprep.subr.bf16.mxu1 %v11032_v36 }
 0xa58   :  { %8514 = vmatpush2.bf16.msra.mxu1 %v11030_v12 }
 0xa59   :  { %8515 = vmatprep.subr.bf16.mxu1 %v11038_v13 }
 0xa5c   :  { %8516 = vmatpush2.bf16.msra.mxu1 %v11036_v34 }
 0xa5d   :  { %8517 = vmatprep.subr.bf16.mxu1 %v11044_v31 }
 0xa60   :  { %8518 = vmatpush2.bf16.msra.mxu1 %v11042_v45 }
 0xa61   :  { %8519 = vmatprep.subr.bf16.mxu1 %v11050_v35 }
 0xa64   :  { %8520 = vmatpush2.bf16.msra.mxu1 %v11048_v33 }
 0xa65   :  { %8521 = vmatprep.subr.bf16.mxu1 %v11056_v39 }
 0xa68   :  { %8522 = vmatpush2.bf16.msra.mxu1 %v11054_v56 }
 0xa69   :  { %8523 = vmatprep.subr.bf16.mxu1 %v11062_v10 }
 0xa6c   :  { %8524 = vmatpush2.bf16.msra.mxu1 %v11060_v30 }
 0xa6d   :  { %8525 = vmatprep.subr.bf16.mxu1 %v11068_v49 }
 0xa70   :  { %8526 = vmatpush2.bf16.msra.mxu1 %v11066_v44 }
 0xa73   :  { %8528 = vmatmul.mubr.bf16.vlgmr.msra.gmra.mxu1 %v11072_v28  ;;  %v10979_v28 = vld [vmem:[#allocation7 + $0x170] ss:$8 sps:$4 sm:$0xff]  }
 0xab3   :  { %v7549_v43 = vpop.f32.mrf.mxu0  ;;  %v7592_v11 = vpop.f32.mrf.mxu1 }
 0xab4   :  { %v7601_v14 = vadd.f32 %v7549_v43, %v14416_v26  ;;  %v7603_v22 = vadd.f32 %v7592_v11, %v14420_v54  ;;  %v10987_v43 = vld [vmem:[#allocation7 + $0x164] ss:$8 sps:$4 sm:$0xff]   ;;  %v10985_v26 = vld [vmem:[#allocation7 + $0x160] ss:$8 sps:$4 sm:$0xff]   ;;  %v11005_v11 = vld [vmem:[#allocation7 + $0x134] ss:$8 sps:$4 sm:$0xff]  }
 0xab5   :  { %v7551_v20 = vpop.f32.mrf.mxu0  ;;  %v7594_v0 = vpop.f32.mrf.mxu1  ;;  %v11039_v54 = vld [vmem:[#allocation7 + $0x1d0] ss:$8 sps:$4 sm:$0xff]  }
 0xab6   :  { %v9617_v29 = vmul.f32 -1.442695, %v7601_v14  ;;  %v7602_v21 = vadd.f32 %v7551_v20, %v14417_v7  ;;  %v9619_v8 = vmul.f32 -1.442695, %v7603_v22  ;;  %v7604_v4 = vadd.f32 %v7594_v0, %v14422_v57  ;;  %v10991_v14 = vld [vmem:[#allocation7 + $0x150] ss:$8 sps:$4 sm:$0xff]  }
 0xab7   :  { %v7553_v55 = vpop.f32.mrf.mxu0  ;;  %v7596_v53 = vpop.f32.mrf.mxu1  ;;  %v10999_v20 = vld [vmem:[#allocation7 + $0x144] ss:$8 sps:$4 sm:$0xff]   ;;  %v11003_v7 = vld [vmem:[#allocation7 + $0x130] ss:$8 sps:$4 sm:$0xff]   ;;  %v11029_v0 = vld [vmem:[#allocation7 + $0x1f4] ss:$8 sps:$4 sm:$0xff]  }
 0xab8   :  { %11326 = vpow2.f32 %v9617_v29  ;;  %v9618_v52 = vmul.f32 -1.442695, %v7602_v21  ;;  %v7605_v9 = vadd.f32 %v7553_v55, %v14418_v1  ;;  %v7607_v5 = vadd.f32 %v7596_v53, %v14421_v41  ;;  %v10997_v29 = vld [vmem:[#allocation7 + $0x140] ss:$8 sps:$4 sm:$0xff]   ;;  %v11011_v21 = vld [vmem:[#allocation7 + $0x124] ss:$8 sps:$4 sm:$0xff]  }
 0xab9   :  { %v7555_v40 = vpop.f32.mrf.mxu0  ;;  %v7598_v60 = vpop.f32.mrf.mxu1  ;;  %v11009_v55 = vld [vmem:[#allocation7 + $0x120] ss:$8 sps:$4 sm:$0xff]   ;;  %v11015_v1 = vld [vmem:[#allocation7 + $0x110] ss:$8 sps:$4 sm:$0xff]   ;;  %v11047_v22 = vld [vmem:[#allocation7 + $0x1c4] ss:$8 sps:$4 sm:$0xff]  }
 0xaba   :  { %11328 = vpow2.f32 %v9618_v52  ;;  %v9620_v18 = vmul.f32 -1.442695, %v7605_v9  ;;  %v7606_v50 = vadd.f32 %v7555_v40, %v14419_v63  ;;  %v9622_v16 = vmul.f32 -1.442695, %v7607_v5  ;;  %v11017_v52 = vld [vmem:[#allocation7 + $0x114] ss:$8 sps:$4 sm:$0xff]  }
 0xabb   :  { %v7608_v3 = vadd.f32 %v7598_v60, %v14423_v61  ;;  %v11023_v9 = vld [vmem:[#allocation7 + $0x104] ss:$8 sps:$4 sm:$0xff]   ;;  %v11021_v40 = vld [vmem:[#allocation7 + $0x100] ss:$8 sps:$4 sm:$0xff]   ;;  %v11053_v41 = vld [vmem:[#allocation7 + $0x1b4] ss:$8 sps:$4 sm:$0xff]  }
 0xabc   :  { %11330 = vpow2.f32 %v9620_v18  ;;  %v9621_v25 = vmul.f32 -1.442695, %v7606_v50  ;;  %v11027_v18 = vld [vmem:[#allocation7 + $0x1f0] ss:$8 sps:$4 sm:$0xff]   ;;  %v11035_v63 = vld [vmem:[#allocation7 + $0x1e4] ss:$8 sps:$4 sm:$0xff]  }
 0xabd   :  { %v11033_v50 = vld [vmem:[#allocation7 + $0x1e0] ss:$8 sps:$4 sm:$0xff]   ;;  %v11051_v5 = vld [vmem:[#allocation7 + $0x1b0] ss:$8 sps:$4 sm:$0xff]  }
 0xabe   :  { %11332 = vpow2.f32 %v9621_v25  ;;  %v11041_v25 = vld [vmem:[#allocation7 + $0x1d4] ss:$8 sps:$4 sm:$0xff]   ;;  %v11045_v53 = vld [vmem:[#allocation7 + $0x1c0] ss:$8 sps:$4 sm:$0xff]   ;;  %v11063_v60 = vld [vmem:[#allocation7 + $0x190] ss:$8 sps:$4 sm:$0xff]  }
 0xabf   :  { %11334 = vpow2.f32 %v9619_v8  ;;  %v11059_v8 = vld [vmem:[#allocation7 + $0x1a4] ss:$8 sps:$4 sm:$0xff]   ;;  %v11057_v57 = vld [vmem:[#allocation7 + $0x1a0] ss:$8 sps:$4 sm:$0xff]  }
 0xac0   :  { %11336 = vtanh.f32 %v7604_v4  ;;  %v11065_v4 = vld [vmem:[#allocation7 + $0x194] ss:$8 sps:$4 sm:$0xff]  }
 0xac1   :  { %v11079_v61 = vld [vmem:[#allocation12 + $0x38] sm:$0xff]  }
 0xac5   :  { %v11327_v58 = vpop.eup %11326 }
 0xac6   :  { %v7627_v38 = vadd.f32 1.0, %v11327_v58  ;;  %v11071_v58 = vld [vmem:[#allocation7 + $0x184] ss:$8 sps:$4 sm:$0xff]  }
 0xac7   :  { %v11329_v32 = vpop.eup %11328 }
 0xac8   :  { %11338 = vrcp.f32 %v7627_v38  ;;  %v7628_v19 = vadd.f32 1.0, %v11329_v32  ;;  %v11075_v38 = vld [vmem:[%s14251_s1 + $0x8] ss:$24 sps:$4 sm:$0xff]  }
 0xac9   :  { %v11331_v27 = vpop.eup %11330  ;;  %11340 = vpow2.f32 %v9622_v16  ;;  %v11069_v16 = vld [vmem:[#allocation7 + $0x180] ss:$8 sps:$4 sm:$0xff]  }
 0xaca   :  { %11342 = vrcp.f32 %v7628_v19  ;;  %v7630_v59 = vadd.f32 1.0, %v11331_v27  ;;  %v11078_v32 = vld [vmem:[#allocation12 + $0x78] sm:$0xff]   ;;  %v11081_v19 = vld [vmem:[#allocation12 + $0x30] sm:$0xff]   ;;  %v11082_v27 = vld [vmem:[#allocation12 + $0x68] sm:$0xff]  }
 0xacb   :  { %v11333_v37 = vpop.eup %11332  ;;  %11344 = vtanh.f32 %v7608_v3  ;;  %v11080_v3 = vld [vmem:[#allocation12 + $0x70] sm:$0xff]  }
 0xacc   :  { %11346 = vrcp.f32 %v7630_v59  ;;  %v7631_v6 = vadd.f32 1.0, %v11333_v37  ;;  %v11335_v23 = vpop.eup %11334  ;;  %v11083_v59 = vld [vmem:[#allocation12 + $0x28] sm:$0xff]   ;;  %v11084_v37 = vld [vmem:[#allocation12 + $0x60] sm:$0xff]  }
 0xacd   :  { %v11337_v46 = vpop.eup %11336  ;;  %v7629_v15 = vadd.f32 1.0, %v11335_v23  ;;  %v11086_v23 = vld [vmem:[#allocation12 + $0x58] sm:$0xff]  }
 0xace   :  { %11348 = vrcp.f32 %v7631_v6  ;;  %v11085_v6 = vld [vmem:[#allocation12 + $0x20] sm:$0xff]  }
 0xacf   :  { %11350 = vrcp.f32 %v7629_v15  ;;  %v11092_v15 = vld [vmem:[#allocation12 + $0x40] sm:$0xff]  }
 0xad5   :  { %v11339_v42 = vpop.eup %11338 }
 0xad6   :  { %v11341_v17 = vpop.eup %11340  ;;  %v7649_v51 = vmul.f32 %v11339_v42, %v11337_v46  ;;  %v11087_v46 = vld [vmem:[#allocation12 + $0x18] sm:$0xff]   ;;  %v11088_v42 = vld [vmem:[#allocation12 + $0x50] sm:$0xff]  }
 0xad7   :  { %v11343_v47 = vpop.eup %11342  ;;  %v7632_v45 = vadd.f32 1.0, %v11341_v17  ;;  %v11089_v17 = vld [vmem:[#allocation12 + $0x10] sm:$0xff]  }
 0xad8   :  { %v11345_v24 = vpop.eup %11344  ;;  %v7647_v36 = vmul.f32 %v11343_v47, %v14195_v2  ;;  %v11077_v2 = vld [vmem:[%s14251_s1 + $0xc] ss:$24 sps:$4 sm:$0xff]  }
 0xad9   :  { %v11347_v12 = vpop.eup %11346  ;;  %v11091_v47 = vld [vmem:[#allocation12 + $0x8] sm:$0xff]  }
 0xada   :  { %v7651_v13 = vadd.f32 %v7649_v51, %v7647_v36  ;;  %v7650_v34 = vmul.f32 %v11347_v12, %v11345_v24  ;;  %v11090_v51 = vld [vmem:[#allocation12 + $0x48] sm:$0xff]   ;;  %v11093_v24 = vld [vmem:[#allocation12] sm:$0xff]   ;;  %v11786_v36 = vmov 0.0  }
 0xadb   :  { %v11349_v31 = vpop.eup %11348 }
 0xadc   :  { %11352 = vtanh.f32 %v7651_v13  ;;  %v7648_v35 = vmul.f32 %v11349_v31, %v14199_v48  ;;  %v11351_v39 = vpop.eup %11350  ;;  %v10993_v48 = vld [vmem:[#allocation7 + $0x154] ss:$8 sps:$4 sm:$0xff]  }
 0xadd   :  { %11354 = vrcp.f32 %v7632_v45 }
 0xade   :  { %v7652_v33 = vadd.f32 %v7650_v34, %v7648_v35 }
 0xae0   :  { %11356 = vtanh.f32 %v7652_v33 }
 0xae9   :  { %v11353_v56 = vpop.eup %11352 }
 0xaea   :  { %v7655_v10 = vmul.f32 %v11353_v56, %v11351_v39  ;;  %v11355_v30 = vpop.eup %11354 }
 0xaed   :  { %v11357_v49 = vpop.eup %11356 }
 0xaee   :  { %v7656_v44 = vmul.f32 %v11357_v49, %v11355_v30 }
 0xaf0   :  { %v7759_v62 = vpack.c.bf16 %v7656_v44, %v7655_v10 }
 0xaf2   :  { %7889 = vmatmul.mubr.bf16.vlgmr.msra.gmra.mxu0 %v7759_v62 }
 0xaf3   :  { %8453 = vmatpush1.bf16.msra.mxu0 %v10979_v28  ;;  %8484 = vmatprep.mubr.bf16.mxu0 %v11077_v2  ;;  %v8443_v12 = vpop.f32.mrf.mxu1 }
 0xaf4   :  { %8454 = vmatprep.subr.bf16.mxu0 %v10987_v43  ;;  %v8538_v43 = vld [vmem:[#allocation10] sm:$0x3] }
 0xaf5   :  { %v8445_v13 = vpop.f32.mrf.mxu1 }
 0xaf7   :  { %8455 = vmatpush1.bf16.msra.mxu0 %v10985_v26  ;;  %v8447_v31 = vpop.f32.mrf.mxu1 }
 0xaf8   :  { %8456 = vmatprep.subr.bf16.mxu0 %v10993_v48 }
 0xaf9   :  { %v8449_v35 = vpop.f32.mrf.mxu1 }
 0xafb   :  { %8457 = vmatpush1.bf16.msra.mxu0 %v10991_v14 }
 0xafc   :  { %8458 = vmatprep.subr.bf16.mxu0 %v10999_v20 }
 0xaff   :  { %8459 = vmatpush1.bf16.msra.mxu0 %v10997_v29 }
 0xb00   :  { %8460 = vmatprep.subr.bf16.mxu0 %v11005_v11  ;;  %v14424_v11 = vld [vmem:[#allocation24_spill] sm:$0xff] }
 0xb03   :  { %8461 = vmatpush1.bf16.msra.mxu0 %v11003_v7  ;;  %v14425_v7 = vsub.s32 1, %v14424_v11 }
 0xb04   :  { %8462 = vmatprep.subr.bf16.mxu0 %v11011_v21 }
 0xb05   :  { %v8547_v21 = vrot.slane %v8538_v43, %v14425_v7 }
 0xb07   :  { %8463 = vmatpush1.bf16.msra.mxu0 %v11009_v55 }
 0xb08   :  { %8464 = vmatprep.subr.bf16.mxu0 %v11017_v52 }
 0xb0b   :  { %8465 = vmatpush1.bf16.msra.mxu0 %v11015_v1  ;;  %v14426_v1 = vsub.s32 0, %v14424_v11 }
 0xb0c   :  { %8466 = vmatprep.subr.bf16.mxu0 %v11023_v9 }
 0xb0d   :  { %v8543_v9 = vrot.slane %v8538_v43, %v14426_v1 }
 0xb0f   :  { %8467 = vmatpush1.bf16.msra.mxu0 %v11021_v40 }
 0xb10   :  { %8468 = vmatprep.subr.bf16.mxu0 %v11029_v0 }
 0xb13   :  { %8469 = vmatpush2.bf16.msra.mxu0 %v11027_v18 }
 0xb14   :  { %8470 = vmatprep.subr.bf16.mxu0 %v11035_v63 }
 0xb17   :  { %8471 = vmatpush2.bf16.msra.mxu0 %v11033_v50 }
 0xb18   :  { %8472 = vmatprep.subr.bf16.mxu0 %v11041_v25 }
 0xb1b   :  { %8473 = vmatpush2.bf16.msra.mxu0 %v11039_v54 }
 0xb1c   :  { %8474 = vmatprep.subr.bf16.mxu0 %v11047_v22 }
 0xb1f   :  { %8475 = vmatpush2.bf16.msra.mxu0 %v11045_v53 }
 0xb20   :  { %8476 = vmatprep.subr.bf16.mxu0 %v11053_v41 }
 0xb23   :  { %8477 = vmatpush2.bf16.msra.mxu0 %v11051_v5 }
 0xb24   :  { %8478 = vmatprep.subr.bf16.mxu0 %v11059_v8 }
 0xb27   :  { %8479 = vmatpush2.bf16.msra.mxu0 %v11057_v57 }
 0xb28   :  { %8480 = vmatprep.subr.bf16.mxu0 %v11065_v4 }
 0xb2b   :  { %8481 = vmatpush2.bf16.msra.mxu0 %v11063_v60  ;;  %v11094_v60 = vld [vmem:[#allocation15 + $0x38] sm:$0xff]  }
 0xb2c   :  { %8482 = vmatprep.subr.bf16.mxu0 %v11071_v58 }
 0xb2f   :  { %8483 = vmatpush2.bf16.msra.mxu0 %v11069_v16  ;;  %v11095_v16 = vld [vmem:[#allocation15 + $0x30] sm:$0xff]  }
 0xb30   :  { %9767 = vmatprep.subr.bf16.mxu0 %v11078_v32  ;;  %v11097_v32 = vld [vmem:[#allocation15 + $0x20] sm:$0xff]  }
 0xb32   :  { %8485 = vmatmul.mubr.bf16.vlgmr.msra.gmra.mxu0 %v11075_v38  ;;  %v11096_v38 = vld [vmem:[#allocation15 + $0x28] sm:$0xff]  }
 0xb33   :  { %9768 = vmatpush3.bf16.msra.mxu0 %v11079_v61  ;;  %v8529_v39 = vpop.f32.mrf.mxu1  ;;  %v11098_v61 = vld [vmem:[#allocation15 + $0x18] sm:$0xff]  }
 0xb34   :  { %9769 = vmatprep.subr.bf16.mxu0 %v11080_v3  ;;  %v11099_v3 = vld [vmem:[#allocation15 + $0x10] sm:$0xff]  }
 0xb35   :  { %v8531_v30 = vpop.f32.mrf.mxu1 }
 0xb37   :  { %9770 = vmatpush3.bf16.msra.mxu0 %v11081_v19  ;;  %v8533_v48 = vpop.f32.mrf.mxu1  ;;  %v11100_v19 = vld [vmem:[#allocation15 + $0x8] sm:$0xff]  }
 0xb38   :  { %9771 = vmatprep.subr.bf16.mxu0 %v11082_v27  ;;  %v11101_v27 = vld [vmem:[#allocation15] sm:$0xff]  }
 0xb39   :  { %v8535_v63 = vpop.f32.mrf.mxu1 }
 0xb3b   :  { %9772 = vmatpush3.bf16.msra.mxu0 %v11083_v59 }
 0xb3c   :  { %9773 = vmatprep.subr.bf16.mxu0 %v11084_v37 }
 0xb3f   :  { %9774 = vmatpush3.bf16.msra.mxu0 %v11085_v6 }
 0xb40   :  { %9775 = vmatprep.subr.bf16.mxu0 %v11086_v23  ;;  %v9741_v23 = vld [vmem:[#allocation13] ss:$0 sm:$0xff] }
 0xb43   :  { %9776 = vmatpush3.bf16.msra.mxu0 %v11087_v46 }
 0xb44   :  { %9777 = vmatprep.subr.bf16.mxu0 %v11088_v42 }
 0xb47   :  { %9778 = vmatpush3.bf16.msra.mxu0 %v11089_v17 }
 0xb48   :  { %9779 = vmatprep.subr.bf16.mxu0 %v11090_v51 }
 0xb4b   :  { %9780 = vmatpush3.bf16.msra.mxu0 %v11091_v47 }
 0xb4c   :  { %9781 = vmatprep.subr.bf16.mxu0 %v11092_v15 }
 0xb4f   :  { %9782 = vmatpush3.bf16.msra.mxu0 %v11093_v24 }
 0xb50   :  { %9798 = vmatprep.subr.bf16.mxu0 %v11786_v36 }
 0xbb2   :  { %v7890_v34 = vpop.f32.mrf.mxu0 }
 0xbb3   :  { %v8444_v10 = vadd.f32 %v8443_v12, %v7890_v34 }
 0xbb4   :  { %v7892_v45 = vpop.f32.mrf.mxu0 }
 0xbb5   :  { %v8446_v44 = vadd.f32 %v8445_v13, %v7892_v45  ;;  %v9758_v13 = vld [vmem:[#allocation16] ss:$0 sm:$0xff] }
 0xbb6   :  { %v7894_v33 = vpop.f32.mrf.mxu0 }
 0xbb7   :  { %v8448_v62 = vadd.f32 %v8447_v31, %v7894_v33 }
 0xbb8   :  { %v7896_v56 = vpop.f32.mrf.mxu0 }
 0xbb9   :  { %v8450_v20 = vadd.f32 %v8449_v35, %v7896_v56 }
 0xbf2   :  { %v8486_v49 = vpop.f32.mrf.mxu0 }
 0xbf3   :  { %v8487_v28 = vadd.f32 %v8486_v49, %v8444_v10 }
 0xbf4   :  { %v8488_v2 = vpop.f32.mrf.mxu0 }
 0xbf5   :  { %v8489_v26 = vadd.f32 %v8488_v2, %v8446_v44  ;;  %v8530_v52 = vadd.f32 %v8529_v39, %v8487_v28 }
 0xbf6   :  { %v8490_v14 = vpop.f32.mrf.mxu0 }
 0xbf7   :  { %v8532_v29 = vadd.f32 %v8531_v30, %v8489_v26  ;;  %v8491_v55 = vadd.f32 %v8490_v14, %v8448_v62  ;;  %v8550_v22 = vadd.f32 %v8543_v9, %v8530_v52 }
 0xbf8   :  { %v8492_v40 = vpop.f32.mrf.mxu0 }
 0xbf9   :  { %v8534_v0 = vadd.f32 %v8533_v48, %v8491_v55  ;;  %v8493_v18 = vadd.f32 %v8492_v40, %v8450_v20  ;;  %v8551_v50 = vadd.f32 %v8547_v21, %v8532_v29  ;;  %v8554_v57 = vmax.f32 %v8550_v22, 0.0 }
 0xbfb   :  { %v8552_v25 = vadd.f32 %v8543_v9, %v8534_v0  ;;  %v8536_v54 = vadd.f32 %v8535_v63, %v8493_v18  ;;  %v8555_v5 = vmax.f32 %v8551_v50, 0.0 }
 0xbfd   :  { %v8553_v53 = vadd.f32 %v8547_v21, %v8536_v54  ;;  %v8556_v41 = vmax.f32 %v8552_v25, 0.0 }
 0xbff   :  { %v8557_v8 = vmax.f32 %v8553_v53, 0.0  ;;  %v8558_v58 = vpack.c.bf16 %v8556_v41, %v8554_v57 }
 0xc01   :  { %v8559_v4 = vpack.c.bf16 %v8557_v8, %v8555_v5 }
 0xc03   :  { %8727 = vmatprep.mubr.bf16.mxu0 %v8559_v4 }
 0xc04   :  { %8728 = vmatmul.mubr.bf16.vlgmr.msra.gmra.mxu0 %v8558_v58 }
 0xc05   :  { %9799 = vmatpush3.bf16.msra.mxu0 %v11094_v60  ;;  %9814 = vmatprep.mubr.msk.bf16.mxu0 %vm11787_vm0, %v11786_v36 }
 0xc06   :  { %9800 = vmatprep.subr.bf16.mxu0 %v11786_v36 }
 0xc09   :  { %9801 = vmatpush3.bf16.msra.mxu0 %v11095_v16 }
 0xc0a   :  { %9802 = vmatprep.subr.bf16.mxu0 %v11786_v36 }
 0xc0d   :  { %9803 = vmatpush3.bf16.msra.mxu0 %v11096_v38 }
 0xc0e   :  { %9804 = vmatprep.subr.bf16.mxu0 %v11786_v36 }
 0xc11   :  { %9805 = vmatpush3.bf16.msra.mxu0 %v11097_v32 }
 0xc12   :  { %9806 = vmatprep.subr.bf16.mxu0 %v11786_v36 }
 0xc15   :  { %9807 = vmatpush3.bf16.msra.mxu0 %v11098_v61 }
 0xc16   :  { %9808 = vmatprep.subr.bf16.mxu0 %v11786_v36 }
 0xc19   :  { %9809 = vmatpush3.bf16.msra.mxu0 %v11099_v3 }
 0xc1a   :  { %9810 = vmatprep.subr.bf16.mxu0 %v11786_v36 }
 0xc1d   :  { %9811 = vmatpush3.bf16.msra.mxu0 %v11100_v19 }
 0xc1e   :  { %9812 = vmatprep.subr.bf16.mxu0 %v11786_v36 }
 0xc21   :  { %9813 = vmatpush3.bf16.msra.mxu0 %v11101_v27 }
 0xcc4   :  { %v9783_v59 = vpop.f32.mrf.mxu0 }
 0xcc6   :  { %v9784_v37 = vpop.f32.mrf.mxu0 }
 0xcc7   :  { %v9785_v6 = vadd.f32 %v9784_v37, %v9783_v59 }
 0xcc8   :  { %v9786_v46 = vpop.f32.mrf.mxu0 }
 0xcc9   :  { %v8730_v17 = vadd.f32 %v9785_v6, %v9741_v23 }
 0xcca   :  { %v9787_v42 = vpop.f32.mrf.mxu0 }
 0xccb   :  { %v9788_v51 = vadd.f32 %v9787_v42, %v9786_v46  ;;  %v8736_v15 = vmax.f32 %v8730_v17, 0.0 }
 0xccd   :  { %v8733_v47 = vadd.f32 %v9788_v51, %v9741_v23 }
 0xccf   :  { %v8737_v24 = vmax.f32 %v8733_v47, 0.0 }
 0xcd1   :  { %v8738_v12 = vpack.c.bf16 %v8737_v24, %v8736_v15 }
 0xcd3   :  { %9815 = vmatmul.mubr.bf16.vlgmr.msra.gmra.mxu0 %v8738_v12 }
 0xd93   :  { %v8844_v34 = vpop.f32.mrf.mxu0 }
 0xd94   :  { %v8845_v31 = vadd.f32 %v9758_v13, %v8844_v34 }
 0xd95   :  { %v9816_v45 = vpop.f32.mrf.mxu0 }
 0xd96   :  { %8851 = vst [vmem:[%s14262_s12] sm:$0xff] %v8845_v31 }
 0xd97   :  { %v8847_v36 = vpop.f32.mrf.mxu0 }
 0xd98   :  { %v8848_v35 = vadd.f32 %v9758_v13, %v8847_v36 }
 0xd99   :  { %v9817_v33 = vpop.f32.mrf.mxu0 }
 0xd9a   :  { %8852 = vst [vmem:[%s14262_s12 + $0x8] sm:$0xff] %v8848_v35 }
 0xd9b   :  { %8857 = vsyncpa [#allocation3], 1 }
 0xd9c   :  { %8858 = vsyncpa [#allocation5], 1 }
 0xd9d   :  { %8859 = vsyncpa [#allocation8], 1 }
 0xd9e   :  { %8860 = vsyncpa [#allocation11], 1 }
 0xd9f   :  { %8861 = vsyncpa [#allocation14], 1 }
 0xda0   :  { %8862 = vsyncpa [#allocation17], 1 }

</bundles_post_ra>
